<compile_context>
chip_gen: v7x
topology: tpu7x:2x2x1
jax: 0.10.0
libtpu: 0.0.40
codegen_flags: <defaults>
</compile_context>

<pallas_src>
import numpy as np
import jax
import jax.numpy as jnp
from jax.experimental import pallas as pl
from jax.experimental.pallas import tpu as pltpu


def _band_structure_valid(w_out, kw, w_in):
    """T[x, dx, s] = 1 iff input column s feeds output column x at tap dx (valid conv)."""
    t = np.zeros((w_out, kw, w_in), np.float32)
    for x in range(w_out):
        for dx in range(kw):
            t[x, dx, x + dx] = 1.0
    return t


def _band_structure_padded(w_out_padded, kw, w_in, pad):
    """Structure for: replication-pad the (w_in)-wide input columns by `pad`, run a
    kw-tap valid conv, then replication-pad the output columns back to w_out_padded."""
    w_valid = w_out_padded - 2 * pad
    t = np.zeros((w_out_padded, kw, w_in), np.float32)
    for s_out in range(w_out_padded):
        x = min(max(s_out - pad, 0), w_valid - 1)          # output-column replication
        for dx in range(kw):
            s_src = min(max(x + dx - pad, 0), w_in - 1)    # input-column replication
            t[s_out, dx, s_src] = 1.0
    return t


def _banded_weights(t, w):
    """Fold conv weights (Cout, Cin, KH, KW) into per-row-tap banded matrices.

    Returns (KH, Win*Cin, Wout*Cout) with
      M[dy, s*Cin + c, x*Cout + o] = sum_dx T[x, dx, s] * w[o, c, dy, dx]
    """
    w = w.astype(jnp.float32)
    m = jnp.einsum("xds,ocyd->yscxo", jnp.asarray(t), w, precision="highest")
    w_out, _, w_in = t.shape
    c_out, c_in, kh, _ = w.shape
    return m.reshape(kh, w_in * c_in, w_out * c_out)


def _pick_block_batch(n, h, target_rows=256):
    """Samples per grid step: fill the MXU M dim but keep >=2 grid steps (v7x's 2 TCs)."""
    cap = max(1, target_rows // h)
    if n >= 2:
        cap = min(cap, n // 2)
    bb = 1
    for d in range(1, max(cap, 1) + 1):
        if n % d == 0:
            bb = d
    return bb


def _const_block_spec(shape):
    """BlockSpec with a constant index_map, single-buffered (loaded once, VMEM-resident)."""
    index_map = lambda *_: (0,) * len(shape)
    try:
        return pl.BlockSpec(shape, index_map, pipeline_mode=pl.Buffered(1))
    except TypeError:  # older jax without pipeline_mode on BlockSpec
        return pl.BlockSpec(shape, index_map)


def feature_extraction_layer(x, w1, b1, w2, b2):
    """Pallas implementation of _FeatureExtractionLayer.forward(x).

    Args:
      x:  (N, Cin, H, W) float32 (NCHW).
      w1: (32, Cin, 5, 5), b1: (32,)   -- first conv.
      w2: (64, 32, 5, 5),  b2: (64,)   -- second conv.
    Returns:
      (N, 64, H, W) float32.
    """
    n, c_in, h, w = x.shape
    c1, kh, kw = w1.shape[0], w1.shape[2], w1.shape[3]
    c2 = w2.shape[0]
    assert kh == 5 and kw == 5 and w1.shape[1] == c_in and w2.shape[1] == c1
    pad = (kh - 1) // 2                      # ReplicationPad2d((2, 2, 2, 2))
    ho, wo = h - (kh - 1), w - (kw - 1)
    assert ho >= 1 and wo >= 1

    bb = _pick_block_batch(n, h)             # samples per grid step
    grid = n // bb
    rows = bb * h                            # stacked rows per grid step
    m_full = rows - (kh - 1)                 # "full-height" conv rows (incl. seam garbage)
    n_chunk = min(512, w * c2)               # conv2 output-lane chunk (keeps acc in vregs)

    # Lane-dense activation layout: samples stacked along rows -> (N*H, W*Cin), bf16.
    # TODO(synk): if adjacent SoccerMap layers adopt this (rows, W*C) layout, the
    # NCHW<->NHWC transposes here (extra HBM round-trips) can be dropped / fused away.
    x_rows = (jnp.transpose(x, (0, 2, 3, 1))
              .reshape(n * h, w * c_in)
              .astype(jnp.bfloat16))

    # Banded bf16 weight matrices (built once, wrapper side).  Column replication padding
    # of both the intermediate activation and the final output is folded into m2.
    m1 = _banded_weights(_band_structure_valid(wo, kw, w), w1).astype(jnp.bfloat16)
    m2 = _banded_weights(_band_structure_padded(w, kw, wo, pad), w2).astype(jnp.bfloat16)
    b1t = jnp.tile(b1.astype(jnp.float32), wo).reshape(1, wo * c1)
    b2t = jnp.tile(b2.astype(jnp.float32), w).reshape(1, w * c2)

    def _row_pad_per_sample(a_full, lanes):
        # a_full: (m_full, lanes) valid conv rows for bb row-stacked samples (+ seam rows,
        # which are skipped).  Returns (bb*h, lanes): per-sample [top*pad, Ho rows, bot*pad].
        pieces = []
        for b in range(bb):
            top = a_full[b * h:b * h + 1, :]
            mid = a_full[b * h:b * h + ho, :]
            bot = a_full[b * h + ho - 1:b * h + ho, :]
            pieces.append(jnp.broadcast_to(top, (pad, lanes)))
            pieces.append(mid)
            pieces.append(jnp.broadcast_to(bot, (pad, lanes)))
        return jnp.concatenate(pieces, axis=0)

    def kernel(x_ref, m1_ref, b1_ref, m2_ref, b2_ref, o_ref, a1_ref):
        # ---- conv1 (valid) + ReLU: 5 row-band matmuls, bf16 x bf16 -> f32 acc ----
        acc1 = jnp.dot(x_ref[0:m_full, :], m1_ref[0],
                       preferred_element_type=jnp.float32)
        for dy in range(1, kh):
            acc1 = acc1 + jnp.dot(x_ref[dy:dy + m_full, :], m1_ref[dy],
                                  preferred_element_type=jnp.float32)
        a1 = jnp.maximum(acc1 + b1_ref[...], 0.0)            # (m_full, Wo*C1) f32

        # ---- row replication pad per sample: one full-block lane-dense store ----
        a1_ref[...] = _row_pad_per_sample(a1, wo * c1).astype(a1_ref.dtype)

        # ---- conv2 + ReLU (column pads folded into m2), 512-lane output chunks ----
        for n0 in range(0, w * c2, n_chunk):
            n1 = min(n0 + n_chunk, w * c2)
            acc2 = jnp.dot(a1_ref[0:m_full, :], m2_ref[0, :, n0:n1],
                           preferred_element_type=jnp.float32)
            for dy in range(1, kh):
                acc2 = acc2 + jnp.dot(a1_ref[dy:dy + m_full, :], m2_ref[dy, :, n0:n1],
                                      preferred_element_type=jnp.float32)
            a2 = jnp.maximum(acc2 + b2_ref[:, n0:n1], 0.0)    # (m_full, chunk) f32
            o_ref[:, n0:n1] = _row_pad_per_sample(a2, n1 - n0).astype(o_ref.dtype)

    flops = 2 * grid * kh * m_full * ((w * c_in) * (wo * c1) + (wo * c1) * (w * c2))
    bytes_accessed = int(x_rows.size * 2 + m1.size * 2 + m2.size * 2
                         + (b1t.size + b2t.size) * 4 + n * h * w * c2 * 4)

    # VMEM residency: single-buffered bf16 weights + f32 biases + double-buffered
    # x/out blocks + padded-a1 scratch.  Cap at 48 MiB (safe on v7x's 64 MiB physical).
    vmem_need = ((m1.size + m2.size) * 2 + (b1t.size + b2t.size) * 4
                 + 2 * rows * (w * c_in) * 2 + 2 * rows * (w * c2) * 4
                 + rows * (wo * c1) * 2)
    vmem_limit = int(min(48 * 1024 * 1024, max(16 * 1024 * 1024, 2 * vmem_need)))

    out_rows = pl.pallas_call(
        kernel,
        out_shape=jax.ShapeDtypeStruct((n * h, w * c2), jnp.float32),
        grid=(grid,),
        in_specs=[
            pl.BlockSpec((rows, w * c_in), lambda i: (i, 0)),   # x, bb samples per step
            _const_block_spec((kh, w * c_in, wo * c1)),         # m1 (resident, 1 buffer)
            _const_block_spec((1, wo * c1)),                    # bias1 (tiled)
            _const_block_spec((kh, wo * c1, w * c2)),           # m2 (resident, 1 buffer)
            _const_block_spec((1, w * c2)),                     # bias2 (tiled)
        ],
        out_specs=pl.BlockSpec((rows, w * c2), lambda i: (i, 0)),
        scratch_shapes=[pltpu.VMEM((rows, wo * c1), jnp.bfloat16)],  # row-padded a1
        compiler_params=pltpu.CompilerParams(
            dimension_semantics=("parallel",),   # batch groups split across v7x's 2 TCs
            vmem_limit_bytes=vmem_limit,
        ),
        cost_estimate=pl.CostEstimate(
            flops=int(flops), transcendentals=0, bytes_accessed=bytes_accessed),
    )(x_rows, m1, b1t, m2, b2t)

    # (N*H, W*C2) -> NHWC -> NCHW
    return jnp.transpose(out_rows.reshape(n, h, w, c2), (0, 3, 1, 2))


def _reference(x, w1, b1, w2, b2):
    """Plain-JAX reference of the PyTorch forward pass."""
    def conv_relu(v, wt, bs):
        y = jax.lax.conv_general_dilated(
            v, wt, window_strides=(1, 1), padding="VALID",
            dimension_numbers=("NCHW", "OIHW", "NCHW"),
            precision=jax.lax.Precision.HIGHEST)
        return jax.nn.relu(y + bs.reshape(1, -1, 1, 1))

    def rep_pad(v):
        return jnp.pad(v, ((0, 0), (0, 0), (2, 2), (2, 2)), mode="edge")

    y = rep_pad(conv_relu(x, w1, b1))
    y = rep_pad(conv_relu(y, w2, b2))
    return y


if __name__ == "__main__":
    key = jax.random.PRNGKey(0)
    kx, ka, kb, kc, kd = jax.random.split(key, 5)

    # N=4 -> 2 samples stacked per grid step AND a grid of 2 (exercises both the
    # row-stacked batching with a sample seam and the parallel batch axis).
    N, C_IN, H, W = 4, 4, 16, 16
    C1, C2, K = 32, 64, 5

    x = jax.random.normal(kx, (N, C_IN, H, W), dtype=jnp.float32)

    def conv_init(kw_key, kb_key, cout, cin, k):
        bound = 1.0 / np.sqrt(cin * k * k)
        wt = jax.random.uniform(kw_key, (cout, cin, k, k),
                                minval=-bound, maxval=bound, dtype=jnp.float32)
        bs = jax.random.uniform(kb_key, (cout,),
                                minval=-bound, maxval=bound, dtype=jnp.float32)
        return wt, bs

    w1, b1 = conv_init(ka, kb, C1, C_IN, K)
    w2, b2 = conv_init(kc, kd, C2, C1, K)

    out = feature_extraction_layer(x, w1, b1, w2, b2)
    out = jax.block_until_ready(out)

    ref = _reference(x, w1, b1, w2, b2)
    assert out.shape == (N, C2, H, W), out.shape
    # bf16 activations/weights with f32 accumulation: error stays at the ~1e-2 level.
    max_err = float(jnp.max(jnp.abs(out - ref)))
    assert jnp.allclose(out, ref, atol=2e-2, rtol=2e-2), max_err

    print("KERNEL_OK")
</pallas_src>

<mosaic_0001>
module attributes {stable_mosaic.version = 11 : i64} {
  func.func @kernel(%arg0: i32, %arg1: memref<32x64xbf16, #tpu.memory_space<vmem>>, %arg2: memref<5x64x384xbf16, #tpu.memory_space<vmem>>, %arg3: memref<1x384xf32, #tpu.memory_space<vmem>>, %arg4: memref<5x384x1024xbf16, #tpu.memory_space<vmem>>, %arg5: memref<1x1024xf32, #tpu.memory_space<vmem>>, %arg6: memref<32x1024xf32, #tpu.memory_space<vmem>>, %arg7: memref<32x384xbf16, #tpu.memory_space<vmem>>) attributes {dimension_semantics = [#tpu.dimension_semantics<parallel>], iteration_bounds = array<i64: 2>, scalar_prefetch = 0 : i64, scratch_operands = 1 : i64, tpu.core_type = #tpu.core_type<tc>, window_params = [{transform_indices = @transform_0, window_bounds = array<i64: 32, 64>}, {pipeline_mode = #tpu.pipeline_mode<synchronous>, transform_indices = @transform_1, window_bounds = array<i64: 5, 64, 384>}, {pipeline_mode = #tpu.pipeline_mode<synchronous>, transform_indices = @transform_2, window_bounds = array<i64: 1, 384>}, {pipeline_mode = #tpu.pipeline_mode<synchronous>, transform_indices = @transform_3, window_bounds = array<i64: 5, 384, 1024>}, {pipeline_mode = #tpu.pipeline_mode<synchronous>, transform_indices = @transform_4, window_bounds = array<i64: 1, 1024>}, {transform_indices = @transform_5, window_bounds = array<i64: 32, 1024>}]} {
    %c0 = arith.constant 0 : index
    %c0_0 = arith.constant 0 : index
    %0 = vector.load %arg1[%c0, %c0_0] : memref<32x64xbf16, #tpu.memory_space<vmem>>, vector<28x64xbf16>
    %c0_1 = arith.constant 0 : index
    %c0_2 = arith.constant 0 : index
    %c0_3 = arith.constant 0 : index
    %1 = vector.load %arg2[%c0_1, %c0_2, %c0_3] : memref<5x64x384xbf16, #tpu.memory_space<vmem>>, vector<1x64x384xbf16>
    %2 = vector.shape_cast %1 : vector<1x64x384xbf16> to vector<64x384xbf16>
    %cst = arith.constant dense<0.000000e+00> : vector<28x384xf32>
    %3 = tpu.matmul %0, %2, %cst {dimension_numbers = #tpu.dot_dimension_numbers<[1], [0], [0], [1], [0, 0, 1, 1], [], []>} : vector<28x64xbf16>, vector<64x384xbf16>, vector<28x384xf32> -> vector<28x384xf32>
    %c1 = arith.constant 1 : index
    %c0_4 = arith.constant 0 : index
    %4 = vector.load %arg1[%c1, %c0_4] : memref<32x64xbf16, #tpu.memory_space<vmem>>, vector<28x64xbf16>
    %c1_5 = arith.constant 1 : index
    %c0_6 = arith.constant 0 : index
    %c0_7 = arith.constant 0 : index
    %5 = vector.load %arg2[%c1_5, %c0_6, %c0_7] : memref<5x64x384xbf16, #tpu.memory_space<vmem>>, vector<1x64x384xbf16>
    %6 = vector.shape_cast %5 : vector<1x64x384xbf16> to vector<64x384xbf16>
    %cst_8 = arith.constant dense<0.000000e+00> : vector<28x384xf32>
    %7 = tpu.matmul %4, %6, %cst_8 {dimension_numbers = #tpu.dot_dimension_numbers<[1], [0], [0], [1], [0, 0, 1, 1], [], []>} : vector<28x64xbf16>, vector<64x384xbf16>, vector<28x384xf32> -> vector<28x384xf32>
    %8 = arith.addf %3, %7 : vector<28x384xf32>
    %c2 = arith.constant 2 : index
    %c0_9 = arith.constant 0 : index
    %9 = vector.load %arg1[%c2, %c0_9] : memref<32x64xbf16, #tpu.memory_space<vmem>>, vector<28x64xbf16>
    %c2_10 = arith.constant 2 : index
    %c0_11 = arith.constant 0 : index
    %c0_12 = arith.constant 0 : index
    %10 = vector.load %arg2[%c2_10, %c0_11, %c0_12] : memref<5x64x384xbf16, #tpu.memory_space<vmem>>, vector<1x64x384xbf16>
    %11 = vector.shape_cast %10 : vector<1x64x384xbf16> to vector<64x384xbf16>
    %cst_13 = arith.constant dense<0.000000e+00> : vector<28x384xf32>
    %12 = tpu.matmul %9, %11, %cst_13 {dimension_numbers = #tpu.dot_dimension_numbers<[1], [0], [0], [1], [0, 0, 1, 1], [], []>} : vector<28x64xbf16>, vector<64x384xbf16>, vector<28x384xf32> -> vector<28x384xf32>
    %13 = arith.addf %8, %12 : vector<28x384xf32>
    %c3 = arith.constant 3 : index
    %c0_14 = arith.constant 0 : index
    %14 = vector.load %arg1[%c3, %c0_14] : memref<32x64xbf16, #tpu.memory_space<vmem>>, vector<28x64xbf16>
    %c3_15 = arith.constant 3 : index
    %c0_16 = arith.constant 0 : index
    %c0_17 = arith.constant 0 : index
    %15 = vector.load %arg2[%c3_15, %c0_16, %c0_17] : memref<5x64x384xbf16, #tpu.memory_space<vmem>>, vector<1x64x384xbf16>
    %16 = vector.shape_cast %15 : vector<1x64x384xbf16> to vector<64x384xbf16>
    %cst_18 = arith.constant dense<0.000000e+00> : vector<28x384xf32>
    %17 = tpu.matmul %14, %16, %cst_18 {dimension_numbers = #tpu.dot_dimension_numbers<[1], [0], [0], [1], [0, 0, 1, 1], [], []>} : vector<28x64xbf16>, vector<64x384xbf16>, vector<28x384xf32> -> vector<28x384xf32>
    %18 = arith.addf %13, %17 : vector<28x384xf32>
    %c4 = arith.constant 4 : index
    %c0_19 = arith.constant 0 : index
    %19 = vector.load %arg1[%c4, %c0_19] : memref<32x64xbf16, #tpu.memory_space<vmem>>, vector<28x64xbf16>
    %c4_20 = arith.constant 4 : index
    %c0_21 = arith.constant 0 : index
    %c0_22 = arith.constant 0 : index
    %20 = vector.load %arg2[%c4_20, %c0_21, %c0_22] : memref<5x64x384xbf16, #tpu.memory_space<vmem>>, vector<1x64x384xbf16>
    %21 = vector.shape_cast %20 : vector<1x64x384xbf16> to vector<64x384xbf16>
    %cst_23 = arith.constant dense<0.000000e+00> : vector<28x384xf32>
    %22 = tpu.matmul %19, %21, %cst_23 {dimension_numbers = #tpu.dot_dimension_numbers<[1], [0], [0], [1], [0, 0, 1, 1], [], []>} : vector<28x64xbf16>, vector<64x384xbf16>, vector<28x384xf32> -> vector<28x384xf32>
    %23 = arith.addf %18, %22 : vector<28x384xf32>
    %c0_24 = arith.constant 0 : index
    %c0_25 = arith.constant 0 : index
    %24 = vector.load %arg3[%c0_24, %c0_25] : memref<1x384xf32, #tpu.memory_space<vmem>>, vector<1x384xf32>
    %25 = vector.broadcast %24 : vector<1x384xf32> to vector<28x384xf32>
    %26 = arith.addf %23, %25 : vector<28x384xf32>
    %cst_26 = arith.constant 0.000000e+00 : f32
    %27 = vector.broadcast %cst_26 : f32 to vector<28x384xf32>
    %28 = arith.maximumf %26, %27 : vector<28x384xf32>
    %29 = vector.extract_strided_slice %28 {offsets = [0, 0], sizes = [1, 384], strides = [1, 1]} : vector<28x384xf32> to vector<1x384xf32>
    %30 = vector.extract_strided_slice %28 {offsets = [0, 0], sizes = [12, 384], strides = [1, 1]} : vector<28x384xf32> to vector<12x384xf32>
    %31 = vector.extract_strided_slice %28 {offsets = [11, 0], sizes = [1, 384], strides = [1, 1]} : vector<28x384xf32> to vector<1x384xf32>
    %32 = vector.shape_cast %29 : vector<1x384xf32> to vector<1x384xf32>
    %33 = vector.broadcast %32 : vector<1x384xf32> to vector<2x384xf32>
    %34 = vector.shape_cast %31 : vector<1x384xf32> to vector<1x384xf32>
    %35 = vector.broadcast %34 : vector<1x384xf32> to vector<2x384xf32>
    %36 = vector.extract_strided_slice %28 {offsets = [16, 0], sizes = [1, 384], strides = [1, 1]} : vector<28x384xf32> to vector<1x384xf32>
    %37 = vector.extract_strided_slice %28 {offsets = [16, 0], sizes = [12, 384], strides = [1, 1]} : vector<28x384xf32> to vector<12x384xf32>
    %38 = vector.extract_strided_slice %28 {offsets = [27, 0], sizes = [1, 384], strides = [1, 1]} : vector<28x384xf32> to vector<1x384xf32>
    %39 = vector.shape_cast %36 : vector<1x384xf32> to vector<1x384xf32>
    %40 = vector.broadcast %39 : vector<1x384xf32> to vector<2x384xf32>
    %41 = vector.shape_cast %38 : vector<1x384xf32> to vector<1x384xf32>
    %42 = vector.broadcast %41 : vector<1x384xf32> to vector<2x384xf32>
    %43 = tpu.concatenate %33, %30, %35, %40, %37, %42 in 0 : vector<2x384xf32>, vector<12x384xf32>, vector<2x384xf32>, vector<2x384xf32>, vector<12x384xf32>, vector<2x384xf32> -> vector<32x384xf32>
    %44 = arith.truncf %43 : vector<32x384xf32> to vector<32x384xbf16>
    %c0_27 = arith.constant 0 : index
    %c0_28 = arith.constant 0 : index
    %45 = vector.load %arg7[%c0_27, %c0_28] : memref<32x384xbf16, #tpu.memory_space<vmem>>, vector<32x384xbf16>
    tpu.vector_store %arg7[%c0_27, %c0_28], %44 {strides = array<i32>} : memref<32x384xbf16, #tpu.memory_space<vmem>>, vector<32x384xbf16>,
    %c0_29 = arith.constant 0 : index
    %c0_30 = arith.constant 0 : index
    %46 = vector.load %arg7[%c0_29, %c0_30] : memref<32x384xbf16, #tpu.memory_space<vmem>>, vector<28x384xbf16>
    %c0_31 = arith.constant 0 : index
    %c0_32 = arith.constant 0 : index
    %c0_33 = arith.constant 0 : index
    %47 = vector.load %arg4[%c0_31, %c0_32, %c0_33] : memref<5x384x1024xbf16, #tpu.memory_space<vmem>>, vector<1x384x512xbf16>
    %48 = vector.shape_cast %47 : vector<1x384x512xbf16> to vector<384x512xbf16>
    %cst_34 = arith.constant dense<0.000000e+00> : vector<28x512xf32>
    %49 = tpu.matmul %46, %48, %cst_34 {dimension_numbers = #tpu.dot_dimension_numbers<[1], [0], [0], [1], [0, 0, 1, 1], [], []>} : vector<28x384xbf16>, vector<384x512xbf16>, vector<28x512xf32> -> vector<28x512xf32>
    %c1_35 = arith.constant 1 : index
    %c0_36 = arith.constant 0 : index
    %50 = vector.load %arg7[%c1_35, %c0_36] : memref<32x384xbf16, #tpu.memory_space<vmem>>, vector<28x384xbf16>
    %c1_37 = arith.constant 1 : index
    %c0_38 = arith.constant 0 : index
    %c0_39 = arith.constant 0 : index
    %51 = vector.load %arg4[%c1_37, %c0_38, %c0_39] : memref<5x384x1024xbf16, #tpu.memory_space<vmem>>, vector<1x384x512xbf16>
    %52 = vector.shape_cast %51 : vector<1x384x512xbf16> to vector<384x512xbf16>
    %cst_40 = arith.constant dense<0.000000e+00> : vector<28x512xf32>
    %53 = tpu.matmul %50, %52, %cst_40 {dimension_numbers = #tpu.dot_dimension_numbers<[1], [0], [0], [1], [0, 0, 1, 1], [], []>} : vector<28x384xbf16>, vector<384x512xbf16>, vector<28x512xf32> -> vector<28x512xf32>
    %54 = arith.addf %49, %53 : vector<28x512xf32>
    %c2_41 = arith.constant 2 : index
    %c0_42 = arith.constant 0 : index
    %55 = vector.load %arg7[%c2_41, %c0_42] : memref<32x384xbf16, #tpu.memory_space<vmem>>, vector<28x384xbf16>
    %c2_43 = arith.constant 2 : index
    %c0_44 = arith.constant 0 : index
    %c0_45 = arith.constant 0 : index
    %56 = vector.load %arg4[%c2_43, %c0_44, %c0_45] : memref<5x384x1024xbf16, #tpu.memory_space<vmem>>, vector<1x384x512xbf16>
    %57 = vector.shape_cast %56 : vector<1x384x512xbf16> to vector<384x512xbf16>
    %cst_46 = arith.constant dense<0.000000e+00> : vector<28x512xf32>
    %58 = tpu.matmul %55, %57, %cst_46 {dimension_numbers = #tpu.dot_dimension_numbers<[1], [0], [0], [1], [0, 0, 1, 1], [], []>} : vector<28x384xbf16>, vector<384x512xbf16>, vector<28x512xf32> -> vector<28x512xf32>
    %59 = arith.addf %54, %58 : vector<28x512xf32>
    %c3_47 = arith.constant 3 : index
    %c0_48 = arith.constant 0 : index
    %60 = vector.load %arg7[%c3_47, %c0_48] : memref<32x384xbf16, #tpu.memory_space<vmem>>, vector<28x384xbf16>
    %c3_49 = arith.constant 3 : index
    %c0_50 = arith.constant 0 : index
    %c0_51 = arith.constant 0 : index
    %61 = vector.load %arg4[%c3_49, %c0_50, %c0_51] : memref<5x384x1024xbf16, #tpu.memory_space<vmem>>, vector<1x384x512xbf16>
    %62 = vector.shape_cast %61 : vector<1x384x512xbf16> to vector<384x512xbf16>
    %cst_52 = arith.constant dense<0.000000e+00> : vector<28x512xf32>
    %63 = tpu.matmul %60, %62, %cst_52 {dimension_numbers = #tpu.dot_dimension_numbers<[1], [0], [0], [1], [0, 0, 1, 1], [], []>} : vector<28x384xbf16>, vector<384x512xbf16>, vector<28x512xf32> -> vector<28x512xf32>
    %64 = arith.addf %59, %63 : vector<28x512xf32>
    %c4_53 = arith.constant 4 : index
    %c0_54 = arith.constant 0 : index
    %65 = vector.load %arg7[%c4_53, %c0_54] : memref<32x384xbf16, #tpu.memory_space<vmem>>, vector<28x384xbf16>
    %c4_55 = arith.constant 4 : index
    %c0_56 = arith.constant 0 : index
    %c0_57 = arith.constant 0 : index
    %66 = vector.load %arg4[%c4_55, %c0_56, %c0_57] : memref<5x384x1024xbf16, #tpu.memory_space<vmem>>, vector<1x384x512xbf16>
    %67 = vector.shape_cast %66 : vector<1x384x512xbf16> to vector<384x512xbf16>
    %cst_58 = arith.constant dense<0.000000e+00> : vector<28x512xf32>
    %68 = tpu.matmul %65, %67, %cst_58 {dimension_numbers = #tpu.dot_dimension_numbers<[1], [0], [0], [1], [0, 0, 1, 1], [], []>} : vector<28x384xbf16>, vector<384x512xbf16>, vector<28x512xf32> -> vector<28x512xf32>
    %69 = arith.addf %64, %68 : vector<28x512xf32>
    %c0_59 = arith.constant 0 : index
    %c0_60 = arith.constant 0 : index
    %70 = vector.load %arg5[%c0_59, %c0_60] : memref<1x1024xf32, #tpu.memory_space<vmem>>, vector<1x512xf32>
    %71 = vector.broadcast %70 : vector<1x512xf32> to vector<28x512xf32>
    %72 = arith.addf %69, %71 : vector<28x512xf32>
    %cst_61 = arith.constant 0.000000e+00 : f32
    %73 = vector.broadcast %cst_61 : f32 to vector<28x512xf32>
    %74 = arith.maximumf %72, %73 : vector<28x512xf32>
    %75 = vector.extract_strided_slice %74 {offsets = [0, 0], sizes = [1, 512], strides = [1, 1]} : vector<28x512xf32> to vector<1x512xf32>
    %76 = vector.extract_strided_slice %74 {offsets = [0, 0], sizes = [12, 512], strides = [1, 1]} : vector<28x512xf32> to vector<12x512xf32>
    %77 = vector.extract_strided_slice %74 {offsets = [11, 0], sizes = [1, 512], strides = [1, 1]} : vector<28x512xf32> to vector<1x512xf32>
    %78 = vector.shape_cast %75 : vector<1x512xf32> to vector<1x512xf32>
    %79 = vector.broadcast %78 : vector<1x512xf32> to vector<2x512xf32>
    %80 = vector.shape_cast %77 : vector<1x512xf32> to vector<1x512xf32>
    %81 = vector.broadcast %80 : vector<1x512xf32> to vector<2x512xf32>
    %82 = vector.extract_strided_slice %74 {offsets = [16, 0], sizes = [1, 512], strides = [1, 1]} : vector<28x512xf32> to vector<1x512xf32>
    %83 = vector.extract_strided_slice %74 {offsets = [16, 0], sizes = [12, 512], strides = [1, 1]} : vector<28x512xf32> to vector<12x512xf32>
    %84 = vector.extract_strided_slice %74 {offsets = [27, 0], sizes = [1, 512], strides = [1, 1]} : vector<28x512xf32> to vector<1x512xf32>
    %85 = vector.shape_cast %82 : vector<1x512xf32> to vector<1x512xf32>
    %86 = vector.broadcast %85 : vector<1x512xf32> to vector<2x512xf32>
    %87 = vector.shape_cast %84 : vector<1x512xf32> to vector<1x512xf32>
    %88 = vector.broadcast %87 : vector<1x512xf32> to vector<2x512xf32>
    %89 = tpu.concatenate %79, %76, %81, %86, %83, %88 in 0 : vector<2x512xf32>, vector<12x512xf32>, vector<2x512xf32>, vector<2x512xf32>, vector<12x512xf32>, vector<2x512xf32> -> vector<32x512xf32>
    %c0_62 = arith.constant 0 : index
    %c0_63 = arith.constant 0 : index
    %90 = vector.load %arg6[%c0_62, %c0_63] : memref<32x1024xf32, #tpu.memory_space<vmem>>, vector<32x512xf32>
    tpu.vector_store %arg6[%c0_62, %c0_63], %89 {strides = array<i32>} : memref<32x1024xf32, #tpu.memory_space<vmem>>, vector<32x512xf32>,
    %c0_64 = arith.constant 0 : index
    %c0_65 = arith.constant 0 : index
    %91 = vector.load %arg7[%c0_64, %c0_65] : memref<32x384xbf16, #tpu.memory_space<vmem>>, vector<28x384xbf16>
    %c0_66 = arith.constant 0 : index
    %c0_67 = arith.constant 0 : index
    %c512 = arith.constant 512 : index
    %92 = vector.load %arg4[%c0_66, %c0_67, %c512] : memref<5x384x1024xbf16, #tpu.memory_space<vmem>>, vector<1x384x512xbf16>
    %93 = vector.shape_cast %92 : vector<1x384x512xbf16> to vector<384x512xbf16>
    %cst_68 = arith.constant dense<0.000000e+00> : vector<28x512xf32>
    %94 = tpu.matmul %91, %93, %cst_68 {dimension_numbers = #tpu.dot_dimension_numbers<[1], [0], [0], [1], [0, 0, 1, 1], [], []>} : vector<28x384xbf16>, vector<384x512xbf16>, vector<28x512xf32> -> vector<28x512xf32>
    %c1_69 = arith.constant 1 : index
    %c0_70 = arith.constant 0 : index
    %95 = vector.load %arg7[%c1_69, %c0_70] : memref<32x384xbf16, #tpu.memory_space<vmem>>, vector<28x384xbf16>
    %c1_71 = arith.constant 1 : index
    %c0_72 = arith.constant 0 : index
    %c512_73 = arith.constant 512 : index
    %96 = vector.load %arg4[%c1_71, %c0_72, %c512_73] : memref<5x384x1024xbf16, #tpu.memory_space<vmem>>, vector<1x384x512xbf16>
    %97 = vector.shape_cast %96 : vector<1x384x512xbf16> to vector<384x512xbf16>
    %cst_74 = arith.constant dense<0.000000e+00> : vector<28x512xf32>
    %98 = tpu.matmul %95, %97, %cst_74 {dimension_numbers = #tpu.dot_dimension_numbers<[1], [0], [0], [1], [0, 0, 1, 1], [], []>} : vector<28x384xbf16>, vector<384x512xbf16>, vector<28x512xf32> -> vector<28x512xf32>
    %99 = arith.addf %94, %98 : vector<28x512xf32>
    %c2_75 = arith.constant 2 : index
    %c0_76 = arith.constant 0 : index
    %100 = vector.load %arg7[%c2_75, %c0_76] : memref<32x384xbf16, #tpu.memory_space<vmem>>, vector<28x384xbf16>
    %c2_77 = arith.constant 2 : index
    %c0_78 = arith.constant 0 : index
    %c512_79 = arith.constant 512 : index
    %101 = vector.load %arg4[%c2_77, %c0_78, %c512_79] : memref<5x384x1024xbf16, #tpu.memory_space<vmem>>, vector<1x384x512xbf16>
    %102 = vector.shape_cast %101 : vector<1x384x512xbf16> to vector<384x512xbf16>
    %cst_80 = arith.constant dense<0.000000e+00> : vector<28x512xf32>
    %103 = tpu.matmul %100, %102, %cst_80 {dimension_numbers = #tpu.dot_dimension_numbers<[1], [0], [0], [1], [0, 0, 1, 1], [], []>} : vector<28x384xbf16>, vector<384x512xbf16>, vector<28x512xf32> -> vector<28x512xf32>
    %104 = arith.addf %99, %103 : vector<28x512xf32>
    %c3_81 = arith.constant 3 : index
    %c0_82 = arith.constant 0 : index
    %105 = vector.load %arg7[%c3_81, %c0_82] : memref<32x384xbf16, #tpu.memory_space<vmem>>, vector<28x384xbf16>
    %c3_83 = arith.constant 3 : index
    %c0_84 = arith.constant 0 : index
    %c512_85 = arith.constant 512 : index
    %106 = vector.load %arg4[%c3_83, %c0_84, %c512_85] : memref<5x384x1024xbf16, #tpu.memory_space<vmem>>, vector<1x384x512xbf16>
    %107 = vector.shape_cast %106 : vector<1x384x512xbf16> to vector<384x512xbf16>
    %cst_86 = arith.constant dense<0.000000e+00> : vector<28x512xf32>
    %108 = tpu.matmul %105, %107, %cst_86 {dimension_numbers = #tpu.dot_dimension_numbers<[1], [0], [0], [1], [0, 0, 1, 1], [], []>} : vector<28x384xbf16>, vector<384x512xbf16>, vector<28x512xf32> -> vector<28x512xf32>
    %109 = arith.addf %104, %108 : vector<28x512xf32>
    %c4_87 = arith.constant 4 : index
    %c0_88 = arith.constant 0 : index
    %110 = vector.load %arg7[%c4_87, %c0_88] : memref<32x384xbf16, #tpu.memory_space<vmem>>, vector<28x384xbf16>
    %c4_89 = arith.constant 4 : index
    %c0_90 = arith.constant 0 : index
    %c512_91 = arith.constant 512 : index
    %111 = vector.load %arg4[%c4_89, %c0_90, %c512_91] : memref<5x384x1024xbf16, #tpu.memory_space<vmem>>, vector<1x384x512xbf16>
    %112 = vector.shape_cast %111 : vector<1x384x512xbf16> to vector<384x512xbf16>
    %cst_92 = arith.constant dense<0.000000e+00> : vector<28x512xf32>
    %113 = tpu.matmul %110, %112, %cst_92 {dimension_numbers = #tpu.dot_dimension_numbers<[1], [0], [0], [1], [0, 0, 1, 1], [], []>} : vector<28x384xbf16>, vector<384x512xbf16>, vector<28x512xf32> -> vector<28x512xf32>
    %114 = arith.addf %109, %113 : vector<28x512xf32>
    %c0_93 = arith.constant 0 : index
    %c512_94 = arith.constant 512 : index
    %115 = vector.load %arg5[%c0_93, %c512_94] : memref<1x1024xf32, #tpu.memory_space<vmem>>, vector<1x512xf32>
    %116 = vector.broadcast %115 : vector<1x512xf32> to vector<28x512xf32>
    %117 = arith.addf %114, %116 : vector<28x512xf32>
    %cst_95 = arith.constant 0.000000e+00 : f32
    %118 = vector.broadcast %cst_95 : f32 to vector<28x512xf32>
    %119 = arith.maximumf %117, %118 : vector<28x512xf32>
    %120 = vector.extract_strided_slice %119 {offsets = [0, 0], sizes = [1, 512], strides = [1, 1]} : vector<28x512xf32> to vector<1x512xf32>
    %121 = vector.extract_strided_slice %119 {offsets = [0, 0], sizes = [12, 512], strides = [1, 1]} : vector<28x512xf32> to vector<12x512xf32>
    %122 = vector.extract_strided_slice %119 {offsets = [11, 0], sizes = [1, 512], strides = [1, 1]} : vector<28x512xf32> to vector<1x512xf32>
    %123 = vector.shape_cast %120 : vector<1x512xf32> to vector<1x512xf32>
    %124 = vector.broadcast %123 : vector<1x512xf32> to vector<2x512xf32>
    %125 = vector.shape_cast %122 : vector<1x512xf32> to vector<1x512xf32>
    %126 = vector.broadcast %125 : vector<1x512xf32> to vector<2x512xf32>
    %127 = vector.extract_strided_slice %119 {offsets = [16, 0], sizes = [1, 512], strides = [1, 1]} : vector<28x512xf32> to vector<1x512xf32>
    %128 = vector.extract_strided_slice %119 {offsets = [16, 0], sizes = [12, 512], strides = [1, 1]} : vector<28x512xf32> to vector<12x512xf32>
    %129 = vector.extract_strided_slice %119 {offsets = [27, 0], sizes = [1, 512], strides = [1, 1]} : vector<28x512xf32> to vector<1x512xf32>
    %130 = vector.shape_cast %127 : vector<1x512xf32> to vector<1x512xf32>
    %131 = vector.broadcast %130 : vector<1x512xf32> to vector<2x512xf32>
    %132 = vector.shape_cast %129 : vector<1x512xf32> to vector<1x512xf32>
    %133 = vector.broadcast %132 : vector<1x512xf32> to vector<2x512xf32>
    %134 = tpu.concatenate %124, %121, %126, %131, %128, %133 in 0 : vector<2x512xf32>, vector<12x512xf32>, vector<2x512xf32>, vector<2x512xf32>, vector<12x512xf32>, vector<2x512xf32> -> vector<32x512xf32>
    %c0_96 = arith.constant 0 : index
    %c512_97 = arith.constant 512 : index
    %135 = vector.load %arg6[%c0_96, %c512_97] : memref<32x1024xf32, #tpu.memory_space<vmem>>, vector<32x512xf32>
    tpu.vector_store %arg6[%c0_96, %c512_97], %134 {strides = array<i32>} : memref<32x1024xf32, #tpu.memory_space<vmem>>, vector<32x512xf32>,
    return
  }
  func.func @transform_0(%arg0: i32) -> (i32, i32) {
    %c0_i32 = arith.constant 0 : i32
    %c0_i32_0 = arith.constant 0 : i32
    return %arg0, %c0_i32 : i32, i32
  }
  func.func @transform_1(%arg0: i32) -> (i32, i32, i32) {
    %c0_i32 = arith.constant 0 : i32
    %c0_i32_0 = arith.constant 0 : i32
    %c0_i32_1 = arith.constant 0 : i32
    %c0_i32_2 = arith.constant 0 : i32
    return %c0_i32, %c0_i32_0, %c0_i32_1 : i32, i32, i32
  }
  func.func @transform_2(%arg0: i32) -> (i32, i32) {
    %c0_i32 = arith.constant 0 : i32
    %c0_i32_0 = arith.constant 0 : i32
    %c0_i32_1 = arith.constant 0 : i32
    return %c0_i32, %c0_i32_0 : i32, i32
  }
  func.func @transform_3(%arg0: i32) -> (i32, i32, i32) {
    %c0_i32 = arith.constant 0 : i32
    %c0_i32_0 = arith.constant 0 : i32
    %c0_i32_1 = arith.constant 0 : i32
    %c0_i32_2 = arith.constant 0 : i32
    return %c0_i32, %c0_i32_0, %c0_i32_1 : i32, i32, i32
  }
  func.func @transform_4(%arg0: i32) -> (i32, i32) {
    %c0_i32 = arith.constant 0 : i32
    %c0_i32_0 = arith.constant 0 : i32
    %c0_i32_1 = arith.constant 0 : i32
    return %c0_i32, %c0_i32_0 : i32, i32
  }
  func.func @transform_5(%arg0: i32) -> (i32, i32) {
    %c0_i32 = arith.constant 0 : i32
    %c0_i32_0 = arith.constant 0 : i32
    return %arg0, %c0_i32 : i32, i32
  }
}

</mosaic_0001>

<bundles_post_ra>
// kernel: tpu_custom_call.1
= control target key start
LH: loop header
LB: loop body
LE: loop exit
PB: predicated region body
PF: predicated region fallthrough
CT: control target
= control target key end

     0   :  { %10 = vsyncpa [#allocation4], 0  ;;  %s13301_s0 = inlined_call_operand.hbm [shape: bf16[64,64], index: 0, kind: input, shape index: {}]   ;;  %s13302_s1 = inlined_call_operand.hbm [shape: bf16[5,64,384], index: 1, kind: input, shape index: {}]   ;;  %s13303_s2 = inlined_call_operand.hbm [shape: f32[1,384], index: 2, kind: input, shape index: {}]   ;;  %s13304_s3 = inlined_call_operand.hbm [shape: bf16[5,384,1024], index: 3, kind: input, shape index: {}]   ;;  %s13305_s4 = inlined_call_operand.hbm [shape: f32[1,1024], index: 4, kind: input, shape index: {}]   ;;  %s13306_s5 = inlined_call_operand.hbm [shape: f32[64,1024], index: 5, kind: output, shape index: {}]  }
   0x1   :  { %12 = vsyncpa [#allocation4 + $0x1], 0 }
   0x2   :  { %13 = vsyncpa [#allocation7], 0 }
   0x3   :  { %14 = vsyncpa [#allocation10], 0 }
   0x4   :  { %15 = vsyncpa [#allocation5], 0 }
   0x5   :  { %17 = vsyncpa [#allocation5 + $0x1], 0  ;;  %s12311_s18 = smov 0   ;;  %s12313_s19 = smov 0  }
   0x6   :  { %s12315_s20 = smov 0   ;;  %s12317_s21 = smov 0  }
   0x7 LB: > { %s12332_s22 = sadd.s32 4294967295, %s12264_s21   ;;  %s10363_s23 = sadd.s32 4294967294, %s12264_s21   ;;  %s12264_s21 = sphi %s12317_s21, %s13339_s21   ;;  %s12260_s20 = sphi %s12315_s20, %s13338_s20   ;;  %s12256_s19 = sphi %s12313_s19, %s13337_s19   ;;  %s12252_s18 = sphi %s12311_s18, %s13336_s18  }
   0x8   : > { %p43_p0 = scmp.ne.s32.totalorder %s12256_s19, %s12252_s18  ;;  %p13307_p1 = scmp.eq.s32.totalorder %s12332_s22, 0 }
   0x9   : > { %p157_p3 = scmp.eq.s32.totalorder %s10363_s23, 1  ;;  %p10364_p5 = scmp.ge.s32.totalorder %s12264_s21, 1 }
   0xa   : > { %p12341_p4 = por %p13307_p1, %p43_p0  ;;  %p164_p7 = scmp.lt.s32.totalorder %s12264_s21, 3 }
   0xb   : > { %p12346_p6 = por %p157_p3, %p43_p0  ;;  %s12266_s27 = smov [#allocation6]  }
   0xc   : > { %s13312_s24 = scalar_select %p12341_p4, 1, 0 }
   0xd   : > { %s13313_s25 = scalar_select %p12346_p6, 1, 0 }
   0xe   : > { %p12351_p8 = pnand %p10364_p5, %p164_p7  ;;  %s176_s28 = sshll.u32 %s12266_s27, 4  ;;  %s12355_s28 = int_to_ptr.vmem [resolvable:$true] %s176_s28 }
   0xf   : > { %s12267_s30 = smov [#allocation9]   ;;  %s12048_s9 = scalar_lea.hbm %s13302_s1, 7680 }
  0x10   : > { %s13314_s26 = scalar_select %p12351_p8, 1, 0 }
  0x11   : > { %p11881_p9 = pneg %p12351_p8  ;;  %s200_s6 = sshll.u32 %s12267_s30, 4  ;;  %s12366_s6 = int_to_ptr.vmem [resolvable:$true] %s200_s6 }
  0x12   : > { %p12049_p12 = scmp.ne.s32.totalorder %s13302_s1, %s12048_s9  ;;  %p12055_p5 = scmp.lt.u32.totalorder %s12048_s9, %s13302_s1 }
  0x13   : > { %p12362_p11 = pnand %p11881_p9, %p13307_p1 }
  0x15   : > { %p12376_p13 = pneg %p12362_p11 }
  0x17   : > { %p12051_p0 = pnand %p12376_p13, %p12049_p12 }
  0x19   : > { %p12052_p3 = pneg %p12051_p0 }
  0x1b   : > { %p12057_p7 = pnand %p12055_p5, %p12052_p3 }
  0x1d   : > { %12060 = shalt.err (!%p12057_p7)
}
  0x1e   : > { %s12061_s15 = scalar_lea.vmem %s12355_s28, 7680  ;;  %p12069_p2 = scmp.lt.s32.totalorder %s12355_s28, %s12355_s28 }
  0x1f   : > { %p12062_p9 = scmp.ne.s32.totalorder %s12355_s28, %s12061_s15  ;;  %p12070_p6 = scmp.lt.s32.totalorder %s12061_s15, %s12061_s15 }
  0x21   : > { %p12064_p10 = pnand %p12062_p9, %p12376_p13  ;;  %p12071_p12 = por %p12070_p6, %p12069_p2 }
  0x23   : > { %p12065_p1 = pneg %p12064_p10 }
  0x25   : > { %p12072_p0 = pnand %p12071_p12, %p12065_p1 }
  0x27   : > { %12075 = shalt.err (!%p12072_p0)
}
  0x28   : > { %s12268_s16 = smov 192   ;;  %s12269_s17 = smov 12  }
  0x29   : > { %11884 = dma.hbm_to_vmem [thread:$0]  (!%p12362_p11), %s13302_s1, 7680, %s12355_s28, [#allocation7], %s12268_s16, %s12268_s16, %s12269_s17  }
  0x2a   : > { %s12076_s8 = scalar_lea.hbm %s13304_s3, 122880 }
  0x2b   : > { %p12077_p2 = scmp.ne.s32.totalorder %s13304_s3, %s12076_s8  ;;  %p12083_p10 = scmp.lt.u32.totalorder %s12076_s8, %s13304_s3 }
  0x2d   : > { %p12079_p1 = pnand %p12077_p2, %p12376_p13 }
  0x2f   : > { %p12080_p6 = pneg %p12079_p1 }
  0x31   : > { %p12085_p3 = pnand %p12083_p10, %p12080_p6 }
  0x33   : > { %12088 = shalt.err (!%p12085_p3)
}
  0x34   : > { %s12089_s28 = scalar_lea.vmem %s12366_s6, 122880  ;;  %p12097_p12 = scmp.lt.s32.totalorder %s12366_s6, %s12366_s6 }
  0x35   : > { %p12090_p5 = scmp.ne.s32.totalorder %s12366_s6, %s12089_s28  ;;  %p12098_p0 = scmp.lt.s32.totalorder %s12089_s28, %s12089_s28 }
  0x37   : > { %p12092_p7 = pnand %p12090_p5, %p12376_p13  ;;  %p12099_p2 = por %p12098_p0, %p12097_p12 }
  0x39   : > { %p12093_p9 = pneg %p12092_p7 }
  0x3b   : > { %p12100_p1 = pnand %p12099_p2, %p12093_p9 }
  0x3d   : > { %12103 = shalt.err (!%p12100_p1)
}
  0x3e   : > { %s12270_s14 = smov 512   ;;  %s12271_s15 = smov 32  }
  0x3f   : > { %11890 = dma.hbm_to_vmem [thread:$0]  (!%p12362_p11), %s13304_s3, 122880, %s12366_s6, [#allocation10], %s12270_s14, %s12270_s14, %s12271_s15  }
  0x40   : > { %s12272_s23 = smov [#allocation8]   ;;  %s12273_s30 = smov [#allocation11]  }
  0x41   : > { %s190_s27 = sshll.u32 %s12272_s23, 4  ;;  %s214_s7 = sshll.u32 %s12273_s30, 4  ;;  %s191_s27 = int_to_ptr.vmem [resolvable:$true] %s190_s27  ;;  %s12420_s7 = int_to_ptr.vmem [resolvable:$true] %s214_s7 }
  0x42   : > { %s12104_s10 = scalar_lea.hbm %s13303_s2, 48 }
  0x43   : > { %p12105_p6 = scmp.ne.s32.totalorder %s13303_s2, %s12104_s10  ;;  %p12111_p5 = scmp.lt.u32.totalorder %s12104_s10, %s13303_s2 }
  0x45   : > { %p12107_p10 = pnand %p12105_p6, %p12376_p13 }
  0x47   : > { %p12108_p3 = pneg %p12107_p10 }
  0x49   : > { %p12113_p7 = pnand %p12111_p5, %p12108_p3 }
  0x4b   : > { %12116 = shalt.err (!%p12113_p7)
}
  0x4c   : > { %s12117_s14 = scalar_lea.vmem %s191_s27, 48  ;;  %s12124_s15 = scalar_lea.vmem %s191_s27, 64 }
  0x4d   : > { %p12118_p9 = scmp.ne.s32.totalorder %s191_s27, %s12117_s14  ;;  %p12125_p2 = scmp.lt.s32.totalorder %s191_s27, %s191_s27 }
  0x4e   : > { %p12126_p1 = scmp.lt.s32.totalorder %s12124_s15, %s12117_s14 }
  0x4f   : > { %p12120_p12 = pnand %p12118_p9, %p12376_p13 }
  0x50   : > { %p12127_p4 = por %p12126_p1, %p12125_p2 }
  0x51   : > { %p12121_p0 = pneg %p12120_p12 }
  0x53   : > { %p12128_p8 = pnand %p12127_p4, %p12121_p0 }
  0x55   : > { %12131 = shalt.err (!%p12128_p8)
}
  0x56   : > { %11887 = dma.hbm_to_vmem [thread:$0]  (!%p12362_p11), %s13303_s2, 48, %s191_s27, [#allocation7]  }
  0x57   : > { %s12132_s8 = scalar_lea.hbm %s13305_s4, 128 }
  0x58   : > { %p12133_p6 = scmp.ne.s32.totalorder %s13305_s4, %s12132_s8  ;;  %p12139_p4 = scmp.lt.u32.totalorder %s12132_s8, %s13305_s4 }
  0x5a   : > { %p12135_p10 = pnand %p12133_p6, %p12376_p13 }
  0x5c   : > { %p12136_p3 = pneg %p12135_p10 }
  0x5e   : > { %p12141_p8 = pnand %p12139_p4, %p12136_p3 }
  0x60   : > { %12144 = shalt.err (!%p12141_p8)
}
  0x61   : > { %s12145_s27 = scalar_lea.vmem %s12420_s7, 128  ;;  %p12153_p12 = scmp.lt.s32.totalorder %s12420_s7, %s12420_s7 }
  0x62   : > { %p12146_p5 = scmp.ne.s32.totalorder %s12420_s7, %s12145_s27  ;;  %p12154_p0 = scmp.lt.s32.totalorder %s12145_s27, %s12145_s27 }
  0x64   : > { %p12148_p7 = pnand %p12146_p5, %p12376_p13  ;;  %p12155_p2 = por %p12154_p0, %p12153_p12 }
  0x66   : > { %p12149_p9 = pneg %p12148_p7 }
  0x68   : > { %p12156_p1 = pnand %p12155_p2, %p12149_p9 }
  0x6a   : > { %12159 = shalt.err (!%p12156_p1)
}
  0x6b   : > { %11893 = dma.hbm_to_vmem [thread:$0]  (!%p12362_p11), %s13305_s4, 128, %s12420_s7, [#allocation10]  }
  0x6c   : > { %s12464_s12 = sadd.s32 1, %s12264_s21   ;;  %s30_s14 = sadd.s32 1, %s12260_s20 }
  0x6d   : > { %s27_s29 = ssub.s32 %s12264_s21, %s12464_s12  ;;  %p37_p6 = scmp.ne.s32.totalorder %s12260_s20, %s12256_s19 }
  0x6e   : > { %p28_p13 = scmp.eq.s32.totalorder %s27_s29, 0  ;;  %p38_p10 = scmp.eq.s32.totalorder %s12264_s21, 0 }
  0x6f   : > { %p13317_p4 = scmp.eq.s32.totalorder %s12332_s22, 1  ;;  %p11906_p5 = scmp.lt.s32.totalorder %s12264_s21, 2 }
  0x70   : > { %s12473_s15 = scalar_select %p28_p13, %s12260_s20, %s30_s14  }
  0x71   : > { %p39_p3 = por %p38_p10, %p37_p6  ;;  %p12477_p8 = por %p13317_p4, %p37_p6 }
  0x72   : > { %s225_s17 = sand.u32 1, %s12260_s20   ;;  %s11432_s7 = sshll.u32 %s12264_s21, 8 }
  0x73   : > { %s10370_s23 = sshll.u32 %s225_s17, 4  ;;  %s12487_s9 = scalar_lea.hbm %s13301_s0, %s11432_s7 }
  0x74   : > { %s229_s10 = scalar_lea.vmem [#allocation3], %s10370_s23  ;;  %p12491_p11 = pnand %p11906_p5, %p39_p3 }
  0x75   : > { %s236_s11 = sshll.u32 %s229_s10, 4  ;;  %s12495_s27 = scalar_lea.sflag [#allocation4], %s225_s17  ;;  %s12489_s11 = int_to_ptr.vmem [resolvable:$true] %s236_s11 }
  0x76   : > { %s12160_s28 = scalar_lea.hbm %s12487_s9, 256  ;;  %p12162_p9 = pneg %p12491_p11 }
  0x77   : > { %p12161_p7 = scmp.ne.s32.totalorder %s12487_s9, %s12160_s28  ;;  %s12165_s14 = scalar_lea.hbm %s13301_s0, 512 }
  0x78   : > { %p12166_p2 = scmp.lt.u32.totalorder %s12487_s9, %s13301_s0  ;;  %p12167_p1 = scmp.lt.u32.totalorder %s12165_s14, %s12160_s28 }
  0x79   : > { %p12163_p12 = pnand %p12162_p9, %p12161_p7  ;;  %p12169_p6 = scmp.lt.u32.totalorder %s12160_s28, %s12487_s9 }
  0x7a   : > { %p12168_p13 = por %p12167_p1, %p12166_p2 }
  0x7b   : > { %p12164_p0 = pneg %p12163_p12 }
  0x7c   : > { %p12170_p10 = por %p12169_p6, %p12168_p13 }
  0x7e   : > { %p12171_p3 = pnand %p12170_p10, %p12164_p0 }
  0x80   : > { %12174 = shalt.err (!%p12171_p3)
}
  0x81   : > { %s12175_s17 = scalar_lea.vmem %s12489_s11, 256  ;;  %s12274_s30 = smov [#allocation3]  }
  0x82   : > { %p12176_p4 = scmp.ne.s32.totalorder %s12489_s11, %s12175_s17  ;;  %s12180_s8 = sshll.u32 %s12274_s30, 4  ;;  %s12181_s8 = int_to_ptr.vmem [resolvable:$false] %s12180_s8 }
  0x83   : > { %s12182_s10 = scalar_lea.vmem %s12181_s8, 512  ;;  %p12183_p12 = scmp.lt.s32.totalorder %s12489_s11, %s12181_s8 }
  0x84   : > { %p12178_p5 = pnand %p12176_p4, %p12162_p9  ;;  %p12184_p2 = scmp.lt.s32.totalorder %s12182_s10, %s12175_s17 }
  0x86   : > { %p12179_p7 = pneg %p12178_p5  ;;  %p12185_p1 = por %p12184_p2, %p12183_p12 }
  0x88   : > { %p12186_p13 = pnand %p12185_p1, %p12179_p7 }
  0x8a   : > { %12189 = shalt.err (!%p12186_p13)
}
  0x8b   : > { %s12275_s28 = smov 64   ;;  %s12276_s6 = smov 4  }
  0x8c   : > { %11897 = dma.hbm_to_vmem [thread:$0]  (!%p12491_p11), %s12487_s9, 256, %s12489_s11, %s12495_s27, %s12275_s28, %s12275_s28, %s12276_s6  }
  0x8d   : > { %p13320_p9 = scmp.ne.s32.totalorder %s13314_s26, 0 }
  0x8e   : > { %s12526_s29 = sand.u32 (!%p13320_p9), 1, %s12256_s19   ;;  %p13321_p0 = scmp.ne.s32.totalorder (!%p13320_p9), %s13312_s24, 0 }
  0x8f   : > { %248 = sbr.rel (%p13320_p9) target bundleno = 1651 (0x673), region = 40  ;;  %s10374_s14 = sshll.u32 (!%p13320_p9), %s12526_s29, 4 }
  0x90   : > { %s251_s23 = scalar_lea.sflag (!%p13320_p9), [#allocation4], %s12526_s29  ;;  %s12530_s7 = scalar_lea.vmem (!%p13320_p9), [#allocation3], %s10374_s14 }
  0x96   : > { %12235 = dma.done.wait (%p13321_p0), %s251_s23, 256  }
  0x97   : > { %12237 = vsyncadd (%p13321_p0), %s251_s23, 4294967040  ;;  %p13322_p11 = scmp.eq.s32.totalorder %s12332_s22, 0 }
  0x99   : > { %12239 = dma.done.wait (%p13322_p11), [#allocation7], 7728   ;;  %p13323_p6 = pmov %p13322_p11 }
  0x9b   : > { %12241 = vsyncadd (%p13323_p6), [#allocation7], 4294959568  ;;  %p13324_p10 = pmov %p13323_p6 }
  0x9c   : > { %p13325_p3 = pmov %p13323_p6 }
  0x9d   : > { %12243 = dma.done.wait (%p13324_p10), [#allocation10], 123008  }
  0x9e   : > { %12245 = vsyncadd (%p13325_p3), [#allocation10], 4294844288  ;;  %v13310_v0 = vmov 0   ;;  %v11957_v1 = vld [vmem:[#allocation6 + $0x64] ss:$12 sps:$4 sm:$0xff]   ;;  %vm428_vm1 = vcmask 523264  }
  0x9f   : > { %467 = vmatprep.mubr.bf16.mxu0 %v13310_v0  ;;  %v11959_v2 = vld [vmem:[#allocation6 + $0x68] ss:$12 sps:$4 sm:$0xff]   ;;  %435 = vmatprep.subr.bf16.mxu0 %v11957_v1  ;;  %v11960_v3 = vld [vmem:[#allocation6 + $0x60] ss:$12 sps:$4 sm:$0xff]   ;;  %v11964_v6 = vld [vmem:[#allocation6 + $0x78] ss:$12 sps:$4 sm:$0xff]  }
  0xa0   : > { %11465 = vmatprep.subr.bf16.mxu1 %v11959_v2  ;;  %v11961_v4 = vld [vmem:[#allocation6 + $0x7c] ss:$12 sps:$4 sm:$0xff]   ;;  %436 = vmatpush1.bf16.msra.mxu0 %v11960_v3  ;;  %v11963_v5 = vld [vmem:[#allocation6 + $0x80] ss:$12 sps:$4 sm:$0xff]   ;;  %v11967_v8 = vld [vmem:[#allocation6 + $0x98] ss:$12 sps:$4 sm:$0xff]  }
  0xa1   : > { %11466 = vmatpush3.bf16.msra.mxu1 %v11959_v2  ;;  %437 = vmatprep.subr.bf16.mxu0 %v11961_v4  ;;  %v11965_v7 = vld [vmem:[#allocation6 + $0x94] ss:$12 sps:$4 sm:$0xff]   ;;  %v11968_v9 = vld [vmem:[#allocation6 + $0x90] ss:$12 sps:$4 sm:$0xff]   ;;  %v11969_v10 = vld [vmem:[#allocation6 + $0xac] ss:$12 sps:$4 sm:$0xff]  }
  0xa2   : > { %11467 = vmatprep.subr.bf16.mxu1 %v11963_v5  ;;  %v11971_v11 = vld [vmem:[#allocation6 + $0xb0] ss:$12 sps:$4 sm:$0xff]   ;;  %v12547_v13 = vld [vmem:[%s12530_s7 + $0x4] sm:$0xf]  ;;  %v12550_v14 = vld [vmem:[%s12530_s7 + $0x8] sm:$0xf] }
  0xa3   : > { %v300_v12 = vld [vmem:[%s12530_s7] sm:$0xf]  ;;  %v320_v15 = vld [vmem:[%s12530_s7 + $0xc] sm:$0x7]  ;;  %v11972_v17 = vld [vmem:[#allocation6 + $0xa8] ss:$12 sps:$4 sm:$0xff]  }
  0xa4   : > { %438 = vmatpush1.bf16.msra.mxu0 %v11964_v6  ;;  %v12554_v16 = vcombine.low %v300_v12, %v12547_v13  ;;  %v10381_v18 = vcombine.low %v12550_v14, %v320_v15  ;;  %v11978_v21 = vld [vmem:[#allocation6 + $0x4] ss:$12 sps:$4 sm:$0xff]   ;;  %v11979_v23 = vld [vmem:[#allocation6 + $0x8] ss:$12 sps:$4 sm:$0xff]   ;;  %vm348_vm0 = vsmask.f32 7424 }
  0xa5   : > { %11468 = vmatpush3.bf16.msra.mxu1 %v11963_v5  ;;  %439 = vmatprep.subr.bf16.mxu0 %v11965_v7  ;;  %v11976_v28 = vld [vmem:[#allocation6] ss:$12 sps:$4 sm:$0xff]   ;;  %v11982_v30 = vld [vmem:[#allocation6 + $0x1c] ss:$12 sps:$4 sm:$0xff]   ;;  %v11980_v33 = vld [vmem:[#allocation6 + $0x18] ss:$12 sps:$4 sm:$0xff]  }
  0xa6   : > { %11469 = vmatprep.subr.bf16.mxu1 %v11967_v8  ;;  %v350_v19 = vshrl.u32 %v12554_v16, 16  ;;  %v352_v20 = vshll.u32 %v12554_v16, 16  ;;  %v357_v22 = vshll.u32 %v10381_v18, 16  ;;  %v361_v24 = vshrl.u32 %v10381_v18, 16  ;;  %v11983_v32 = vld [vmem:[#allocation6 + $0x20] ss:$12 sps:$4 sm:$0xff]  }
  0xa7   : > { %v11986_v34 = vld [vmem:[#allocation6 + $0x34] ss:$12 sps:$4 sm:$0xff]   ;;  %v11987_v35 = vld [vmem:[#allocation6 + $0x38] ss:$12 sps:$4 sm:$0xff]   ;;  %v11984_v36 = vld [vmem:[#allocation6 + $0x30] ss:$12 sps:$4 sm:$0xff]  }
  0xa8   : > { %440 = vmatpush1.bf16.msra.mxu0 %v11968_v9  ;;  %v354_v25 = vrot.slane %v352_v20, 1  ;;  %v359_v26 = vrot.slane %v357_v22, 1  ;;  %v11990_v37 = vld [vmem:[#allocation6 + $0x4c] ss:$12 sps:$4 sm:$0xff]   ;;  %v11991_v38 = vld [vmem:[#allocation6 + $0x50] ss:$12 sps:$4 sm:$0xff]  }
  0xa9   : > { %11470 = vmatpush3.bf16.msra.mxu1 %v11967_v8  ;;  %441 = vmatprep.subr.bf16.mxu0 %v11969_v10  ;;  %v11988_v39 = vld [vmem:[#allocation6 + $0x48] ss:$12 sps:$4 sm:$0xff]   ;;  %v11994_v40 = vld [vmem:[#allocation6 + $0xc4] ss:$12 sps:$4 sm:$0xff]   ;;  %v303_v41 = vld [vmem:[%s12530_s7 + $0xc] sm:$0x3] }
  0xaa   : > { %11471 = vmatprep.subr.bf16.mxu1 %v11971_v11  ;;  %v355_v27 = vor.u32 %v354_v25, %v350_v19  ;;  %v363_v29 = vor.u32 %v361_v24, %v359_v26  ;;  %v11995_v42 = vld [vmem:[#allocation6 + $0xc8] ss:$12 sps:$4 sm:$0xff]   ;;  %v711_v43 = vld [vmem:[%s12530_s7] sm:$0xe]  ;;  %v920_v44 = vld [vmem:[%s12530_s7 + $0xc] sm:$0xf]  ;;  %v10398_v48 = vcombine.low %v12550_v14, %v303_v41 }
  0xab   : > { %v10415_v45 = vcombine.low %v711_v43, %v12547_v13  ;;  %v12572_v46 = vrot.slane %v10381_v18, 1  ;;  %v11992_v47 = vld [vmem:[#allocation6 + $0xc0] ss:$12 sps:$4 sm:$0xff]   ;;  %v11999_v49 = vld [vmem:[#allocation6 + $0xdc] ss:$12 sps:$4 sm:$0xff]   ;;  %vm732_vm2 = vcmask 1046528   ;;  %v12576_v52 = vcombine.low %v12550_v14, %v920_v44 }
  0xac   : > { %442 = vmatpush1.bf16.msra.mxu0 %v11972_v17  ;;  %v360_v31 = vsel %vm348_vm0, %v355_v27, %v359_v26  ;;  %v12000_v51 = vld [vmem:[#allocation6 + $0xe0] ss:$12 sps:$4 sm:$0xff]   ;;  %v11997_v53 = vld [vmem:[#allocation6 + $0xd8] ss:$12 sps:$4 sm:$0xff]   ;;  %v12001_v59 = vld [vmem:[#allocation6 + $0xf0] ss:$12 sps:$4 sm:$0xff]  }
  0xad   : > { %11472 = vmatpush3.bf16.msra.mxu1 %v11971_v11  ;;  %609 = vmatprep.subr.bf16.mxu0 %v11978_v21  ;;  %v733_v50 = vrot.slane %v10415_v45, 1  ;;  %v12003_v55 = vld [vmem:[#allocation6 + $0xf4] ss:$12 sps:$4 sm:$0xff]   ;;  %v12004_v56 = vld [vmem:[#allocation6 + $0xf8] ss:$12 sps:$4 sm:$0xff]   ;;  %v951_v57 = vshrl.u32 %v12576_v52, 16 }
  0xae   : > { %11477 = vmatprep.subr.bf16.mxu1 %v11979_v23  ;;  %11473 = vmatprep.mubr.msk.bf16.mxu1 %vm428_vm1, %v360_v31  ;;  %v954_v58 = vshll.u32 %v12576_v52, 16  ;;  %v943_v60 = vshrl.u32 %v10415_v45, 16  ;;  %v946_v61 = vshll.u32 %v10415_v45, 16  ;;  %v12007_v62 = vld [vmem:[#allocation6 + $0x10c] ss:$12 sps:$4 sm:$0xff]   ;;  %vm1164_vm4 = vcmask 1045504  }
  0xaf   : > { %10394 = vmatmul.mubr.msk.bf16.vlgmr.msra.gmra.mrb[0].mxu0 %vm428_vm1, %v360_v31  ;;  %v735_v54 = vsel %vm732_vm2, %v733_v50, %v12572_v46  ;;  %v12008_v63 = vld [vmem:[#allocation6 + $0x110] ss:$12 sps:$4 sm:$0xff]   ;;  %v12005_v1 = vld [vmem:[#allocation6 + $0x108] ss:$12 sps:$4 sm:$0xff]   ;;  %v953_v2 = vrot.slane %v951_v57, 1  ;;  %vm1447_vm5 = vcmask 1041408  }
  0xb0   : > { %11474 = vmatmul.mubr.msk.bf16.vlgmr.msra.gmra.mrb[0].mxu1 %vm428_vm1, %v363_v29  ;;  %610 = vmatpush1.bf16.msra.mxu0 %v11976_v28  ;;  %v956_v3 = vrot.slane %v954_v58, 2  ;;  %v945_v4 = vrot.slane %v943_v60, 1  ;;  %v948_v5 = vrot.slane %v946_v61, 2  ;;  %v12012_v6 = vld [vmem:[#allocation6 + $0x124] ss:$12 sps:$4 sm:$0xff]   ;;  %v12604_v28 = vrot.slane %v12576_v52, 2 }
  0xb1   : > { %11478 = vmatpush3.bf16.msra.mxu1 %v11979_v23  ;;  %611 = vmatprep.subr.bf16.mxu0 %v11982_v30  ;;  %v12013_v7 = vld [vmem:[#allocation6 + $0x128] ss:$12 sps:$4 sm:$0xff]   ;;  %v12010_v8 = vld [vmem:[#allocation6 + $0x120] ss:$12 sps:$4 sm:$0xff]   ;;  %vm941_vm3 = vsmask.f32 6400 }
  0xb2   : > { %11479 = vmatprep.subr.bf16.mxu1 %v11983_v32  ;;  %477 = vmatprep.mubr.bf16.mxu0 %v13310_v0  ;;  %v949_v9 = vor.u32 %v948_v5, %v945_v4  ;;  %v12589_v10 = vor.u32 %v956_v3, %v953_v2  ;;  %v12016_v11 = vld [vmem:[#allocation6 + $0x13c] ss:$12 sps:$4 sm:$0xff]   ;;  %v12017_v12 = vld [vmem:[#allocation6 + $0x140] ss:$12 sps:$4 sm:$0xff]   ;;  %v12014_v14 = vld [vmem:[#allocation6 + $0x138] ss:$12 sps:$4 sm:$0xff]  }
  0xb3   : > { %11485 = vmatprep.mubr.msk.bf16.mxu1 %vm428_vm1, %v12554_v16  ;;  %v12021_v17 = vld [vmem:[#allocation6 + $0x158] ss:$12 sps:$4 sm:$0xff]   ;;  %v12018_v18 = vld [vmem:[#allocation6 + $0x150] ss:$12 sps:$4 sm:$0xff]   ;;  %v12022_v22 = vld [vmem:[#allocation6 + $0x168] ss:$12 sps:$4 sm:$0xff]  }
  0xb4   : > { %612 = vmatpush1.bf16.msra.mxu0 %v11980_v33  ;;  %v958_v15 = vsel %vm941_vm3, %v949_v9, %v12589_v10  ;;  %v12024_v19 = vld [vmem:[#allocation6 + $0x16c] ss:$12 sps:$4 sm:$0xff]   ;;  %v1143_v20 = vld [vmem:[%s12530_s7] sm:$0xc]  ;;  %v12029_v25 = vld [vmem:[#allocation6 + $0x188] ss:$12 sps:$4 sm:$0xff]  }
  0xb5   : > { %11480 = vmatpush3.bf16.msra.mxu1 %v11983_v32  ;;  %613 = vmatprep.subr.bf16.mxu0 %v11986_v34  ;;  %v12025_v21 = vld [vmem:[#allocation6 + $0x170] ss:$12 sps:$4 sm:$0xff]   ;;  %v10449_v23 = vcombine.low %v1143_v20, %v12547_v13  ;;  %v12026_v26 = vld [vmem:[#allocation6 + $0x180] ss:$12 sps:$4 sm:$0xff]   ;;  %v12030_v13 = vld [vmem:[#allocation6 + $0x198] ss:$12 sps:$4 sm:$0xff]  }
  0xb6   : > { %11481 = vmatprep.subr.bf16.mxu1 %v11987_v35  ;;  %v12028_v24 = vld [vmem:[#allocation6 + $0x184] ss:$12 sps:$4 sm:$0xff]   ;;  %v12033_v30 = vld [vmem:[#allocation6 + $0x1a0] ss:$12 sps:$4 sm:$0xff]   ;;  %v12038_v41 = vld [vmem:[#allocation6 + $0x1c8] ss:$12 sps:$4 sm:$0xff]  }
  0xb7   : > { %10395 = vmatmul.mubr.msk.bf16.gmra.mrb[4].mxu0 %vm428_vm1, %v363_v29  ;;  %v1165_v27 = vrot.slane %v10449_v23, 2  ;;  %v12032_v29 = vld [vmem:[#allocation6 + $0x19c] ss:$12 sps:$4 sm:$0xff]   ;;  %v12036_v32 = vld [vmem:[#allocation6 + $0x1b4] ss:$12 sps:$4 sm:$0xff]   ;;  %s10379_s24 = sshll.u32 %s12526_s29, 8 }
  0xb8   : > { %614 = vmatpush1.bf16.msra.mxu0 %v11984_v36  ;;  %641 = vmatprep.mubr.bf16.mxu0 %v13310_v0  ;;  %v12037_v33 = vld [vmem:[#allocation6 + $0x1b8] ss:$12 sps:$4 sm:$0xff]   ;;  %v12034_v34 = vld [vmem:[#allocation6 + $0x1b0] ss:$12 sps:$4 sm:$0xff]   ;;  %s12993_s26 = scalar_lea.vmem [#allocation12], %s10379_s24  ;;  %s11434_s9 = sshll.u32 %s12332_s22, 12 }
  0xb9   : > { %11482 = vmatpush3.bf16.msra.mxu1 %v11987_v35  ;;  %615 = vmatprep.subr.bf16.mxu0 %v11990_v37  ;;  %v1167_v31 = vsel %vm1164_vm4, %v1165_v27, %v12604_v28  ;;  %v12040_v35 = vld [vmem:[#allocation6 + $0x1cc] ss:$12 sps:$4 sm:$0xff]   ;;  %v12041_v36 = vld [vmem:[#allocation6 + $0x1d0] ss:$12 sps:$4 sm:$0xff]   ;;  %v1615_v37 = vld [vmem:[#allocation9 + $0x600] sm:$0xff]  ;;  %s10252_s11 = sshll.u32 %s12993_s26, 4  ;;  %s13250_s27 = scalar_lea.hbm %s13306_s5, %s11434_s9  ;;  %s13252_s11 = int_to_ptr.vmem [resolvable:$true] %s10252_s11 }
  0xba   : > { %11483 = vmatprep.subr.bf16.mxu1 %v11991_v38  ;;  %v1619_v44 = vld [vmem:[#allocation9 + $0x640] sm:$0xff]  ;;  %s10238_s17 = scalar_lea.sflag [#allocation5], %s12526_s29  ;;  %s12190_s30 = scalar_lea.vmem %s13252_s11, 4096 }
  0xbb   : > { %v1621_v45 = vld [vmem:[#allocation9 + $0x660] sm:$0xff]  ;;  %p12191_p4 = scmp.ne.s32.totalorder %s13252_s11, %s12190_s30  ;;  %s12278_s8 = smov [#allocation12]  }
  0xbc   : > { %616 = vmatpush1.bf16.msra.mxu0 %v11988_v39  ;;  %v1616_v39 = vld [vmem:[#allocation9 + $0x608] sm:$0xff]  ;;  %v10471_v50 = vcombine.high %v1619_v44, %v1621_v45  ;;  %v1623_v52 = vld [vmem:[#allocation9 + $0x680] sm:$0xff]  ;;  %s12194_s10 = sshll.u32 %s12278_s8, 4  ;;  %s12195_s10 = int_to_ptr.vmem [resolvable:$false] %s12194_s10 }
  0xbd   : > { %11484 = vmatpush3.bf16.msra.mxu1 %v11991_v38  ;;  %806 = vmatprep.subr.bf16.mxu0 %v11994_v40  ;;  %v1617_v38 = vld [vmem:[#allocation9 + $0x620] sm:$0xff]  ;;  %v1618_v40 = vld [vmem:[#allocation9 + $0x628] sm:$0xff]  ;;  %p12192_p5 = pnand %p12191_p4, %p12477_p8  ;;  %s12196_s28 = scalar_lea.vmem %s12195_s10, 8192 }
  0xbe   : > { %11489 = vmatprep.subr.bf16.mxu1 %v11995_v42  ;;  %v10469_v43 = vcombine.high %v1616_v39, %v1618_v40  ;;  %v1627_v60 = vld [vmem:[#allocation9 + $0x6c0] sm:$0xff]  ;;  %p12197_p12 = scmp.lt.s32.totalorder %s13252_s11, %s12195_s10  ;;  %p12198_p2 = scmp.lt.s32.totalorder %s12196_s28, %s12190_s30 }
  0xbf   : > { %10411 = vmatmul.mubr.msk.bf16.vlgmr.msra.gmra.mrb[0].mxu0 %vm428_vm1, %v12554_v16  ;;  %v12020_v16 = vld [vmem:[#allocation6 + $0x154] ss:$12 sps:$4 sm:$0xff]   ;;  %v1629_v61 = vld [vmem:[#allocation9 + $0x6e0] sm:$0xff]  ;;  %p12193_p7 = pneg %p12192_p5 }
  0xc0   : > { %11486 = vmatmul.mubr.msk.bf16.vlgmr.msra.gmra.mrb[0].mxu1 %vm428_vm1, %v10398_v48  ;;  %807 = vmatpush1.bf16.msra.mxu0 %v11992_v47  ;;  %v1622_v47 = vld [vmem:[#allocation9 + $0x668] sm:$0xff]  ;;  %v10479_v3 = vcombine.high %v1627_v60, %v1629_v61  ;;  %v1631_v5 = vld [vmem:[#allocation9 + $0x700] sm:$0xff]  ;;  %v10478_v9 = vcombine.low %v1627_v60, %v1629_v61  ;;  %p12199_p1 = por %p12198_p2, %p12197_p12 }
  0xc1   : > { %11490 = vmatpush3.bf16.msra.mxu1 %v11995_v42  ;;  %808 = vmatprep.subr.bf16.mxu0 %v11999_v49  ;;  %v10467_v42 = vcombine.high %v1615_v37, %v1617_v38  ;;  %v10468_v49 = vcombine.low %v1616_v39, %v1618_v40  ;;  %v1641_v23 = vld [vmem:[#allocation9 + $0x7a0] sm:$0xff] }
  0xc2   : > { %11491 = vmatprep.subr.bf16.mxu1 %v12000_v51  ;;  %651 = vmatprep.mubr.bf16.mxu0 %v13310_v0  ;;  %v1647_v39 = vld [vmem:[#allocation9 + $0x800] sm:$0xff]  ;;  %p12200_p13 = pnand %p12199_p1, %p12193_p7 }
  0xc3   : > { %11497 = vmatprep.mubr.msk.bf16.mxu1 %vm428_vm1, %v735_v54  ;;  %v1649_v40 = vld [vmem:[#allocation9 + $0x820] sm:$0xff] }
  0xc4   : > { %809 = vmatpush1.bf16.msra.mxu0 %v11997_v53  ;;  %v1625_v53 = vld [vmem:[#allocation9 + $0x6a0] sm:$0xff] }
  0xc5   : > { %11492 = vmatpush3.bf16.msra.mxu1 %v12000_v51  ;;  %810 = vmatprep.subr.bf16.mxu0 %v12003_v55  ;;  %v1626_v55 = vld [vmem:[#allocation9 + $0x6a8] sm:$0xff]  ;;  %v10475_v58 = vcombine.high %v1623_v52, %v1625_v53 }
  0xc6   : > { %11493 = vmatprep.subr.bf16.mxu1 %v12004_v56 }
  0xc7   : > { %10412 = vmatmul.mubr.msk.bf16.gmra.mrb[4].mxu0 %vm428_vm1, %v10398_v48  ;;  %v10466_v48 = vcombine.low %v1615_v37, %v1617_v38 }
  0xc8   : > { %811 = vmatpush1.bf16.msra.mxu0 %v12001_v59  ;;  %838 = vmatprep.mubr.bf16.mxu0 %v13310_v0 }
  0xc9   : > { %11494 = vmatpush3.bf16.msra.mxu1 %v12004_v56  ;;  %812 = vmatprep.subr.bf16.mxu0 %v12007_v62  ;;  %v10470_v56 = vcombine.low %v1619_v44, %v1621_v45  ;;  %v1628_v62 = vld [vmem:[#allocation9 + $0x6c8] sm:$0xff]  ;;  %v10498_v44 = vcombine.low %v1647_v39, %v1649_v40 }
  0xca   : > { %11495 = vmatprep.subr.bf16.mxu1 %v12008_v63 }
  0xcc   : > { %813 = vmatpush1.bf16.msra.mxu0 %v12005_v1  ;;  %v10474_v1 = vcombine.low %v1623_v52, %v1625_v53 }
  0xcd   : > { %11496 = vmatpush3.bf16.msra.mxu1 %v12008_v63  ;;  %1029 = vmatprep.subr.bf16.mxu0 %v12012_v6  ;;  %v1630_v63 = vld [vmem:[#allocation9 + $0x6e8] sm:$0xff]  ;;  %v1633_v6 = vld [vmem:[#allocation9 + $0x720] sm:$0xff] }
  0xce   : > { %11501 = vmatprep.subr.bf16.mxu1 %v12013_v7  ;;  %v10481_v4 = vcombine.high %v1628_v62, %v1630_v63 }
  0xcf   : > { %10428 = vmatmul.mubr.msk.bf16.vlgmr.msra.gmra.mrb[0].mxu0 %vm428_vm1, %v735_v54  ;;  %v1624_v54 = vld [vmem:[#allocation9 + $0x688] sm:$0xff] }
  0xd0   : > { %11498 = vmatmul.mubr.msk.bf16.vlgmr.msra.gmra.mrb[0].mxu1 %vm428_vm1, %v12572_v46  ;;  %1030 = vmatpush1.bf16.msra.mxu0 %v12010_v8  ;;  %v10477_v59 = vcombine.high %v1624_v54, %v1626_v55  ;;  %v10476_v2 = vcombine.low %v1624_v54, %v1626_v55  ;;  %v1634_v8 = vld [vmem:[#allocation9 + $0x728] sm:$0xff]  ;;  %v1655_v55 = vld [vmem:[#allocation9 + $0x880] sm:$0xff] }
  0xd1   : > { %11502 = vmatpush3.bf16.msra.mxu1 %v12013_v7  ;;  %1031 = vmatprep.subr.bf16.mxu0 %v12016_v11  ;;  %v1632_v7 = vld [vmem:[#allocation9 + $0x708] sm:$0xff]  ;;  %v10483_v11 = vcombine.high %v1631_v5, %v1633_v6 }
  0xd2   : > { %11503 = vmatprep.subr.bf16.mxu1 %v12017_v12  ;;  %848 = vmatprep.mubr.bf16.mxu0 %v13310_v0 }
  0xd3   : > { %11509 = vmatprep.mubr.msk.bf16.mxu1 %vm428_vm1, %v958_v15 }
  0xd4   : > { %1032 = vmatpush1.bf16.msra.mxu0 %v12014_v14  ;;  %v1635_v14 = vld [vmem:[#allocation9 + $0x740] sm:$0xff] }
  0xd5   : > { %11504 = vmatpush3.bf16.msra.mxu1 %v12017_v12  ;;  %1033 = vmatprep.subr.bf16.mxu0 %v12020_v16  ;;  %v10485_v12 = vcombine.high %v1632_v7, %v1634_v8  ;;  %v1636_v16 = vld [vmem:[#allocation9 + $0x748] sm:$0xff] }
  0xd6   : > { %11505 = vmatprep.subr.bf16.mxu1 %v12021_v17 }
  0xd7   : > { %10429 = vmatmul.mubr.msk.bf16.gmra.mrb[4].mxu0 %vm428_vm1, %v12572_v46  ;;  %v1620_v46 = vld [vmem:[#allocation9 + $0x648] sm:$0xff] }
  0xd8   : > { %1034 = vmatpush1.bf16.msra.mxu0 %v12018_v18  ;;  %1061 = vmatprep.mubr.bf16.mxu0 %v13310_v0  ;;  %v10473_v51 = vcombine.high %v1620_v46, %v1622_v47  ;;  %v10472_v57 = vcombine.low %v1620_v46, %v1622_v47  ;;  %v10482_v18 = vcombine.low %v1631_v5, %v1633_v6  ;;  %v1651_v47 = vld [vmem:[#allocation9 + $0x840] sm:$0xff] }
  0xd9   : > { %11506 = vmatpush3.bf16.msra.mxu1 %v12021_v17  ;;  %1035 = vmatprep.subr.bf16.mxu0 %v12024_v19  ;;  %v1638_v17 = vld [vmem:[#allocation9 + $0x768] sm:$0xff]  ;;  %v10484_v19 = vcombine.low %v1632_v7, %v1634_v8  ;;  %v1663_v8 = vld [vmem:[#allocation9 + $0x900] sm:$0xff] }
  0xda   : > { %11507 = vmatprep.subr.bf16.mxu1 %v12025_v21  ;;  %v10488_v27 = vcombine.low %v1636_v16, %v1638_v17 }
  0xdc   : > { %1036 = vmatpush1.bf16.msra.mxu0 %v12022_v22  ;;  %v1639_v22 = vld [vmem:[#allocation9 + $0x780] sm:$0xff] }
  0xdd   : > { %11508 = vmatpush3.bf16.msra.mxu1 %v12025_v21  ;;  %1238 = vmatprep.subr.bf16.mxu0 %v12028_v24  ;;  %v10489_v21 = vcombine.high %v1636_v16, %v1638_v17  ;;  %v1640_v24 = vld [vmem:[#allocation9 + $0x788] sm:$0xff]  ;;  %v1667_v17 = vld [vmem:[#allocation9 + $0x940] sm:$0xff] }
  0xde   : > { %11513 = vmatprep.subr.bf16.mxu1 %v12029_v25 }
  0xdf   : > { %10445 = vmatmul.mubr.msk.bf16.vlgmr.msra.gmra.mrb[0].mxu0 %vm428_vm1, %v958_v15  ;;  %v1637_v15 = vld [vmem:[#allocation9 + $0x760] sm:$0xff] }
  0xe0   : > { %11510 = vmatmul.mubr.msk.bf16.vlgmr.msra.gmra.mrb[0].mxu1 %vm428_vm1, %v12589_v10  ;;  %1239 = vmatpush1.bf16.msra.mxu0 %v12026_v26  ;;  %v10487_v20 = vcombine.high %v1635_v14, %v1637_v15  ;;  %v10486_v26 = vcombine.low %v1635_v14, %v1637_v15 }
  0xe1   : > { %11514 = vmatpush3.bf16.msra.mxu1 %v12029_v25  ;;  %1240 = vmatprep.subr.bf16.mxu0 %v12032_v29  ;;  %v1642_v25 = vld [vmem:[#allocation9 + $0x7a8] sm:$0xff] }
  0xe2   : > { %11515 = vmatprep.subr.bf16.mxu1 %v12033_v30  ;;  %1071 = vmatprep.mubr.bf16.mxu0 %v13310_v0  ;;  %v10493_v29 = vcombine.high %v1640_v24, %v1642_v25 }
  0xe3   : > { %11521 = vmatprep.mubr.msk.bf16.mxu1 %vm428_vm1, %v1167_v31 }
  0xe4   : > { %1241 = vmatpush1.bf16.msra.mxu0 %v12030_v13  ;;  %v1645_v13 = vld [vmem:[#allocation9 + $0x7e0] sm:$0xff] }
  0xe5   : > { %11516 = vmatpush3.bf16.msra.mxu1 %v12033_v30  ;;  %1242 = vmatprep.subr.bf16.mxu0 %v12036_v32  ;;  %v1643_v30 = vld [vmem:[#allocation9 + $0x7c0] sm:$0xff]  ;;  %v1646_v32 = vld [vmem:[#allocation9 + $0x7e8] sm:$0xff] }
  0xe6   : > { %11517 = vmatprep.subr.bf16.mxu1 %v12037_v33  ;;  %v10494_v37 = vcombine.low %v1643_v30, %v1645_v13 }
  0xe7   : > { %10446 = vmatmul.mubr.msk.bf16.gmra.mrb[4].mxu0 %vm428_vm1, %v12589_v10  ;;  %v10480_v10 = vcombine.low %v1628_v62, %v1630_v63  ;;  %v1659_v63 = vld [vmem:[#allocation9 + $0x8c0] sm:$0xff] }
  0xe8   : > { %1243 = vmatpush1.bf16.msra.mxu0 %v12034_v34  ;;  %1270 = vmatprep.mubr.bf16.mxu0 %v13310_v0  ;;  %v10492_v34 = vcombine.low %v1640_v24, %v1642_v25  ;;  %v1673_v24 = vld [vmem:[#allocation9 + $0x9a0] sm:$0xff] }
  0xe9   : > { %11518 = vmatpush3.bf16.msra.mxu1 %v12037_v33  ;;  %1244 = vmatprep.subr.bf16.mxu0 %v12040_v35  ;;  %v10490_v33 = vcombine.low %v1639_v22, %v1641_v23  ;;  %v10495_v35 = vcombine.high %v1643_v30, %v1645_v13  ;;  %v1675_v30 = vld [vmem:[#allocation9 + $0x9c0] sm:$0xff] }
  0xea   : > { %11519 = vmatprep.subr.bf16.mxu1 %v12041_v36 }
  0xec   : > { %1245 = vmatpush1.bf16.msra.mxu0 %v12038_v41  ;;  %v1648_v41 = vld [vmem:[#allocation9 + $0x808] sm:$0xff] }
  0xed   : > { %11520 = vmatpush3.bf16.msra.mxu1 %v12041_v36  ;;  %2242 = vmatprep.subr.bf16.mxu0 %v10467_v42  ;;  %v10499_v42 = vcombine.high %v1647_v39, %v1649_v40  ;;  %v12622_v40 = vld [vmem:[#allocation9 + $0xa00] sm:$0xff] }
  0xee   : > { %2348 = vmatprep.subr.bf16.mxu1 %v10469_v43  ;;  %v1650_v43 = vld [vmem:[#allocation9 + $0x828] sm:$0xff] }
  0xef   : > { %10462 = vmatmul.mubr.msk.bf16.vlgmr.msra.gmra.mrb[0].mxu0 %vm428_vm1, %v1167_v31  ;;  %v1644_v31 = vld [vmem:[#allocation9 + $0x7c8] sm:$0xff]  ;;  %v10500_v45 = vcombine.low %v1648_v41, %v1650_v43  ;;  %v10501_v46 = vcombine.high %v1648_v41, %v1650_v43  ;;  %v12624_v41 = vld [vmem:[#allocation9 + $0xa20] sm:$0xff] }
  0xf0   : > { %11522 = vmatmul.mubr.msk.bf16.vlgmr.msra.gmra.mrb[0].mxu1 %vm428_vm1, %v12604_v28  ;;  %1280 = vmatprep.mubr.bf16.mxu0 %v13310_v0  ;;  %v10497_v36 = vcombine.high %v1644_v31, %v1646_v32  ;;  %v10496_v38 = vcombine.low %v1644_v31, %v1646_v32  ;;  %v1677_v31 = vld [vmem:[#allocation9 + $0x9e0] sm:$0xff]  ;;  %v1676_v32 = vld [vmem:[#allocation9 + $0x9c8] sm:$0xff]  ;;  %v10531_v43 = vcombine.high %v12622_v40, %v12624_v41 }
  0xf1   : > { %2243 = vmatpush1.bf16.msra.mxu0 %v10466_v48  ;;  %2349 = vmatpush1.bf16.msra.mxu1 %v10468_v49  ;;  %v1653_v48 = vld [vmem:[#allocation9 + $0x860] sm:$0xff]  ;;  %v1652_v49 = vld [vmem:[#allocation9 + $0x848] sm:$0xff] }
  0xf2   : > { %2244 = vmatprep.subr.bf16.mxu0 %v10471_v50  ;;  %2350 = vmatprep.subr.bf16.mxu1 %v10473_v51  ;;  %v10503_v50 = vcombine.high %v1651_v47, %v1653_v48  ;;  %v1654_v51 = vld [vmem:[#allocation9 + $0x868] sm:$0xff]  ;;  %v10502_v52 = vcombine.low %v1651_v47, %v1653_v48  ;;  %v1354_v48 = vlaneseq }
  0xf3   : > { %v10504_v53 = vcombine.low %v1652_v49, %v1654_v51  ;;  %v10505_v54 = vcombine.high %v1652_v49, %v1654_v51  ;;  %v1352_v51 = vld [vmem:[#allocation8] sm:$0x7] }
  0xf4   : > { %v1355_v49 = vshrl.u32 %v1354_v48, 7 }
  0xf5   : > { %2245 = vmatpush1.bf16.msra.mxu0 %v10470_v56  ;;  %2351 = vmatpush1.bf16.msra.mxu1 %v10472_v57  ;;  %v1657_v56 = vld [vmem:[#allocation9 + $0x8a0] sm:$0xff]  ;;  %v1656_v57 = vld [vmem:[#allocation9 + $0x888] sm:$0xff] }
  0xf6   : > { %2246 = vmatprep.subr.bf16.mxu0 %v10475_v58  ;;  %2352 = vmatprep.subr.bf16.mxu1 %v10477_v59  ;;  %v10507_v58 = vcombine.high %v1655_v55, %v1657_v56  ;;  %v1658_v59 = vld [vmem:[#allocation9 + $0x8a8] sm:$0xff]  ;;  %v10506_v60 = vcombine.low %v1655_v55, %v1657_v56 }
  0xf7   : > { %10463 = vmatmul.mubr.msk.bf16.gmra.mrb[4].mxu0 %vm428_vm1, %v12604_v28  ;;  %v10491_v28 = vcombine.high %v1639_v22, %v1641_v23  ;;  %v10508_v61 = vcombine.low %v1656_v57, %v1658_v59  ;;  %v10509_v62 = vcombine.high %v1656_v57, %v1658_v59  ;;  %v1670_v22 = vld [vmem:[#allocation9 + $0x968] sm:$0xff]  ;;  %v1671_v23 = vld [vmem:[#allocation9 + $0x980] sm:$0xff] }
  0xf9   : > { %2247 = vmatpush1.bf16.msra.mxu0 %v10474_v1  ;;  %2353 = vmatpush1.bf16.msra.mxu1 %v10476_v2  ;;  %v1661_v1 = vld [vmem:[#allocation9 + $0x8e0] sm:$0xff]  ;;  %v1660_v2 = vld [vmem:[#allocation9 + $0x8c8] sm:$0xff] }
  0xfa   : > { %2248 = vmatprep.subr.bf16.mxu0 %v10479_v3  ;;  %2354 = vmatprep.subr.bf16.mxu1 %v10481_v4  ;;  %v10511_v3 = vcombine.high %v1659_v63, %v1661_v1  ;;  %v1662_v4 = vld [vmem:[#allocation9 + $0x8e8] sm:$0xff]  ;;  %v10510_v5 = vcombine.low %v1659_v63, %v1661_v1 }
  0xfb   : > { %v10512_v6 = vcombine.low %v1660_v2, %v1662_v4  ;;  %v10513_v7 = vcombine.high %v1660_v2, %v1662_v4 }
  0xfd   : > { %2249 = vmatpush1.bf16.msra.mxu0 %v10478_v9  ;;  %2355 = vmatpush1.bf16.msra.mxu1 %v10480_v10  ;;  %v1665_v9 = vld [vmem:[#allocation9 + $0x920] sm:$0xff]  ;;  %v1664_v10 = vld [vmem:[#allocation9 + $0x908] sm:$0xff] }
  0xfe   : > { %2250 = vmatprep.subr.bf16.mxu0 %v10483_v11  ;;  %2356 = vmatprep.subr.bf16.mxu1 %v10485_v12  ;;  %v10515_v11 = vcombine.high %v1663_v8, %v1665_v9  ;;  %v1666_v12 = vld [vmem:[#allocation9 + $0x928] sm:$0xff]  ;;  %v10514_v14 = vcombine.low %v1663_v8, %v1665_v9 }
  0xff   : > { %v10516_v15 = vcombine.low %v1664_v10, %v1666_v12  ;;  %v10517_v16 = vcombine.high %v1664_v10, %v1666_v12 }
 0x101   : > { %2251 = vmatpush1.bf16.msra.mxu0 %v10482_v18  ;;  %2357 = vmatpush1.bf16.msra.mxu1 %v10484_v19  ;;  %v1669_v18 = vld [vmem:[#allocation9 + $0x960] sm:$0xff]  ;;  %v1668_v19 = vld [vmem:[#allocation9 + $0x948] sm:$0xff] }
 0x102   : > { %2252 = vmatprep.subr.bf16.mxu0 %v10487_v20  ;;  %2358 = vmatprep.subr.bf16.mxu1 %v10489_v21  ;;  %v10518_v20 = vcombine.low %v1667_v17, %v1669_v18  ;;  %v10519_v21 = vcombine.high %v1667_v17, %v1669_v18  ;;  %v10520_v25 = vcombine.low %v1668_v19, %v1670_v22 }
 0x105   : > { %2253 = vmatpush1.bf16.msra.mxu0 %v10486_v26  ;;  %2359 = vmatpush1.bf16.msra.mxu1 %v10488_v27  ;;  %v10521_v26 = vcombine.high %v1668_v19, %v1670_v22  ;;  %v10523_v27 = vcombine.high %v1671_v23, %v1673_v24 }
 0x106   : > { %2254 = vmatprep.subr.bf16.mxu0 %v10491_v28  ;;  %2360 = vmatprep.subr.bf16.mxu1 %v10493_v29  ;;  %v1672_v28 = vld [vmem:[#allocation9 + $0x988] sm:$0xff] }
 0x107   : > { %v1674_v29 = vld [vmem:[#allocation9 + $0x9a8] sm:$0xff] }
 0x108   : > { %v10525_v13 = vcombine.high %v1672_v28, %v1674_v29 }
 0x109   : > { %2255 = vmatpush1.bf16.msra.mxu0 %v10490_v33  ;;  %2361 = vmatpush1.bf16.msra.mxu1 %v10492_v34  ;;  %v1678_v33 = vld [vmem:[#allocation9 + $0x9e8] sm:$0xff]  ;;  %v10522_v34 = vcombine.low %v1671_v23, %v1673_v24 }
 0x10a   : > { %2256 = vmatprep.subr.bf16.mxu0 %v10495_v35  ;;  %2362 = vmatprep.subr.bf16.mxu1 %v10497_v36  ;;  %v10524_v35 = vcombine.low %v1672_v28, %v1674_v29  ;;  %v10527_v36 = vcombine.high %v1675_v30, %v1677_v31  ;;  %v10528_v39 = vcombine.low %v1676_v32, %v1678_v33 }
 0x10d   : > { %2257 = vmatpush1.bf16.msra.mxu0 %v10494_v37  ;;  %2363 = vmatpush1.bf16.msra.mxu1 %v10496_v38  ;;  %v10529_v37 = vcombine.high %v1676_v32, %v1678_v33  ;;  %v10526_v38 = vcombine.low %v1675_v30, %v1677_v31 }
 0x10e   : > { %2258 = vmatprep.subr.bf16.mxu0 %v10499_v42  ;;  %2364 = vmatprep.subr.bf16.mxu1 %v10501_v46  ;;  %v12626_v42 = vld [vmem:[#allocation9 + $0xa08] sm:$0xff] }
 0x111   : > { %2259 = vmatpush1.bf16.msra.mxu0 %v10498_v44  ;;  %2365 = vmatpush1.bf16.msra.mxu1 %v10500_v45  ;;  %v12630_v44 = vld [vmem:[#allocation9 + $0xa28] sm:$0xff]  ;;  %v10530_v45 = vcombine.low %v12622_v40, %v12624_v41 }
 0x112   : > { %2260 = vmatprep.subr.bf16.mxu0 %v10503_v50  ;;  %2366 = vmatprep.subr.bf16.mxu1 %v10505_v54  ;;  %v10532_v46 = vcombine.low %v12626_v42, %v12630_v44  ;;  %v10533_v47 = vcombine.high %v12626_v42, %v12630_v44  ;;  %v12638_v50 = vsub.s32 0, %v1355_v49 }
 0x114   : > { %v12645_v54 = vrot.slane %v1352_v51, %v12638_v50 }
 0x115   : > { %2261 = vmatpush1.bf16.msra.mxu0 %v10502_v52  ;;  %2367 = vmatpush1.bf16.msra.mxu1 %v10504_v53  ;;  %v12640_v52 = vsub.s32 2, %v1355_v49  ;;  %v12642_v53 = vsub.s32 1, %v1355_v49 }
 0x116   : > { %2262 = vmatprep.subr.bf16.mxu0 %v10507_v58  ;;  %2368 = vmatprep.subr.bf16.mxu1 %v10509_v62 }
 0x117   : > { %v1365_v55 = vrot.slane %v1352_v51, %v12640_v52  ;;  %v12649_v56 = vrot.slane %v1352_v51, %v12642_v53 }
 0x119   : > { %2263 = vmatpush1.bf16.msra.mxu0 %v10506_v60  ;;  %2369 = vmatpush1.bf16.msra.mxu1 %v10508_v61 }
 0x11a   : > { %2264 = vmatprep.subr.bf16.mxu0 %v10511_v3  ;;  %2370 = vmatprep.subr.bf16.mxu1 %v10513_v7  ;;  %v12653_v3 = vsub.s32 3, %v1355_v49 }
 0x11d   : > { %2265 = vmatpush1.bf16.msra.mxu0 %v10510_v5  ;;  %2371 = vmatpush1.bf16.msra.mxu1 %v10512_v6 }
 0x11e   : > { %2266 = vmatprep.subr.bf16.mxu0 %v10515_v11  ;;  %2372 = vmatprep.subr.bf16.mxu1 %v10517_v16 }
 0x121   : > { %2267 = vmatpush1.bf16.msra.mxu0 %v10514_v14  ;;  %2373 = vmatpush1.bf16.msra.mxu1 %v10516_v15 }
 0x122   : > { %2268 = vmatprep.subr.bf16.mxu0 %v10519_v21  ;;  %2374 = vmatprep.subr.bf16.mxu1 %v10521_v26 }
 0x125   : > { %2269 = vmatpush1.bf16.msra.mxu0 %v10518_v20  ;;  %2375 = vmatpush1.bf16.msra.mxu1 %v10520_v25 }
 0x126   : > { %2270 = vmatprep.subr.bf16.mxu0 %v10523_v27  ;;  %2376 = vmatprep.subr.bf16.mxu1 %v10525_v13 }
 0x129   : > { %2271 = vmatpush1.bf16.msra.mxu0 %v10522_v34  ;;  %2377 = vmatpush1.bf16.msra.mxu1 %v10524_v35 }
 0x12a   : > { %2272 = vmatprep.subr.bf16.mxu0 %v10527_v36  ;;  %2378 = vmatprep.subr.bf16.mxu1 %v10529_v37 }
 0x12d   : > { %2273 = vmatpush1.bf16.msra.mxu0 %v10526_v38  ;;  %2379 = vmatpush1.bf16.msra.mxu1 %v10528_v39 }
 0x12e   : > { %2295 = vmatprep.subr.bf16.mxu0 %v10531_v43  ;;  %2401 = vmatprep.subr.bf16.mxu1 %v10533_v47 }
 0x1c2   : > { %v1272_v57 = vpop.f32.mrb[0].mxu0 }
 0x1c3   : > { %v1369_v58 = vadd.f32 %v12645_v54, %v1272_v57  ;;  %v11523_v59 = vpop.f32.mrb[0].mxu1  ;;  %v1274_v60 = vpop.f32.mrb[1].mxu0 }
 0x1c4   : > { %v1377_v61 = vadd.f32 %v11523_v59, %v1365_v55  ;;  %v1370_v62 = vadd.f32 %v12649_v56, %v1274_v60  ;;  %v1325_v63 = vpop.f32.mrb[1].mxu1  ;;  %v1276_v1 = vpop.f32.mrb[2].mxu0 }
 0x1c5   : > { %v1381_v2 = vmax.f32 %v1369_v58, 0.0  ;;  %v1371_v4 = vadd.f32 %v1365_v55, %v1325_v63  ;;  %v1372_v5 = vadd.f32 %v12645_v54, %v1276_v1  ;;  %v11524_v6 = vpop.f32.mrb[2].mxu1  ;;  %v1278_v7 = vpop.f32.mrb[3].mxu0 }
 0x1c6   : > { %v1389_v8 = vmax.f32 %v1377_v61, 0.0  ;;  %v1382_v9 = vmax.f32 %v1370_v62, 0.0  ;;  %v1380_v10 = vadd.f32 %v11524_v6, %v1365_v55  ;;  %v1373_v11 = vadd.f32 %v12649_v56, %v1278_v7  ;;  %v1328_v12 = vpop.f32.mrb[3].mxu1 }
 0x1c7   : > { %v1396_v14 = vrot.slane %v1381_v2, %v12638_v50  ;;  %v1448_v15 = vrot.slane %v1381_v2, 6  ;;  %v1383_v16 = vmax.f32 %v1371_v4, 0.0  ;;  %v1384_v17 = vmax.f32 %v1372_v5, 0.0 }
 0x1c8   : > { %v1428_v18 = vrot.slane %v1389_v8, %v12638_v50  ;;  %v1471_v19 = vrot.slane %v1389_v8, 6  ;;  %v1400_v20 = vrot.slane %v1382_v9, %v12638_v50  ;;  %v1449_v23 = vrot.slane %v1382_v9, 6 }
 0x1c9   : > { %v1408_v21 = vrot.slane %v1384_v17, %v12653_v3  ;;  %v1484_v22 = vsel %vm1447_vm5, %v1396_v14, %v1448_v15  ;;  %v1451_v24 = vrot.slane %v1384_v17, 6  ;;  %v1392_v25 = vmax.f32 %v1380_v10, 0.0 }
 0x1ca   : > { %v1282_v26 = vpop.f32.mrb[4].mxu0  ;;  %v1404_v27 = vrot.slane %v1383_v16, %v12638_v50  ;;  %v1385_v28 = vmax.f32 %v1373_v11, 0.0  ;;  %v1374_v29 = vadd.f32 %v1365_v55, %v1328_v12  ;;  %v1493_v47 = vsel %vm1447_vm5, %v1428_v18, %v1471_v19 }
 0x1cb   : > { %v1375_v30 = vadd.f32 %v12645_v54, %v1282_v26  ;;  %v1284_v13 = vpop.f32.mrb[5].mxu0  ;;  %v1452_v31 = vsel %vm1447_vm5, %v1448_v15, %v1451_v24  ;;  %v1440_v32 = vrot.slane %v1392_v25, %v12653_v3  ;;  %v1476_v33 = vrot.slane %v1392_v25, 6 }
 0x1cc   : > { %v1376_v34 = vadd.f32 %v12649_v56, %v1284_v13  ;;  %v1286_v35 = vpop.f32.mrb[6].mxu0  ;;  %v1488_v36 = vsel %vm1164_vm4, %v1452_v31, %v1408_v21  ;;  %v1412_v37 = vrot.slane %v1385_v28, %v12653_v3  ;;  %v1453_v38 = vrot.slane %v1385_v28, 6 }
 0x1cd   : > { %v1386_v39 = vmax.f32 %v1374_v29, 0.0  ;;  %v1288_v43 = vpop.f32.mrb[7].mxu0  ;;  %v1450_v48 = vrot.slane %v1383_v16, 6  ;;  %v12670_v49 = vpack.c.bf16 %v1488_v36, %v1484_v22  ;;  %v1477_v51 = vsel %vm1447_vm5, %v1471_v19, %v1476_v33  ;;  %v1683_v36 = vld [vmem:[#allocation9 + $0xa40] sm:$0xff] }
 0x1ce   : > { %v1496_v55 = vsel %vm1164_vm4, %v1477_v51, %v1440_v32  ;;  %v1454_v57 = vsel %vm1447_vm5, %v1449_v23, %v1453_v38  ;;  %v1485_v60 = vsel %vm1447_vm5, %v1400_v20, %v1449_v23  ;;  %v1387_v2 = vmax.f32 %v1375_v30, 0.0  ;;  %v1686_v51 = vld [vmem:[#allocation9 + $0xa68] sm:$0xff] }
 0x1cf   : > { %v1416_v58 = vrot.slane %v1386_v39, %v12653_v3  ;;  %v1455_v59 = vrot.slane %v1386_v39, 6  ;;  %1503 = vst [vmem:[#allocation2] sm:$0xff] %v12670_v49  ;;  %v1502_v61 = vpack.c.bf16 %v1496_v55, %v1493_v47  ;;  %v1489_v62 = vsel %vm1164_vm4, %v1454_v57, %v1412_v37  ;;  %v1685_v47 = vld [vmem:[#allocation9 + $0xa60] sm:$0xff] }
 0x1d0   : > { %v12679_v63 = vpack.c.bf16 %v1489_v62, %v1485_v60  ;;  %v1388_v4 = vmax.f32 %v1376_v34, 0.0  ;;  %v1486_v5 = vsel %vm1447_vm5, %v1404_v27, %v1450_v48  ;;  %v1378_v7 = vadd.f32 %v12645_v54, %v1286_v35 }
 0x1d1   : > { %v1456_v1 = vsel %vm1447_vm5, %v1450_v48, %v1455_v59  ;;  %1508 = vst [vmem:[#allocation2 + $0x28] sm:$0xff] %v1502_v61  ;;  %v1379_v8 = vadd.f32 %v12649_v56, %v1288_v43  ;;  %v1420_v12 = vrot.slane %v1387_v2, %v12638_v50  ;;  %v1469_v14 = vrot.slane %v1387_v2, 6  ;;  %v1684_v48 = vld [vmem:[#allocation9 + $0xa48] sm:$0xff]  ;;  %v1687_v59 = vld [vmem:[#allocation9 + $0xa80] sm:$0xff] }
 0x1d2   : > { %v1490_v6 = vsel %vm1164_vm4, %v1456_v1, %v1416_v58  ;;  %1504 = vst [vmem:[#allocation2 + $0x8] sm:$0xff] %v12679_v63  ;;  %v1390_v10 = vmax.f32 %v1378_v7, 0.0  ;;  %v1424_v15 = vrot.slane %v1388_v4, %v12638_v50  ;;  %v1470_v16 = vrot.slane %v1388_v4, 6  ;;  %v1689_v1 = vld [vmem:[#allocation9 + $0xaa0] sm:$0xff]  ;;  %v1688_v2 = vld [vmem:[#allocation9 + $0xa88] sm:$0xff] }
 0x1d3   : > { %v12687_v9 = vpack.c.bf16 %v1490_v6, %v1486_v5  ;;  %v1391_v11 = vmax.f32 %v1379_v8, 0.0  ;;  %v1491_v21 = vsel %vm1447_vm5, %v1420_v12, %v1469_v14  ;;  %v1726_v27 = vshll.u32 %v12679_v63, 16  ;;  %v1690_v4 = vld [vmem:[#allocation9 + $0xaa8] sm:$0xff] }
 0x1d4   : > { %v1432_v17 = vrot.slane %v1390_v10, %v12653_v3  ;;  %v1472_v18 = vrot.slane %v1390_v10, 6  ;;  %v1492_v22 = vsel %vm1447_vm5, %v1424_v15, %v1470_v16  ;;  %v1714_v28 = vshll.u32 %v12670_v49, 16  ;;  %v1691_v10 = vld [vmem:[#allocation9 + $0xac0] sm:$0xff]  ;;  %v1692_v12 = vld [vmem:[#allocation9 + $0xac8] sm:$0xff] }
 0x1d5   : > { %1505 = vst [vmem:[#allocation2 + $0x10] sm:$0xff] %v12687_v9  ;;  %v1436_v54 = vrot.slane %v1391_v11, %v12653_v3  ;;  %v1474_v56 = vrot.slane %v1391_v11, 6  ;;  %v1728_v29 = vrot.slane %v1726_v27, 1  ;;  %v1724_v32 = vshrl.u32 %v12679_v63, 16  ;;  %v1693_v11 = vld [vmem:[#allocation9 + $0xae0] sm:$0xff] }
 0x1d6   : > { %v1473_v19 = vsel %vm1447_vm5, %v1469_v14, %v1472_v18  ;;  %v1716_v31 = vrot.slane %v1714_v28, 1  ;;  %v1712_v35 = vshrl.u32 %v12670_v49, 16  ;;  %v10535_v61 = vcombine.high %v1683_v36, %v1685_v47  ;;  %v1694_v14 = vld [vmem:[#allocation9 + $0xae8] sm:$0xff] }
 0x1d7   : > { %v1475_v20 = vsel %vm1447_vm5, %v1470_v16, %v1474_v56  ;;  %v1494_v23 = vsel %vm1164_vm4, %v1473_v19, %v1432_v17  ;;  %v1729_v37 = vor.u32 %v1728_v29, %v1724_v32  ;;  %v10537_v62 = vcombine.high %v1684_v48, %v1686_v51  ;;  %v1697_v16 = vld [vmem:[#allocation9 + $0xb20] sm:$0xff]  ;;  %v1696_v17 = vld [vmem:[#allocation9 + $0xb08] sm:$0xff] }
 0x1d8   : > { %v1495_v24 = vsel %vm1164_vm4, %v1475_v20, %v1436_v54  ;;  %v1500_v25 = vpack.c.bf16 %v1494_v23, %v1491_v21  ;;  %v1717_v55 = vor.u32 %v1716_v31, %v1712_v35  ;;  %v10534_v5 = vcombine.low %v1683_v36, %v1685_v47  ;;  %v1698_v18 = vld [vmem:[#allocation9 + $0xb28] sm:$0xff]  ;;  %v1699_v21 = vld [vmem:[#allocation9 + $0xb40] sm:$0xff]  ;;  %v12718_v47 = vld [vmem:[#allocation2 + $0x28] sm:$0x7f] }
 0x1d9   : > { %v1501_v26 = vpack.c.bf16 %v1495_v24, %v1492_v22  ;;  %v10536_v6 = vcombine.low %v1684_v48, %v1686_v51  ;;  %v10539_v7 = vcombine.high %v1687_v59, %v1689_v1  ;;  %v10541_v8 = vcombine.high %v1688_v2, %v1690_v4  ;;  %v1701_v22 = vld [vmem:[#allocation9 + $0xb60] sm:$0xff]  ;;  %v1700_v23 = vld [vmem:[#allocation9 + $0xb48] sm:$0xff] }
 0x1da   : > { %1506 = vst [vmem:[#allocation2 + $0x18] sm:$0xff] %v1500_v25  ;;  %v10538_v40 = vcombine.low %v1687_v59, %v1689_v1  ;;  %v10540_v41 = vcombine.low %v1688_v2, %v1690_v4  ;;  %v10543_v44 = vcombine.high %v1691_v10, %v1693_v11  ;;  %v10542_v54 = vcombine.low %v1691_v10, %v1693_v11  ;;  %v1702_v24 = vld [vmem:[#allocation9 + $0xb68] sm:$0xff]  ;;  %v1703_v29 = vld [vmem:[#allocation9 + $0xb80] sm:$0xff] }
 0x1db   : > { %1507 = vst [vmem:[#allocation2 + $0x20] sm:$0xff] %v1501_v26  ;;  %v10544_v56 = vcombine.low %v1692_v12, %v1694_v14  ;;  %v10549_v20 = vcombine.high %v1696_v17, %v1698_v18  ;;  %v10548_v26 = vcombine.low %v1696_v17, %v1698_v18  ;;  %v10551_v27 = vcombine.high %v1699_v21, %v1701_v22  ;;  %v1704_v31 = vld [vmem:[#allocation9 + $0xb88] sm:$0xff]  ;;  %v1515_v59 = vld [vmem:[#allocation9] sm:$0xff] }
 0x1dc   : > { %v10553_v28 = vcombine.high %v1700_v23, %v1702_v24  ;;  %v1706_v32 = vld [vmem:[#allocation9 + $0xba8] sm:$0xff]  ;;  %v1736_v10 = vshrl.u32 %v12687_v9, 16  ;;  %v1525_v17 = vld [vmem:[#allocation9 + $0xa0] sm:$0xff] }
 0x1dd   : > { %v10557_v36 = vcombine.high %v1704_v31, %v1706_v32  ;;  %v10556_v51 = vcombine.low %v1704_v31, %v1706_v32  ;;  %v1518_v1 = vld [vmem:[#allocation9 + $0x28] sm:$0xff]  ;;  %v1531_v32 = vld [vmem:[#allocation9 + $0x100] sm:$0xff] }
 0x1de   : > { %v1524_v18 = vld [vmem:[#allocation9 + $0x88] sm:$0xff] }
 0x1e1   : > { %v1611_v13 = vld [vmem:[#allocation2 + $0x18] sm:$0x7f] }
 0x1e2   : > { %v12702_v30 = vld [vmem:[#allocation2 + $0x20] sm:$0x7f]  ;;  %v1719_v34 = vshll.u32 %v1611_v13, 16  ;;  %v1747_v15 = vshrl.u32 %v1611_v13, 16  ;;  %v1705_v13 = vld [vmem:[#allocation9 + $0xba0] sm:$0xff] }
 0x1e3   : > { %v1731_v33 = vshll.u32 %v12702_v30, 16  ;;  %v1750_v43 = vshrl.u32 %v12702_v30, 16  ;;  %v10555_v35 = vcombine.high %v1703_v29, %v1705_v13  ;;  %v10554_v48 = vcombine.low %v1703_v29, %v1705_v13 }
 0x1e4   : > { %v1721_v39 = vrot.slane %v1719_v34, 1  ;;  %v10552_v34 = vcombine.low %v1700_v23, %v1702_v24  ;;  %v1753_v23 = vshrl.u32 %v12718_v47, 16  ;;  %v1529_v24 = vld [vmem:[#allocation9 + $0xe0] sm:$0xff] }
 0x1e5   : > { %v1733_v38 = vrot.slane %v1731_v33, 1  ;;  %v10550_v33 = vcombine.low %v1699_v21, %v1701_v22  ;;  %v1527_v22 = vld [vmem:[#allocation9 + $0xc0] sm:$0xff] }
 0x1e6   : > { %v1722_v60 = vsel %vm348_vm0, %v1717_v55, %v1721_v39  ;;  %v1749_v42 = vor.u32 %v1747_v15, %v1721_v39  ;;  %v1708_v39 = vld [vmem:[#allocation9 + $0xbc8] sm:$0xff]  ;;  %v1738_v55 = vshll.u32 %v12687_v9, 16  ;;  %v10575_v13 = vcombine.high %v1527_v22, %v1529_v24 }
 0x1e7   : > { %v1734_v57 = vsel %vm348_vm0, %v1729_v37, %v1733_v38  ;;  %v1752_v58 = vor.u32 %v1750_v43, %v1733_v38  ;;  %v1707_v37 = vld [vmem:[#allocation9 + $0xbc0] sm:$0xff]  ;;  %v1710_v43 = vld [vmem:[#allocation9 + $0xbe8] sm:$0xff] }
 0x1e8   : > { %2274 = vmatprep.mubr.bf16.mxu0 %v1734_v57  ;;  %2380 = vmatprep.mubr.bf16.mxu1 %v1734_v57  ;;  %v1709_v38 = vld [vmem:[#allocation9 + $0xbe0] sm:$0xff]  ;;  %v10560_v4 = vcombine.low %v1708_v39, %v1710_v43  ;;  %v1522_v15 = vld [vmem:[#allocation9 + $0x68] sm:$0xff] }
 0x1e9   : > { %2275 = vmatmul.mubr.bf16.vlgmr.msra.gmra.mrb[8].mxu0 %v1722_v60  ;;  %2381 = vmatmul.mubr.bf16.vlgmr.msra.gmra.mrb[4].mxu1 %v1722_v60  ;;  %v10559_v57 = vcombine.high %v1707_v37, %v1709_v38  ;;  %v1743_v60 = vshll.u32 %v12718_v47, 16  ;;  %v10558_v2 = vcombine.low %v1707_v37, %v1709_v38  ;;  %v1537_v47 = vld [vmem:[#allocation9 + $0x160] sm:$0xff] }
 0x1ea   : > { %2296 = vmatpush1.bf16.msra.mxu0 %v10530_v45  ;;  %2402 = vmatpush1.bf16.msra.mxu1 %v10532_v46  ;;  %v10545_v45 = vcombine.high %v1692_v12, %v1694_v14  ;;  %v1695_v46 = vld [vmem:[#allocation9 + $0xb00] sm:$0xff]  ;;  %v1520_v14 = vld [vmem:[#allocation9 + $0x48] sm:$0xff] }
 0x1eb   : > { %2284 = vmatprep.mubr.bf16.mxu0 %v1752_v58  ;;  %2390 = vmatprep.mubr.bf16.mxu1 %v1752_v58  ;;  %v10547_v19 = vcombine.high %v1695_v46, %v1697_v16  ;;  %v10546_v25 = vcombine.low %v1695_v46, %v1697_v16  ;;  %v10561_v58 = vcombine.high %v1708_v39, %v1710_v43  ;;  %v1745_v11 = vrot.slane %v1743_v60, 1  ;;  %v1521_v12 = vld [vmem:[#allocation9 + $0x60] sm:$0xff] }
 0x1ec   : > { %2297 = vmatprep.subr.bf16.mxu0 %v10535_v61  ;;  %2403 = vmatprep.subr.bf16.mxu1 %v10537_v62  ;;  %v1517_v61 = vld [vmem:[#allocation9 + $0x20] sm:$0xff]  ;;  %v1516_v62 = vld [vmem:[#allocation9 + $0x8] sm:$0xff] }
 0x1ed   : > { %v1523_v46 = vld [vmem:[#allocation9 + $0x80] sm:$0xff] }
 0x1ee   : > { %2298 = vmatpush1.bf16.msra.mxu0 %v10534_v5  ;;  %2404 = vmatpush1.bf16.msra.mxu1 %v10536_v6  ;;  %v1740_v5 = vrot.slane %v1738_v55, 1  ;;  %v10563_v6 = vcombine.high %v1515_v59, %v1517_v61  ;;  %v1535_v43 = vld [vmem:[#allocation9 + $0x140] sm:$0xff] }
 0x1ef   : > { %2299 = vmatprep.subr.bf16.mxu0 %v10539_v7  ;;  %2405 = vmatprep.subr.bf16.mxu1 %v10541_v8  ;;  %v10565_v7 = vcombine.high %v1516_v62, %v1518_v1  ;;  %v1519_v8 = vld [vmem:[#allocation9 + $0x40] sm:$0xff] }
 0x1f0   : > { %v1539_v60 = vld [vmem:[#allocation9 + $0x180] sm:$0xff] }
 0x1f1   : > { %2285 = vmatmul.mubr.bf16.gmra.mrb[12].mxu0 %v1749_v42  ;;  %2391 = vmatmul.mubr.bf16.gmra.mrb[8].mxu1 %v1749_v42  ;;  %v10564_v42 = vcombine.low %v1516_v62, %v1518_v1  ;;  %v1542_v62 = vld [vmem:[#allocation9 + $0x1a8] sm:$0xff]  ;;  %v10582_v1 = vcombine.low %v1535_v43, %v1537_v47 }
 0x1f2   : > { %2300 = vmatpush1.bf16.msra.mxu0 %v10538_v40  ;;  %2406 = vmatpush1.bf16.msra.mxu1 %v10540_v41  ;;  %v1741_v40 = vor.u32 %v1740_v5, %v1736_v10  ;;  %v10562_v41 = vcombine.low %v1515_v59, %v1517_v61  ;;  %v1541_v61 = vld [vmem:[#allocation9 + $0x1a0] sm:$0xff]  ;;  %v1546_v10 = vld [vmem:[#allocation9 + $0x1e8] sm:$0xff] }
 0x1f3   : > { %2301 = vmatprep.subr.bf16.mxu0 %v10543_v44  ;;  %2407 = vmatprep.subr.bf16.mxu1 %v10545_v45  ;;  %v10567_v44 = vcombine.high %v1519_v8, %v1521_v12  ;;  %v10569_v45 = vcombine.high %v1520_v14, %v1522_v15 }
 0x1f4   : > { %2327 = vmatprep.mubr.bf16.mxu0 %v13310_v0  ;;  %2433 = vmatprep.mubr.bf16.mxu1 %v13310_v0  ;;  %v1746_v16 = vsel %vm348_vm0, %v1741_v40, %v1745_v11  ;;  %v1547_v40 = vld [vmem:[#allocation9 + $0x200] sm:$0xff] }
 0x1f6   : > { %2302 = vmatpush1.bf16.msra.mxu0 %v10542_v54  ;;  %2408 = vmatpush1.bf16.msra.mxu1 %v10544_v56  ;;  %v1526_v54 = vld [vmem:[#allocation9 + $0xa8] sm:$0xff]  ;;  %v10566_v56 = vcombine.low %v1519_v8, %v1521_v12 }
 0x1f7   : > { %2303 = vmatprep.subr.bf16.mxu0 %v10547_v19  ;;  %2409 = vmatprep.subr.bf16.mxu1 %v10549_v20  ;;  %v10568_v19 = vcombine.low %v1520_v14, %v1522_v15  ;;  %v10571_v20 = vcombine.high %v1523_v46, %v1525_v17  ;;  %v10573_v21 = vcombine.high %v1524_v18, %v1526_v54  ;;  %v1544_v8 = vld [vmem:[#allocation9 + $0x1c8] sm:$0xff] }
 0x1f8   : > { %v10572_v29 = vcombine.low %v1524_v18, %v1526_v54  ;;  %v10593_v15 = vcombine.high %v1544_v8, %v1546_v10  ;;  %v1551_v18 = vld [vmem:[#allocation9 + $0x240] sm:$0xff] }
 0x1f9   : > { %v1553_v54 = vld [vmem:[#allocation9 + $0x260] sm:$0xff] }
 0x1fa   : > { %2304 = vmatpush1.bf16.msra.mxu0 %v10546_v25  ;;  %2410 = vmatpush1.bf16.msra.mxu1 %v10548_v26  ;;  %v1528_v25 = vld [vmem:[#allocation9 + $0xc8] sm:$0xff] }
 0x1fb   : > { %2305 = vmatprep.subr.bf16.mxu0 %v10551_v27  ;;  %2411 = vmatprep.subr.bf16.mxu1 %v10553_v28  ;;  %v1530_v26 = vld [vmem:[#allocation9 + $0xe8] sm:$0xff]  ;;  %v10570_v27 = vcombine.low %v1523_v46, %v1525_v17  ;;  %v1755_v28 = vor.u32 %v1753_v23, %v1745_v11  ;;  %v10586_v11 = vcombine.low %v1539_v60, %v1541_v61 }
 0x1fc   : > { %v10577_v31 = vcombine.high %v1528_v25, %v1530_v26  ;;  %v10576_v37 = vcombine.low %v1528_v25, %v1530_v26  ;;  %v10592_v46 = vcombine.low %v1544_v8, %v1546_v10  ;;  %v1557_v25 = vld [vmem:[#allocation9 + $0x2a0] sm:$0xff]  ;;  %v1556_v26 = vld [vmem:[#allocation9 + $0x288] sm:$0xff] }
 0x1fd   : > { %v1572_v8 = vld [vmem:[#allocation9 + $0x388] sm:$0xff] }
 0x1fe   : > { %2306 = vmatpush1.bf16.msra.mxu0 %v10550_v33  ;;  %2412 = vmatpush1.bf16.msra.mxu1 %v10552_v34  ;;  %v1533_v33 = vld [vmem:[#allocation9 + $0x120] sm:$0xff]  ;;  %v1532_v34 = vld [vmem:[#allocation9 + $0x108] sm:$0xff] }
 0x1ff   : > { %2307 = vmatprep.subr.bf16.mxu0 %v10555_v35  ;;  %2413 = vmatprep.subr.bf16.mxu1 %v10557_v36  ;;  %v1534_v35 = vld [vmem:[#allocation9 + $0x128] sm:$0xff]  ;;  %v10574_v36 = vcombine.low %v1527_v22, %v1529_v24  ;;  %v10579_v38 = vcombine.high %v1531_v32, %v1533_v33  ;;  %v10578_v55 = vcombine.low %v1531_v32, %v1533_v33  ;;  %v1555_v24 = vld [vmem:[#allocation9 + $0x280] sm:$0xff] }
 0x200   : > { %v10581_v39 = vcombine.high %v1532_v34, %v1534_v35  ;;  %v10599_v22 = vcombine.high %v1551_v18, %v1553_v54  ;;  %v1559_v32 = vld [vmem:[#allocation9 + $0x2c0] sm:$0xff]  ;;  %v1574_v10 = vld [vmem:[#allocation9 + $0x3a8] sm:$0xff] }
 0x201   : > { %v1561_v33 = vld [vmem:[#allocation9 + $0x2e0] sm:$0xff] }
 0x202   : > { %2308 = vmatpush1.bf16.msra.mxu0 %v10554_v48  ;;  %2414 = vmatpush1.bf16.msra.mxu1 %v10556_v51  ;;  %v1536_v48 = vld [vmem:[#allocation9 + $0x148] sm:$0xff] }
 0x203   : > { %2309 = vmatprep.subr.bf16.mxu0 %v10559_v57  ;;  %2415 = vmatprep.subr.bf16.mxu1 %v10561_v58  ;;  %v1538_v51 = vld [vmem:[#allocation9 + $0x168] sm:$0xff]  ;;  %v10580_v57 = vcombine.low %v1532_v34, %v1534_v35  ;;  %v10583_v58 = vcombine.high %v1535_v43, %v1537_v47  ;;  %v1563_v43 = vld [vmem:[#allocation9 + $0x300] sm:$0xff] }
 0x204   : > { %v10585_v59 = vcombine.high %v1536_v48, %v1538_v51  ;;  %v1560_v34 = vld [vmem:[#allocation9 + $0x2c8] sm:$0xff]  ;;  %v1565_v47 = vld [vmem:[#allocation9 + $0x320] sm:$0xff] }
 0x205   : > { %v1562_v35 = vld [vmem:[#allocation9 + $0x2e8] sm:$0xff] }
 0x206   : > { %2310 = vmatpush1.bf16.msra.mxu0 %v10558_v2  ;;  %2416 = vmatpush1.bf16.msra.mxu1 %v10560_v4  ;;  %v10584_v2 = vcombine.low %v1536_v48, %v1538_v51  ;;  %v10587_v4 = vcombine.high %v1539_v60, %v1541_v61  ;;  %v1564_v48 = vld [vmem:[#allocation9 + $0x308] sm:$0xff]  ;;  %v1567_v60 = vld [vmem:[#allocation9 + $0x340] sm:$0xff] }
 0x207   : > { %2934 = vmatprep.subr.bf16.mxu0 %v10563_v6  ;;  %3040 = vmatprep.subr.bf16.mxu1 %v10565_v7  ;;  %v1543_v6 = vld [vmem:[#allocation9 + $0x1c0] sm:$0xff]  ;;  %v1566_v51 = vld [vmem:[#allocation9 + $0x328] sm:$0xff] }
 0x208   : > { %v1545_v7 = vld [vmem:[#allocation9 + $0x1e0] sm:$0xff] }
 0x209   : > { %2328 = vmatmul.mubr.bf16.vlgmr.msra.gmra.mrb[8].mxu0 %v1746_v16  ;;  %2434 = vmatmul.mubr.bf16.vlgmr.msra.gmra.mrb[4].mxu1 %v1746_v16  ;;  %v10591_v14 = vcombine.high %v1543_v6, %v1545_v7  ;;  %v1569_v61 = vld [vmem:[#allocation9 + $0x360] sm:$0xff] }
 0x20a   : > { %2935 = vmatpush1.bf16.msra.mxu0 %v10562_v41  ;;  %3041 = vmatpush1.bf16.msra.mxu1 %v10564_v42  ;;  %v1549_v41 = vld [vmem:[#allocation9 + $0x220] sm:$0xff]  ;;  %v1548_v42 = vld [vmem:[#allocation9 + $0x208] sm:$0xff] }
 0x20b   : > { %2936 = vmatprep.subr.bf16.mxu0 %v10567_v44  ;;  %3042 = vmatprep.subr.bf16.mxu1 %v10569_v45  ;;  %v1550_v44 = vld [vmem:[#allocation9 + $0x228] sm:$0xff]  ;;  %v10590_v45 = vcombine.low %v1543_v6, %v1545_v7  ;;  %v10595_v16 = vcombine.high %v1547_v40, %v1549_v41  ;;  %v1571_v6 = vld [vmem:[#allocation9 + $0x380] sm:$0xff] }
 0x20c   : > { %2337 = vmatprep.mubr.bf16.mxu0 %v13310_v0  ;;  %2443 = vmatprep.mubr.bf16.mxu1 %v13310_v0  ;;  %v10597_v17 = vcombine.high %v1548_v42, %v1550_v44  ;;  %v1573_v7 = vld [vmem:[#allocation9 + $0x3a0] sm:$0xff] }
 0x20e   : > { %2937 = vmatpush1.bf16.msra.mxu0 %v10566_v56  ;;  %3043 = vmatpush1.bf16.msra.mxu1 %v10568_v19  ;;  %v1552_v56 = vld [vmem:[#allocation9 + $0x248] sm:$0xff] }
 0x20f   : > { %2938 = vmatprep.subr.bf16.mxu0 %v10571_v20  ;;  %3044 = vmatprep.subr.bf16.mxu1 %v10573_v21  ;;  %v1554_v19 = vld [vmem:[#allocation9 + $0x268] sm:$0xff]  ;;  %v10594_v20 = vcombine.low %v1547_v40, %v1549_v41  ;;  %v10596_v21 = vcombine.low %v1548_v42, %v1550_v44  ;;  %v1575_v40 = vld [vmem:[#allocation9 + $0x3c0] sm:$0xff] }
 0x210   : > { %v10601_v23 = vcombine.high %v1552_v56, %v1554_v19  ;;  %v1577_v41 = vld [vmem:[#allocation9 + $0x3e0] sm:$0xff]  ;;  %v1576_v42 = vld [vmem:[#allocation9 + $0x3c8] sm:$0xff] }
 0x211   : > { %2338 = vmatmul.mubr.bf16.gmra.mrb[12].mxu0 %v1755_v28  ;;  %2444 = vmatmul.mubr.bf16.gmra.mrb[8].mxu1 %v1755_v28  ;;  %v10598_v28 = vcombine.low %v1551_v18, %v1553_v54  ;;  %v1578_v44 = vld [vmem:[#allocation9 + $0x3e8] sm:$0xff]  ;;  %v1579_v18 = vld [vmem:[#allocation9 + $0x400] sm:$0xff] }
 0x212   : > { %2939 = vmatpush1.bf16.msra.mxu0 %v10570_v27  ;;  %2966 = vmatprep.mubr.bf16.mxu0 %v12679_v63  ;;  %v1558_v27 = vld [vmem:[#allocation9 + $0x2a8] sm:$0xff]  ;;  %v1581_v54 = vld [vmem:[#allocation9 + $0x420] sm:$0xff] }
 0x213   : > { %3045 = vmatpush1.bf16.msra.mxu1 %v10572_v29  ;;  %3072 = vmatprep.mubr.bf16.mxu1 %v12679_v63  ;;  %v1540_v63 = vld [vmem:[#allocation9 + $0x188] sm:$0xff]  ;;  %v10600_v29 = vcombine.low %v1552_v56, %v1554_v19 }
 0x214   : > { %2940 = vmatprep.subr.bf16.mxu0 %v10575_v13  ;;  %3046 = vmatprep.subr.bf16.mxu1 %v10577_v31  ;;  %v10589_v5 = vcombine.high %v1540_v63, %v1542_v62  ;;  %v10588_v12 = vcombine.low %v1540_v63, %v1542_v62  ;;  %v10603_v13 = vcombine.high %v1555_v24, %v1557_v25  ;;  %v1568_v63 = vld [vmem:[#allocation9 + $0x348] sm:$0xff] }
 0x215   : > { %v10605_v31 = vcombine.high %v1556_v26, %v1558_v27  ;;  %v1570_v62 = vld [vmem:[#allocation9 + $0x368] sm:$0xff] }
 0x216   : > { %2941 = vmatpush1.bf16.msra.mxu0 %v10574_v36  ;;  %v10602_v36 = vcombine.low %v1555_v24, %v1557_v25  ;;  %v1580_v56 = vld [vmem:[#allocation9 + $0x408] sm:$0xff]  ;;  %v1583_v24 = vld [vmem:[#allocation9 + $0x440] sm:$0xff] }
 0x217   : > { %3047 = vmatpush1.bf16.msra.mxu1 %v10576_v37  ;;  %2942 = vmatprep.subr.bf16.mxu0 %v10579_v38  ;;  %v10604_v37 = vcombine.low %v1556_v26, %v1558_v27  ;;  %v10607_v38 = vcombine.high %v1559_v32, %v1561_v33  ;;  %v1582_v19 = vld [vmem:[#allocation9 + $0x428] sm:$0xff]  ;;  %v1585_v25 = vld [vmem:[#allocation9 + $0x460] sm:$0xff] }
 0x218   : > { %3048 = vmatprep.subr.bf16.mxu1 %v10581_v39  ;;  %v10609_v39 = vcombine.high %v1560_v34, %v1562_v35  ;;  %v1584_v26 = vld [vmem:[#allocation9 + $0x448] sm:$0xff] }
 0x219   : > { %v1586_v27 = vld [vmem:[#allocation9 + $0x468] sm:$0xff] }
 0x21a   : > { %2943 = vmatpush1.bf16.msra.mxu0 %v10578_v55  ;;  %v10606_v55 = vcombine.low %v1559_v32, %v1561_v33  ;;  %v10633_v32 = vcombine.high %v1584_v26, %v1586_v27  ;;  %v1587_v33 = vld [vmem:[#allocation9 + $0x480] sm:$0xff] }
 0x21b   : > { %3049 = vmatpush1.bf16.msra.mxu1 %v10580_v57  ;;  %2944 = vmatprep.subr.bf16.mxu0 %v10583_v58  ;;  %v10608_v57 = vcombine.low %v1560_v34, %v1562_v35  ;;  %v10611_v58 = vcombine.high %v1563_v43, %v1565_v47  ;;  %v1589_v34 = vld [vmem:[#allocation9 + $0x4a0] sm:$0xff]  ;;  %v1588_v35 = vld [vmem:[#allocation9 + $0x488] sm:$0xff] }
 0x21c   : > { %3050 = vmatprep.subr.bf16.mxu1 %v10585_v59  ;;  %v10613_v59 = vcombine.high %v1564_v48, %v1566_v51 }
 0x21e   : > { %2945 = vmatpush1.bf16.msra.mxu0 %v10582_v1  ;;  %v10610_v1 = vcombine.low %v1563_v43, %v1565_v47  ;;  %v1591_v47 = vld [vmem:[#allocation9 + $0x4c0] sm:$0xff] }
 0x21f   : > { %3051 = vmatpush1.bf16.msra.mxu1 %v10584_v2  ;;  %2946 = vmatprep.subr.bf16.mxu0 %v10587_v4  ;;  %v10612_v2 = vcombine.low %v1564_v48, %v1566_v51  ;;  %v10615_v4 = vcombine.high %v1567_v60, %v1569_v61  ;;  %v1593_v48 = vld [vmem:[#allocation9 + $0x4e0] sm:$0xff]  ;;  %v1592_v51 = vld [vmem:[#allocation9 + $0x4c8] sm:$0xff] }
 0x220   : > { %3052 = vmatprep.subr.bf16.mxu1 %v10589_v5  ;;  %v10617_v5 = vcombine.high %v1568_v63, %v1570_v62 }
 0x222   : > { %2947 = vmatpush1.bf16.msra.mxu0 %v10586_v11  ;;  %v10614_v11 = vcombine.low %v1567_v60, %v1569_v61  ;;  %v1595_v61 = vld [vmem:[#allocation9 + $0x500] sm:$0xff] }
 0x223   : > { %3053 = vmatpush1.bf16.msra.mxu1 %v10588_v12  ;;  %2948 = vmatprep.subr.bf16.mxu0 %v10591_v14  ;;  %v10616_v12 = vcombine.low %v1568_v63, %v1570_v62  ;;  %v10619_v14 = vcombine.high %v1571_v6, %v1573_v7  ;;  %v1597_v63 = vld [vmem:[#allocation9 + $0x520] sm:$0xff]  ;;  %v1596_v62 = vld [vmem:[#allocation9 + $0x508] sm:$0xff] }
 0x224   : > { %3054 = vmatprep.subr.bf16.mxu1 %v10593_v15  ;;  %v10621_v15 = vcombine.high %v1572_v8, %v1574_v10 }
 0x226   : > { %2949 = vmatpush1.bf16.msra.mxu0 %v10590_v45  ;;  %v10618_v45 = vcombine.low %v1571_v6, %v1573_v7  ;;  %v1599_v7 = vld [vmem:[#allocation9 + $0x540] sm:$0xff] }
 0x227   : > { %3055 = vmatpush1.bf16.msra.mxu1 %v10592_v46  ;;  %2950 = vmatprep.subr.bf16.mxu0 %v10595_v16  ;;  %v10620_v46 = vcombine.low %v1572_v8, %v1574_v10  ;;  %v10623_v16 = vcombine.high %v1575_v40, %v1577_v41  ;;  %v1601_v8 = vld [vmem:[#allocation9 + $0x560] sm:$0xff]  ;;  %v1600_v10 = vld [vmem:[#allocation9 + $0x548] sm:$0xff] }
 0x228   : > { %3056 = vmatprep.subr.bf16.mxu1 %v10597_v17  ;;  %v10625_v17 = vcombine.high %v1576_v42, %v1578_v44 }
 0x22a   : > { %2951 = vmatpush1.bf16.msra.mxu0 %v10594_v20  ;;  %v10622_v20 = vcombine.low %v1575_v40, %v1577_v41  ;;  %v1603_v41 = vld [vmem:[#allocation9 + $0x580] sm:$0xff] }
 0x22b   : > { %3057 = vmatpush1.bf16.msra.mxu1 %v10596_v21  ;;  %2952 = vmatprep.subr.bf16.mxu0 %v10599_v22  ;;  %v10624_v21 = vcombine.low %v1576_v42, %v1578_v44  ;;  %v10627_v22 = vcombine.high %v1579_v18, %v1581_v54  ;;  %v1605_v42 = vld [vmem:[#allocation9 + $0x5a0] sm:$0xff]  ;;  %v1604_v44 = vld [vmem:[#allocation9 + $0x588] sm:$0xff] }
 0x22c   : > { %3058 = vmatprep.subr.bf16.mxu1 %v10601_v23  ;;  %v10629_v23 = vcombine.high %v1580_v56, %v1582_v19 }
 0x22e   : > { %2953 = vmatpush1.bf16.msra.mxu0 %v10598_v28  ;;  %v10626_v28 = vcombine.low %v1579_v18, %v1581_v54  ;;  %v1607_v54 = vld [vmem:[#allocation9 + $0x5c0] sm:$0xff] }
 0x22f   : > { %3059 = vmatpush1.bf16.msra.mxu1 %v10600_v29  ;;  %2954 = vmatprep.subr.bf16.mxu0 %v10603_v13  ;;  %v10628_v29 = vcombine.low %v1580_v56, %v1582_v19  ;;  %v10631_v13 = vcombine.high %v1583_v24, %v1585_v25  ;;  %v1609_v56 = vld [vmem:[#allocation9 + $0x5e0] sm:$0xff]  ;;  %v1608_v19 = vld [vmem:[#allocation9 + $0x5c8] sm:$0xff] }
 0x230   : > { %3060 = vmatprep.subr.bf16.mxu1 %v10605_v31  ;;  %v1513_v31 = vld [vmem:[#allocation2 + $0x20] sm:$0x3f] }
 0x232   : > { %2955 = vmatpush1.bf16.msra.mxu0 %v10602_v36  ;;  %v1590_v36 = vld [vmem:[#allocation9 + $0x4a8] sm:$0xff] }
 0x233   : > { %3061 = vmatpush1.bf16.msra.mxu1 %v10604_v37  ;;  %2956 = vmatprep.subr.bf16.mxu0 %v10607_v38  ;;  %v10630_v37 = vcombine.low %v1583_v24, %v1585_v25  ;;  %v10632_v38 = vcombine.low %v1584_v26, %v1586_v27  ;;  %v10637_v43 = vcombine.high %v1588_v35, %v1590_v36  ;;  %v3150_v25 = vld [vmem:[#allocation9 + $0xc00] sm:$0xff]  ;;  %v3151_v27 = vld [vmem:[#allocation9 + $0xc08] sm:$0xff] }
 0x234   : > { %3062 = vmatprep.subr.bf16.mxu1 %v10609_v39  ;;  %v10635_v39 = vcombine.high %v1587_v33, %v1589_v34  ;;  %v3152_v26 = vld [vmem:[#allocation9 + $0xc20] sm:$0xff] }
 0x236   : > { %2957 = vmatpush1.bf16.msra.mxu0 %v10606_v55  ;;  %v1594_v55 = vld [vmem:[#allocation9 + $0x4e8] sm:$0xff] }
 0x237   : > { %3063 = vmatpush1.bf16.msra.mxu1 %v10608_v57  ;;  %2958 = vmatprep.subr.bf16.mxu0 %v10611_v58  ;;  %v10634_v57 = vcombine.low %v1587_v33, %v1589_v34  ;;  %v10636_v58 = vcombine.low %v1588_v35, %v1590_v36  ;;  %v10641_v60 = vcombine.high %v1592_v51, %v1594_v55  ;;  %v3154_v33 = vld [vmem:[#allocation9 + $0xc40] sm:$0xff]  ;;  %v3155_v35 = vld [vmem:[#allocation9 + $0xc48] sm:$0xff] }
 0x238   : > { %3064 = vmatprep.subr.bf16.mxu1 %v10613_v59  ;;  %v10639_v59 = vcombine.high %v1591_v47, %v1593_v48  ;;  %v3156_v34 = vld [vmem:[#allocation9 + $0xc60] sm:$0xff]  ;;  %v3157_v36 = vld [vmem:[#allocation9 + $0xc68] sm:$0xff] }
 0x23a   : > { %2959 = vmatpush1.bf16.msra.mxu0 %v10610_v1  ;;  %v1598_v1 = vld [vmem:[#allocation9 + $0x528] sm:$0xff] }
 0x23b   : > { %3065 = vmatpush1.bf16.msra.mxu1 %v10612_v2  ;;  %2960 = vmatprep.subr.bf16.mxu0 %v10615_v4  ;;  %v10638_v2 = vcombine.low %v1591_v47, %v1593_v48  ;;  %v10640_v4 = vcombine.low %v1592_v51, %v1594_v55  ;;  %v10645_v6 = vcombine.high %v1596_v62, %v1598_v1  ;;  %v3158_v47 = vld [vmem:[#allocation9 + $0xc80] sm:$0xff]  ;;  %v3159_v51 = vld [vmem:[#allocation9 + $0xc88] sm:$0xff] }
 0x23c   : > { %3066 = vmatprep.subr.bf16.mxu1 %v10617_v5  ;;  %v10643_v5 = vcombine.high %v1595_v61, %v1597_v63  ;;  %v3160_v48 = vld [vmem:[#allocation9 + $0xca0] sm:$0xff]  ;;  %v3161_v55 = vld [vmem:[#allocation9 + $0xca8] sm:$0xff] }
 0x23e   : > { %2961 = vmatpush1.bf16.msra.mxu0 %v10614_v11  ;;  %v1602_v11 = vld [vmem:[#allocation9 + $0x568] sm:$0xff] }
 0x23f   : > { %3067 = vmatpush1.bf16.msra.mxu1 %v10616_v12  ;;  %2962 = vmatprep.subr.bf16.mxu0 %v10619_v14  ;;  %v10642_v12 = vcombine.low %v1595_v61, %v1597_v63  ;;  %v10644_v14 = vcombine.low %v1596_v62, %v1598_v1  ;;  %v10649_v40 = vcombine.high %v1600_v10, %v1602_v11  ;;  %v3162_v61 = vld [vmem:[#allocation9 + $0xcc0] sm:$0xff]  ;;  %v3163_v1 = vld [vmem:[#allocation9 + $0xcc8] sm:$0xff] }
 0x240   : > { %3068 = vmatprep.subr.bf16.mxu1 %v10621_v15  ;;  %v10647_v15 = vcombine.high %v1599_v7, %v1601_v8  ;;  %v3164_v63 = vld [vmem:[#allocation9 + $0xce0] sm:$0xff]  ;;  %v10666_v62 = vcombine.low %v3158_v47, %v3160_v48 }
 0x242   : > { %2963 = vmatpush1.bf16.msra.mxu0 %v10618_v45  ;;  %v1606_v45 = vld [vmem:[#allocation9 + $0x5a8] sm:$0xff] }
 0x243   : > { %3069 = vmatpush1.bf16.msra.mxu1 %v10620_v46  ;;  %2964 = vmatprep.subr.bf16.mxu0 %v10623_v16  ;;  %v10646_v46 = vcombine.low %v1599_v7, %v1601_v8  ;;  %v10648_v16 = vcombine.low %v1600_v10, %v1602_v11  ;;  %v10653_v18 = vcombine.high %v1604_v44, %v1606_v45  ;;  %v3166_v8 = vld [vmem:[#allocation9 + $0xd00] sm:$0xff] }
 0x244   : > { %3070 = vmatprep.subr.bf16.mxu1 %v10625_v17  ;;  %v10651_v17 = vcombine.high %v1603_v41, %v1605_v42  ;;  %v10671_v7 = vcombine.high %v3162_v61, %v3164_v63  ;;  %v3168_v10 = vld [vmem:[#allocation9 + $0xd20] sm:$0xff] }
 0x246   : > { %2965 = vmatpush1.bf16.msra.mxu0 %v10622_v20  ;;  %v1610_v20 = vld [vmem:[#allocation9 + $0x5e8] sm:$0xff] }
 0x247   : > { %3071 = vmatpush1.bf16.msra.mxu1 %v10624_v21  ;;  %2987 = vmatprep.subr.bf16.mxu0 %v10627_v22  ;;  %v10650_v21 = vcombine.low %v1603_v41, %v1605_v42  ;;  %v10652_v22 = vcombine.low %v1604_v44, %v1606_v45  ;;  %v10657_v24 = vcombine.high %v1608_v19, %v1610_v20  ;;  %v3170_v44 = vld [vmem:[#allocation9 + $0xd40] sm:$0xff] }
 0x248   : > { %3093 = vmatprep.subr.bf16.mxu1 %v10629_v23  ;;  %v10655_v23 = vcombine.high %v1607_v54, %v1609_v56  ;;  %v10675_v41 = vcombine.high %v3166_v8, %v3168_v10  ;;  %v3172_v45 = vld [vmem:[#allocation9 + $0xd60] sm:$0xff] }
 0x249   : > { %2967 = vmatmul.mubr.bf16.vlgmr.msra.gmra.mrb[8].mxu0 %v12670_v49 }
 0x24a   : > { %3073 = vmatmul.mubr.bf16.vlgmr.msra.gmra.mrb[4].mxu1 %v12670_v49  ;;  %2976 = vmatprep.mubr.bf16.mxu0 %v1513_v31  ;;  %v1512_v49 = vld [vmem:[#allocation2 + $0x18] sm:$0x3f] }
 0x24b   : > { %2988 = vmatpush1.bf16.msra.mxu0 %v10626_v28  ;;  %3082 = vmatprep.mubr.bf16.mxu1 %v1513_v31  ;;  %v3153_v28 = vld [vmem:[#allocation9 + $0xc28] sm:$0xff]  ;;  %v10659_v31 = vcombine.high %v3150_v25, %v3152_v26 }
 0x24c   : > { %3094 = vmatpush1.bf16.msra.mxu1 %v10628_v29  ;;  %2989 = vmatprep.subr.bf16.mxu0 %v10631_v13  ;;  %v10654_v29 = vcombine.low %v1607_v54, %v1609_v56  ;;  %v10656_v13 = vcombine.low %v1608_v19, %v1610_v20  ;;  %v10679_v54 = vcombine.high %v3170_v44, %v3172_v45  ;;  %v3174_v19 = vld [vmem:[#allocation9 + $0xd80] sm:$0xff] }
 0x24d   : > { %3095 = vmatprep.subr.bf16.mxu1 %v10633_v32  ;;  %v10661_v32 = vcombine.high %v3151_v27, %v3153_v28  ;;  %v3176_v20 = vld [vmem:[#allocation9 + $0xda0] sm:$0xff] }
 0x24f   : > { %2990 = vmatpush1.bf16.msra.mxu0 %v10630_v37  ;;  %v10658_v37 = vcombine.low %v3150_v25, %v3152_v26  ;;  %v10683_v25 = vcombine.high %v3174_v19, %v3176_v20 }
 0x250   : > { %3096 = vmatpush1.bf16.msra.mxu1 %v10632_v38  ;;  %2991 = vmatprep.subr.bf16.mxu0 %v10635_v39  ;;  %v10660_v38 = vcombine.low %v3151_v27, %v3153_v28  ;;  %v10663_v39 = vcombine.high %v3154_v33, %v3156_v34  ;;  %v3178_v27 = vld [vmem:[#allocation9 + $0xdc0] sm:$0xff] }
 0x251   : > { %2977 = vmatmul.mubr.bf16.gmra.mrb[12].mxu0 %v1512_v49  ;;  %3097 = vmatprep.subr.bf16.mxu1 %v10637_v43  ;;  %v10665_v43 = vcombine.high %v3155_v35, %v3157_v36  ;;  %v3180_v28 = vld [vmem:[#allocation9 + $0xde0] sm:$0xff] }
 0x252   : > { %3083 = vmatmul.mubr.bf16.gmra.mrb[8].mxu1 %v1512_v49  ;;  %3019 = vmatprep.mubr.bf16.mxu0 %v13310_v0  ;;  %v10664_v49 = vcombine.low %v3155_v35, %v3157_v36  ;;  %v3182_v35 = vld [vmem:[#allocation9 + $0xe00] sm:$0xff] }
 0x253   : > { %2992 = vmatpush1.bf16.msra.mxu0 %v10634_v57  ;;  %3125 = vmatprep.mubr.bf16.mxu1 %v13310_v0  ;;  %v10662_v57 = vcombine.low %v3154_v33, %v3156_v34  ;;  %v10687_v33 = vcombine.high %v3178_v27, %v3180_v28  ;;  %v3184_v36 = vld [vmem:[#allocation9 + $0xe20] sm:$0xff] }
 0x254   : > { %3098 = vmatpush1.bf16.msra.mxu1 %v10636_v58  ;;  %2993 = vmatprep.subr.bf16.mxu0 %v10639_v59  ;;  %v10667_v58 = vcombine.high %v3158_v47, %v3160_v48  ;;  %v10669_v59 = vcombine.high %v3159_v51, %v3161_v55  ;;  %v10691_v47 = vcombine.high %v3182_v35, %v3184_v36 }
 0x255   : > { %3099 = vmatprep.subr.bf16.mxu1 %v10641_v60  ;;  %v12737_v60 = vld [vmem:[#allocation2 + $0x8] sm:$0xfe] }
 0x257   : > { %2994 = vmatpush1.bf16.msra.mxu0 %v10638_v2  ;;  %v3165_v2 = vld [vmem:[#allocation9 + $0xce8] sm:$0xff] }
 0x258   : > { %3100 = vmatpush1.bf16.msra.mxu1 %v10640_v4  ;;  %2995 = vmatprep.subr.bf16.mxu0 %v10643_v5  ;;  %v10668_v4 = vcombine.low %v3159_v51, %v3161_v55  ;;  %v1514_v5 = vld [vmem:[#allocation2 + $0x28] sm:$0x3f]  ;;  %v10673_v11 = vcombine.high %v3163_v1, %v3165_v2  ;;  %v3186_v51 = vld [vmem:[#allocation9 + $0xe40] sm:$0xff] }
 0x259   : > { %3101 = vmatprep.subr.bf16.mxu1 %v10645_v6  ;;  %v3255_v6 = vrot.slane %v12737_v60, 1  ;;  %v3188_v55 = vld [vmem:[#allocation9 + $0xe60] sm:$0xff] }
 0x25b   : > { %2996 = vmatpush1.bf16.msra.mxu0 %v10642_v12  ;;  %v3167_v12 = vld [vmem:[#allocation9 + $0xd08] sm:$0xff] }
 0x25c   : > { %3102 = vmatpush1.bf16.msra.mxu1 %v10644_v14  ;;  %2997 = vmatprep.subr.bf16.mxu0 %v10647_v15  ;;  %v3169_v14 = vld [vmem:[#allocation9 + $0xd28] sm:$0xff]  ;;  %v10670_v15 = vcombine.low %v3162_v61, %v3164_v63  ;;  %v10695_v61 = vcombine.high %v3186_v51, %v3188_v55 }
 0x25d   : > { %3103 = vmatprep.subr.bf16.mxu1 %v10649_v40  ;;  %v10672_v40 = vcombine.low %v3163_v1, %v3165_v2  ;;  %v10677_v42 = vcombine.high %v3167_v12, %v3169_v14  ;;  %v3192_v1 = vld [vmem:[#allocation9 + $0xea0] sm:$0xff]  ;;  %v3191_v2 = vld [vmem:[#allocation9 + $0xe88] sm:$0xff] }
 0x25f   : > { %2998 = vmatpush1.bf16.msra.mxu0 %v10646_v46  ;;  %v3171_v46 = vld [vmem:[#allocation9 + $0xd48] sm:$0xff] }
 0x260   : > { %3104 = vmatpush1.bf16.msra.mxu1 %v10648_v16  ;;  %2999 = vmatprep.subr.bf16.mxu0 %v10651_v17  ;;  %v3173_v16 = vld [vmem:[#allocation9 + $0xd68] sm:$0xff]  ;;  %v10674_v17 = vcombine.low %v3166_v8, %v3168_v10  ;;  %v3194_v10 = vld [vmem:[#allocation9 + $0xec0] sm:$0xff] }
 0x261   : > { %3105 = vmatprep.subr.bf16.mxu1 %v10653_v18  ;;  %v10676_v18 = vcombine.low %v3167_v12, %v3169_v14  ;;  %v10681_v56 = vcombine.high %v3171_v46, %v3173_v16  ;;  %v3195_v12 = vld [vmem:[#allocation9 + $0xec8] sm:$0xff] }
 0x262   : > { %v3197_v14 = vld [vmem:[#allocation9 + $0xee8] sm:$0xff] }
 0x263   : > { %3000 = vmatpush1.bf16.msra.mxu0 %v10650_v21  ;;  %v3175_v21 = vld [vmem:[#allocation9 + $0xd88] sm:$0xff] }
 0x264   : > { %3106 = vmatpush1.bf16.msra.mxu1 %v10652_v22  ;;  %3001 = vmatprep.subr.bf16.mxu0 %v10655_v23  ;;  %v3177_v22 = vld [vmem:[#allocation9 + $0xda8] sm:$0xff]  ;;  %v10678_v23 = vcombine.low %v3170_v44, %v3172_v45  ;;  %v3200_v44 = vld [vmem:[#allocation9 + $0xf20] sm:$0xff] }
 0x265   : > { %3107 = vmatprep.subr.bf16.mxu1 %v10657_v24  ;;  %v10680_v24 = vcombine.low %v3171_v46, %v3173_v16  ;;  %v10685_v26 = vcombine.high %v3175_v21, %v3177_v22  ;;  %v3199_v45 = vld [vmem:[#allocation9 + $0xf08] sm:$0xff] }
 0x266   : > { %v3201_v46 = vld [vmem:[#allocation9 + $0xf28] sm:$0xff] }
 0x267   : > { %3002 = vmatpush1.bf16.msra.mxu0 %v10654_v29  ;;  %v3179_v29 = vld [vmem:[#allocation9 + $0xdc8] sm:$0xff] }
 0x268   : > { %3108 = vmatpush1.bf16.msra.mxu1 %v10656_v13  ;;  %3747 = vmatprep.subr.bf16.mxu0 %v10659_v31  ;;  %v3181_v13 = vld [vmem:[#allocation9 + $0xde8] sm:$0xff]  ;;  %v10682_v31 = vcombine.low %v3174_v19, %v3176_v20  ;;  %v3204_v19 = vld [vmem:[#allocation9 + $0xf60] sm:$0xff] }
 0x269   : > { %3853 = vmatprep.subr.bf16.mxu1 %v10661_v32  ;;  %v10684_v32 = vcombine.low %v3175_v21, %v3177_v22  ;;  %v10689_v34 = vcombine.high %v3179_v29, %v3181_v13  ;;  %v3203_v20 = vld [vmem:[#allocation9 + $0xf48] sm:$0xff] }
 0x26a   : > { %3020 = vmatmul.mubr.bf16.vlgmr.msra.gmra.mrb[8].mxu0 %v12687_v9  ;;  %v3205_v21 = vld [vmem:[#allocation9 + $0xf68] sm:$0xff] }
 0x26b   : > { %3126 = vmatmul.mubr.bf16.vlgmr.msra.gmra.mrb[4].mxu1 %v12687_v9  ;;  %3748 = vmatpush1.bf16.msra.mxu0 %v10658_v37  ;;  %v12740_v9 = vrot.slane %v12702_v30, 1  ;;  %v3183_v37 = vld [vmem:[#allocation9 + $0xe08] sm:$0xff] }
 0x26c   : > { %3854 = vmatpush1.bf16.msra.mxu1 %v10660_v38  ;;  %3749 = vmatprep.subr.bf16.mxu0 %v10663_v39  ;;  %v3185_v38 = vld [vmem:[#allocation9 + $0xe28] sm:$0xff]  ;;  %v10686_v39 = vcombine.low %v3178_v27, %v3180_v28  ;;  %v3208_v27 = vld [vmem:[#allocation9 + $0xfa0] sm:$0xff] }
 0x26d   : > { %3855 = vmatprep.subr.bf16.mxu1 %v10665_v43  ;;  %3029 = vmatprep.mubr.bf16.mxu0 %v13310_v0  ;;  %v3257_v30 = vsel %vm732_vm2, %v3255_v6, %v12740_v9  ;;  %v10688_v43 = vcombine.low %v3179_v29, %v3181_v13  ;;  %v10693_v48 = vcombine.high %v3183_v37, %v3185_v38  ;;  %v3207_v28 = vld [vmem:[#allocation9 + $0xf88] sm:$0xff] }
 0x26e   : > { %3135 = vmatprep.mubr.bf16.mxu1 %v13310_v0  ;;  %v3209_v29 = vld [vmem:[#allocation9 + $0xfa8] sm:$0xff] }
 0x26f   : > { %3750 = vmatpush1.bf16.msra.mxu0 %v10662_v57  ;;  %v3187_v57 = vld [vmem:[#allocation9 + $0xe48] sm:$0xff] }
 0x270   : > { %3856 = vmatpush1.bf16.msra.mxu1 %v10664_v49  ;;  %3751 = vmatprep.subr.bf16.mxu0 %v10667_v58  ;;  %v3189_v49 = vld [vmem:[#allocation9 + $0xe68] sm:$0xff]  ;;  %v10690_v58 = vcombine.low %v3182_v35, %v3184_v36  ;;  %v3212_v35 = vld [vmem:[#allocation9 + $0xfe0] sm:$0xff] }
 0x271   : > { %3857 = vmatprep.subr.bf16.mxu1 %v10669_v59  ;;  %v10692_v59 = vcombine.low %v3183_v37, %v3185_v38  ;;  %v10697_v63 = vcombine.high %v3187_v57, %v3189_v49  ;;  %v10696_v6 = vcombine.low %v3187_v57, %v3189_v49  ;;  %v3211_v36 = vld [vmem:[#allocation9 + $0xfc8] sm:$0xff] }
 0x272   : > { %3030 = vmatmul.mubr.bf16.gmra.mrb[12].mxu0 %v1514_v5  ;;  %v3213_v37 = vld [vmem:[#allocation9 + $0xfe8] sm:$0xff] }
 0x273   : > { %3136 = vmatmul.mubr.bf16.gmra.mrb[8].mxu1 %v1514_v5  ;;  %3752 = vmatpush1.bf16.msra.mxu0 %v10666_v62  ;;  %v3190_v62 = vld [vmem:[#allocation9 + $0xe80] sm:$0xff]  ;;  %v10694_v5 = vcombine.low %v3186_v51, %v3188_v55  ;;  %v3215_v55 = vld [vmem:[#allocation9 + $0x1008] sm:$0xff] }
 0x274   : > { %3779 = vmatprep.mubr.bf16.mxu0 %v3257_v30  ;;  %3858 = vmatpush1.bf16.msra.mxu1 %v10668_v4  ;;  %v3193_v4 = vld [vmem:[#allocation9 + $0xea8] sm:$0xff]  ;;  %v3216_v51 = vld [vmem:[#allocation9 + $0x1020] sm:$0xff] }
 0x275   : > { %3885 = vmatprep.mubr.bf16.mxu1 %v3257_v30  ;;  %3753 = vmatprep.subr.bf16.mxu0 %v10671_v7  ;;  %v10699_v7 = vcombine.high %v3190_v62, %v3192_v1  ;;  %v10701_v8 = vcombine.high %v3191_v2, %v3193_v4  ;;  %v10698_v30 = vcombine.low %v3190_v62, %v3192_v1  ;;  %v3217_v57 = vld [vmem:[#allocation9 + $0x1028] sm:$0xff] }
 0x276   : > { %3859 = vmatprep.subr.bf16.mxu1 %v10673_v11  ;;  %v3196_v11 = vld [vmem:[#allocation9 + $0xee0] sm:$0xff]  ;;  %v10725_v1 = vcombine.high %v3215_v55, %v3217_v57 }
 0x277   : > { %3754 = vmatpush1.bf16.msra.mxu0 %v10670_v15  ;;  %v10700_v15 = vcombine.low %v3191_v2, %v3193_v4  ;;  %v10702_v16 = vcombine.low %v3194_v10, %v3196_v11  ;;  %v3218_v2 = vld [vmem:[#allocation9 + $0x1040] sm:$0xff] }
 0x278   : > { %3860 = vmatpush1.bf16.msra.mxu1 %v10672_v40  ;;  %3755 = vmatprep.subr.bf16.mxu0 %v10675_v41  ;;  %v10703_v40 = vcombine.high %v3194_v10, %v3196_v11  ;;  %v10705_v41 = vcombine.high %v3195_v12, %v3197_v14  ;;  %v3220_v4 = vld [vmem:[#allocation9 + $0x1060] sm:$0xff]  ;;  %v10724_v11 = vcombine.low %v3215_v55, %v3217_v57 }
 0x279   : > { %3861 = vmatprep.subr.bf16.mxu1 %v10677_v42  ;;  %v3198_v42 = vld [vmem:[#allocation9 + $0xf00] sm:$0xff] }
 0x27a   : > { %v10706_v22 = vcombine.low %v3198_v42, %v3200_v44  ;;  %v3242_v57 = vld [vmem:[#allocation9 + $0x11c0] sm:$0xff] }
 0x27b   : > { %3756 = vmatpush1.bf16.msra.mxu0 %v10674_v17  ;;  %v10704_v17 = vcombine.low %v3195_v12, %v3197_v14  ;;  %v10727_v12 = vcombine.high %v3218_v2, %v3220_v4 }
 0x27c   : > { %3862 = vmatpush1.bf16.msra.mxu1 %v10676_v18  ;;  %3757 = vmatprep.subr.bf16.mxu0 %v10679_v54  ;;  %v10707_v18 = vcombine.high %v3198_v42, %v3200_v44  ;;  %v10709_v54 = vcombine.high %v3199_v45, %v3201_v46  ;;  %v10726_v42 = vcombine.low %v3218_v2, %v3220_v4  ;;  %v3979_v4 = vld [vmem:[#allocation9 + $0x1200] sm:$0xff] }
 0x27d   : > { %3863 = vmatprep.subr.bf16.mxu1 %v10681_v56  ;;  %v3202_v56 = vld [vmem:[#allocation9 + $0xf40] sm:$0xff] }
 0x27e   : > { %v10710_v13 = vcombine.low %v3202_v56, %v3204_v19 }
 0x27f   : > { %3758 = vmatpush1.bf16.msra.mxu0 %v10678_v23  ;;  %v10708_v23 = vcombine.low %v3199_v45, %v3201_v46 }
 0x280   : > { %3864 = vmatpush1.bf16.msra.mxu1 %v10680_v24  ;;  %3759 = vmatprep.subr.bf16.mxu0 %v10683_v25  ;;  %v10711_v24 = vcombine.high %v3202_v56, %v3204_v19  ;;  %v10713_v25 = vcombine.high %v3203_v20, %v3205_v21 }
 0x281   : > { %3865 = vmatprep.subr.bf16.mxu1 %v10685_v26  ;;  %v3206_v26 = vld [vmem:[#allocation9 + $0xf80] sm:$0xff] }
 0x282   : > { %v10714_v38 = vcombine.low %v3206_v26, %v3208_v27 }
 0x283   : > { %3760 = vmatpush1.bf16.msra.mxu0 %v10682_v31  ;;  %v10712_v31 = vcombine.low %v3203_v20, %v3205_v21  ;;  %v3230_v21 = vld [vmem:[#allocation9 + $0x1100] sm:$0xff] }
 0x284   : > { %3866 = vmatpush1.bf16.msra.mxu1 %v10684_v32  ;;  %3761 = vmatprep.subr.bf16.mxu0 %v10687_v33  ;;  %v10715_v32 = vcombine.high %v3206_v26, %v3208_v27  ;;  %v10717_v33 = vcombine.high %v3207_v28, %v3209_v29 }
 0x285   : > { %3867 = vmatprep.subr.bf16.mxu1 %v10689_v34  ;;  %v3210_v34 = vld [vmem:[#allocation9 + $0xfc0] sm:$0xff] }
 0x286   : > { %v10718_v49 = vcombine.low %v3210_v34, %v3212_v35 }
 0x287   : > { %3762 = vmatpush1.bf16.msra.mxu0 %v10686_v39  ;;  %v10716_v39 = vcombine.low %v3207_v28, %v3209_v29  ;;  %v3234_v29 = vld [vmem:[#allocation9 + $0x1140] sm:$0xff] }
 0x288   : > { %3868 = vmatpush1.bf16.msra.mxu1 %v10688_v43  ;;  %3763 = vmatprep.subr.bf16.mxu0 %v10691_v47  ;;  %v10719_v43 = vcombine.high %v3210_v34, %v3212_v35  ;;  %v10721_v47 = vcombine.high %v3211_v36, %v3213_v37 }
 0x289   : > { %3869 = vmatprep.subr.bf16.mxu1 %v10693_v48  ;;  %v3214_v48 = vld [vmem:[#allocation9 + $0x1000] sm:$0xff] }
 0x28b   : > { %3764 = vmatpush1.bf16.msra.mxu0 %v10690_v58  ;;  %v10720_v58 = vcombine.low %v3211_v36, %v3213_v37  ;;  %v3238_v37 = vld [vmem:[#allocation9 + $0x1180] sm:$0xff] }
 0x28c   : > { %3870 = vmatpush1.bf16.msra.mxu1 %v10692_v59  ;;  %3765 = vmatprep.subr.bf16.mxu0 %v10695_v61  ;;  %v12745_v59 = vld [vmem:[#allocation2] sm:$0xfe]  ;;  %v10723_v61 = vcombine.high %v3214_v48, %v3216_v51 }
 0x28d   : > { %3871 = vmatprep.subr.bf16.mxu1 %v10697_v63  ;;  %v12043_v63 = vld [vmem:[#allocation2 + $0x18] sm:$0x7f] }
 0x28e   : > { %v3253_v62 = vrot.slane %v12043_v63, 1 }
 0x28f   : > { %3766 = vmatpush1.bf16.msra.mxu0 %v10694_v5  ;;  %v3252_v5 = vrot.slane %v12745_v59, 1 }
 0x290   : > { %3872 = vmatpush1.bf16.msra.mxu1 %v10696_v6  ;;  %3767 = vmatprep.subr.bf16.mxu0 %v10699_v7  ;;  %v3219_v6 = vld [vmem:[#allocation9 + $0x1048] sm:$0xff] }
 0x291   : > { %3873 = vmatprep.subr.bf16.mxu1 %v10701_v8  ;;  %v3221_v7 = vld [vmem:[#allocation9 + $0x1068] sm:$0xff]  ;;  %v10722_v8 = vcombine.low %v3214_v48, %v3216_v51  ;;  %v3254_v10 = vsel %vm732_vm2, %v3252_v5, %v3253_v62  ;;  %v3981_v5 = vld [vmem:[#allocation9 + $0x1220] sm:$0xff] }
 0x292   : > { %v10729_v14 = vcombine.high %v3219_v6, %v3221_v7  ;;  %v10728_v44 = vcombine.low %v3219_v6, %v3221_v7  ;;  %v12753_v6 = vld [vmem:[#allocation2 + $0x10] sm:$0xfe]  ;;  %v3980_v7 = vld [vmem:[#allocation9 + $0x1208] sm:$0xff] }
 0x293   : > { %3768 = vmatpush1.bf16.msra.mxu0 %v10698_v30  ;;  %v3222_v30 = vld [vmem:[#allocation9 + $0x1080] sm:$0xff] }
 0x294   : > { %3874 = vmatpush1.bf16.msra.mxu1 %v10700_v15  ;;  %3769 = vmatprep.subr.bf16.mxu0 %v10703_v40  ;;  %v3224_v15 = vld [vmem:[#allocation9 + $0x10a0] sm:$0xff]  ;;  %v3223_v40 = vld [vmem:[#allocation9 + $0x1088] sm:$0xff] }
 0x295   : > { %3875 = vmatprep.subr.bf16.mxu1 %v10705_v41  ;;  %v3225_v41 = vld [vmem:[#allocation9 + $0x10a8] sm:$0xff]  ;;  %v10731_v45 = vcombine.high %v3222_v30, %v3224_v15  ;;  %v10730_v56 = vcombine.low %v3222_v30, %v3224_v15  ;;  %v3258_v30 = vrot.slane %v12753_v6, 1  ;;  %v12044_v15 = vld [vmem:[#allocation2 + $0x28] sm:$0x7f] }
 0x296   : > { %v10733_v46 = vcombine.high %v3223_v40, %v3225_v41  ;;  %v10732_v19 = vcombine.low %v3223_v40, %v3225_v41  ;;  %v3259_v40 = vrot.slane %v12044_v15, 1  ;;  %v4005_v15 = vld [vmem:[#allocation9 + $0x13a0] sm:$0xff] }
 0x297   : > { %3770 = vmatpush1.bf16.msra.mxu0 %v10702_v16  ;;  %v3226_v16 = vld [vmem:[#allocation9 + $0x10c0] sm:$0xff] }
 0x298   : > { %3876 = vmatpush1.bf16.msra.mxu1 %v10704_v17  ;;  %3771 = vmatprep.subr.bf16.mxu0 %v10707_v18  ;;  %v3228_v17 = vld [vmem:[#allocation9 + $0x10e0] sm:$0xff]  ;;  %v3227_v18 = vld [vmem:[#allocation9 + $0x10c8] sm:$0xff] }
 0x299   : > { %3877 = vmatprep.subr.bf16.mxu1 %v10709_v54  ;;  %v3229_v54 = vld [vmem:[#allocation9 + $0x10e8] sm:$0xff]  ;;  %v10735_v20 = vcombine.high %v3226_v16, %v3228_v17 }
 0x29a   : > { %v10736_v26 = vcombine.low %v3227_v18, %v3229_v54 }
 0x29b   : > { %3772 = vmatpush1.bf16.msra.mxu0 %v10706_v22  ;;  %v3232_v22 = vld [vmem:[#allocation9 + $0x1120] sm:$0xff] }
 0x29c   : > { %3878 = vmatpush1.bf16.msra.mxu1 %v10708_v23  ;;  %3773 = vmatprep.subr.bf16.mxu0 %v10711_v24  ;;  %v3231_v23 = vld [vmem:[#allocation9 + $0x1108] sm:$0xff]  ;;  %v10739_v27 = vcombine.high %v3230_v21, %v3232_v22 }
 0x29d   : > { %3879 = vmatprep.subr.bf16.mxu1 %v10713_v25  ;;  %v3233_v24 = vld [vmem:[#allocation9 + $0x1128] sm:$0xff]  ;;  %v10734_v25 = vcombine.low %v3226_v16, %v3228_v17  ;;  %v10754_v16 = vcombine.low %v3979_v4, %v3981_v5 }
 0x29e   : > { %v10741_v28 = vcombine.high %v3231_v23, %v3233_v24  ;;  %v10740_v34 = vcombine.low %v3231_v23, %v3233_v24  ;;  %v4096_v23 = vshll.u32 %v12737_v60, 16  ;;  %v3988_v24 = vld [vmem:[#allocation9 + $0x1288] sm:$0xff] }
 0x29f   : > { %3774 = vmatpush1.bf16.msra.mxu0 %v10710_v13  ;;  %v3236_v13 = vld [vmem:[#allocation9 + $0x1160] sm:$0xff] }
 0x2a0   : > { %3880 = vmatpush1.bf16.msra.mxu1 %v10712_v31  ;;  %3775 = vmatprep.subr.bf16.mxu0 %v10715_v32  ;;  %v3235_v31 = vld [vmem:[#allocation9 + $0x1148] sm:$0xff]  ;;  %v10743_v35 = vcombine.high %v3234_v29, %v3236_v13 }
 0x2a1   : > { %3881 = vmatprep.subr.bf16.mxu1 %v10717_v33  ;;  %v3237_v32 = vld [vmem:[#allocation9 + $0x1168] sm:$0xff]  ;;  %v10738_v33 = vcombine.low %v3230_v21, %v3232_v22  ;;  %v3989_v21 = vld [vmem:[#allocation9 + $0x12a0] sm:$0xff]  ;;  %v4093_v22 = vshrl.u32 %v12737_v60, 16 }
 0x2a2   : > { %v10745_v36 = vcombine.high %v3235_v31, %v3237_v32  ;;  %v10744_v48 = vcombine.low %v3235_v31, %v3237_v32  ;;  %v3991_v60 = vld [vmem:[#allocation9 + $0x12c0] sm:$0xff] }
 0x2a3   : > { %3776 = vmatpush1.bf16.msra.mxu0 %v10714_v38  ;;  %v3240_v38 = vld [vmem:[#allocation9 + $0x11a0] sm:$0xff]  ;;  %v4095_v32 = vrot.slane %v4093_v22, 1 }
 0x2a4   : > { %3882 = vmatpush1.bf16.msra.mxu1 %v10716_v39  ;;  %3777 = vmatprep.subr.bf16.mxu0 %v10719_v43  ;;  %v3239_v39 = vld [vmem:[#allocation9 + $0x1188] sm:$0xff]  ;;  %v10747_v51 = vcombine.high %v3238_v37, %v3240_v38  ;;  %v10746_v63 = vcombine.low %v3238_v37, %v3240_v38  ;;  %v4013_v22 = vld [vmem:[#allocation9 + $0x1420] sm:$0xff] }
 0x2a5   : > { %3883 = vmatprep.subr.bf16.mxu1 %v10721_v47  ;;  %v3241_v43 = vld [vmem:[#allocation9 + $0x11a8] sm:$0xff]  ;;  %v10742_v47 = vcombine.low %v3234_v29, %v3236_v13 }
 0x2a6   : > { %v10749_v55 = vcombine.high %v3239_v39, %v3241_v43  ;;  %v3992_v37 = vld [vmem:[#allocation9 + $0x12c8] sm:$0xff] }
 0x2a7   : > { %3778 = vmatpush1.bf16.msra.mxu0 %v10718_v49  ;;  %v3244_v49 = vld [vmem:[#allocation9 + $0x11e0] sm:$0xff]  ;;  %v3994_v38 = vld [vmem:[#allocation9 + $0x12e8] sm:$0xff] }
 0x2a8   : > { %3884 = vmatpush1.bf16.msra.mxu1 %v10720_v58  ;;  %3800 = vmatprep.subr.bf16.mxu0 %v10723_v61  ;;  %v3243_v58 = vld [vmem:[#allocation9 + $0x11c8] sm:$0xff] }
 0x2a9   : > { %3906 = vmatprep.subr.bf16.mxu1 %v10725_v1  ;;  %v3245_v61 = vld [vmem:[#allocation9 + $0x11e8] sm:$0xff]  ;;  %v10751_v1 = vcombine.high %v3242_v57, %v3244_v49 }
 0x2aa   : > { %3780 = vmatmul.mubr.bf16.vlgmr.msra.gmra.mrb[8].mxu0 %v3254_v10  ;;  %v10753_v2 = vcombine.high %v3243_v58, %v3245_v61 }
 0x2ab   : > { %3886 = vmatmul.mubr.bf16.vlgmr.msra.gmra.mrb[4].mxu1 %v3254_v10  ;;  %3789 = vmatprep.mubr.bf16.mxu0 %v12740_v9  ;;  %v10750_v10 = vcombine.low %v3242_v57, %v3244_v49  ;;  %v3996_v57 = vld [vmem:[#allocation9 + $0x1308] sm:$0xff] }
 0x2ac   : > { %3801 = vmatpush1.bf16.msra.mxu0 %v10722_v8  ;;  %3895 = vmatprep.mubr.bf16.mxu1 %v12740_v9  ;;  %v10737_v9 = vcombine.high %v3227_v18, %v3229_v54  ;;  %v3982_v8 = vld [vmem:[#allocation9 + $0x1228] sm:$0xff] }
 0x2ad   : > { %3907 = vmatpush1.bf16.msra.mxu1 %v10724_v11  ;;  %3802 = vmatprep.subr.bf16.mxu0 %v10727_v12  ;;  %v10752_v11 = vcombine.low %v3243_v58, %v3245_v61  ;;  %v10755_v12 = vcombine.high %v3979_v4, %v3981_v5  ;;  %v10757_v41 = vcombine.high %v3980_v7, %v3982_v8  ;;  %v3998_v49 = vld [vmem:[#allocation9 + $0x1328] sm:$0xff]  ;;  %v4001_v4 = vld [vmem:[#allocation9 + $0x1360] sm:$0xff] }
 0x2ae   : > { %3908 = vmatprep.subr.bf16.mxu1 %v10729_v14  ;;  %v12755_v14 = vld [vmem:[#allocation2 + $0x20] sm:$0xff]  ;;  %v10756_v54 = vcombine.low %v3980_v7, %v3982_v8 }
 0x2af   : > { %v4101_v17 = vshrl.u32 %v12755_v14, 16  ;;  %v4104_v18 = vshll.u32 %v12755_v14, 16  ;;  %v4000_v5 = vld [vmem:[#allocation9 + $0x1348] sm:$0xff] }
 0x2b0   : > { %3803 = vmatpush1.bf16.msra.mxu0 %v10726_v42  ;;  %v3983_v42 = vld [vmem:[#allocation9 + $0x1240] sm:$0xff]  ;;  %v4002_v7 = vld [vmem:[#allocation9 + $0x1368] sm:$0xff] }
 0x2b1   : > { %3909 = vmatpush1.bf16.msra.mxu1 %v10728_v44  ;;  %3804 = vmatprep.subr.bf16.mxu0 %v10731_v45  ;;  %v3985_v44 = vld [vmem:[#allocation9 + $0x1260] sm:$0xff]  ;;  %v3984_v45 = vld [vmem:[#allocation9 + $0x1248] sm:$0xff] }
 0x2b2   : > { %3790 = vmatmul.mubr.bf16.gmra.mrb[12].mxu0 %v3253_v62  ;;  %3910 = vmatprep.subr.bf16.mxu1 %v10733_v46  ;;  %v3986_v46 = vld [vmem:[#allocation9 + $0x1268] sm:$0xff] }
 0x2b3   : > { %3896 = vmatmul.mubr.bf16.gmra.mrb[8].mxu1 %v3253_v62  ;;  %3832 = vmatprep.mubr.bf16.mxu0 %v13310_v0  ;;  %v10748_v62 = vcombine.low %v3239_v39, %v3241_v43  ;;  %v10760_v29 = vcombine.low %v3984_v45, %v3986_v46 }
 0x2b4   : > { %3805 = vmatpush1.bf16.msra.mxu0 %v10730_v56  ;;  %3938 = vmatprep.mubr.bf16.mxu1 %v13310_v0  ;;  %v10759_v56 = vcombine.high %v3983_v42, %v3985_v44 }
 0x2b5   : > { %3911 = vmatpush1.bf16.msra.mxu1 %v10732_v19  ;;  %3806 = vmatprep.subr.bf16.mxu0 %v10735_v20  ;;  %v3260_v19 = vsel %vm732_vm2, %v3258_v30, %v3259_v40  ;;  %v10761_v20 = vcombine.high %v3984_v45, %v3986_v46  ;;  %v4003_v30 = vld [vmem:[#allocation9 + $0x1380] sm:$0xff] }
 0x2b6   : > { %3912 = vmatprep.subr.bf16.mxu1 %v10737_v9  ;;  %v3987_v9 = vld [vmem:[#allocation9 + $0x1280] sm:$0xff]  ;;  %v10779_v45 = vcombine.high %v4003_v30, %v4005_v15 }
 0x2b7   : > { %v10763_v13 = vcombine.high %v3987_v9, %v3989_v21 }
 0x2b8   : > { %3807 = vmatpush1.bf16.msra.mxu0 %v10734_v25  ;;  %v3990_v25 = vld [vmem:[#allocation9 + $0x12a8] sm:$0xff] }
 0x2b9   : > { %3913 = vmatpush1.bf16.msra.mxu1 %v10736_v26  ;;  %3808 = vmatprep.subr.bf16.mxu0 %v10739_v27  ;;  %v10758_v26 = vcombine.low %v3983_v42, %v3985_v44  ;;  %v4103_v27 = vrot.slane %v4101_v17, 1  ;;  %v10765_v31 = vcombine.high %v3988_v24, %v3990_v25  ;;  %v10764_v39 = vcombine.low %v3988_v24, %v3990_v25  ;;  %v4009_v17 = vld [vmem:[#allocation9 + $0x13e0] sm:$0xff]  ;;  %v4014_v24 = vld [vmem:[#allocation9 + $0x1428] sm:$0xff] }
 0x2ba   : > { %3914 = vmatprep.subr.bf16.mxu1 %v10741_v28  ;;  %v4106_v28 = vrot.slane %v4104_v18, 2  ;;  %v10776_v44 = vcombine.low %v4000_v5, %v4002_v7  ;;  %v4008_v18 = vld [vmem:[#allocation9 + $0x13c8] sm:$0xff] }
 0x2bc   : > { %3809 = vmatpush1.bf16.msra.mxu0 %v10738_v33  ;;  %v4098_v33 = vrot.slane %v4096_v23, 2  ;;  %v4012_v23 = vld [vmem:[#allocation9 + $0x1408] sm:$0xff] }
 0x2bd   : > { %3915 = vmatpush1.bf16.msra.mxu1 %v10740_v34  ;;  %3810 = vmatprep.subr.bf16.mxu0 %v10743_v35  ;;  %v3993_v34 = vld [vmem:[#allocation9 + $0x12e0] sm:$0xff]  ;;  %v10762_v35 = vcombine.low %v3987_v9, %v3989_v21 }
 0x2be   : > { %3916 = vmatprep.subr.bf16.mxu1 %v10745_v36  ;;  %v12765_v36 = vor.u32 %v4106_v28, %v4103_v27  ;;  %v4099_v43 = vor.u32 %v4098_v33, %v4095_v32  ;;  %v10766_v61 = vcombine.low %v3991_v60, %v3993_v34  ;;  %v4011_v21 = vld [vmem:[#allocation9 + $0x1400] sm:$0xff]  ;;  %v10789_v28 = vcombine.high %v4012_v23, %v4014_v24  ;;  %v4018_v32 = vld [vmem:[#allocation9 + $0x1468] sm:$0xff] }
 0x2bf   : > { %v10787_v27 = vcombine.high %v4011_v21, %v4013_v22  ;;  %v10786_v33 = vcombine.low %v4011_v21, %v4013_v22 }
 0x2c0   : > { %3811 = vmatpush1.bf16.msra.mxu0 %v10742_v47  ;;  %v10767_v47 = vcombine.high %v3991_v60, %v3993_v34  ;;  %v4108_v58 = vsel %vm941_vm3, %v4099_v43, %v12765_v36  ;;  %v10788_v60 = vcombine.low %v4012_v23, %v4014_v24  ;;  %v4022_v43 = vld [vmem:[#allocation9 + $0x14a8] sm:$0xff]  ;;  %v4039_v23 = vld [vmem:[#allocation9 + $0x15c0] sm:$0xff] }
 0x2c1   : > { %3917 = vmatpush1.bf16.msra.mxu1 %v10744_v48  ;;  %3812 = vmatprep.subr.bf16.mxu0 %v10747_v51  ;;  %v3995_v48 = vld [vmem:[#allocation9 + $0x1300] sm:$0xff] }
 0x2c2   : > { %3918 = vmatprep.subr.bf16.mxu1 %v10749_v55  ;;  %v3997_v51 = vld [vmem:[#allocation9 + $0x1320] sm:$0xff]  ;;  %v10769_v55 = vcombine.high %v3992_v37, %v3994_v38 }
 0x2c3   : > { %v10770_v8 = vcombine.low %v3995_v48, %v3997_v51  ;;  %v4041_v24 = vld [vmem:[#allocation9 + $0x15e0] sm:$0xff] }
 0x2c4   : > { %3813 = vmatpush1.bf16.msra.mxu0 %v10746_v63  ;;  %v10768_v63 = vcombine.low %v3992_v37, %v3994_v38  ;;  %v4019_v37 = vld [vmem:[#allocation9 + $0x1480] sm:$0xff] }
 0x2c5   : > { %3919 = vmatpush1.bf16.msra.mxu1 %v10748_v62  ;;  %3814 = vmatprep.subr.bf16.mxu0 %v10751_v1  ;;  %v10771_v62 = vcombine.high %v3995_v48, %v3997_v51  ;;  %v10773_v1 = vcombine.high %v3996_v57, %v3998_v49  ;;  %v4021_v38 = vld [vmem:[#allocation9 + $0x14a0] sm:$0xff] }
 0x2c6   : > { %3920 = vmatprep.subr.bf16.mxu1 %v10753_v2  ;;  %v3999_v2 = vld [vmem:[#allocation9 + $0x1340] sm:$0xff]  ;;  %v10795_v51 = vcombine.high %v4019_v37, %v4021_v38 }
 0x2c7   : > { %v10774_v42 = vcombine.low %v3999_v2, %v4001_v4 }
 0x2c8   : > { %3815 = vmatpush1.bf16.msra.mxu0 %v10750_v10  ;;  %v10772_v10 = vcombine.low %v3996_v57, %v3998_v49  ;;  %v4023_v57 = vld [vmem:[#allocation9 + $0x14c0] sm:$0xff] }
 0x2c9   : > { %3921 = vmatpush1.bf16.msra.mxu1 %v10752_v11  ;;  %4612 = vmatprep.subr.bf16.mxu0 %v10755_v12  ;;  %v10775_v11 = vcombine.high %v3999_v2, %v4001_v4  ;;  %v10777_v12 = vcombine.high %v4000_v5, %v4002_v7  ;;  %v4025_v49 = vld [vmem:[#allocation9 + $0x14e0] sm:$0xff]  ;;  %v4028_v7 = vld [vmem:[#allocation9 + $0x1508] sm:$0xff] }
 0x2ca   : > { %4718 = vmatprep.subr.bf16.mxu1 %v10757_v41  ;;  %v4006_v41 = vld [vmem:[#allocation9 + $0x13a8] sm:$0xff]  ;;  %v4027_v4 = vld [vmem:[#allocation9 + $0x1500] sm:$0xff] }
 0x2cb   : > { %3833 = vmatmul.mubr.bf16.vlgmr.msra.gmra.mrb[8].mxu0 %v3260_v19  ;;  %v4029_v5 = vld [vmem:[#allocation9 + $0x1520] sm:$0xff] }
 0x2cc   : > { %3939 = vmatmul.mubr.bf16.vlgmr.msra.gmra.mrb[4].mxu1 %v3260_v19  ;;  %4613 = vmatpush1.bf16.msra.mxu0 %v10754_v16  ;;  %v4007_v16 = vld [vmem:[#allocation9 + $0x13c0] sm:$0xff] }
 0x2cd   : > { %4719 = vmatpush1.bf16.msra.mxu1 %v10756_v54  ;;  %4614 = vmatprep.subr.bf16.mxu0 %v10759_v56  ;;  %v4010_v54 = vld [vmem:[#allocation9 + $0x13e8] sm:$0xff]  ;;  %v10778_v56 = vcombine.low %v4003_v30, %v4005_v15  ;;  %v10782_v25 = vcombine.low %v4007_v16, %v4009_v17  ;;  %v4031_v15 = vld [vmem:[#allocation9 + $0x1540] sm:$0xff] }
 0x2ce   : > { %4720 = vmatprep.subr.bf16.mxu1 %v10761_v20  ;;  %3842 = vmatprep.mubr.bf16.mxu0 %v13310_v0  ;;  %v10783_v20 = vcombine.high %v4007_v16, %v4009_v17  ;;  %v10785_v9 = vcombine.high %v4008_v18, %v4010_v54  ;;  %v4035_v17 = vld [vmem:[#allocation9 + $0x1580] sm:$0xff] }
 0x2cf   : > { %3948 = vmatprep.mubr.bf16.mxu1 %v13310_v0 }
 0x2d0   : > { %4615 = vmatpush1.bf16.msra.mxu0 %v10758_v26  ;;  %v10784_v26 = vcombine.low %v4008_v18, %v4010_v54  ;;  %v4037_v18 = vld [vmem:[#allocation9 + $0x15a0] sm:$0xff]  ;;  %v4036_v54 = vld [vmem:[#allocation9 + $0x1588] sm:$0xff] }
 0x2d1   : > { %4721 = vmatpush1.bf16.msra.mxu1 %v10760_v29  ;;  %4616 = vmatprep.subr.bf16.mxu0 %v10763_v13  ;;  %v4015_v29 = vld [vmem:[#allocation9 + $0x1440] sm:$0xff]  ;;  %v10811_v21 = vcombine.high %v4035_v17, %v4037_v18 }
 0x2d2   : > { %4722 = vmatprep.subr.bf16.mxu1 %v10765_v31  ;;  %v4017_v13 = vld [vmem:[#allocation9 + $0x1460] sm:$0xff]  ;;  %v4016_v31 = vld [vmem:[#allocation9 + $0x1448] sm:$0xff] }
 0x2d3   : > { %3843 = vmatmul.mubr.bf16.gmra.mrb[12].mxu0 %v3259_v40  ;;  %v10791_v34 = vcombine.high %v4015_v29, %v4017_v13  ;;  %v10792_v48 = vcombine.low %v4016_v31, %v4018_v32 }
 0x2d4   : > { %3949 = vmatmul.mubr.bf16.gmra.mrb[8].mxu1 %v3259_v40  ;;  %4617 = vmatpush1.bf16.msra.mxu0 %v10762_v35  ;;  %v4004_v40 = vld [vmem:[#allocation9 + $0x1388] sm:$0xff]  ;;  %v10793_v35 = vcombine.high %v4016_v31, %v4018_v32  ;;  %v4079_v31 = vshll.u32 %v12745_v59, 16 }
 0x2d5   : > { %4644 = vmatprep.mubr.bf16.mxu0 %v4108_v58  ;;  %4723 = vmatpush1.bf16.msra.mxu1 %v10764_v39  ;;  %v10781_v46 = vcombine.high %v4004_v40, %v4006_v41  ;;  %v10780_v19 = vcombine.low %v4004_v40, %v4006_v41  ;;  %v4020_v39 = vld [vmem:[#allocation9 + $0x1488] sm:$0xff]  ;;  %v4033_v40 = vld [vmem:[#allocation9 + $0x1560] sm:$0xff] }
 0x2d6   : > { %4750 = vmatprep.mubr.bf16.mxu1 %v4108_v58  ;;  %4618 = vmatprep.subr.bf16.mxu0 %v10767_v47  ;;  %v10790_v47 = vcombine.low %v4015_v29, %v4017_v13  ;;  %v4024_v58 = vld [vmem:[#allocation9 + $0x14c8] sm:$0xff]  ;;  %v10810_v29 = vcombine.low %v4035_v17, %v4037_v18  ;;  %v4076_v13 = vshrl.u32 %v12745_v59, 16 }
 0x2d7   : > { %4724 = vmatprep.subr.bf16.mxu1 %v10769_v55  ;;  %v10797_v55 = vcombine.high %v4020_v39, %v4022_v43  ;;  %v4032_v41 = vld [vmem:[#allocation9 + $0x1548] sm:$0xff] }
 0x2d8   : > { %4619 = vmatpush1.bf16.msra.mxu0 %v10766_v61  ;;  %v4026_v61 = vld [vmem:[#allocation9 + $0x14e8] sm:$0xff] }
 0x2d9   : > { %4725 = vmatpush1.bf16.msra.mxu1 %v10768_v63  ;;  %4620 = vmatprep.subr.bf16.mxu0 %v10771_v62  ;;  %v10794_v63 = vcombine.low %v4019_v37, %v4021_v38  ;;  %v10796_v62 = vcombine.low %v4020_v39, %v4022_v43  ;;  %v10801_v2 = vcombine.high %v4024_v58, %v4026_v61  ;;  %v4043_v37 = vld [vmem:[#allocation9 + $0x1600] sm:$0xff]  ;;  %v4044_v39 = vld [vmem:[#allocation9 + $0x1608] sm:$0xff] }
 0x2da   : > { %4726 = vmatprep.subr.bf16.mxu1 %v10773_v1  ;;  %v10799_v1 = vcombine.high %v4023_v57, %v4025_v49  ;;  %v4045_v38 = vld [vmem:[#allocation9 + $0x1620] sm:$0xff]  ;;  %v4046_v43 = vld [vmem:[#allocation9 + $0x1628] sm:$0xff] }
 0x2db   : > { %v10819_v59 = vcombine.high %v4043_v37, %v4045_v38 }
 0x2dc   : > { %4621 = vmatpush1.bf16.msra.mxu0 %v10770_v8  ;;  %v4030_v8 = vld [vmem:[#allocation9 + $0x1528] sm:$0xff] }
 0x2dd   : > { %4727 = vmatpush1.bf16.msra.mxu1 %v10772_v10  ;;  %4622 = vmatprep.subr.bf16.mxu0 %v10775_v11  ;;  %v10798_v10 = vcombine.low %v4023_v57, %v4025_v49  ;;  %v10800_v11 = vcombine.low %v4024_v58, %v4026_v61  ;;  %v10805_v30 = vcombine.high %v4028_v7, %v4030_v8  ;;  %v4047_v58 = vld [vmem:[#allocation9 + $0x1640] sm:$0xff] }
 0x2de   : > { %4728 = vmatprep.subr.bf16.mxu1 %v10777_v12  ;;  %v10803_v12 = vcombine.high %v4027_v4, %v4029_v5  ;;  %v10821_v49 = vcombine.high %v4044_v39, %v4046_v43  ;;  %v4049_v61 = vld [vmem:[#allocation9 + $0x1660] sm:$0xff] }
 0x2e0   : > { %4623 = vmatpush1.bf16.msra.mxu0 %v10774_v42  ;;  %v4034_v42 = vld [vmem:[#allocation9 + $0x1568] sm:$0xff] }
 0x2e1   : > { %4729 = vmatpush1.bf16.msra.mxu1 %v10776_v44  ;;  %4624 = vmatprep.subr.bf16.mxu0 %v10779_v45  ;;  %v10802_v44 = vcombine.low %v4027_v4, %v4029_v5  ;;  %v10804_v45 = vcombine.low %v4028_v7, %v4030_v8  ;;  %v10809_v16 = vcombine.high %v4032_v41, %v4034_v42 }
 0x2e2   : > { %4730 = vmatprep.subr.bf16.mxu1 %v10781_v46  ;;  %v10807_v46 = vcombine.high %v4031_v15, %v4033_v40  ;;  %v10820_v5 = vcombine.low %v4044_v39, %v4046_v43  ;;  %v10823_v7 = vcombine.high %v4047_v58, %v4049_v61 }
 0x2e4   : > { %4625 = vmatpush1.bf16.msra.mxu0 %v10778_v56  ;;  %v4038_v56 = vld [vmem:[#allocation9 + $0x15a8] sm:$0xff] }
 0x2e5   : > { %4731 = vmatpush1.bf16.msra.mxu1 %v10780_v19  ;;  %4626 = vmatprep.subr.bf16.mxu0 %v10783_v20  ;;  %v12769_v19 = vld [vmem:[#allocation2 + $0x18] sm:$0xff]  ;;  %v10806_v20 = vcombine.low %v4031_v15, %v4033_v40  ;;  %v10813_v22 = vcombine.high %v4036_v54, %v4038_v56  ;;  %v10812_v32 = vcombine.low %v4036_v54, %v4038_v56 }
 0x2e6   : > { %4732 = vmatprep.subr.bf16.mxu1 %v10785_v9  ;;  %v10808_v9 = vcombine.low %v4032_v41, %v4034_v42  ;;  %v10822_v15 = vcombine.low %v4047_v58, %v4049_v61  ;;  %v4059_v56 = vld [vmem:[#allocation9 + $0x1700] sm:$0xff]  ;;  %v4072_v61 = vld [vmem:[#allocation9 + $0x17c8] sm:$0xff] }
 0x2e8   : > { %4627 = vmatpush1.bf16.msra.mxu0 %v10782_v25  ;;  %v4084_v25 = vshrl.u32 %v12769_v19, 16 }
 0x2e9   : > { %4733 = vmatpush1.bf16.msra.mxu1 %v10784_v26  ;;  %4628 = vmatprep.subr.bf16.mxu0 %v10787_v27  ;;  %v4087_v26 = vshll.u32 %v12769_v19, 16  ;;  %v4040_v27 = vld [vmem:[#allocation9 + $0x15c8] sm:$0xff] }
 0x2ea   : > { %4734 = vmatprep.subr.bf16.mxu1 %v10789_v28  ;;  %v4042_v28 = vld [vmem:[#allocation9 + $0x15e8] sm:$0xff] }
 0x2ec   : > { %4629 = vmatpush1.bf16.msra.mxu0 %v10786_v33  ;;  %v10815_v33 = vcombine.high %v4039_v23, %v4041_v24 }
 0x2ed   : > { %4735 = vmatpush1.bf16.msra.mxu1 %v10788_v60  ;;  %4630 = vmatprep.subr.bf16.mxu0 %v10791_v34  ;;  %v10817_v60 = vcombine.high %v4040_v27, %v4042_v28  ;;  %v4086_v34 = vrot.slane %v4084_v25, 1 }
 0x2ee   : > { %4736 = vmatprep.subr.bf16.mxu1 %v10793_v35  ;;  %v4089_v35 = vrot.slane %v4087_v26, 2  ;;  %v4063_v26 = vld [vmem:[#allocation9 + $0x1740] sm:$0xff] }
 0x2f0   : > { %4631 = vmatpush1.bf16.msra.mxu0 %v10790_v47  ;;  %v10814_v47 = vcombine.low %v4039_v23, %v4041_v24  ;;  %v4090_v57 = vor.u32 %v4089_v35, %v4086_v34  ;;  %v4069_v34 = vld [vmem:[#allocation9 + $0x17a0] sm:$0xff]  ;;  %v4068_v35 = vld [vmem:[#allocation9 + $0x1788] sm:$0xff] }
 0x2f1   : > { %4737 = vmatpush1.bf16.msra.mxu1 %v10792_v48  ;;  %4632 = vmatprep.subr.bf16.mxu0 %v10795_v51  ;;  %v4078_v48 = vrot.slane %v4076_v13, 1  ;;  %v4081_v51 = vrot.slane %v4079_v31, 2 }
 0x2f2   : > { %4738 = vmatprep.subr.bf16.mxu1 %v10797_v55  ;;  %v10816_v55 = vcombine.low %v4040_v27, %v4042_v28  ;;  %v4065_v27 = vld [vmem:[#allocation9 + $0x1760] sm:$0xff]  ;;  %v4064_v28 = vld [vmem:[#allocation9 + $0x1748] sm:$0xff] }
 0x2f3   : > { %v10838_v39 = vcombine.low %v4063_v26, %v4065_v27 }
 0x2f4   : > { %4633 = vmatpush1.bf16.msra.mxu0 %v10794_v63  ;;  %v4082_v63 = vor.u32 %v4081_v51, %v4078_v48  ;;  %v4110_v48 = vshrl.u32 %v12753_v6, 16 }
 0x2f5   : > { %4739 = vmatpush1.bf16.msra.mxu1 %v10796_v62  ;;  %4634 = vmatprep.subr.bf16.mxu0 %v10799_v1  ;;  %v4048_v62 = vld [vmem:[#allocation9 + $0x1648] sm:$0xff] }
 0x2f6   : > { %4740 = vmatprep.subr.bf16.mxu1 %v10801_v2  ;;  %v4050_v1 = vld [vmem:[#allocation9 + $0x1668] sm:$0xff]  ;;  %v10818_v2 = vcombine.low %v4043_v37, %v4045_v38  ;;  %v4091_v4 = vsel %vm941_vm3, %v4082_v63, %v4090_v57  ;;  %v12780_v38 = vld [vmem:[#allocation2 + $0x28] sm:$0xff] }
 0x2f7   : > { %v10825_v8 = vcombine.high %v4048_v62, %v4050_v1  ;;  %v10824_v40 = vcombine.low %v4048_v62, %v4050_v1  ;;  %v4070_v37 = vld [vmem:[#allocation9 + $0x17a8] sm:$0xff]  ;;  %v4121_v58 = vshll.u32 %v12780_v38, 16 }
 0x2f8   : > { %4635 = vmatpush1.bf16.msra.mxu0 %v10798_v10  ;;  %v4051_v10 = vld [vmem:[#allocation9 + $0x1680] sm:$0xff]  ;;  %v10845_v51 = vcombine.high %v4068_v35, %v4070_v37  ;;  %v4074_v63 = vld [vmem:[#allocation9 + $0x17e8] sm:$0xff]  ;;  %v10844_v1 = vcombine.low %v4068_v35, %v4070_v37 }
 0x2f9   : > { %4741 = vmatpush1.bf16.msra.mxu1 %v10800_v11  ;;  %4636 = vmatprep.subr.bf16.mxu0 %v10803_v12  ;;  %v4053_v11 = vld [vmem:[#allocation9 + $0x16a0] sm:$0xff]  ;;  %v4052_v12 = vld [vmem:[#allocation9 + $0x1688] sm:$0xff] }
 0x2fa   : > { %4742 = vmatprep.subr.bf16.mxu1 %v10805_v30  ;;  %v4054_v30 = vld [vmem:[#allocation9 + $0x16a8] sm:$0xff]  ;;  %v10827_v41 = vcombine.high %v4051_v10, %v4053_v11  ;;  %v10826_v17 = vcombine.low %v4051_v10, %v4053_v11  ;;  %v4123_v10 = vrot.slane %v4121_v58, 2  ;;  %v4844_v11 = vld [vmem:[#allocation9 + $0x1800] sm:$0xff] }
 0x2fb   : > { %v10829_v42 = vcombine.high %v4052_v12, %v4054_v30  ;;  %v10828_v18 = vcombine.low %v4052_v12, %v4054_v30  ;;  %v4845_v12 = vld [vmem:[#allocation9 + $0x1808] sm:$0xff] }
 0x2fc   : > { %4637 = vmatpush1.bf16.msra.mxu0 %v10802_v44  ;;  %v4055_v44 = vld [vmem:[#allocation9 + $0x16c0] sm:$0xff]  ;;  %v4847_v30 = vld [vmem:[#allocation9 + $0x1828] sm:$0xff] }
 0x2fd   : > { %4743 = vmatpush1.bf16.msra.mxu1 %v10804_v45  ;;  %4638 = vmatprep.subr.bf16.mxu0 %v10807_v46  ;;  %v4057_v45 = vld [vmem:[#allocation9 + $0x16e0] sm:$0xff]  ;;  %v4056_v46 = vld [vmem:[#allocation9 + $0x16c8] sm:$0xff] }
 0x2fe   : > { %4744 = vmatprep.subr.bf16.mxu1 %v10809_v16  ;;  %v4058_v16 = vld [vmem:[#allocation9 + $0x16e8] sm:$0xff]  ;;  %v10831_v54 = vcombine.high %v4055_v44, %v4057_v45 }
 0x2ff   : > { %v10832_v23 = vcombine.low %v4056_v46, %v4058_v16 }
 0x300   : > { %4639 = vmatpush1.bf16.msra.mxu0 %v10806_v20  ;;  %v4061_v20 = vld [vmem:[#allocation9 + $0x1720] sm:$0xff] }
 0x301   : > { %4745 = vmatpush1.bf16.msra.mxu1 %v10808_v9  ;;  %4640 = vmatprep.subr.bf16.mxu0 %v10811_v21  ;;  %v4060_v9 = vld [vmem:[#allocation9 + $0x1708] sm:$0xff]  ;;  %v10835_v24 = vcombine.high %v4059_v56, %v4061_v20  ;;  %v10834_v13 = vcombine.low %v4059_v56, %v4061_v20 }
 0x302   : > { %4746 = vmatprep.subr.bf16.mxu1 %v10813_v22  ;;  %v4062_v21 = vld [vmem:[#allocation9 + $0x1728] sm:$0xff]  ;;  %v10830_v22 = vcombine.low %v4055_v44, %v4057_v45  ;;  %v10853_v45 = vcombine.high %v4845_v12, %v4847_v30 }
 0x303   : > { %v10837_v25 = vcombine.high %v4060_v9, %v4062_v21  ;;  %v10836_v31 = vcombine.low %v4060_v9, %v4062_v21  ;;  %v4852_v21 = vld [vmem:[#allocation9 + $0x1880] sm:$0xff] }
 0x304   : > { %4641 = vmatpush1.bf16.msra.mxu0 %v10810_v29  ;;  %v4066_v29 = vld [vmem:[#allocation9 + $0x1768] sm:$0xff] }
 0x305   : > { %4747 = vmatpush1.bf16.msra.mxu1 %v10812_v32  ;;  %4642 = vmatprep.subr.bf16.mxu0 %v10815_v33  ;;  %v10839_v32 = vcombine.high %v4063_v26, %v4065_v27  ;;  %v10841_v33 = vcombine.high %v4064_v28, %v4066_v29  ;;  %v10840_v43 = vcombine.low %v4064_v28, %v4066_v29  ;;  %v4841_v29 = vld [vmem:[#allocation2 + $0x8] sm:$0xfc] }
 0x306   : > { %4748 = vmatprep.subr.bf16.mxu1 %v10817_v60  ;;  %v4067_v60 = vld [vmem:[#allocation9 + $0x1780] sm:$0xff]  ;;  %v4949_v37 = vrot.slane %v4841_v29, 2 }
 0x307   : > { %v10842_v62 = vcombine.low %v4067_v60, %v4069_v34 }
 0x308   : > { %4643 = vmatpush1.bf16.msra.mxu0 %v10814_v47  ;;  %v10843_v47 = vcombine.high %v4067_v60, %v4069_v34  ;;  %v4857_v60 = vld [vmem:[#allocation9 + $0x18c8] sm:$0xff] }
 0x309   : > { %4749 = vmatpush1.bf16.msra.mxu1 %v10816_v55  ;;  %4665 = vmatprep.subr.bf16.mxu0 %v10819_v59  ;;  %v4071_v55 = vld [vmem:[#allocation9 + $0x17c0] sm:$0xff]  ;;  %v4859_v34 = vld [vmem:[#allocation9 + $0x18e8] sm:$0xff] }
 0x30a   : > { %4771 = vmatprep.subr.bf16.mxu1 %v10821_v49  ;;  %v4073_v59 = vld [vmem:[#allocation9 + $0x17e0] sm:$0xff]  ;;  %v4118_v49 = vshrl.u32 %v12780_v38, 16 }
 0x30b   : > { %4645 = vmatmul.mubr.bf16.vlgmr.msra.gmra.mrb[8].mxu0 %v4091_v4 }
 0x30c   : > { %4751 = vmatmul.mubr.bf16.vlgmr.msra.gmra.mrb[4].mxu1 %v4091_v4  ;;  %4654 = vmatprep.mubr.bf16.mxu0 %v12765_v36  ;;  %v4112_v4 = vrot.slane %v4110_v48, 1  ;;  %v10865_v48 = vcombine.high %v4857_v60, %v4859_v34 }
 0x30d   : > { %4666 = vmatpush1.bf16.msra.mxu0 %v10818_v2  ;;  %4760 = vmatprep.mubr.bf16.mxu1 %v12765_v36  ;;  %v10833_v36 = vcombine.high %v4056_v46, %v4058_v16  ;;  %v10847_v2 = vcombine.high %v4071_v55, %v4073_v59  ;;  %v4848_v46 = vld [vmem:[#allocation9 + $0x1840] sm:$0xff] }
 0x30e   : > { %4772 = vmatpush1.bf16.msra.mxu1 %v10820_v5  ;;  %4667 = vmatprep.subr.bf16.mxu0 %v10823_v7  ;;  %v10849_v5 = vcombine.high %v4072_v61, %v4074_v63  ;;  %v4850_v16 = vld [vmem:[#allocation9 + $0x1860] sm:$0xff] }
 0x30f   : > { %4773 = vmatprep.subr.bf16.mxu1 %v10825_v8  ;;  %v4120_v8 = vrot.slane %v4118_v49, 1  ;;  %v10855_v56 = vcombine.high %v4848_v46, %v4850_v16 }
 0x311   : > { %4668 = vmatpush1.bf16.msra.mxu0 %v10822_v15  ;;  %v10846_v15 = vcombine.low %v4071_v55, %v4073_v59  ;;  %v4124_v44 = vor.u32 %v4123_v10, %v4120_v8  ;;  %v4863_v55 = vld [vmem:[#allocation9 + $0x1928] sm:$0xff]  ;;  %v4868_v8 = vld [vmem:[#allocation9 + $0x1980] sm:$0xff] }
 0x312   : > { %4774 = vmatpush1.bf16.msra.mxu1 %v10824_v40  ;;  %4669 = vmatprep.subr.bf16.mxu0 %v10827_v41  ;;  %v10848_v40 = vcombine.low %v4072_v61, %v4074_v63  ;;  %v4864_v61 = vld [vmem:[#allocation9 + $0x1940] sm:$0xff] }
 0x313   : > { %4655 = vmatmul.mubr.bf16.gmra.mrb[12].mxu0 %v4090_v57  ;;  %4775 = vmatprep.subr.bf16.mxu1 %v10829_v42  ;;  %v4866_v63 = vld [vmem:[#allocation9 + $0x1960] sm:$0xff] }
 0x314   : > { %4761 = vmatmul.mubr.bf16.gmra.mrb[8].mxu1 %v4090_v57  ;;  %4697 = vmatprep.mubr.bf16.mxu0 %v13310_v0  ;;  %v4113_v57 = vshll.u32 %v12753_v6, 16  ;;  %v4846_v6 = vld [vmem:[#allocation9 + $0x1820] sm:$0xff] }
 0x315   : > { %4670 = vmatpush1.bf16.msra.mxu0 %v10826_v17  ;;  %4803 = vmatprep.mubr.bf16.mxu1 %v13310_v0  ;;  %v10851_v41 = vcombine.high %v4844_v11, %v4846_v6  ;;  %v4849_v17 = vld [vmem:[#allocation9 + $0x1848] sm:$0xff]  ;;  %v4870_v10 = vld [vmem:[#allocation9 + $0x19a0] sm:$0xff] }
 0x316   : > { %4776 = vmatpush1.bf16.msra.mxu1 %v10828_v18  ;;  %4671 = vmatprep.subr.bf16.mxu0 %v10831_v54  ;;  %v4115_v7 = vrot.slane %v4113_v57, 2  ;;  %v4851_v18 = vld [vmem:[#allocation9 + $0x1868] sm:$0xff]  ;;  %v10850_v54 = vcombine.low %v4844_v11, %v4846_v6  ;;  %v10864_v57 = vcombine.low %v4857_v60, %v4859_v34  ;;  %v4886_v60 = vld [vmem:[#allocation9 + $0x1aa0] sm:$0xff] }
 0x317   : > { %4777 = vmatprep.subr.bf16.mxu1 %v10833_v36  ;;  %v10852_v36 = vcombine.low %v4845_v12, %v4847_v30  ;;  %v10857_v9 = vcombine.high %v4849_v17, %v4851_v18  ;;  %v10856_v26 = vcombine.low %v4849_v17, %v4851_v18  ;;  %v4869_v11 = vld [vmem:[#allocation9 + $0x1988] sm:$0xff]  ;;  %v10870_v12 = vcombine.low %v4864_v61, %v4866_v63 }
 0x318   : > { %v4116_v42 = vor.u32 %v4115_v7, %v4112_v4  ;;  %v4871_v6 = vld [vmem:[#allocation9 + $0x19a8] sm:$0xff] }
 0x319   : > { %4672 = vmatpush1.bf16.msra.mxu0 %v10830_v22  ;;  %v4854_v22 = vld [vmem:[#allocation9 + $0x18a0] sm:$0xff]  ;;  %v4885_v34 = vld [vmem:[#allocation9 + $0x1a88] sm:$0xff] }
 0x31a   : > { %4778 = vmatpush1.bf16.msra.mxu1 %v10832_v23  ;;  %4673 = vmatprep.subr.bf16.mxu0 %v10835_v24  ;;  %v4125_v20 = vsel %vm941_vm3, %v4116_v42, %v4124_v44  ;;  %v4853_v23 = vld [vmem:[#allocation9 + $0x1888] sm:$0xff]  ;;  %v10859_v27 = vcombine.high %v4852_v21, %v4854_v22  ;;  %v4874_v42 = vld [vmem:[#allocation9 + $0x19e0] sm:$0xff] }
 0x31b   : > { %4779 = vmatprep.subr.bf16.mxu1 %v10837_v25  ;;  %v4855_v24 = vld [vmem:[#allocation9 + $0x18a8] sm:$0xff]  ;;  %v10854_v25 = vcombine.low %v4848_v46, %v4850_v16  ;;  %v10874_v46 = vcombine.low %v4868_v8, %v4870_v10  ;;  %v10876_v16 = vcombine.low %v4869_v11, %v4871_v6 }
 0x31c   : > { %v10861_v28 = vcombine.high %v4853_v23, %v4855_v24  ;;  %v10860_v35 = vcombine.low %v4853_v23, %v4855_v24  ;;  %v4880_v24 = vld [vmem:[#allocation9 + $0x1a40] sm:$0xff] }
 0x31d   : > { %4674 = vmatpush1.bf16.msra.mxu0 %v10834_v13  ;;  %v4856_v13 = vld [vmem:[#allocation9 + $0x18c0] sm:$0xff] }
 0x31e   : > { %4780 = vmatpush1.bf16.msra.mxu1 %v10836_v31  ;;  %4675 = vmatprep.subr.bf16.mxu0 %v10839_v32  ;;  %v4858_v31 = vld [vmem:[#allocation9 + $0x18e0] sm:$0xff]  ;;  %v10858_v32 = vcombine.low %v4852_v21, %v4854_v22 }
 0x31f   : > { %4781 = vmatprep.subr.bf16.mxu1 %v10841_v33  ;;  %v12790_v33 = vrot.slane %v12755_v14, 2  ;;  %v10862_v59 = vcombine.low %v4856_v13, %v4858_v31 }
 0x321   : > { %4676 = vmatpush1.bf16.msra.mxu0 %v10838_v39  ;;  %v10863_v39 = vcombine.high %v4856_v13, %v4858_v31  ;;  %v4951_v14 = vsel %vm1164_vm4, %v4949_v37, %v12790_v33 }
 0x322   : > { %4782 = vmatpush1.bf16.msra.mxu1 %v10840_v43  ;;  %4677 = vmatprep.subr.bf16.mxu0 %v10843_v47  ;;  %v4860_v43 = vld [vmem:[#allocation9 + $0x1900] sm:$0xff] }
 0x323   : > { %4783 = vmatprep.subr.bf16.mxu1 %v10845_v51  ;;  %v4862_v47 = vld [vmem:[#allocation9 + $0x1920] sm:$0xff]  ;;  %v4861_v51 = vld [vmem:[#allocation9 + $0x1908] sm:$0xff] }
 0x324   : > { %v10867_v49 = vcombine.high %v4860_v43, %v4862_v47  ;;  %v10869_v58 = vcombine.high %v4861_v51, %v4863_v55  ;;  %v10868_v4 = vcombine.low %v4861_v51, %v4863_v55  ;;  %v4890_v51 = vld [vmem:[#allocation9 + $0x1ae0] sm:$0xff]  ;;  %v4889_v55 = vld [vmem:[#allocation9 + $0x1ac8] sm:$0xff] }
 0x325   : > { %4678 = vmatpush1.bf16.msra.mxu0 %v10842_v62  ;;  %v4865_v62 = vld [vmem:[#allocation9 + $0x1948] sm:$0xff] }
 0x326   : > { %4784 = vmatpush1.bf16.msra.mxu1 %v10844_v1  ;;  %4679 = vmatprep.subr.bf16.mxu0 %v10847_v2  ;;  %v4867_v1 = vld [vmem:[#allocation9 + $0x1968] sm:$0xff]  ;;  %v10866_v2 = vcombine.low %v4860_v43, %v4862_v47 }
 0x327   : > { %4785 = vmatprep.subr.bf16.mxu1 %v10849_v5  ;;  %v10871_v5 = vcombine.high %v4864_v61, %v4866_v63  ;;  %v10873_v7 = vcombine.high %v4865_v62, %v4867_v1  ;;  %v10872_v30 = vcombine.low %v4865_v62, %v4867_v1  ;;  %v4892_v61 = vld [vmem:[#allocation9 + $0x1b00] sm:$0xff]  ;;  %v4893_v62 = vld [vmem:[#allocation9 + $0x1b08] sm:$0xff] }
 0x328   : > { %v4894_v63 = vld [vmem:[#allocation9 + $0x1b20] sm:$0xff]  ;;  %v4895_v1 = vld [vmem:[#allocation9 + $0x1b28] sm:$0xff] }
 0x329   : > { %4680 = vmatpush1.bf16.msra.mxu0 %v10846_v15  ;;  %v10875_v15 = vcombine.high %v4868_v8, %v4870_v10  ;;  %v4896_v8 = vld [vmem:[#allocation9 + $0x1b40] sm:$0xff] }
 0x32a   : > { %4786 = vmatpush1.bf16.msra.mxu1 %v10848_v40  ;;  %5441 = vmatprep.subr.bf16.mxu0 %v10851_v41  ;;  %v10877_v40 = vcombine.high %v4869_v11, %v4871_v6  ;;  %v4872_v41 = vld [vmem:[#allocation9 + $0x19c0] sm:$0xff]  ;;  %v4897_v11 = vld [vmem:[#allocation9 + $0x1b48] sm:$0xff] }
 0x32b   : > { %5547 = vmatprep.subr.bf16.mxu1 %v10853_v45  ;;  %v4875_v45 = vld [vmem:[#allocation9 + $0x19e8] sm:$0xff]  ;;  %v10879_v17 = vcombine.high %v4872_v41, %v4874_v42  ;;  %v4898_v10 = vld [vmem:[#allocation9 + $0x1b60] sm:$0xff] }
 0x32c   : > { %4698 = vmatmul.mubr.bf16.vlgmr.msra.gmra.mrb[8].mxu0 %v4125_v20  ;;  %v4899_v6 = vld [vmem:[#allocation9 + $0x1b68] sm:$0xff] }
 0x32d   : > { %4804 = vmatmul.mubr.bf16.vlgmr.msra.gmra.mrb[4].mxu1 %v4125_v20  ;;  %5442 = vmatpush1.bf16.msra.mxu0 %v10850_v54  ;;  %v4876_v54 = vld [vmem:[#allocation9 + $0x1a00] sm:$0xff]  ;;  %v4879_v20 = vld [vmem:[#allocation9 + $0x1a28] sm:$0xff] }
 0x32e   : > { %5548 = vmatpush1.bf16.msra.mxu1 %v10852_v36  ;;  %5443 = vmatprep.subr.bf16.mxu0 %v10855_v56  ;;  %v4878_v36 = vld [vmem:[#allocation9 + $0x1a20] sm:$0xff]  ;;  %v4877_v56 = vld [vmem:[#allocation9 + $0x1a08] sm:$0xff] }
 0x32f   : > { %5549 = vmatprep.subr.bf16.mxu1 %v10857_v9  ;;  %4707 = vmatprep.mubr.bf16.mxu0 %v13310_v0  ;;  %v10878_v9 = vcombine.low %v4872_v41, %v4874_v42  ;;  %v10883_v22 = vcombine.high %v4876_v54, %v4878_v36  ;;  %v10885_v23 = vcombine.high %v4877_v56, %v4879_v20  ;;  %v4900_v41 = vld [vmem:[#allocation9 + $0x1b80] sm:$0xff] }
 0x330   : > { %4813 = vmatprep.mubr.bf16.mxu1 %v13310_v0  ;;  %v10884_v29 = vcombine.low %v4877_v56, %v4879_v20  ;;  %v4902_v42 = vld [vmem:[#allocation9 + $0x1ba0] sm:$0xff]  ;;  %v4905_v56 = vld [vmem:[#allocation9 + $0x1bc8] sm:$0xff] }
 0x331   : > { %5444 = vmatpush1.bf16.msra.mxu0 %v10854_v25  ;;  %v4882_v25 = vld [vmem:[#allocation9 + $0x1a60] sm:$0xff]  ;;  %v4907_v20 = vld [vmem:[#allocation9 + $0x1be8] sm:$0xff] }
 0x332   : > { %5550 = vmatpush1.bf16.msra.mxu1 %v10856_v26  ;;  %5445 = vmatprep.subr.bf16.mxu0 %v10859_v27  ;;  %v4881_v26 = vld [vmem:[#allocation9 + $0x1a48] sm:$0xff]  ;;  %v10887_v13 = vcombine.high %v4880_v24, %v4882_v25  ;;  %v10886_v37 = vcombine.low %v4880_v24, %v4882_v25  ;;  %v4908_v24 = vld [vmem:[#allocation9 + $0x1c00] sm:$0xff] }
 0x333   : > { %5551 = vmatprep.subr.bf16.mxu1 %v10861_v28  ;;  %v4883_v27 = vld [vmem:[#allocation9 + $0x1a68] sm:$0xff]  ;;  %v10882_v28 = vcombine.low %v4876_v54, %v4878_v36  ;;  %v4904_v54 = vld [vmem:[#allocation9 + $0x1bc0] sm:$0xff] }
 0x334   : > { %4708 = vmatmul.mubr.bf16.gmra.mrb[12].mxu0 %v4124_v44  ;;  %v10889_v31 = vcombine.high %v4881_v26, %v4883_v27  ;;  %v4906_v36 = vld [vmem:[#allocation9 + $0x1be0] sm:$0xff] }
 0x335   : > { %4814 = vmatmul.mubr.bf16.gmra.mrb[8].mxu1 %v4124_v44  ;;  %5446 = vmatpush1.bf16.msra.mxu0 %v10858_v32  ;;  %v4873_v44 = vld [vmem:[#allocation9 + $0x19c8] sm:$0xff]  ;;  %v4884_v32 = vld [vmem:[#allocation9 + $0x1a80] sm:$0xff] }
 0x336   : > { %5473 = vmatprep.mubr.bf16.mxu0 %v4951_v14  ;;  %5552 = vmatpush1.bf16.msra.mxu1 %v10860_v35  ;;  %v10881_v18 = vcombine.high %v4873_v44, %v4875_v45  ;;  %v10880_v21 = vcombine.low %v4873_v44, %v4875_v45  ;;  %v4887_v35 = vld [vmem:[#allocation9 + $0x1aa8] sm:$0xff]  ;;  %v10891_v43 = vcombine.high %v4884_v32, %v4886_v60  ;;  %v4910_v25 = vld [vmem:[#allocation9 + $0x1c20] sm:$0xff] }
 0x337   : > { %5579 = vmatprep.mubr.bf16.mxu1 %v4951_v14  ;;  %5447 = vmatprep.subr.bf16.mxu0 %v10863_v39  ;;  %v10888_v39 = vcombine.low %v4881_v26, %v4883_v27  ;;  %v10893_v47 = vcombine.high %v4885_v34, %v4887_v35  ;;  %v4891_v14 = vld [vmem:[#allocation9 + $0x1ae8] sm:$0xff] }
 0x338   : > { %5553 = vmatprep.subr.bf16.mxu1 %v10865_v48  ;;  %v4888_v48 = vld [vmem:[#allocation9 + $0x1ac0] sm:$0xff]  ;;  %v4901_v44 = vld [vmem:[#allocation9 + $0x1b88] sm:$0xff] }
 0x339   : > { %5448 = vmatpush1.bf16.msra.mxu0 %v10862_v59  ;;  %v10890_v59 = vcombine.low %v4884_v32, %v4886_v60  ;;  %v4903_v45 = vld [vmem:[#allocation9 + $0x1ba8] sm:$0xff]  ;;  %v4947_v32 = vrot.slane %v12769_v19, 2 }
 0x33a   : > { %5554 = vmatpush1.bf16.msra.mxu1 %v10864_v57  ;;  %5449 = vmatprep.subr.bf16.mxu0 %v10867_v49  ;;  %v10892_v57 = vcombine.low %v4885_v34, %v4887_v35  ;;  %v10895_v49 = vcombine.high %v4888_v48, %v4890_v51  ;;  %v4909_v26 = vld [vmem:[#allocation9 + $0x1c08] sm:$0xff]  ;;  %v4912_v34 = vld [vmem:[#allocation9 + $0x1c40] sm:$0xff] }
 0x33b   : > { %5555 = vmatprep.subr.bf16.mxu1 %v10869_v58  ;;  %v10897_v58 = vcombine.high %v4889_v55, %v4891_v14  ;;  %v4911_v27 = vld [vmem:[#allocation9 + $0x1c28] sm:$0xff]  ;;  %v4914_v35 = vld [vmem:[#allocation9 + $0x1c60] sm:$0xff] }
 0x33c   : > { %v10917_v60 = vcombine.high %v4909_v26, %v4911_v27  ;;  %v4917_v19 = vld [vmem:[#allocation9 + $0x1c88] sm:$0xff] }
 0x33d   : > { %5450 = vmatpush1.bf16.msra.mxu0 %v10866_v2  ;;  %v10894_v2 = vcombine.low %v4888_v48, %v4890_v51  ;;  %v10916_v51 = vcombine.low %v4909_v26, %v4911_v27  ;;  %v4936_v26 = vld [vmem:[#allocation9 + $0x1dc0] sm:$0xff] }
 0x33e   : > { %5556 = vmatpush1.bf16.msra.mxu1 %v10868_v4  ;;  %5451 = vmatprep.subr.bf16.mxu0 %v10871_v5  ;;  %v10896_v4 = vcombine.low %v4889_v55, %v4891_v14  ;;  %v10899_v5 = vcombine.high %v4892_v61, %v4894_v63  ;;  %v10919_v55 = vcombine.high %v4912_v34, %v4914_v35  ;;  %v4938_v27 = vld [vmem:[#allocation9 + $0x1de0] sm:$0xff] }
 0x33f   : > { %5557 = vmatprep.subr.bf16.mxu1 %v10873_v7  ;;  %v10901_v7 = vcombine.high %v4893_v62, %v4895_v1 }
 0x341   : > { %5452 = vmatpush1.bf16.msra.mxu0 %v10870_v12  ;;  %v10898_v12 = vcombine.low %v4892_v61, %v4894_v63 }
 0x342   : > { %5558 = vmatpush1.bf16.msra.mxu1 %v10872_v30  ;;  %5453 = vmatprep.subr.bf16.mxu0 %v10875_v15  ;;  %v10900_v30 = vcombine.low %v4893_v62, %v4895_v1  ;;  %v10903_v15 = vcombine.high %v4896_v8, %v4898_v10  ;;  %v4920_v1 = vld [vmem:[#allocation9 + $0x1cc0] sm:$0xff] }
 0x343   : > { %5559 = vmatprep.subr.bf16.mxu1 %v10877_v40  ;;  %v10905_v40 = vcombine.high %v4897_v11, %v4899_v6 }
 0x345   : > { %5454 = vmatpush1.bf16.msra.mxu0 %v10874_v46  ;;  %v10902_v46 = vcombine.low %v4896_v8, %v4898_v10 }
 0x346   : > { %5560 = vmatpush1.bf16.msra.mxu1 %v10876_v16  ;;  %5455 = vmatprep.subr.bf16.mxu0 %v10879_v17  ;;  %v10904_v16 = vcombine.low %v4897_v11, %v4899_v6  ;;  %v10907_v17 = vcombine.high %v4900_v41, %v4902_v42  ;;  %v4924_v11 = vld [vmem:[#allocation9 + $0x1d00] sm:$0xff] }
 0x347   : > { %5561 = vmatprep.subr.bf16.mxu1 %v10881_v18  ;;  %v10909_v18 = vcombine.high %v4901_v44, %v4903_v45  ;;  %v4926_v6 = vld [vmem:[#allocation9 + $0x1d20] sm:$0xff] }
 0x349   : > { %5456 = vmatpush1.bf16.msra.mxu0 %v10878_v9  ;;  %v10906_v9 = vcombine.low %v4900_v41, %v4902_v42  ;;  %v10931_v41 = vcombine.high %v4924_v11, %v4926_v6 }
 0x34a   : > { %5562 = vmatpush1.bf16.msra.mxu1 %v10880_v21  ;;  %5457 = vmatprep.subr.bf16.mxu0 %v10883_v22  ;;  %v10908_v21 = vcombine.low %v4901_v44, %v4903_v45  ;;  %v10911_v22 = vcombine.high %v4904_v54, %v4906_v36  ;;  %v4928_v44 = vld [vmem:[#allocation9 + $0x1d40] sm:$0xff] }
 0x34b   : > { %5563 = vmatprep.subr.bf16.mxu1 %v10885_v23  ;;  %v10913_v23 = vcombine.high %v4905_v56, %v4907_v20  ;;  %v4930_v45 = vld [vmem:[#allocation9 + $0x1d60] sm:$0xff] }
 0x34d   : > { %5458 = vmatpush1.bf16.msra.mxu0 %v10882_v28  ;;  %v10910_v28 = vcombine.low %v4904_v54, %v4906_v36  ;;  %v10935_v54 = vcombine.high %v4928_v44, %v4930_v45 }
 0x34e   : > { %5564 = vmatpush1.bf16.msra.mxu1 %v10884_v29  ;;  %5459 = vmatprep.subr.bf16.mxu0 %v10887_v13  ;;  %v10912_v29 = vcombine.low %v4905_v56, %v4907_v20  ;;  %v4840_v13 = vld [vmem:[#allocation2] sm:$0xfc]  ;;  %v4932_v56 = vld [vmem:[#allocation9 + $0x1d80] sm:$0xff] }
 0x34f   : > { %5565 = vmatprep.subr.bf16.mxu1 %v10889_v31  ;;  %v10915_v31 = vcombine.high %v4908_v24, %v4910_v25  ;;  %v4934_v20 = vld [vmem:[#allocation9 + $0x1da0] sm:$0xff] }
 0x351   : > { %5460 = vmatpush1.bf16.msra.mxu0 %v10886_v37  ;;  %v4946_v37 = vrot.slane %v4840_v13, 2  ;;  %v10938_v13 = vcombine.low %v4932_v56, %v4934_v20 }
 0x352   : > { %5566 = vmatpush1.bf16.msra.mxu1 %v10888_v39  ;;  %5461 = vmatprep.subr.bf16.mxu0 %v10891_v43  ;;  %v4913_v39 = vld [vmem:[#allocation9 + $0x1c48] sm:$0xff] }
 0x353   : > { %5567 = vmatprep.subr.bf16.mxu1 %v10893_v47  ;;  %v4915_v43 = vld [vmem:[#allocation9 + $0x1c68] sm:$0xff]  ;;  %v10914_v47 = vcombine.low %v4908_v24, %v4910_v25  ;;  %v4948_v48 = vsel %vm1164_vm4, %v4946_v37, %v4947_v32  ;;  %v10939_v24 = vcombine.high %v4932_v56, %v4934_v20  ;;  %v4842_v37 = vld [vmem:[#allocation2 + $0x10] sm:$0xfc]  ;;  %v5996_v56 = vld [vmem:[#allocation9 + $0x710] sm:$0xff] }
 0x354   : > { %v10921_v14 = vcombine.high %v4913_v39, %v4915_v43  ;;  %v10920_v61 = vcombine.low %v4913_v39, %v4915_v43  ;;  %v5981_v39 = vld [vmem:[#allocation9 + $0x618] sm:$0xff]  ;;  %v5998_v20 = vld [vmem:[#allocation9 + $0x730] sm:$0xff] }
 0x355   : > { %5462 = vmatpush1.bf16.msra.mxu0 %v10890_v59  ;;  %v4916_v59 = vld [vmem:[#allocation9 + $0x1c80] sm:$0xff]  ;;  %v5983_v43 = vld [vmem:[#allocation9 + $0x638] sm:$0xff] }
 0x356   : > { %5568 = vmatpush1.bf16.msra.mxu1 %v10892_v57  ;;  %5463 = vmatprep.subr.bf16.mxu0 %v10895_v49  ;;  %v4918_v57 = vld [vmem:[#allocation9 + $0x1ca0] sm:$0xff]  ;;  %v4919_v49 = vld [vmem:[#allocation9 + $0x1ca8] sm:$0xff] }
 0x357   : > { %5569 = vmatprep.subr.bf16.mxu1 %v10897_v58  ;;  %v10918_v58 = vcombine.low %v4912_v34, %v4914_v35  ;;  %v10923_v63 = vcombine.high %v4916_v59, %v4918_v57  ;;  %v10925_v62 = vcombine.high %v4917_v19, %v4919_v49  ;;  %v10924_v8 = vcombine.low %v4917_v19, %v4919_v49  ;;  %v5980_v34 = vld [vmem:[#allocation9 + $0x610] sm:$0xff]  ;;  %v5985_v49 = vld [vmem:[#allocation9 + $0x658] sm:$0xff] }
 0x358   : > { %v5982_v35 = vld [vmem:[#allocation9 + $0x630] sm:$0xff] }
 0x359   : > { %5464 = vmatpush1.bf16.msra.mxu0 %v10894_v2  ;;  %v4922_v2 = vld [vmem:[#allocation9 + $0x1ce0] sm:$0xff]  ;;  %v5986_v19 = vld [vmem:[#allocation9 + $0x670] sm:$0xff] }
 0x35a   : > { %5570 = vmatpush1.bf16.msra.mxu1 %v10896_v4  ;;  %5465 = vmatprep.subr.bf16.mxu0 %v10899_v5  ;;  %v4921_v4 = vld [vmem:[#allocation9 + $0x1cc8] sm:$0xff]  ;;  %v10927_v10 = vcombine.high %v4920_v1, %v4922_v2 }
 0x35b   : > { %5571 = vmatprep.subr.bf16.mxu1 %v10901_v7  ;;  %v4923_v5 = vld [vmem:[#allocation9 + $0x1ce8] sm:$0xff]  ;;  %v10922_v7 = vcombine.low %v4916_v59, %v4918_v57  ;;  %v10949_v59 = vcombine.high %v5981_v39, %v5983_v43  ;;  %v5984_v57 = vld [vmem:[#allocation9 + $0x650] sm:$0xff] }
 0x35d   : > { %5466 = vmatpush1.bf16.msra.mxu0 %v10898_v12  ;;  %v4925_v12 = vld [vmem:[#allocation9 + $0x1d08] sm:$0xff] }
 0x35e   : > { %5572 = vmatpush1.bf16.msra.mxu1 %v10900_v30  ;;  %5467 = vmatprep.subr.bf16.mxu0 %v10903_v15  ;;  %v4927_v30 = vld [vmem:[#allocation9 + $0x1d28] sm:$0xff]  ;;  %v10926_v15 = vcombine.low %v4920_v1, %v4922_v2  ;;  %v10951_v1 = vcombine.high %v5984_v57, %v5986_v19 }
 0x35f   : > { %5573 = vmatprep.subr.bf16.mxu1 %v10905_v40  ;;  %v10928_v40 = vcombine.low %v4921_v4, %v4923_v5  ;;  %v10933_v42 = vcombine.high %v4925_v12, %v4927_v30  ;;  %v12803_v2 = vld [vmem:[#allocation2 + $0x20] sm:$0x7f] }
 0x361   : > { %5468 = vmatpush1.bf16.msra.mxu0 %v10902_v46  ;;  %v4929_v46 = vld [vmem:[#allocation9 + $0x1d48] sm:$0xff] }
 0x362   : > { %5574 = vmatpush1.bf16.msra.mxu1 %v10904_v16  ;;  %5469 = vmatprep.subr.bf16.mxu0 %v10907_v17  ;;  %v4931_v16 = vld [vmem:[#allocation9 + $0x1d68] sm:$0xff]  ;;  %v10930_v17 = vcombine.low %v4924_v11, %v4926_v6  ;;  %v10950_v11 = vcombine.low %v5984_v57, %v5986_v19  ;;  %v6096_v6 = vshll.u32 %v12803_v2, 16  ;;  %v6010_v57 = vld [vmem:[#allocation9 + $0x7f0] sm:$0xff]  ;;  %v6009_v19 = vld [vmem:[#allocation9 + $0x7d8] sm:$0xff] }
 0x363   : > { %5575 = vmatprep.subr.bf16.mxu1 %v10909_v18  ;;  %v10932_v18 = vcombine.low %v4925_v12, %v4927_v30  ;;  %v10937_v36 = vcombine.high %v4929_v46, %v4931_v16 }
 0x365   : > { %5470 = vmatpush1.bf16.msra.mxu0 %v10906_v9  ;;  %v4933_v9 = vld [vmem:[#allocation9 + $0x1d88] sm:$0xff] }
 0x366   : > { %5576 = vmatpush1.bf16.msra.mxu1 %v10908_v21  ;;  %5471 = vmatprep.subr.bf16.mxu0 %v10911_v22  ;;  %v4935_v21 = vld [vmem:[#allocation9 + $0x1da8] sm:$0xff]  ;;  %v10934_v22 = vcombine.low %v4928_v44, %v4930_v45 }
 0x367   : > { %5577 = vmatprep.subr.bf16.mxu1 %v10913_v23  ;;  %v10936_v23 = vcombine.low %v4929_v46, %v4931_v16  ;;  %v10941_v25 = vcombine.high %v4933_v9, %v4935_v21  ;;  %v12811_v46 = vrot.slane %v6096_v6, 1  ;;  %v5993_v16 = vld [vmem:[#allocation9 + $0x6d8] sm:$0xff]  ;;  %v6016_v6 = vld [vmem:[#allocation9 + $0x850] sm:$0xff] }
 0x369   : > { %5472 = vmatpush1.bf16.msra.mxu0 %v10910_v28  ;;  %v4937_v28 = vld [vmem:[#allocation9 + $0x1dc8] sm:$0xff] }
 0x36a   : > { %5578 = vmatpush1.bf16.msra.mxu1 %v10912_v29  ;;  %5494 = vmatprep.subr.bf16.mxu0 %v10915_v31  ;;  %v4939_v29 = vld [vmem:[#allocation9 + $0x1de8] sm:$0xff]  ;;  %v10940_v31 = vcombine.low %v4933_v9, %v4935_v21  ;;  %v5997_v21 = vld [vmem:[#allocation9 + $0x718] sm:$0xff] }
 0x36b   : > { %5600 = vmatprep.subr.bf16.mxu1 %v10917_v60  ;;  %v10945_v60 = vcombine.high %v4937_v28, %v4939_v29 }
 0x36c   : > { %5474 = vmatmul.mubr.bf16.vlgmr.msra.gmra.mrb[8].mxu0 %v4948_v48 }
 0x36d   : > { %5580 = vmatmul.mubr.bf16.vlgmr.msra.gmra.mrb[4].mxu1 %v4948_v48  ;;  %5483 = vmatprep.mubr.bf16.mxu0 %v12790_v33  ;;  %v10944_v48 = vcombine.low %v4937_v28, %v4939_v29  ;;  %v6000_v28 = vld [vmem:[#allocation9 + $0x750] sm:$0xff] }
 0x36e   : > { %5495 = vmatpush1.bf16.msra.mxu0 %v10914_v47  ;;  %5589 = vmatprep.mubr.bf16.mxu1 %v12790_v33  ;;  %v10929_v33 = vcombine.high %v4921_v4, %v4923_v5  ;;  %v10942_v47 = vcombine.low %v4936_v26, %v4938_v27  ;;  %v6002_v29 = vld [vmem:[#allocation9 + $0x770] sm:$0xff] }
 0x36f   : > { %5601 = vmatpush1.bf16.msra.mxu1 %v10916_v51  ;;  %5496 = vmatprep.subr.bf16.mxu0 %v10919_v55  ;;  %v10947_v51 = vcombine.high %v5980_v34, %v5982_v35  ;;  %v4952_v55 = vrot.slane %v4842_v37, 2  ;;  %v6004_v37 = vld [vmem:[#allocation9 + $0x790] sm:$0xff] }
 0x370   : > { %5602 = vmatprep.subr.bf16.mxu1 %v10921_v14  ;;  %v4953_v14 = vrot.slane %v12780_v38, 2  ;;  %v5988_v38 = vld [vmem:[#allocation9 + $0x690] sm:$0xff] }
 0x372   : > { %5497 = vmatpush1.bf16.msra.mxu0 %v10918_v58  ;;  %v5987_v58 = vld [vmem:[#allocation9 + $0x678] sm:$0xff]  ;;  %v4954_v4 = vsel %vm1164_vm4, %v4952_v55, %v4953_v14 }
 0x373   : > { %5603 = vmatpush1.bf16.msra.mxu1 %v10920_v61  ;;  %5498 = vmatprep.subr.bf16.mxu0 %v10923_v63  ;;  %v12801_v61 = vld [vmem:[#allocation2 + $0x8] sm:$0xff]  ;;  %v10946_v63 = vcombine.low %v5980_v34, %v5982_v35  ;;  %v10953_v5 = vcombine.high %v5985_v49, %v5987_v58  ;;  %v10952_v12 = vcombine.low %v5985_v49, %v5987_v58 }
 0x374   : > { %5484 = vmatmul.mubr.bf16.gmra.mrb[12].mxu0 %v4947_v32  ;;  %5604 = vmatprep.subr.bf16.mxu1 %v10925_v62  ;;  %v10948_v62 = vcombine.low %v5981_v39, %v5983_v43  ;;  %v6089_v45 = vshrl.u32 %v12801_v61, 16  ;;  %v10967_v34 = vcombine.high %v6000_v28, %v6002_v29  ;;  %v6006_v39 = vld [vmem:[#allocation9 + $0x7b0] sm:$0xff]  ;;  %v6005_v43 = vld [vmem:[#allocation9 + $0x798] sm:$0xff] }
 0x375   : > { %5590 = vmatmul.mubr.bf16.gmra.mrb[8].mxu1 %v4947_v32  ;;  %5526 = vmatprep.mubr.bf16.mxu0 %v13310_v0  ;;  %v10943_v32 = vcombine.high %v4936_v26, %v4938_v27  ;;  %v10963_v26 = vcombine.high %v5996_v56, %v5998_v20  ;;  %v10971_v55 = vcombine.high %v6004_v37, %v6006_v39  ;;  %v6011_v49 = vld [vmem:[#allocation9 + $0x7f8] sm:$0xff] }
 0x376   : > { %5499 = vmatpush1.bf16.msra.mxu0 %v10922_v7  ;;  %5632 = vmatprep.mubr.bf16.mxu1 %v13310_v0  ;;  %v5990_v7 = vld [vmem:[#allocation9 + $0x6b0] sm:$0xff]  ;;  %v10970_v58 = vcombine.low %v6004_v37, %v6006_v39 }
 0x377   : > { %5605 = vmatpush1.bf16.msra.mxu1 %v10924_v8  ;;  %5500 = vmatprep.subr.bf16.mxu0 %v10927_v10  ;;  %v6091_v8 = vshll.u32 %v12801_v61, 16  ;;  %v5989_v10 = vld [vmem:[#allocation9 + $0x698] sm:$0xff]  ;;  %v10955_v30 = vcombine.high %v5988_v38, %v5990_v7  ;;  %v10954_v44 = vcombine.low %v5988_v38, %v5990_v7  ;;  %v6032_v37 = vld [vmem:[#allocation9 + $0x950] sm:$0xff] }
 0x378   : > { %5606 = vmatprep.subr.bf16.mxu1 %v10929_v33  ;;  %v5991_v33 = vld [vmem:[#allocation9 + $0x6b8] sm:$0xff]  ;;  %v6034_v39 = vld [vmem:[#allocation9 + $0x970] sm:$0xff] }
 0x379   : > { %v6013_v38 = vld [vmem:[#allocation9 + $0x818] sm:$0xff] }
 0x37a   : > { %5501 = vmatpush1.bf16.msra.mxu0 %v10926_v15  ;;  %v10957_v15 = vcombine.high %v5989_v10, %v5991_v33  ;;  %v6015_v7 = vld [vmem:[#allocation9 + $0x838] sm:$0xff] }
 0x37b   : > { %5607 = vmatpush1.bf16.msra.mxu1 %v10928_v40  ;;  %5502 = vmatprep.subr.bf16.mxu0 %v10931_v41  ;;  %v6093_v40 = vrot.slane %v6091_v8, 1  ;;  %v5992_v41 = vld [vmem:[#allocation9 + $0x6d0] sm:$0xff] }
 0x37c   : > { %5608 = vmatprep.subr.bf16.mxu1 %v10933_v42  ;;  %v5994_v42 = vld [vmem:[#allocation9 + $0x6f0] sm:$0xff] }
 0x37e   : > { %5503 = vmatpush1.bf16.msra.mxu0 %v10930_v17  ;;  %v5995_v17 = vld [vmem:[#allocation9 + $0x6f8] sm:$0xff] }
 0x37f   : > { %5609 = vmatpush1.bf16.msra.mxu1 %v10932_v18  ;;  %5504 = vmatprep.subr.bf16.mxu0 %v10935_v54  ;;  %v10956_v18 = vcombine.low %v5989_v10, %v5991_v33  ;;  %v6094_v54 = vor.u32 %v6093_v40, %v6089_v45  ;;  %v10961_v9 = vcombine.high %v5993_v16, %v5995_v17  ;;  %v6020_v45 = vld [vmem:[#allocation9 + $0x890] sm:$0xff] }
 0x380   : > { %5610 = vmatprep.subr.bf16.mxu1 %v10937_v36  ;;  %v10959_v36 = vcombine.high %v5992_v41, %v5994_v42  ;;  %v10976_v10 = vcombine.low %v6009_v19, %v6011_v49 }
 0x382   : > { %5505 = vmatpush1.bf16.msra.mxu0 %v10934_v22  ;;  %v5999_v22 = vld [vmem:[#allocation9 + $0x738] sm:$0xff] }
 0x383   : > { %5611 = vmatpush1.bf16.msra.mxu1 %v10936_v23  ;;  %5506 = vmatprep.subr.bf16.mxu0 %v10939_v24  ;;  %v6099_v23 = vsel %vm348_vm0, %v6094_v54, %v12811_v46  ;;  %v10958_v24 = vcombine.low %v5992_v41, %v5994_v42  ;;  %v10965_v27 = vcombine.high %v5997_v21, %v5999_v22 }
 0x384   : > { %5612 = vmatprep.subr.bf16.mxu1 %v10941_v25  ;;  %v10960_v25 = vcombine.low %v5993_v16, %v5995_v17  ;;  %v10980_v41 = vcombine.low %v6013_v38, %v6015_v7  ;;  %v6022_v16 = vld [vmem:[#allocation9 + $0x8b0] sm:$0xff]  ;;  %v6021_v17 = vld [vmem:[#allocation9 + $0x898] sm:$0xff] }
 0x386   : > { %5507 = vmatpush1.bf16.msra.mxu0 %v10938_v13  ;;  %v6001_v13 = vld [vmem:[#allocation9 + $0x758] sm:$0xff] }
 0x387   : > { %5613 = vmatpush1.bf16.msra.mxu1 %v10940_v31  ;;  %5508 = vmatprep.subr.bf16.mxu0 %v10943_v32  ;;  %v6003_v31 = vld [vmem:[#allocation9 + $0x778] sm:$0xff]  ;;  %v10962_v32 = vcombine.low %v5996_v56, %v5998_v20  ;;  %v10987_v56 = vcombine.high %v6020_v45, %v6022_v16 }
 0x388   : > { %5614 = vmatprep.subr.bf16.mxu1 %v10945_v60  ;;  %v10964_v60 = vcombine.low %v5997_v21, %v5999_v22  ;;  %v10969_v35 = vcombine.high %v6001_v13, %v6003_v31  ;;  %v6026_v21 = vld [vmem:[#allocation9 + $0x8f0] sm:$0xff]  ;;  %v6025_v22 = vld [vmem:[#allocation9 + $0x8d8] sm:$0xff] }
 0x38a   : > { %5509 = vmatpush1.bf16.msra.mxu0 %v10942_v47  ;;  %v6007_v47 = vld [vmem:[#allocation9 + $0x7b8] sm:$0xff] }
 0x38b   : > { %5615 = vmatpush1.bf16.msra.mxu1 %v10944_v48  ;;  %6607 = vmatprep.subr.bf16.mxu0 %v10947_v51  ;;  %v10966_v48 = vcombine.low %v6000_v28, %v6002_v29  ;;  %v10968_v51 = vcombine.low %v6001_v13, %v6003_v31  ;;  %v6028_v28 = vld [vmem:[#allocation9 + $0x910] sm:$0xff]  ;;  %v6029_v13 = vld [vmem:[#allocation9 + $0x918] sm:$0xff] }
 0x38c   : > { %6713 = vmatprep.subr.bf16.mxu1 %v10949_v59  ;;  %v6008_v59 = vld [vmem:[#allocation9 + $0x7d0] sm:$0xff]  ;;  %v6031_v31 = vld [vmem:[#allocation9 + $0x938] sm:$0xff] }
 0x38d   : > { %5527 = vmatmul.mubr.bf16.vlgmr.msra.gmra.mrb[8].mxu0 %v4954_v4  ;;  %v10974_v8 = vcombine.low %v6008_v59, %v6010_v57  ;;  %v6030_v29 = vld [vmem:[#allocation9 + $0x930] sm:$0xff] }
 0x38e   : > { %5633 = vmatmul.mubr.bf16.vlgmr.msra.gmra.mrb[4].mxu1 %v4954_v4  ;;  %6608 = vmatpush1.bf16.msra.mxu0 %v10946_v63  ;;  %v10972_v63 = vcombine.low %v6005_v43, %v6007_v47  ;;  %v6012_v4 = vld [vmem:[#allocation9 + $0x810] sm:$0xff] }
 0x38f   : > { %6714 = vmatpush1.bf16.msra.mxu1 %v10948_v62  ;;  %6609 = vmatprep.subr.bf16.mxu0 %v10951_v1  ;;  %v10975_v62 = vcombine.high %v6008_v59, %v6010_v57  ;;  %v10977_v1 = vcombine.high %v6009_v19, %v6011_v49  ;;  %v6036_v59 = vld [vmem:[#allocation9 + $0x990] sm:$0xff]  ;;  %v6037_v19 = vld [vmem:[#allocation9 + $0x998] sm:$0xff] }
 0x390   : > { %6715 = vmatprep.subr.bf16.mxu1 %v10953_v5  ;;  %5536 = vmatprep.mubr.bf16.mxu0 %v13310_v0  ;;  %v6014_v5 = vld [vmem:[#allocation9 + $0x830] sm:$0xff]  ;;  %v6039_v49 = vld [vmem:[#allocation9 + $0x9b8] sm:$0xff] }
 0x391   : > { %5642 = vmatprep.mubr.bf16.mxu1 %v13310_v0  ;;  %v10979_v33 = vcombine.high %v6012_v4, %v6014_v5  ;;  %v10978_v40 = vcombine.low %v6012_v4, %v6014_v5  ;;  %v6038_v57 = vld [vmem:[#allocation9 + $0x9b0] sm:$0xff]  ;;  %v11005_v4 = vcombine.high %v6037_v19, %v6039_v49 }
 0x392   : > { %6610 = vmatpush1.bf16.msra.mxu0 %v10950_v11  ;;  %v10981_v11 = vcombine.high %v6013_v38, %v6015_v7  ;;  %v6040_v5 = vld [vmem:[#allocation9 + $0x9d0] sm:$0xff]  ;;  %v6041_v7 = vld [vmem:[#allocation9 + $0x9d8] sm:$0xff] }
 0x393   : > { %6716 = vmatpush1.bf16.msra.mxu1 %v10952_v12  ;;  %6611 = vmatprep.subr.bf16.mxu0 %v10955_v30  ;;  %v6018_v12 = vld [vmem:[#allocation9 + $0x870] sm:$0xff]  ;;  %v6017_v30 = vld [vmem:[#allocation9 + $0x858] sm:$0xff] }
 0x394   : > { %6717 = vmatprep.subr.bf16.mxu1 %v10957_v15  ;;  %v6019_v15 = vld [vmem:[#allocation9 + $0x878] sm:$0xff]  ;;  %v10983_v42 = vcombine.high %v6016_v6, %v6018_v12  ;;  %v10982_v54 = vcombine.low %v6016_v6, %v6018_v12  ;;  %v6042_v38 = vld [vmem:[#allocation9 + $0x9f0] sm:$0xff]  ;;  %v11004_v6 = vcombine.low %v6037_v19, %v6039_v49 }
 0x395   : > { %5537 = vmatmul.mubr.bf16.gmra.mrb[12].mxu0 %v4953_v14  ;;  %v11007_v12 = vcombine.high %v6040_v5, %v6042_v38  ;;  %v6060_v49 = vld [vmem:[#allocation9 + $0xb10] sm:$0xff] }
 0x396   : > { %5643 = vmatmul.mubr.bf16.gmra.mrb[8].mxu1 %v4953_v14  ;;  %6612 = vmatpush1.bf16.msra.mxu0 %v10954_v44  ;;  %v10973_v14 = vcombine.high %v6005_v43, %v6007_v47  ;;  %v10985_v44 = vcombine.high %v6017_v30, %v6019_v15  ;;  %v6033_v43 = vld [vmem:[#allocation9 + $0x958] sm:$0xff] }
 0x397   : > { %6639 = vmatprep.mubr.bf16.mxu0 %v6099_v23  ;;  %6718 = vmatpush1.bf16.msra.mxu1 %v10956_v18  ;;  %v6023_v18 = vld [vmem:[#allocation9 + $0x8b8] sm:$0xff] }
 0x398   : > { %6745 = vmatprep.mubr.bf16.mxu1 %v6099_v23  ;;  %6613 = vmatprep.subr.bf16.mxu0 %v10959_v36  ;;  %v10984_v36 = vcombine.low %v6017_v30, %v6019_v15  ;;  %v10989_v20 = vcombine.high %v6021_v17, %v6023_v18  ;;  %v6027_v23 = vld [vmem:[#allocation9 + $0x8f8] sm:$0xff] }
 0x399   : > { %6719 = vmatprep.subr.bf16.mxu1 %v10961_v9  ;;  %v6024_v9 = vld [vmem:[#allocation9 + $0x8d0] sm:$0xff]  ;;  %v6035_v47 = vld [vmem:[#allocation9 + $0x978] sm:$0xff] }
 0x39a   : > { %6614 = vmatpush1.bf16.msra.mxu0 %v10958_v24  ;;  %v10986_v24 = vcombine.low %v6020_v45, %v6022_v16  ;;  %v11006_v45 = vcombine.low %v6040_v5, %v6042_v38 }
 0x39b   : > { %6720 = vmatpush1.bf16.msra.mxu1 %v10960_v25  ;;  %6615 = vmatprep.subr.bf16.mxu0 %v10963_v26  ;;  %v10988_v25 = vcombine.low %v6021_v17, %v6023_v18  ;;  %v10991_v26 = vcombine.high %v6024_v9, %v6026_v21 }
 0x39c   : > { %6721 = vmatprep.subr.bf16.mxu1 %v10965_v27  ;;  %v10993_v27 = vcombine.high %v6025_v22, %v6027_v23 }
 0x39e   : > { %6616 = vmatpush1.bf16.msra.mxu0 %v10962_v32  ;;  %v10990_v32 = vcombine.low %v6024_v9, %v6026_v21  ;;  %v6050_v9 = vld [vmem:[#allocation9 + $0xa70] sm:$0xff] }
 0x39f   : > { %6722 = vmatpush1.bf16.msra.mxu1 %v10964_v60  ;;  %6617 = vmatprep.subr.bf16.mxu0 %v10967_v34  ;;  %v10992_v60 = vcombine.low %v6025_v22, %v6027_v23  ;;  %v10995_v34 = vcombine.high %v6028_v28, %v6030_v29  ;;  %v6115_v22 = vshrl.u32 %v12803_v2, 16  ;;  %v6049_v23 = vld [vmem:[#allocation9 + $0xa58] sm:$0xff] }
 0x3a0   : > { %6723 = vmatprep.subr.bf16.mxu1 %v10969_v35  ;;  %v10997_v35 = vcombine.high %v6029_v13, %v6031_v31  ;;  %v6055_v2 = vld [vmem:[#allocation9 + $0xab8] sm:$0xff] }
 0x3a2   : > { %6618 = vmatpush1.bf16.msra.mxu0 %v10966_v48  ;;  %v10994_v48 = vcombine.low %v6028_v28, %v6030_v29  ;;  %v6117_v28 = vor.u32 %v6115_v22, %v12811_v46 }
 0x3a3   : > { %6724 = vmatpush1.bf16.msra.mxu1 %v10968_v51  ;;  %6619 = vmatprep.subr.bf16.mxu0 %v10971_v55  ;;  %v10996_v51 = vcombine.low %v6029_v13, %v6031_v31  ;;  %v10999_v55 = vcombine.high %v6032_v37, %v6034_v39  ;;  %v6052_v31 = vld [vmem:[#allocation9 + $0xa90] sm:$0xff] }
 0x3a4   : > { %6725 = vmatprep.subr.bf16.mxu1 %v10973_v14  ;;  %v11001_v14 = vcombine.high %v6033_v43, %v6035_v47 }
 0x3a6   : > { %6620 = vmatpush1.bf16.msra.mxu0 %v10970_v58  ;;  %v10998_v58 = vcombine.low %v6032_v37, %v6034_v39 }
 0x3a7   : > { %6726 = vmatpush1.bf16.msra.mxu1 %v10972_v63  ;;  %6621 = vmatprep.subr.bf16.mxu0 %v10975_v62  ;;  %v11000_v63 = vcombine.low %v6033_v43, %v6035_v47  ;;  %v11003_v62 = vcombine.high %v6036_v59, %v6038_v57  ;;  %v6056_v43 = vld [vmem:[#allocation9 + $0xad0] sm:$0xff] }
 0x3a8   : > { %6727 = vmatprep.subr.bf16.mxu1 %v10977_v1  ;;  %v12815_v1 = vld [vmem:[#allocation2] sm:$0xff] }
 0x3a9   : > { %v6058_v47 = vld [vmem:[#allocation9 + $0xaf0] sm:$0xff] }
 0x3aa   : > { %6622 = vmatpush1.bf16.msra.mxu0 %v10974_v8  ;;  %v6043_v8 = vld [vmem:[#allocation9 + $0x9f8] sm:$0xff] }
 0x3ab   : > { %6728 = vmatpush1.bf16.msra.mxu1 %v10976_v10  ;;  %6623 = vmatprep.subr.bf16.mxu0 %v10979_v33  ;;  %v12817_v10 = vld [vmem:[#allocation2 + $0x18] sm:$0x7f]  ;;  %v11002_v33 = vcombine.low %v6036_v59, %v6038_v57  ;;  %v11009_v30 = vcombine.high %v6041_v7, %v6043_v8  ;;  %v11008_v17 = vcombine.low %v6041_v7, %v6043_v8  ;;  %v6064_v8 = vld [vmem:[#allocation9 + $0xb50] sm:$0xff] }
 0x3ac   : > { %6729 = vmatprep.subr.bf16.mxu1 %v10981_v11  ;;  %v6079_v11 = vshll.u32 %v12815_v1, 16  ;;  %v6084_v15 = vshll.u32 %v12817_v10, 16  ;;  %v6112_v39 = vshrl.u32 %v12817_v10, 16  ;;  %v11023_v57 = vcombine.high %v6056_v43, %v6058_v47  ;;  %v6066_v10 = vld [vmem:[#allocation9 + $0xb70] sm:$0xff] }
 0x3ae   : > { %6624 = vmatpush1.bf16.msra.mxu0 %v10978_v40  ;;  %v6044_v40 = vld [vmem:[#allocation9 + $0xa10] sm:$0xff]  ;;  %v6081_v16 = vrot.slane %v6079_v11, 1  ;;  %v6067_v11 = vld [vmem:[#allocation9 + $0xb78] sm:$0xff] }
 0x3af   : > { %6730 = vmatpush1.bf16.msra.mxu1 %v10980_v41  ;;  %6625 = vmatprep.subr.bf16.mxu0 %v10983_v42  ;;  %v6046_v41 = vld [vmem:[#allocation9 + $0xa30] sm:$0xff]  ;;  %v6045_v42 = vld [vmem:[#allocation9 + $0xa18] sm:$0xff] }
 0x3b0   : > { %6731 = vmatprep.subr.bf16.mxu1 %v10985_v44  ;;  %v6047_v44 = vld [vmem:[#allocation9 + $0xa38] sm:$0xff]  ;;  %v11011_v18 = vcombine.high %v6044_v40, %v6046_v41 }
 0x3b2   : > { %6626 = vmatpush1.bf16.msra.mxu0 %v10982_v54  ;;  %v6077_v54 = vshrl.u32 %v12815_v1, 16 }
 0x3b3   : > { %6732 = vmatpush1.bf16.msra.mxu1 %v10984_v36  ;;  %6627 = vmatprep.subr.bf16.mxu0 %v10987_v56  ;;  %v6086_v36 = vrot.slane %v6084_v15, 1  ;;  %v11013_v56 = vcombine.high %v6045_v42, %v6047_v44 }
 0x3b4   : > { %6733 = vmatprep.subr.bf16.mxu1 %v10989_v20  ;;  %v6048_v20 = vld [vmem:[#allocation9 + $0xa50] sm:$0xff]  ;;  %v6082_v21 = vor.u32 %v6081_v16, %v6077_v54  ;;  %v11030_v16 = vcombine.low %v6064_v8, %v6066_v10 }
 0x3b5   : > { %v11015_v29 = vcombine.high %v6048_v20, %v6050_v9 }
 0x3b6   : > { %6628 = vmatpush1.bf16.msra.mxu0 %v10986_v24  ;;  %v6051_v24 = vld [vmem:[#allocation9 + $0xa78] sm:$0xff] }
 0x3b7   : > { %6734 = vmatpush1.bf16.msra.mxu1 %v10988_v25  ;;  %6629 = vmatprep.subr.bf16.mxu0 %v10991_v26  ;;  %v11010_v25 = vcombine.low %v6044_v40, %v6046_v41  ;;  %v6087_v26 = vsel %vm348_vm0, %v6082_v21, %v6086_v36  ;;  %v11017_v13 = vcombine.high %v6049_v23, %v6051_v24  ;;  %v6068_v40 = vld [vmem:[#allocation9 + $0xb90] sm:$0xff]  ;;  %v6075_v21 = vld [vmem:[#allocation9 + $0xbf8] sm:$0xff] }
 0x3b8   : > { %6735 = vmatprep.subr.bf16.mxu1 %v10993_v27  ;;  %v11012_v27 = vcombine.low %v6045_v42, %v6047_v44  ;;  %v6070_v41 = vld [vmem:[#allocation9 + $0xbb0] sm:$0xff]  ;;  %v6069_v42 = vld [vmem:[#allocation9 + $0xb98] sm:$0xff] }
 0x3b9   : > { %v6071_v44 = vld [vmem:[#allocation9 + $0xbb8] sm:$0xff]  ;;  %v11034_v22 = vcombine.low %v6068_v40, %v6070_v41 }
 0x3ba   : > { %6630 = vmatpush1.bf16.msra.mxu0 %v10990_v32  ;;  %v6054_v32 = vld [vmem:[#allocation9 + $0xab0] sm:$0xff]  ;;  %v11037_v54 = vcombine.high %v6069_v42, %v6071_v44 }
 0x3bb   : > { %6736 = vmatpush1.bf16.msra.mxu1 %v10992_v60  ;;  %6631 = vmatprep.subr.bf16.mxu0 %v10995_v34  ;;  %v6053_v60 = vld [vmem:[#allocation9 + $0xa98] sm:$0xff]  ;;  %v11014_v34 = vcombine.low %v6048_v20, %v6050_v9  ;;  %v11019_v37 = vcombine.high %v6052_v31, %v6054_v32 }
 0x3bc   : > { %6737 = vmatprep.subr.bf16.mxu1 %v10997_v35  ;;  %v11016_v35 = vcombine.low %v6049_v23, %v6051_v24  ;;  %v11021_v46 = vcombine.high %v6053_v60, %v6055_v2  ;;  %v11020_v59 = vcombine.low %v6053_v60, %v6055_v2  ;;  %v6073_v9 = vld [vmem:[#allocation9 + $0xbd8] sm:$0xff]  ;;  %v11036_v23 = vcombine.low %v6069_v42, %v6071_v44  ;;  %v5899_v42 = vld [vmem:[#allocation9 + $0x130] sm:$0xff] }
 0x3be   : > { %6632 = vmatpush1.bf16.msra.mxu0 %v10994_v48  ;;  %v6057_v48 = vld [vmem:[#allocation9 + $0xad8] sm:$0xff] }
 0x3bf   : > { %6738 = vmatpush1.bf16.msra.mxu1 %v10996_v51  ;;  %6633 = vmatprep.subr.bf16.mxu0 %v10999_v55  ;;  %v6059_v51 = vld [vmem:[#allocation9 + $0xaf8] sm:$0xff]  ;;  %v6114_v55 = vor.u32 %v6112_v39, %v6086_v36  ;;  %v6072_v36 = vld [vmem:[#allocation9 + $0xbd0] sm:$0xff] }
 0x3c0   : > { %6739 = vmatprep.subr.bf16.mxu1 %v11001_v14  ;;  %v11018_v14 = vcombine.low %v6052_v31, %v6054_v32  ;;  %v11025_v19 = vcombine.high %v6057_v48, %v6059_v51  ;;  %v11024_v5 = vcombine.low %v6057_v48, %v6059_v51  ;;  %v5884_v31 = vld [vmem:[#allocation9 + $0x38] sm:$0xff] }
 0x3c1   : > { %v5888_v48 = vld [vmem:[#allocation9 + $0x78] sm:$0xff] }
 0x3c2   : > { %6634 = vmatpush1.bf16.msra.mxu0 %v10998_v58  ;;  %v6062_v58 = vld [vmem:[#allocation9 + $0xb30] sm:$0xff] }
 0x3c3   : > { %6740 = vmatpush1.bf16.msra.mxu1 %v11000_v63  ;;  %6635 = vmatprep.subr.bf16.mxu0 %v11003_v62  ;;  %v6061_v63 = vld [vmem:[#allocation9 + $0xb18] sm:$0xff]  ;;  %v11027_v38 = vcombine.high %v6060_v49, %v6062_v58 }
 0x3c4   : > { %6741 = vmatprep.subr.bf16.mxu1 %v11005_v4  ;;  %v6063_v62 = vld [vmem:[#allocation9 + $0xb38] sm:$0xff]  ;;  %v11022_v4 = vcombine.low %v6056_v43, %v6058_v47  ;;  %v5887_v43 = vld [vmem:[#allocation9 + $0x70] sm:$0xff] }
 0x3c5   : > { %v11029_v7 = vcombine.high %v6061_v63, %v6063_v62  ;;  %v5886_v47 = vld [vmem:[#allocation9 + $0x58] sm:$0xff] }
 0x3c6   : > { %6636 = vmatpush1.bf16.msra.mxu0 %v11002_v33  ;;  %v6065_v33 = vld [vmem:[#allocation9 + $0xb58] sm:$0xff] }
 0x3c7   : > { %6742 = vmatpush1.bf16.msra.mxu1 %v11004_v6  ;;  %6637 = vmatprep.subr.bf16.mxu0 %v11007_v12  ;;  %v11026_v6 = vcombine.low %v6060_v49, %v6062_v58  ;;  %v11028_v12 = vcombine.low %v6061_v63, %v6063_v62  ;;  %v11033_v15 = vcombine.high %v6065_v33, %v6067_v11  ;;  %v5889_v49 = vld [vmem:[#allocation9 + $0x90] sm:$0xff]  ;;  %v5890_v63 = vld [vmem:[#allocation9 + $0x98] sm:$0xff] }
 0x3c8   : > { %6743 = vmatprep.subr.bf16.mxu1 %v11009_v30  ;;  %v11031_v30 = vcombine.high %v6064_v8, %v6066_v10  ;;  %v5891_v58 = vld [vmem:[#allocation9 + $0xb0] sm:$0xff]  ;;  %v5892_v62 = vld [vmem:[#allocation9 + $0xb8] sm:$0xff] }
 0x3c9   : > { %v5893_v10 = vld [vmem:[#allocation9 + $0xd0] sm:$0xff] }
 0x3ca   : > { %6638 = vmatpush1.bf16.msra.mxu0 %v11006_v45  ;;  %v12828_v45 = vld [vmem:[#allocation2 + $0x10] sm:$0xff] }
 0x3cb   : > { %6744 = vmatpush1.bf16.msra.mxu1 %v11008_v17  ;;  %6660 = vmatprep.subr.bf16.mxu0 %v11011_v18  ;;  %v11032_v17 = vcombine.low %v6065_v33, %v6067_v11  ;;  %v11035_v18 = vcombine.high %v6068_v40, %v6070_v41  ;;  %v6103_v20 = vshll.u32 %v12828_v45, 16  ;;  %v6101_v60 = vshrl.u32 %v12828_v45, 16  ;;  %v5895_v33 = vld [vmem:[#allocation9 + $0xf0] sm:$0xff] }
 0x3cc   : > { %6766 = vmatprep.subr.bf16.mxu1 %v11013_v56  ;;  %v6074_v56 = vld [vmem:[#allocation9 + $0xbf0] sm:$0xff]  ;;  %v11050_v11 = vcombine.low %v5889_v49, %v5891_v58  ;;  %v11055_v40 = vcombine.high %v5893_v10, %v5895_v33 }
 0x3cd   : > { %6640 = vmatmul.mubr.bf16.vlgmr.msra.gmra.mrb[16].mxu0 %v6087_v26  ;;  %v11039_v24 = vcombine.high %v6072_v36, %v6074_v56  ;;  %v11038_v32 = vcombine.low %v6072_v36, %v6074_v56  ;;  %v5897_v41 = vld [vmem:[#allocation9 + $0x110] sm:$0xff] }
 0x3ce   : > { %6746 = vmatmul.mubr.bf16.vlgmr.msra.gmra.mrb[12].mxu1 %v6087_v26  ;;  %6649 = vmatprep.mubr.bf16.mxu0 %v6117_v28  ;;  %v11041_v26 = vcombine.high %v6073_v9, %v6075_v21  ;;  %v11059_v36 = vcombine.high %v5897_v41, %v5899_v42 }
 0x3cf   : > { %6661 = vmatpush1.bf16.msra.mxu0 %v11010_v25  ;;  %6755 = vmatprep.mubr.bf16.mxu1 %v6117_v28  ;;  %v5979_v25 = vld [vmem:[#allocation2 + $0x28] sm:$0x7f] }
 0x3d0   : > { %6767 = vmatpush1.bf16.msra.mxu1 %v11012_v27  ;;  %6662 = vmatprep.subr.bf16.mxu0 %v11015_v29  ;;  %v6105_v27 = vrot.slane %v6103_v20, 1  ;;  %v5881_v28 = vld [vmem:[#allocation9 + $0x10] sm:$0xff]  ;;  %v6108_v2 = vshll.u32 %v5979_v25, 16  ;;  %v6118_v8 = vshrl.u32 %v5979_v25, 16 }
 0x3d1   : > { %6768 = vmatprep.subr.bf16.mxu1 %v11017_v13  ;;  %v5883_v29 = vld [vmem:[#allocation9 + $0x30] sm:$0xff]  ;;  %v5882_v13 = vld [vmem:[#allocation9 + $0x18] sm:$0xff] }
 0x3d2   : > { %v11045_v39 = vcombine.high %v5882_v13, %v5884_v31  ;;  %v6110_v51 = vrot.slane %v6108_v2, 1  ;;  %v5901_v20 = vld [vmem:[#allocation9 + $0x150] sm:$0xff] }
 0x3d3   : > { %6663 = vmatpush1.bf16.msra.mxu0 %v11014_v34  ;;  %v11040_v34 = vcombine.low %v6073_v9, %v6075_v21  ;;  %v5903_v9 = vld [vmem:[#allocation9 + $0x170] sm:$0xff]  ;;  %v5902_v21 = vld [vmem:[#allocation9 + $0x158] sm:$0xff] }
 0x3d4   : > { %6769 = vmatpush1.bf16.msra.mxu1 %v11016_v35  ;;  %6664 = vmatprep.subr.bf16.mxu0 %v11019_v37  ;;  %v11043_v35 = vcombine.high %v5881_v28, %v5883_v29  ;;  %v6106_v37 = vor.u32 %v6105_v27, %v6101_v60  ;;  %v11063_v25 = vcombine.high %v5901_v20, %v5903_v9  ;;  %v5905_v27 = vld [vmem:[#allocation9 + $0x190] sm:$0xff] }
 0x3d5   : > { %6650 = vmatmul.mubr.bf16.gmra.mrb[20].mxu0 %v6114_v55  ;;  %6770 = vmatprep.subr.bf16.mxu1 %v11021_v46  ;;  %v5885_v46 = vld [vmem:[#allocation9 + $0x50] sm:$0xff] }
 0x3d6   : > { %6756 = vmatmul.mubr.bf16.gmra.mrb[16].mxu1 %v6114_v55  ;;  %6692 = vmatprep.mubr.bf16.mxu0 %v13310_v0  ;;  %v11042_v55 = vcombine.low %v5881_v28, %v5883_v29  ;;  %v5907_v28 = vld [vmem:[#allocation9 + $0x1b0] sm:$0xff]  ;;  %v5906_v29 = vld [vmem:[#allocation9 + $0x198] sm:$0xff] }
 0x3d7   : > { %6665 = vmatpush1.bf16.msra.mxu0 %v11018_v14  ;;  %6798 = vmatprep.mubr.bf16.mxu1 %v13310_v0  ;;  %v11044_v14 = vcombine.low %v5882_v13, %v5884_v31  ;;  %v5908_v13 = vld [vmem:[#allocation9 + $0x1b8] sm:$0xff]  ;;  %v5909_v2 = vld [vmem:[#allocation9 + $0x1d0] sm:$0xff] }
 0x3d8   : > { %6771 = vmatpush1.bf16.msra.mxu1 %v11020_v59  ;;  %6666 = vmatprep.subr.bf16.mxu0 %v11023_v57  ;;  %v11047_v59 = vcombine.high %v5885_v46, %v5887_v43  ;;  %v6111_v57 = vsel %vm348_vm0, %v6106_v37, %v6110_v51  ;;  %v11069_v60 = vcombine.high %v5906_v29, %v5908_v13  ;;  %v5912_v37 = vld [vmem:[#allocation9 + $0x1f8] sm:$0xff] }
 0x3d9   : > { %6772 = vmatprep.subr.bf16.mxu1 %v11025_v19  ;;  %v11049_v19 = vcombine.high %v5886_v47, %v5888_v48 }
 0x3db   : > { %6667 = vmatpush1.bf16.msra.mxu0 %v11022_v4  ;;  %v11046_v4 = vcombine.low %v5885_v46, %v5887_v43  ;;  %v11068_v46 = vcombine.low %v5906_v29, %v5908_v13  ;;  %v5936_v29 = vld [vmem:[#allocation9 + $0x378] sm:$0xff] }
 0x3dc   : > { %6773 = vmatpush1.bf16.msra.mxu1 %v11024_v5  ;;  %6668 = vmatprep.subr.bf16.mxu0 %v11027_v38  ;;  %v11048_v5 = vcombine.low %v5886_v47, %v5888_v48  ;;  %v11051_v38 = vcombine.high %v5889_v49, %v5891_v58  ;;  %v5913_v48 = vld [vmem:[#allocation9 + $0x210] sm:$0xff] }
 0x3dd   : > { %6774 = vmatprep.subr.bf16.mxu1 %v11029_v7  ;;  %v11053_v7 = vcombine.high %v5890_v63, %v5892_v62  ;;  %v5917_v58 = vld [vmem:[#allocation9 + $0x250] sm:$0xff] }
 0x3df   : > { %6669 = vmatpush1.bf16.msra.mxu0 %v11026_v6  ;;  %v5894_v6 = vld [vmem:[#allocation9 + $0xd8] sm:$0xff] }
 0x3e0   : > { %6775 = vmatpush1.bf16.msra.mxu1 %v11028_v12  ;;  %6670 = vmatprep.subr.bf16.mxu0 %v11031_v30  ;;  %v5896_v12 = vld [vmem:[#allocation9 + $0xf8] sm:$0xff]  ;;  %v6120_v30 = vor.u32 %v6118_v8, %v6110_v51  ;;  %v5915_v51 = vld [vmem:[#allocation9 + $0x230] sm:$0xff] }
 0x3e1   : > { %6776 = vmatprep.subr.bf16.mxu1 %v11033_v15  ;;  %v11052_v15 = vcombine.low %v5890_v63, %v5892_v62  ;;  %v11057_v44 = vcombine.high %v5894_v6, %v5896_v12  ;;  %v5919_v63 = vld [vmem:[#allocation9 + $0x270] sm:$0xff]  ;;  %v5918_v62 = vld [vmem:[#allocation9 + $0x258] sm:$0xff] }
 0x3e3   : > { %6671 = vmatpush1.bf16.msra.mxu0 %v11030_v16  ;;  %v5898_v16 = vld [vmem:[#allocation9 + $0x118] sm:$0xff] }
 0x3e4   : > { %6777 = vmatpush1.bf16.msra.mxu1 %v11032_v17  ;;  %6672 = vmatprep.subr.bf16.mxu0 %v11035_v18  ;;  %v5900_v17 = vld [vmem:[#allocation9 + $0x138] sm:$0xff]  ;;  %v11054_v18 = vcombine.low %v5893_v10, %v5895_v33  ;;  %v5921_v10 = vld [vmem:[#allocation9 + $0x290] sm:$0xff] }
 0x3e5   : > { %6778 = vmatprep.subr.bf16.mxu1 %v11037_v54  ;;  %v11056_v54 = vcombine.low %v5894_v6, %v5896_v12  ;;  %v11061_v56 = vcombine.high %v5898_v16, %v5900_v17  ;;  %v5923_v33 = vld [vmem:[#allocation9 + $0x2b0] sm:$0xff]  ;;  %v5924_v6 = vld [vmem:[#allocation9 + $0x2b8] sm:$0xff]  ;;  %v11078_v12 = vcombine.low %v5917_v58, %v5919_v63 }
 0x3e7   : > { %6673 = vmatpush1.bf16.msra.mxu0 %v11034_v22  ;;  %v5904_v22 = vld [vmem:[#allocation9 + $0x178] sm:$0xff] }
 0x3e8   : > { %6779 = vmatpush1.bf16.msra.mxu1 %v11036_v23  ;;  %6674 = vmatprep.subr.bf16.mxu0 %v11039_v24  ;;  %v11058_v23 = vcombine.low %v5897_v41, %v5899_v42  ;;  %v11060_v24 = vcombine.low %v5898_v16, %v5900_v17  ;;  %v11064_v31 = vcombine.low %v5902_v21, %v5904_v22  ;;  %v5925_v41 = vld [vmem:[#allocation9 + $0x2d0] sm:$0xff]  ;;  %v5928_v16 = vld [vmem:[#allocation9 + $0x2f8] sm:$0xff] }
 0x3e9   : > { %6780 = vmatprep.subr.bf16.mxu1 %v11041_v26  ;;  %v11065_v26 = vcombine.high %v5902_v21, %v5904_v22  ;;  %v5927_v42 = vld [vmem:[#allocation9 + $0x2f0] sm:$0xff]  ;;  %v11082_v17 = vcombine.low %v5921_v10, %v5923_v33  ;;  %v5932_v21 = vld [vmem:[#allocation9 + $0x338] sm:$0xff] }
 0x3ea   : > { %v11086_v22 = vcombine.low %v5925_v41, %v5927_v42 }
 0x3eb   : > { %6675 = vmatpush1.bf16.msra.mxu0 %v11038_v32  ;;  %v11067_v32 = vcombine.high %v5905_v27, %v5907_v28 }
 0x3ec   : > { %6781 = vmatpush1.bf16.msra.mxu1 %v11040_v34  ;;  %7299 = vmatprep.subr.bf16.mxu0 %v11043_v35  ;;  %v5911_v34 = vld [vmem:[#allocation9 + $0x1f0] sm:$0xff]  ;;  %v5910_v35 = vld [vmem:[#allocation9 + $0x1d8] sm:$0xff] }
 0x3ed   : > { %7405 = vmatprep.subr.bf16.mxu1 %v11045_v39  ;;  %v11066_v39 = vcombine.low %v5905_v27, %v5907_v28  ;;  %v11071_v43 = vcombine.high %v5909_v2, %v5911_v34  ;;  %v11073_v47 = vcombine.high %v5910_v35, %v5912_v37  ;;  %v5935_v27 = vld [vmem:[#allocation9 + $0x370] sm:$0xff]  ;;  %v5934_v28 = vld [vmem:[#allocation9 + $0x358] sm:$0xff] }
 0x3ee   : > { %6693 = vmatmul.mubr.bf16.vlgmr.msra.gmra.mrb[16].mxu0 %v6111_v57 }
 0x3ef   : > { %6799 = vmatmul.mubr.bf16.vlgmr.msra.gmra.mrb[12].mxu1 %v6111_v57  ;;  %7300 = vmatpush1.bf16.msra.mxu0 %v11042_v55  ;;  %v5914_v55 = vld [vmem:[#allocation9 + $0x218] sm:$0xff]  ;;  %v11072_v57 = vcombine.low %v5910_v35, %v5912_v37 }
 0x3f0   : > { %7406 = vmatpush1.bf16.msra.mxu1 %v11044_v14  ;;  %7301 = vmatprep.subr.bf16.mxu0 %v11047_v59  ;;  %v5916_v14 = vld [vmem:[#allocation9 + $0x238] sm:$0xff]  ;;  %v11070_v59 = vcombine.low %v5909_v2, %v5911_v34  ;;  %v5939_v2 = vld [vmem:[#allocation9 + $0x3b0] sm:$0xff] }
 0x3f1   : > { %7407 = vmatprep.subr.bf16.mxu1 %v11049_v19  ;;  %6702 = vmatprep.mubr.bf16.mxu0 %v13310_v0  ;;  %v11075_v19 = vcombine.high %v5913_v48, %v5915_v51  ;;  %v11077_v49 = vcombine.high %v5914_v55, %v5916_v14  ;;  %v5938_v34 = vld [vmem:[#allocation9 + $0x398] sm:$0xff] }
 0x3f2   : > { %6808 = vmatprep.mubr.bf16.mxu1 %v13310_v0  ;;  %v5940_v35 = vld [vmem:[#allocation9 + $0x3b8] sm:$0xff] }
 0x3f3   : > { %7302 = vmatpush1.bf16.msra.mxu0 %v11046_v4  ;;  %v5920_v4 = vld [vmem:[#allocation9 + $0x278] sm:$0xff] }
 0x3f4   : > { %7408 = vmatpush1.bf16.msra.mxu1 %v11048_v5  ;;  %7303 = vmatprep.subr.bf16.mxu0 %v11051_v38  ;;  %v11074_v5 = vcombine.low %v5913_v48, %v5915_v51  ;;  %v11076_v38 = vcombine.low %v5914_v55, %v5916_v14  ;;  %v11081_v8 = vcombine.high %v5918_v62, %v5920_v4  ;;  %v5943_v48 = vld [vmem:[#allocation9 + $0x3f0] sm:$0xff]  ;;  %v5942_v51 = vld [vmem:[#allocation9 + $0x3d8] sm:$0xff] }
 0x3f5   : > { %7409 = vmatprep.subr.bf16.mxu1 %v11053_v7  ;;  %v11079_v7 = vcombine.high %v5917_v58, %v5919_v63  ;;  %v5944_v55 = vld [vmem:[#allocation9 + $0x3f8] sm:$0xff]  ;;  %v5947_v58 = vld [vmem:[#allocation9 + $0x430] sm:$0xff] }
 0x3f6   : > { %6703 = vmatmul.mubr.bf16.gmra.mrb[20].mxu0 %v6120_v30  ;;  %v5946_v63 = vld [vmem:[#allocation9 + $0x418] sm:$0xff] }
 0x3f7   : > { %6809 = vmatmul.mubr.bf16.gmra.mrb[16].mxu1 %v6120_v30  ;;  %7304 = vmatpush1.bf16.msra.mxu0 %v11050_v11  ;;  %v5922_v11 = vld [vmem:[#allocation9 + $0x298] sm:$0xff]  ;;  %v11080_v30 = vcombine.low %v5918_v62, %v5920_v4 }
 0x3f8   : > { %7331 = vmatprep.mubr.bf16.mxu0 %v12801_v61  ;;  %7410 = vmatpush1.bf16.msra.mxu1 %v11052_v15  ;;  %v11083_v15 = vcombine.high %v5921_v10, %v5923_v33  ;;  %v5948_v62 = vld [vmem:[#allocation9 + $0x438] sm:$0xff]  ;;  %v5951_v10 = vld [vmem:[#allocation9 + $0x470] sm:$0xff] }
 0x3f9   : > { %7437 = vmatprep.mubr.bf16.mxu1 %v12801_v61  ;;  %7305 = vmatprep.subr.bf16.mxu0 %v11055_v40  ;;  %v11062_v61 = vcombine.low %v5901_v20, %v5903_v9  ;;  %v11085_v40 = vcombine.high %v5922_v11, %v5924_v6  ;;  %v5931_v20 = vld [vmem:[#allocation9 + $0x330] sm:$0xff]  ;;  %v5930_v9 = vld [vmem:[#allocation9 + $0x318] sm:$0xff] }
 0x3fa   : > { %7411 = vmatprep.subr.bf16.mxu1 %v11057_v44  ;;  %v5926_v44 = vld [vmem:[#allocation9 + $0x2d8] sm:$0xff] }
 0x3fb   : > { %7306 = vmatpush1.bf16.msra.mxu0 %v11054_v18  ;;  %v11084_v18 = vcombine.low %v5922_v11, %v5924_v6  ;;  %v5950_v33 = vld [vmem:[#allocation9 + $0x458] sm:$0xff] }
 0x3fc   : > { %7412 = vmatpush1.bf16.msra.mxu1 %v11056_v54  ;;  %7307 = vmatprep.subr.bf16.mxu0 %v11059_v36  ;;  %v11087_v54 = vcombine.high %v5925_v41, %v5927_v42  ;;  %v11089_v36 = vcombine.high %v5926_v44, %v5928_v16  ;;  %v5952_v11 = vld [vmem:[#allocation9 + $0x478] sm:$0xff]  ;;  %v5953_v41 = vld [vmem:[#allocation9 + $0x490] sm:$0xff] }
 0x3fd   : > { %7413 = vmatprep.subr.bf16.mxu1 %v11061_v56  ;;  %v5929_v56 = vld [vmem:[#allocation9 + $0x310] sm:$0xff] }
 0x3fe   : > { %v11090_v13 = vcombine.low %v5929_v56, %v5931_v20  ;;  %v5955_v42 = vld [vmem:[#allocation9 + $0x4b0] sm:$0xff] }
 0x3ff   : > { %7308 = vmatpush1.bf16.msra.mxu0 %v11058_v23  ;;  %v11088_v23 = vcombine.low %v5926_v44, %v5928_v16  ;;  %v5954_v44 = vld [vmem:[#allocation9 + $0x498] sm:$0xff] }
 0x400   : > { %7414 = vmatpush1.bf16.msra.mxu1 %v11060_v24  ;;  %7309 = vmatprep.subr.bf16.mxu0 %v11063_v25  ;;  %v11091_v24 = vcombine.high %v5929_v56, %v5931_v20  ;;  %v11093_v25 = vcombine.high %v5930_v9, %v5932_v21  ;;  %v5956_v16 = vld [vmem:[#allocation9 + $0x4b8] sm:$0xff]  ;;  %v5957_v56 = vld [vmem:[#allocation9 + $0x4d0] sm:$0xff] }
 0x401   : > { %7415 = vmatprep.subr.bf16.mxu1 %v11065_v26  ;;  %v5933_v26 = vld [vmem:[#allocation9 + $0x350] sm:$0xff] }
 0x402   : > { %v11094_v37 = vcombine.low %v5933_v26, %v5935_v27  ;;  %v5959_v20 = vld [vmem:[#allocation9 + $0x4f0] sm:$0xff] }
 0x403   : > { %7310 = vmatpush1.bf16.msra.mxu0 %v11062_v61  ;;  %v11092_v61 = vcombine.low %v5930_v9, %v5932_v21  ;;  %v5958_v9 = vld [vmem:[#allocation9 + $0x4d8] sm:$0xff] }
 0x404   : > { %7416 = vmatpush1.bf16.msra.mxu1 %v11064_v31  ;;  %7311 = vmatprep.subr.bf16.mxu0 %v11067_v32  ;;  %v11095_v31 = vcombine.high %v5933_v26, %v5935_v27  ;;  %v11097_v32 = vcombine.high %v5934_v28, %v5936_v29  ;;  %v5960_v21 = vld [vmem:[#allocation9 + $0x4f8] sm:$0xff]  ;;  %v5961_v26 = vld [vmem:[#allocation9 + $0x510] sm:$0xff] }
 0x405   : > { %7417 = vmatprep.subr.bf16.mxu1 %v11069_v60  ;;  %v5937_v60 = vld [vmem:[#allocation9 + $0x390] sm:$0xff] }
 0x406   : > { %v11098_v14 = vcombine.low %v5937_v60, %v5939_v2  ;;  %v5963_v27 = vld [vmem:[#allocation9 + $0x530] sm:$0xff] }
 0x407   : > { %7312 = vmatpush1.bf16.msra.mxu0 %v11066_v39  ;;  %v11096_v39 = vcombine.low %v5934_v28, %v5936_v29  ;;  %v5962_v28 = vld [vmem:[#allocation9 + $0x518] sm:$0xff] }
 0x408   : > { %7418 = vmatpush1.bf16.msra.mxu1 %v11068_v46  ;;  %7313 = vmatprep.subr.bf16.mxu0 %v11071_v43  ;;  %v11099_v46 = vcombine.high %v5937_v60, %v5939_v2  ;;  %v11101_v43 = vcombine.high %v5938_v34, %v5940_v35  ;;  %v5964_v29 = vld [vmem:[#allocation9 + $0x538] sm:$0xff]  ;;  %v5965_v60 = vld [vmem:[#allocation9 + $0x550] sm:$0xff] }
 0x409   : > { %7419 = vmatprep.subr.bf16.mxu1 %v11073_v47  ;;  %v5941_v47 = vld [vmem:[#allocation9 + $0x3d0] sm:$0xff] }
 0x40a   : > { %v11102_v4 = vcombine.low %v5941_v47, %v5943_v48  ;;  %v5967_v2 = vld [vmem:[#allocation9 + $0x570] sm:$0xff] }
 0x40b   : > { %7314 = vmatpush1.bf16.msra.mxu0 %v11070_v59  ;;  %v11100_v59 = vcombine.low %v5938_v34, %v5940_v35  ;;  %v5966_v34 = vld [vmem:[#allocation9 + $0x558] sm:$0xff] }
 0x40c   : > { %7420 = vmatpush1.bf16.msra.mxu1 %v11072_v57  ;;  %7315 = vmatprep.subr.bf16.mxu0 %v11075_v19  ;;  %v11103_v57 = vcombine.high %v5941_v47, %v5943_v48  ;;  %v11105_v19 = vcombine.high %v5942_v51, %v5944_v55  ;;  %v5968_v35 = vld [vmem:[#allocation9 + $0x578] sm:$0xff]  ;;  %v5969_v47 = vld [vmem:[#allocation9 + $0x590] sm:$0xff] }
 0x40d   : > { %7421 = vmatprep.subr.bf16.mxu1 %v11077_v49  ;;  %v5945_v49 = vld [vmem:[#allocation9 + $0x410] sm:$0xff] }
 0x40e   : > { %v11106_v6 = vcombine.low %v5945_v49, %v5947_v58  ;;  %v5971_v48 = vld [vmem:[#allocation9 + $0x5b0] sm:$0xff] }
 0x40f   : > { %7316 = vmatpush1.bf16.msra.mxu0 %v11074_v5  ;;  %v11104_v5 = vcombine.low %v5942_v51, %v5944_v55  ;;  %v5970_v51 = vld [vmem:[#allocation9 + $0x598] sm:$0xff] }
 0x410   : > { %7422 = vmatpush1.bf16.msra.mxu1 %v11076_v38  ;;  %7317 = vmatprep.subr.bf16.mxu0 %v11079_v7  ;;  %v11107_v38 = vcombine.high %v5945_v49, %v5947_v58  ;;  %v11109_v7 = vcombine.high %v5946_v63, %v5948_v62  ;;  %v5972_v55 = vld [vmem:[#allocation9 + $0x5b8] sm:$0xff]  ;;  %v5973_v49 = vld [vmem:[#allocation9 + $0x5d0] sm:$0xff] }
 0x411   : > { %7423 = vmatprep.subr.bf16.mxu1 %v11081_v8  ;;  %v5949_v8 = vld [vmem:[#allocation9 + $0x450] sm:$0xff] }
 0x412   : > { %v5975_v58 = vld [vmem:[#allocation9 + $0x5f0] sm:$0xff] }
 0x413   : > { %7318 = vmatpush1.bf16.msra.mxu0 %v11078_v12  ;;  %v11108_v12 = vcombine.low %v5946_v63, %v5948_v62  ;;  %v5974_v63 = vld [vmem:[#allocation9 + $0x5d8] sm:$0xff] }
 0x414   : > { %7424 = vmatpush1.bf16.msra.mxu1 %v11080_v30  ;;  %7319 = vmatprep.subr.bf16.mxu0 %v11083_v15  ;;  %v11111_v30 = vcombine.high %v5949_v8, %v5951_v10  ;;  %v5879_v15 = vld [vmem:[#allocation2 + $0x20] sm:$0x3f]  ;;  %v5976_v62 = vld [vmem:[#allocation9 + $0x5f8] sm:$0xff] }
 0x415   : > { %7425 = vmatprep.subr.bf16.mxu1 %v11085_v40  ;;  %v11113_v40 = vcombine.high %v5950_v33, %v5952_v11 }
 0x417   : > { %7320 = vmatpush1.bf16.msra.mxu0 %v11082_v17  ;;  %v11110_v17 = vcombine.low %v5949_v8, %v5951_v10  ;;  %v7514_v8 = vld [vmem:[#allocation9 + $0xc10] sm:$0xff] }
 0x418   : > { %7426 = vmatpush1.bf16.msra.mxu1 %v11084_v18  ;;  %7321 = vmatprep.subr.bf16.mxu0 %v11087_v54  ;;  %v11112_v18 = vcombine.low %v5950_v33, %v5952_v11  ;;  %v11115_v54 = vcombine.high %v5953_v41, %v5955_v42  ;;  %v7516_v10 = vld [vmem:[#allocation9 + $0xc30] sm:$0xff]  ;;  %v7515_v33 = vld [vmem:[#allocation9 + $0xc18] sm:$0xff] }
 0x419   : > { %7427 = vmatprep.subr.bf16.mxu1 %v11089_v36  ;;  %v11117_v36 = vcombine.high %v5954_v44, %v5956_v16  ;;  %v7517_v11 = vld [vmem:[#allocation9 + $0xc38] sm:$0xff] }
 0x41b   : > { %7322 = vmatpush1.bf16.msra.mxu0 %v11086_v22  ;;  %v11114_v22 = vcombine.low %v5953_v41, %v5955_v42  ;;  %v7520_v41 = vld [vmem:[#allocation9 + $0xc70] sm:$0xff]  ;;  %v7519_v42 = vld [vmem:[#allocation9 + $0xc58] sm:$0xff] }
 0x41c   : > { %7428 = vmatpush1.bf16.msra.mxu1 %v11088_v23  ;;  %7323 = vmatprep.subr.bf16.mxu0 %v11091_v24  ;;  %v11116_v23 = vcombine.low %v5954_v44, %v5956_v16  ;;  %v11119_v24 = vcombine.high %v5957_v56, %v5959_v20  ;;  %v7521_v44 = vld [vmem:[#allocation9 + $0xc78] sm:$0xff]  ;;  %v11138_v16 = vcombine.low %v7514_v8, %v7516_v10 }
 0x41d   : > { %7429 = vmatprep.subr.bf16.mxu1 %v11093_v25  ;;  %v11121_v25 = vcombine.high %v5958_v9, %v5960_v21 }
 0x41f   : > { %7324 = vmatpush1.bf16.msra.mxu0 %v11090_v13  ;;  %v11118_v13 = vcombine.low %v5957_v56, %v5959_v20  ;;  %v7524_v56 = vld [vmem:[#allocation9 + $0xcb0] sm:$0xff]  ;;  %v7523_v20 = vld [vmem:[#allocation9 + $0xc98] sm:$0xff] }
 0x420   : > { %7430 = vmatpush1.bf16.msra.mxu1 %v11092_v61  ;;  %7325 = vmatprep.subr.bf16.mxu0 %v11095_v31  ;;  %v11120_v61 = vcombine.low %v5958_v9, %v5960_v21  ;;  %v11123_v31 = vcombine.high %v5961_v26, %v5963_v27  ;;  %v7525_v9 = vld [vmem:[#allocation9 + $0xcb8] sm:$0xff] }
 0x421   : > { %7431 = vmatprep.subr.bf16.mxu1 %v11097_v32  ;;  %v11125_v32 = vcombine.high %v5962_v28, %v5964_v29 }
 0x423   : > { %7326 = vmatpush1.bf16.msra.mxu0 %v11094_v37  ;;  %v11122_v37 = vcombine.low %v5961_v26, %v5963_v27  ;;  %v7528_v26 = vld [vmem:[#allocation9 + $0xcf0] sm:$0xff] }
 0x424   : > { %7432 = vmatpush1.bf16.msra.mxu1 %v11096_v39  ;;  %7327 = vmatprep.subr.bf16.mxu0 %v11099_v46  ;;  %v11124_v39 = vcombine.low %v5962_v28, %v5964_v29  ;;  %v11127_v46 = vcombine.high %v5965_v60, %v5967_v2  ;;  %v12045_v28 = vld [vmem:[#allocation2 + $0x20] sm:$0x7f]  ;;  %v7527_v29 = vld [vmem:[#allocation9 + $0xcd8] sm:$0xff] }
 0x425   : > { %7433 = vmatprep.subr.bf16.mxu1 %v11101_v43  ;;  %v11129_v43 = vcombine.high %v5966_v34, %v5968_v35 }
 0x427   : > { %7328 = vmatpush1.bf16.msra.mxu0 %v11098_v14  ;;  %v11126_v14 = vcombine.low %v5965_v60, %v5967_v2  ;;  %v12850_v2 = vld [vmem:[#allocation9 + $0xd10] sm:$0xff] }
 0x428   : > { %7434 = vmatpush1.bf16.msra.mxu1 %v11100_v59  ;;  %7329 = vmatprep.subr.bf16.mxu0 %v11103_v57  ;;  %v11128_v59 = vcombine.low %v5966_v34, %v5968_v35  ;;  %v11131_v57 = vcombine.high %v5969_v47, %v5971_v48  ;;  %v12852_v34 = vld [vmem:[#allocation9 + $0xd30] sm:$0xff] }
 0x429   : > { %7435 = vmatprep.subr.bf16.mxu1 %v11105_v19  ;;  %v11133_v19 = vcombine.high %v5970_v51, %v5972_v55 }
 0x42b   : > { %7330 = vmatpush1.bf16.msra.mxu0 %v11102_v4  ;;  %v11130_v4 = vcombine.low %v5969_v47, %v5971_v48  ;;  %v12860_v48 = vld [vmem:[#allocation9 + $0xd50] sm:$0xff] }
 0x42c   : > { %7436 = vmatpush1.bf16.msra.mxu1 %v11104_v5  ;;  %7352 = vmatprep.subr.bf16.mxu0 %v11107_v38  ;;  %v11132_v5 = vcombine.low %v5970_v51, %v5972_v55  ;;  %v11135_v38 = vcombine.high %v5973_v49, %v5975_v58  ;;  %v12862_v51 = vld [vmem:[#allocation9 + $0xd70] sm:$0xff]  ;;  %v12864_v55 = vld [vmem:[#allocation9 + $0xd58] sm:$0xff] }
 0x42d   : > { %7458 = vmatprep.subr.bf16.mxu1 %v11109_v7  ;;  %v11137_v7 = vcombine.high %v5974_v63, %v5976_v62 }
 0x42e   : > { %7332 = vmatmul.mubr.bf16.vlgmr.msra.gmra.mrb[16].mxu0 %v12815_v1 }
 0x42f   : > { %7438 = vmatmul.mubr.bf16.vlgmr.msra.gmra.mrb[12].mxu1 %v12815_v1  ;;  %7341 = vmatprep.mubr.bf16.mxu0 %v5879_v15  ;;  %v5878_v1 = vld [vmem:[#allocation2 + $0x18] sm:$0x3f] }
 0x430   : > { %7353 = vmatpush1.bf16.msra.mxu0 %v11106_v6  ;;  %7447 = vmatprep.mubr.bf16.mxu1 %v5879_v15  ;;  %v11134_v6 = vcombine.low %v5973_v49, %v5975_v58  ;;  %v11141_v15 = vcombine.high %v7515_v33, %v7517_v11  ;;  %v12872_v49 = vld [vmem:[#allocation9 + $0xdb0] sm:$0xff]  ;;  %v11154_v58 = vcombine.low %v12850_v2, %v12852_v34 }
 0x431   : > { %7459 = vmatpush1.bf16.msra.mxu1 %v11108_v12  ;;  %7354 = vmatprep.subr.bf16.mxu0 %v11111_v30  ;;  %v11136_v12 = vcombine.low %v5974_v63, %v5976_v62  ;;  %v11139_v30 = vcombine.high %v7514_v8, %v7516_v10  ;;  %v12878_v62 = vld [vmem:[#allocation9 + $0xd98] sm:$0xff] }
 0x432   : > { %7460 = vmatprep.subr.bf16.mxu1 %v11113_v40  ;;  %v7518_v40 = vld [vmem:[#allocation9 + $0xc50] sm:$0xff] }
 0x433   : > { %v11142_v21 = vcombine.low %v7518_v40, %v7520_v41 }
 0x434   : > { %7355 = vmatpush1.bf16.msra.mxu0 %v11110_v17  ;;  %v11140_v17 = vcombine.low %v7515_v33, %v7517_v11  ;;  %v12895_v33 = vld [vmem:[#allocation9 + $0xdf0] sm:$0xff]  ;;  %v12897_v11 = vld [vmem:[#allocation9 + $0xdd8] sm:$0xff] }
 0x435   : > { %7461 = vmatpush1.bf16.msra.mxu1 %v11112_v18  ;;  %7356 = vmatprep.subr.bf16.mxu0 %v11115_v54  ;;  %v11143_v18 = vcombine.high %v7518_v40, %v7520_v41  ;;  %v11145_v54 = vcombine.high %v7519_v42, %v7521_v44  ;;  %v12910_v41 = vld [vmem:[#allocation9 + $0xe10] sm:$0xff] }
 0x436   : > { %7342 = vmatmul.mubr.bf16.gmra.mrb[20].mxu0 %v5878_v1  ;;  %7462 = vmatprep.subr.bf16.mxu1 %v11117_v36  ;;  %v7522_v36 = vld [vmem:[#allocation9 + $0xc90] sm:$0xff] }
 0x437   : > { %7448 = vmatmul.mubr.bf16.gmra.mrb[16].mxu1 %v5878_v1  ;;  %7384 = vmatprep.mubr.bf16.mxu0 %v13310_v0  ;;  %v11147_v1 = vcombine.high %v7522_v36, %v7524_v56  ;;  %v11146_v27 = vcombine.low %v7522_v36, %v7524_v56  ;;  %v12924_v36 = vld [vmem:[#allocation9 + $0xe50] sm:$0xff] }
 0x438   : > { %7357 = vmatpush1.bf16.msra.mxu0 %v11114_v22  ;;  %7490 = vmatprep.mubr.bf16.mxu1 %v13310_v0  ;;  %v11144_v22 = vcombine.low %v7519_v42, %v7521_v44  ;;  %v12912_v42 = vld [vmem:[#allocation9 + $0xe30] sm:$0xff]  ;;  %v12914_v44 = vld [vmem:[#allocation9 + $0xe18] sm:$0xff] }
 0x439   : > { %7463 = vmatpush1.bf16.msra.mxu1 %v11116_v23  ;;  %7358 = vmatprep.subr.bf16.mxu0 %v11119_v24  ;;  %v11149_v23 = vcombine.high %v7523_v20, %v7525_v9  ;;  %v12845_v24 = vld [vmem:[#allocation2 + $0x8] sm:$0xfe] }
 0x43a   : > { %7464 = vmatprep.subr.bf16.mxu1 %v11121_v25  ;;  %v7526_v25 = vld [vmem:[#allocation9 + $0xcd0] sm:$0xff] }
 0x43b   : > { %v11151_v60 = vcombine.high %v7526_v25, %v7528_v26  ;;  %v11150_v47 = vcombine.low %v7526_v25, %v7528_v26  ;;  %v12926_v56 = vld [vmem:[#allocation9 + $0xe70] sm:$0xff] }
 0x43c   : > { %7359 = vmatpush1.bf16.msra.mxu0 %v11118_v13  ;;  %v7529_v13 = vld [vmem:[#allocation9 + $0xcf8] sm:$0xff] }
 0x43d   : > { %7465 = vmatpush1.bf16.msra.mxu1 %v11120_v61  ;;  %7360 = vmatprep.subr.bf16.mxu0 %v11123_v31  ;;  %v11148_v61 = vcombine.low %v7523_v20, %v7525_v9  ;;  %v5880_v31 = vld [vmem:[#allocation2 + $0x28] sm:$0x3f]  ;;  %v11153_v35 = vcombine.high %v7527_v29, %v7529_v13 }
 0x43e   : > { %7466 = vmatprep.subr.bf16.mxu1 %v11125_v32  ;;  %v7619_v32 = vrot.slane %v12845_v24, 1 }
 0x440   : > { %7361 = vmatpush1.bf16.msra.mxu0 %v11122_v37  ;;  %v12854_v37 = vld [vmem:[#allocation9 + $0xd18] sm:$0xff] }
 0x441   : > { %7467 = vmatpush1.bf16.msra.mxu1 %v11124_v39  ;;  %7362 = vmatprep.subr.bf16.mxu0 %v11127_v46  ;;  %v12856_v39 = vld [vmem:[#allocation9 + $0xd38] sm:$0xff]  ;;  %v5669_v46 = vld [vmem:[#allocation11] sm:$0xf] }
 0x442   : > { %7468 = vmatprep.subr.bf16.mxu1 %v11129_v43  ;;  %v11157_v63 = vcombine.high %v12854_v37, %v12856_v39  ;;  %v12890_v8 = vrot.slane %v5669_v46, %v12640_v52  ;;  %v12893_v10 = vrot.slane %v5669_v46, %v12642_v53 }
 0x444   : > { %7363 = vmatpush1.bf16.msra.mxu0 %v11126_v14  ;;  %v11152_v14 = vcombine.low %v7527_v29, %v7529_v13  ;;  %v12948_v29 = vld [vmem:[#allocation9 + $0xe90] sm:$0xff] }
 0x445   : > { %7469 = vmatpush1.bf16.msra.mxu1 %v11128_v59  ;;  %7364 = vmatprep.subr.bf16.mxu0 %v11131_v57  ;;  %v11155_v59 = vcombine.high %v12850_v2, %v12852_v34  ;;  %v12868_v57 = vld [vmem:[#allocation9 + $0xd78] sm:$0xff]  ;;  %v12950_v13 = vld [vmem:[#allocation9 + $0xeb0] sm:$0xff] }
 0x446   : > { %7470 = vmatprep.subr.bf16.mxu1 %v11133_v19  ;;  %v12870_v19 = vld [vmem:[#allocation9 + $0xd90] sm:$0xff]  ;;  %v11160_v40 = vcombine.low %v12864_v55, %v12868_v57  ;;  %v12960_v34 = vld [vmem:[#allocation9 + $0xe98] sm:$0xff] }
 0x448   : > { %7365 = vmatpush1.bf16.msra.mxu0 %v11130_v4  ;;  %v12880_v4 = vld [vmem:[#allocation9 + $0xdb8] sm:$0xff] }
 0x449   : > { %7471 = vmatpush1.bf16.msra.mxu1 %v11132_v5  ;;  %7366 = vmatprep.subr.bf16.mxu0 %v11135_v38  ;;  %v12882_v5 = vld [vmem:[#allocation9 + $0xdd0] sm:$0xff]  ;;  %v11156_v38 = vcombine.low %v12854_v37, %v12856_v39  ;;  %v11164_v20 = vcombine.low %v12878_v62, %v12880_v4  ;;  %v11165_v9 = vcombine.high %v12878_v62, %v12880_v4 }
 0x44a   : > { %7472 = vmatprep.subr.bf16.mxu1 %v11137_v7  ;;  %v12887_v7 = vrot.slane %v5669_v46, %v12638_v50 }
 0x44c   : > { %7367 = vmatpush1.bf16.msra.mxu0 %v11134_v6  ;;  %v12899_v6 = vld [vmem:[#allocation9 + $0xdf8] sm:$0xff] }
 0x44d   : > { %7473 = vmatpush1.bf16.msra.mxu1 %v11136_v12  ;;  %8111 = vmatprep.subr.bf16.mxu0 %v11139_v30  ;;  %v12902_v12 = vrot.slane %v5669_v46, %v12653_v3  ;;  %v11158_v30 = vcombine.low %v12860_v48, %v12862_v51  ;;  %v11168_v25 = vcombine.low %v12897_v11, %v12899_v6 }
 0x44e   : > { %8217 = vmatprep.subr.bf16.mxu1 %v11141_v15  ;;  %v11159_v15 = vcombine.high %v12860_v48, %v12862_v51  ;;  %v11169_v26 = vcombine.high %v12897_v11, %v12899_v6 }
 0x44f   : > { %7385 = vmatmul.mubr.bf16.vlgmr.msra.gmra.mrb[16].mxu0 %v12828_v45 }
 0x450   : > { %7491 = vmatmul.mubr.bf16.vlgmr.msra.gmra.mrb[12].mxu1 %v12828_v45  ;;  %8112 = vmatpush1.bf16.msra.mxu0 %v11138_v16  ;;  %v12847_v45 = vrot.slane %v12045_v28, 1  ;;  %v11161_v16 = vcombine.high %v12864_v55, %v12868_v57  ;;  %v11171_v28 = vcombine.high %v12910_v41, %v12912_v42 }
 0x451   : > { %8218 = vmatpush1.bf16.msra.mxu1 %v11140_v17  ;;  %8113 = vmatprep.subr.bf16.mxu0 %v11143_v18  ;;  %v11162_v17 = vcombine.low %v12870_v19, %v12872_v49  ;;  %v11163_v18 = vcombine.high %v12870_v19, %v12872_v49 }
 0x452   : > { %8219 = vmatprep.subr.bf16.mxu1 %v11145_v54  ;;  %7394 = vmatprep.mubr.bf16.mxu0 %v13310_v0  ;;  %v7621_v43 = vsel %vm732_vm2, %v7619_v32, %v12847_v45  ;;  %v12922_v54 = vld [vmem:[#allocation9 + $0xe38] sm:$0xff] }
 0x453   : > { %7500 = vmatprep.mubr.bf16.mxu1 %v13310_v0  ;;  %v11173_v32 = vcombine.high %v12914_v44, %v12922_v54 }
 0x454   : > { %8114 = vmatpush1.bf16.msra.mxu0 %v11142_v21  ;;  %v11166_v21 = vcombine.low %v12882_v5, %v12895_v33 }
 0x455   : > { %8220 = vmatpush1.bf16.msra.mxu1 %v11144_v22  ;;  %8115 = vmatprep.subr.bf16.mxu0 %v11147_v1  ;;  %v11167_v22 = vcombine.high %v12882_v5, %v12895_v33  ;;  %v12936_v1 = vld [vmem:[#allocation9 + $0xe58] sm:$0xff] }
 0x456   : > { %8221 = vmatprep.subr.bf16.mxu1 %v11149_v23  ;;  %v12938_v23 = vld [vmem:[#allocation9 + $0xe78] sm:$0xff] }
 0x457   : > { %7395 = vmatmul.mubr.bf16.gmra.mrb[20].mxu0 %v5880_v31 }
 0x458   : > { %7501 = vmatmul.mubr.bf16.gmra.mrb[16].mxu1 %v5880_v31  ;;  %8116 = vmatpush1.bf16.msra.mxu0 %v11146_v27  ;;  %v11170_v27 = vcombine.low %v12910_v41, %v12912_v42  ;;  %v11172_v31 = vcombine.low %v12914_v44, %v12922_v54 }
 0x459   : > { %8143 = vmatprep.mubr.bf16.mxu0 %v7621_v43  ;;  %8222 = vmatpush1.bf16.msra.mxu1 %v11148_v61 }
 0x45a   : > { %8249 = vmatprep.mubr.bf16.mxu1 %v7621_v43  ;;  %8117 = vmatprep.subr.bf16.mxu0 %v11151_v60 }
 0x45b   : > { %8223 = vmatprep.subr.bf16.mxu1 %v11153_v35  ;;  %v12962_v35 = vld [vmem:[#allocation9 + $0xeb8] sm:$0xff] }
 0x45c   : > { %8118 = vmatpush1.bf16.msra.mxu0 %v11150_v47 }
 0x45d   : > { %8224 = vmatpush1.bf16.msra.mxu1 %v11152_v14  ;;  %8119 = vmatprep.subr.bf16.mxu0 %v11155_v59 }
 0x45e   : > { %8225 = vmatprep.subr.bf16.mxu1 %v11157_v63 }
 0x460   : > { %8120 = vmatpush1.bf16.msra.mxu0 %v11154_v58  ;;  %v5528_v61 = vpop.f32.mrb[8].mxu0 }
 0x461   : > { %8226 = vmatpush1.bf16.msra.mxu1 %v11156_v38  ;;  %v5691_v37 = vadd.f32 %v12887_v7, %v5528_v61  ;;  %v5634_v39 = vpop.f32.mrb[4].mxu1  ;;  %v5530_v46 = vpop.f32.mrb[9].mxu0  ;;  %8121 = vmatprep.subr.bf16.mxu0 %v11159_v15 }
 0x462   : > { %v5693_v48 = vadd.f32 %v12890_v8, %v5634_v39  ;;  %v5692_v51 = vadd.f32 %v12893_v10, %v5530_v46  ;;  %v5636_v14 = vpop.f32.mrb[5].mxu1  ;;  %8227 = vmatprep.subr.bf16.mxu1 %v11161_v16  ;;  %v5532_v59 = vpop.f32.mrb[10].mxu0 }
 0x463   : > { %v5707_v38 = vmax.f32 %v5691_v37, 0.0  ;;  %v5694_v15 = vadd.f32 %v12902_v12, %v5636_v14  ;;  %v5695_v61 = vadd.f32 %v12887_v7, %v5532_v59  ;;  %v5638_v0 = vpop.f32.mrb[6].mxu1  ;;  %v5534_v43 = vpop.f32.mrb[11].mxu0 }
 0x464   : > { %v5709_v46 = vmax.f32 %v5693_v48, 0.0  ;;  %v5708_v60 = vmax.f32 %v5692_v51, 0.0  ;;  %v5697_v16 = vadd.f32 %v12890_v8, %v5638_v0  ;;  %8122 = vmatpush1.bf16.msra.mxu0 %v11158_v30  ;;  %v5696_v58 = vadd.f32 %v12893_v10, %v5534_v43  ;;  %v5640_v47 = vpop.f32.mrb[7].mxu1 }
 0x465   : > { %v5726_v37 = vrot.slane %v5707_v38, %v12638_v50  ;;  %v5795_v63 = vrot.slane %v5707_v38, 6  ;;  %v5710_v14 = vmax.f32 %v5694_v15, 0.0  ;;  %v5711_v2 = vmax.f32 %v5695_v61, 0.0  ;;  %8228 = vmatpush1.bf16.msra.mxu1 %v11160_v40  ;;  %8123 = vmatprep.subr.bf16.mxu0 %v11163_v18 }
 0x466   : > { %v5734_v48 = vrot.slane %v5709_v46, %v12638_v50  ;;  %v5797_v51 = vrot.slane %v5709_v46, 6  ;;  %v5730_v0 = vrot.slane %v5708_v60, %v12638_v50  ;;  %v5796_v30 = vrot.slane %v5708_v60, 6  ;;  %8229 = vmatprep.subr.bf16.mxu1 %v11165_v9 }
 0x467   : > { %v5843_v43 = vsel %vm1447_vm5, %v5726_v37, %v5795_v63  ;;  %v5738_v59 = vrot.slane %v5710_v14, %v12638_v50  ;;  %v5798_v39 = vrot.slane %v5710_v14, 6  ;;  %v5742_v38 = vrot.slane %v5711_v2, %v12653_v3 }
 0x468   : > { %5859 = vst [vmem:[%s12993_s26] sm:$0xff] %v5843_v43  ;;  %v5845_v55 = vsel %vm1447_vm5, %v5734_v48, %v5797_v51  ;;  %v5844_v57 = vsel %vm1447_vm5, %v5730_v0, %v5796_v30  ;;  %v5799_v40 = vrot.slane %v5711_v2, 6  ;;  %v5713_v18 = vmax.f32 %v5697_v16, 0.0  ;;  %8124 = vmatpush1.bf16.msra.mxu0 %v11162_v17  ;;  %v5538_v9 = vpop.f32.mrb[12].mxu0 }
 0x469   : > { %5861 = vst [vmem:[%s12993_s26 + $0x10] sm:$0xff] %v5845_v55  ;;  %5860 = vst [vmem:[%s12993_s26 + $0x8] sm:$0xff] %v5844_v57  ;;  %v5846_v60 = vsel %vm1447_vm5, %v5738_v59, %v5798_v39  ;;  %v5712_v15 = vmax.f32 %v5696_v58, 0.0  ;;  %v5698_v61 = vadd.f32 %v12902_v12, %v5640_v47  ;;  %8230 = vmatpush1.bf16.msra.mxu1 %v11164_v20  ;;  %v5644_v2 = vpop.f32.mrb[8].mxu1  ;;  %v5540_v16 = vpop.f32.mrb[13].mxu0  ;;  %8125 = vmatprep.subr.bf16.mxu0 %v11167_v22 }
 0x46a   : > { %v5699_v46 = vadd.f32 %v12887_v7, %v5538_v9  ;;  %5862 = vst [vmem:[%s12993_s26 + $0x18] sm:$0xff] %v5846_v60  ;;  %v5800_v19 = vsel %vm1447_vm5, %v5795_v63, %v5799_v40  ;;  %v5750_v49 = vrot.slane %v5713_v18, %v12653_v3  ;;  %v5803_v17 = vrot.slane %v5713_v18, 6  ;;  %v5646_v58 = vpop.f32.mrb[9].mxu1  ;;  %8231 = vmatprep.subr.bf16.mxu1 %v11169_v26  ;;  %v5542_v62 = vpop.f32.mrb[14].mxu0 }
 0x46b   : > { %v5701_v47 = vadd.f32 %v12890_v8, %v5644_v2  ;;  %v5847_v4 = vsel %vm1164_vm4, %v5800_v19, %v5742_v38  ;;  %v5746_v20 = vrot.slane %v5712_v15, %v12653_v3  ;;  %v5801_v37 = vrot.slane %v5712_v15, 6  ;;  %v5648_v14 = vpop.f32.mrb[10].mxu1  ;;  %v5544_v63 = vpop.f32.mrb[15].mxu0  ;;  %v7558_v2 = vld [vmem:[#allocation9 + $0xed0] sm:$0xff] }
 0x46c   : > { %v5714_v22 = vmax.f32 %v5698_v61, 0.0  ;;  %5863 = vst [vmem:[%s12993_s26 + $0x40] sm:$0xff] %v5847_v4  ;;  %v5804_v48 = vsel %vm1447_vm5, %v5797_v51, %v5803_v17  ;;  %v5715_v0 = vmax.f32 %v5699_v46, 0.0  ;;  %v5700_v59 = vadd.f32 %v12893_v10, %v5540_v16  ;;  %8126 = vmatpush1.bf16.msra.mxu0 %v11166_v21  ;;  %v5650_v26 = vpop.f32.mrb[11].mxu1  ;;  %v7560_v16 = vld [vmem:[#allocation9 + $0xef0] sm:$0xff]  ;;  %v7561_v17 = vld [vmem:[#allocation9 + $0xef8] sm:$0xff] }
 0x46d   : > { %v5717_v43 = vmax.f32 %v5701_v47, 0.0  ;;  %v5849_v38 = vsel %vm1164_vm4, %v5804_v48, %v5750_v49  ;;  %v5802_v55 = vsel %vm1447_vm5, %v5796_v30, %v5801_v37  ;;  %8232 = vmatpush1.bf16.msra.mxu1 %v11168_v25  ;;  %8127 = vmatprep.subr.bf16.mxu0 %v11171_v28  ;;  %v5702_v28 = vadd.f32 %v12902_v12, %v5646_v58  ;;  %v7559_v49 = vld [vmem:[#allocation9 + $0xed8] sm:$0xff] }
 0x46e   : > { %v5754_v57 = vrot.slane %v5714_v22, %v12653_v3  ;;  %v5805_v40 = vrot.slane %v5714_v22, 6  ;;  %5865 = vst [vmem:[%s12993_s26 + $0x50] sm:$0xff] %v5849_v38  ;;  %v5848_v5 = vsel %vm1164_vm4, %v5802_v55, %v5746_v20  ;;  %v5758_v33 = vrot.slane %v5715_v0, %v12638_v50  ;;  %8233 = vmatprep.subr.bf16.mxu1 %v11173_v32  ;;  %v7563_v55 = vld [vmem:[#allocation9 + $0xf18] sm:$0xff] }
 0x46f   : > { %v5823_v21 = vrot.slane %v5715_v0, 6  ;;  %v5766_v51 = vrot.slane %v5717_v43, %v12638_v50  ;;  %5864 = vst [vmem:[%s12993_s26 + $0x48] sm:$0xff] %v5848_v5  ;;  %v5825_v6 = vrot.slane %v5717_v43, 6  ;;  %v5716_v25 = vmax.f32 %v5700_v59, 0.0  ;;  %v7562_v43 = vld [vmem:[#allocation9 + $0xf10] sm:$0xff] }
 0x470   : > { %v5806_v11 = vsel %vm1447_vm5, %v5798_v39, %v5805_v40  ;;  %v5703_v9 = vadd.f32 %v12887_v7, %v5542_v62  ;;  %v5705_v60 = vadd.f32 %v12890_v8, %v5648_v14  ;;  %8128 = vmatpush1.bf16.msra.mxu0 %v11170_v27  ;;  %v5718_v61 = vmax.f32 %v5702_v28, 0.0  ;;  %v7566_v28 = vld [vmem:[#allocation9 + $0xf50] sm:$0xff] }
 0x471   : > { %v5850_v30 = vsel %vm1164_vm4, %v5806_v11, %v5754_v57  ;;  %v5851_v18 = vsel %vm1447_vm5, %v5758_v33, %v5823_v21  ;;  %v5853_v32 = vsel %vm1447_vm5, %v5766_v51, %v5825_v6  ;;  %v5762_v39 = vrot.slane %v5716_v25, %v12638_v50  ;;  %8234 = vmatpush1.bf16.msra.mxu1 %v11172_v31  ;;  %v7565_v57 = vld [vmem:[#allocation9 + $0xf38] sm:$0xff] }
 0x472   : > { %5866 = vst [vmem:[%s12993_s26 + $0x58] sm:$0xff] %v5850_v30  ;;  %5867 = vst [vmem:[%s12993_s26 + $0x80] sm:$0xff] %v5851_v18  ;;  %v5824_v15 = vrot.slane %v5716_v25, 6  ;;  %v13326_v7 = vcombine.high %v12924_v36, %v12926_v56  ;;  %v5719_v8 = vmax.f32 %v5703_v9, 0.0  ;;  %v5721_v41 = vmax.f32 %v5705_v60, 0.0  ;;  %v7568_v30 = vld [vmem:[#allocation9 + $0xf70] sm:$0xff] }
 0x473   : > { %5869 = vst [vmem:[%s12993_s26 + $0x90] sm:$0xff] %v5853_v32  ;;  %v5704_v42 = vadd.f32 %v12893_v10, %v5544_v63  ;;  %v5706_v27 = vadd.f32 %v12902_v12, %v5650_v26  ;;  %v13327_v46 = vcombine.high %v12936_v1, %v12938_v23  ;;  %v5770_v54 = vrot.slane %v5718_v61, %v12638_v50  ;;  %v7569_v18 = vld [vmem:[#allocation9 + $0xf78] sm:$0xff] }
 0x474   : > { %8129 = vmatprep.subr.bf16.mxu0 %v13326_v7  ;;  %v5852_v44 = vsel %vm1447_vm5, %v5762_v39, %v5824_v15  ;;  %v5826_v31 = vrot.slane %v5718_v61, 6  ;;  %v11180_v19 = vcombine.low %v12960_v34, %v12962_v35  ;;  %v5774_v10 = vrot.slane %v5719_v8, %v12653_v3  ;;  %v7572_v61 = vld [vmem:[#allocation9 + $0xfb0] sm:$0xff]  ;;  %v7571_v7 = vld [vmem:[#allocation9 + $0xf98] sm:$0xff] }
 0x475   : > { %8235 = vmatprep.subr.bf16.mxu1 %v13327_v46  ;;  %5868 = vst [vmem:[%s12993_s26 + $0x88] sm:$0xff] %v5852_v44  ;;  %v5827_v12 = vrot.slane %v5719_v8, 6  ;;  %v5782_v47 = vrot.slane %v5721_v41, %v12653_v3  ;;  %v5831_v58 = vrot.slane %v5721_v41, 6  ;;  %v13328_v62 = vcombine.low %v12924_v36, %v12926_v56  ;;  %v7573_v8 = vld [vmem:[#allocation9 + $0xfb8] sm:$0xff] }
 0x476   : > { %v5854_v4 = vsel %vm1447_vm5, %v5770_v54, %v5826_v31  ;;  %v5720_v20 = vmax.f32 %v5704_v42, 0.0  ;;  %v5722_v37 = vmax.f32 %v5706_v27, 0.0  ;;  %v13329_v22 = vcombine.low %v12936_v1, %v12938_v23  ;;  %v7564_v1 = vld [vmem:[#allocation9 + $0xf30] sm:$0xff]  ;;  %v7575_v44 = vld [vmem:[#allocation9 + $0xfd8] sm:$0xff] }
 0x477   : > { %8130 = vmatpush1.bf16.msra.mxu0 %v13328_v62  ;;  %v13330_v14 = vcombine.high %v12948_v29, %v12950_v13  ;;  %v11183_v63 = vcombine.high %v7558_v2, %v7560_v16  ;;  %5870 = vst [vmem:[%s12993_s26 + $0x98] sm:$0xff] %v5854_v4  ;;  %v5828_v48 = vsel %vm1447_vm5, %v5823_v21, %v5827_v12  ;;  %v7577_v54 = vld [vmem:[#allocation9 + $0xff8] sm:$0xff]  ;;  %v7580_v12 = vld [vmem:[#allocation9 + $0x1030] sm:$0xff] }
 0x478   : > { %8236 = vmatpush1.bf16.msra.mxu1 %v13329_v22  ;;  %v5832_v36 = vsel %vm1447_vm5, %v5825_v6, %v5831_v58  ;;  %v13331_v56 = vcombine.high %v12960_v34, %v12962_v35  ;;  %v11185_v0 = vcombine.high %v7559_v49, %v7561_v17  ;;  %v5855_v23 = vsel %vm1164_vm4, %v5828_v48, %v5774_v10  ;;  %v7578_v10 = vld [vmem:[#allocation9 + $0x1010] sm:$0xff]  ;;  %v7581_v58 = vld [vmem:[#allocation9 + $0x1038] sm:$0xff]  ;;  %v12046_v22 = vld [vmem:[#allocation2 + $0x18] sm:$0x7f] }
 0x479   : > { %8131 = vmatprep.subr.bf16.mxu0 %v13330_v14  ;;  %v5857_v59 = vsel %vm1164_vm4, %v5832_v36, %v5782_v47  ;;  %v5778_v26 = vrot.slane %v5720_v20, %v12653_v3  ;;  %v5829_v38 = vrot.slane %v5720_v20, 6  ;;  %5871 = vst [vmem:[%s12993_s26 + $0xc0] sm:$0xff] %v5855_v23  ;;  %v5786_v40 = vrot.slane %v5722_v37, %v12653_v3  ;;  %v7579_v47 = vld [vmem:[#allocation9 + $0x1018] sm:$0xff]  ;;  %v13107_v20 = vld [vmem:[#allocation2] sm:$0xfe] }
 0x47a   : > { %8237 = vmatprep.subr.bf16.mxu1 %v13331_v56  ;;  %5873 = vst [vmem:[%s12993_s26 + $0xd0] sm:$0xff] %v5857_v59  ;;  %v5833_v5 = vrot.slane %v5722_v37, 6  ;;  %v13332_v34 = vcombine.low %v12948_v29, %v12950_v13  ;;  %v11182_v35 = vcombine.low %v7558_v2, %v7560_v16  ;;  %v11184_v21 = vcombine.low %v7559_v49, %v7561_v17  ;;  %v7567_v13 = vld [vmem:[#allocation9 + $0xf58] sm:$0xff]  ;;  %v7574_v2 = vld [vmem:[#allocation9 + $0xfd0] sm:$0xff] }
 0x47b   : > { %v5830_v33 = vsel %vm1447_vm5, %v5824_v15, %v5829_v38  ;;  %v11187_v51 = vcombine.high %v7562_v43, %v7564_v1  ;;  %v11189_v25 = vcombine.high %v7563_v55, %v7565_v57  ;;  %v11186_v9 = vcombine.low %v7562_v43, %v7564_v1  ;;  %v7570_v15 = vld [vmem:[#allocation9 + $0xf90] sm:$0xff]  ;;  %v7585_v43 = vld [vmem:[#allocation9 + $0x1078] sm:$0xff] }
 0x47c   : > { %8132 = vmatpush1.bf16.msra.mxu0 %v13332_v34  ;;  %8238 = vmatpush1.bf16.msra.mxu1 %v11180_v19  ;;  %v5856_v11 = vsel %vm1164_vm4, %v5830_v33, %v5778_v26  ;;  %v5834_v6 = vsel %vm1447_vm5, %v5826_v31, %v5833_v5  ;;  %v11188_v60 = vcombine.low %v7563_v55, %v7565_v57  ;;  %v7576_v16 = vld [vmem:[#allocation9 + $0xff0] sm:$0xff]  ;;  %v7617_v14 = vrot.slane %v12046_v22, 1  ;;  %v7589_v5 = vld [vmem:[#allocation9 + $0x10b8] sm:$0xff] }
 0x47d   : > { %8133 = vmatprep.subr.bf16.mxu0 %v11183_v63  ;;  %8239 = vmatprep.subr.bf16.mxu1 %v11185_v0  ;;  %5872 = vst [vmem:[%s12993_s26 + $0xc8] sm:$0xff] %v5856_v11  ;;  %v5858_v29 = vsel %vm1164_vm4, %v5834_v6, %v5786_v40  ;;  %v11191_v32 = vcombine.high %v7566_v28, %v7568_v30  ;;  %v7582_v48 = vld [vmem:[#allocation9 + $0x1050] sm:$0xff]  ;;  %v7616_v56 = vrot.slane %v13107_v20, 1  ;;  %v7583_v0 = vld [vmem:[#allocation9 + $0x1058] sm:$0xff] }
 0x47e   : > { %5874 = vst [vmem:[%s12993_s26 + $0xd8] sm:$0xff] %v5858_v29  ;;  %v11193_v39 = vcombine.high %v7567_v13, %v7569_v18  ;;  %v11190_v41 = vcombine.low %v7566_v28, %v7568_v30  ;;  %v11192_v42 = vcombine.low %v7567_v13, %v7569_v18  ;;  %v11195_v27 = vcombine.high %v7570_v15, %v7572_v61  ;;  %v7584_v36 = vld [vmem:[#allocation9 + $0x1070] sm:$0xff]  ;;  %v7587_v40 = vld [vmem:[#allocation9 + $0x1098] sm:$0xff] }
 0x47f   : > { %v11197_v46 = vcombine.high %v7571_v7, %v7573_v8  ;;  %v11194_v31 = vcombine.low %v7570_v15, %v7572_v61  ;;  %v11196_v19 = vcombine.low %v7571_v7, %v7573_v8  ;;  %v11199_v49 = vcombine.high %v7574_v2, %v7576_v16  ;;  %v7586_v55 = vld [vmem:[#allocation9 + $0x1090] sm:$0xff]  ;;  %v7591_v6 = vld [vmem:[#allocation9 + $0x10d8] sm:$0xff] }
 0x480   : > { %8134 = vmatpush1.bf16.msra.mxu0 %v11182_v35  ;;  %8240 = vmatpush1.bf16.msra.mxu1 %v11184_v21  ;;  %v11201_v17 = vcombine.high %v7575_v44, %v7577_v54  ;;  %v11198_v62 = vcombine.low %v7574_v2, %v7576_v16  ;;  %v11200_v4 = vcombine.low %v7575_v44, %v7577_v54  ;;  %v7588_v57 = vld [vmem:[#allocation9 + $0x10b0] sm:$0xff] }
 0x481   : > { %8135 = vmatprep.subr.bf16.mxu0 %v11187_v51  ;;  %8241 = vmatprep.subr.bf16.mxu1 %v11189_v25  ;;  %v11203_v37 = vcombine.high %v7578_v10, %v7580_v12  ;;  %v11205_v63 = vcombine.high %v7579_v47, %v7581_v58  ;;  %v11202_v1 = vcombine.low %v7578_v10, %v7580_v12  ;;  %v7590_v51 = vld [vmem:[#allocation9 + $0x10d0] sm:$0xff]  ;;  %v7593_v25 = vld [vmem:[#allocation9 + $0x10f8] sm:$0xff] }
 0x482   : > { %v7618_v23 = vsel %vm732_vm2, %v7616_v56, %v7617_v14  ;;  %v11204_v59 = vcombine.low %v7579_v47, %v7581_v58  ;;  %v11207_v26 = vcombine.high %v7582_v48, %v7584_v36  ;;  %v11209_v38 = vcombine.high %v7583_v0, %v7585_v43  ;;  %v7592_v11 = vld [vmem:[#allocation9 + $0x10f0] sm:$0xff] }
 0x483   : > { %v11206_v34 = vcombine.low %v7582_v48, %v7584_v36  ;;  %v11208_v35 = vcombine.low %v7583_v0, %v7585_v43  ;;  %v11211_v33 = vcombine.high %v7586_v55, %v7588_v57  ;;  %v11213_v21 = vcombine.high %v7587_v40, %v7589_v5  ;;  %v7594_v13 = vld [vmem:[#allocation9 + $0x1110] sm:$0xff]  ;;  %v13115_v0 = vld [vmem:[#allocation2 + $0x10] sm:$0xfe] }
 0x484   : > { %8136 = vmatpush1.bf16.msra.mxu0 %v11186_v9  ;;  %8242 = vmatpush1.bf16.msra.mxu1 %v11188_v60  ;;  %v11210_v28 = vcombine.low %v7586_v55, %v7588_v57  ;;  %v11212_v30 = vcombine.low %v7587_v40, %v7589_v5  ;;  %v11215_v29 = vcombine.high %v7590_v51, %v7592_v11  ;;  %v7596_v18 = vld [vmem:[#allocation9 + $0x1130] sm:$0xff]  ;;  %v7595_v9 = vld [vmem:[#allocation9 + $0x1118] sm:$0xff]  ;;  %v7622_v55 = vrot.slane %v13115_v0, 1 }
 0x485   : > { %8137 = vmatprep.subr.bf16.mxu0 %v11191_v32  ;;  %8243 = vmatprep.subr.bf16.mxu1 %v11193_v39  ;;  %v7597_v60 = vld [vmem:[#allocation9 + $0x1138] sm:$0xff]  ;;  %v13333_v32 = vmov 0   ;;  %v11214_v39 = vcombine.low %v7590_v51, %v7592_v11  ;;  %v11216_v15 = vcombine.low %v7591_v6, %v7593_v25  ;;  %v11219_v61 = vcombine.high %v7594_v13, %v7596_v18  ;;  %v7598_v8 = vld [vmem:[#allocation9 + $0x1150] sm:$0xff] }
 0x486   : > { %v11221_v7 = vcombine.high %v7595_v9, %v7597_v60  ;;  %v11220_v2 = vcombine.low %v7595_v9, %v7597_v60  ;;  %v7602_v54 = vld [vmem:[#allocation9 + $0x1190] sm:$0xff]  ;;  %v8343_v43 = vld [vmem:[#allocation9 + $0x1218] sm:$0xff]  ;;  %v8459_v9 = vshll.u32 %v12845_v24, 16 }
 0x487   : > { %v7606_v58 = vld [vmem:[#allocation9 + $0x11d0] sm:$0xff]  ;;  %v8351_v60 = vld [vmem:[#allocation9 + $0x1298] sm:$0xff] }
 0x488   : > { %8138 = vmatpush1.bf16.msra.mxu0 %v11190_v41  ;;  %8244 = vmatpush1.bf16.msra.mxu1 %v11192_v42  ;;  %v7600_v41 = vld [vmem:[#allocation9 + $0x1170] sm:$0xff]  ;;  %v7599_v42 = vld [vmem:[#allocation9 + $0x1158] sm:$0xff] }
 0x489   : > { %8139 = vmatprep.subr.bf16.mxu0 %v11195_v27  ;;  %8245 = vmatprep.subr.bf16.mxu1 %v11197_v46  ;;  %v7601_v27 = vld [vmem:[#allocation9 + $0x1178] sm:$0xff]  ;;  %v11218_v46 = vcombine.low %v7594_v13, %v7596_v18  ;;  %v11223_v16 = vcombine.high %v7598_v8, %v7600_v41  ;;  %v8342_v36 = vld [vmem:[#allocation9 + $0x1210] sm:$0xff]  ;;  %v8456_v18 = vshrl.u32 %v12845_v24, 16 }
 0x48a   : > { %v11225_v44 = vcombine.high %v7599_v42, %v7601_v27  ;;  %v11224_v10 = vcombine.low %v7599_v42, %v7601_v27  ;;  %v8344_v56 = vld [vmem:[#allocation9 + $0x1230] sm:$0xff] }
 0x48b   : > { %v12047_v57 = vld [vmem:[#allocation2 + $0x28] sm:$0x7f]  ;;  %v11234_v51 = vcombine.low %v8342_v36, %v8344_v56  ;;  %v8458_v27 = vrot.slane %v8456_v18, 1 }
 0x48c   : > { %8140 = vmatpush1.bf16.msra.mxu0 %v11194_v31  ;;  %8246 = vmatpush1.bf16.msra.mxu1 %v11196_v19  ;;  %v7604_v31 = vld [vmem:[#allocation9 + $0x11b0] sm:$0xff]  ;;  %v7603_v19 = vld [vmem:[#allocation9 + $0x1198] sm:$0xff]  ;;  %v7623_v40 = vrot.slane %v12047_v57, 1 }
 0x48d   : > { %8141 = vmatprep.subr.bf16.mxu0 %v11199_v49  ;;  %8247 = vmatprep.subr.bf16.mxu1 %v11201_v17  ;;  %v7605_v49 = vld [vmem:[#allocation9 + $0x11b8] sm:$0xff]  ;;  %v11222_v17 = vcombine.low %v7598_v8, %v7600_v41  ;;  %v11227_v12 = vcombine.high %v7602_v54, %v7604_v31  ;;  %v11226_v22 = vcombine.low %v7602_v54, %v7604_v31  ;;  %v8352_v13 = vld [vmem:[#allocation9 + $0x12b0] sm:$0xff] }
 0x48e   : > { %v11229_v47 = vcombine.high %v7603_v19, %v7605_v49  ;;  %v8354_v24 = vld [vmem:[#allocation9 + $0x12d0] sm:$0xff]  ;;  %v8355_v54 = vld [vmem:[#allocation9 + $0x12d8] sm:$0xff] }
 0x48f   : > { %v8357_v31 = vld [vmem:[#allocation9 + $0x12f8] sm:$0xff]  ;;  %v8368_v57 = vld [vmem:[#allocation9 + $0x13b0] sm:$0xff] }
 0x490   : > { %8142 = vmatpush1.bf16.msra.mxu0 %v11198_v62  ;;  %8248 = vmatpush1.bf16.msra.mxu1 %v11200_v4  ;;  %v7608_v62 = vld [vmem:[#allocation9 + $0x11f0] sm:$0xff]  ;;  %v7607_v4 = vld [vmem:[#allocation9 + $0x11d8] sm:$0xff] }
 0x491   : > { %8164 = vmatprep.subr.bf16.mxu0 %v11203_v37  ;;  %8270 = vmatprep.subr.bf16.mxu1 %v11205_v63  ;;  %v7609_v37 = vld [vmem:[#allocation9 + $0x11f8] sm:$0xff]  ;;  %v11231_v63 = vcombine.high %v7606_v58, %v7608_v62  ;;  %v8376_v18 = vld [vmem:[#allocation9 + $0x1430] sm:$0xff] }
 0x492   : > { %v11233_v48 = vcombine.high %v7607_v4, %v7609_v37 }
 0x493   : > { %8144 = vmatmul.mubr.bf16.vlgmr.msra.gmra.mrb[16].mxu0 %v7618_v23  ;;  %8250 = vmatmul.mubr.bf16.vlgmr.msra.gmra.mrb[12].mxu1 %v7618_v23  ;;  %v11230_v23 = vcombine.low %v7606_v58, %v7608_v62  ;;  %v8359_v58 = vld [vmem:[#allocation9 + $0x1318] sm:$0xff] }
 0x494   : > { %8153 = vmatprep.mubr.bf16.mxu0 %v12847_v45  ;;  %8165 = vmatpush1.bf16.msra.mxu0 %v11202_v1  ;;  %v8345_v1 = vld [vmem:[#allocation9 + $0x1238] sm:$0xff] }
 0x495   : > { %8259 = vmatprep.mubr.bf16.mxu1 %v12847_v45  ;;  %8271 = vmatpush1.bf16.msra.mxu1 %v11204_v59  ;;  %v11217_v45 = vcombine.high %v7591_v6, %v7593_v25  ;;  %v11232_v59 = vcombine.low %v7607_v4, %v7609_v37  ;;  %v11237_v5 = vcombine.high %v8343_v43, %v8345_v1  ;;  %v8361_v62 = vld [vmem:[#allocation9 + $0x1338] sm:$0xff] }
 0x496   : > { %8166 = vmatprep.subr.bf16.mxu0 %v11207_v26  ;;  %8272 = vmatprep.subr.bf16.mxu1 %v11209_v38  ;;  %v11235_v26 = vcombine.high %v8342_v36, %v8344_v56  ;;  %v13117_v38 = vld [vmem:[#allocation2 + $0x20] sm:$0xff]  ;;  %v11236_v25 = vcombine.low %v8343_v43, %v8345_v1  ;;  %v8363_v56 = vld [vmem:[#allocation9 + $0x1358] sm:$0xff] }
 0x497   : > { %v8464_v11 = vshrl.u32 %v13117_v38, 16  ;;  %v8467_v6 = vshll.u32 %v13117_v38, 16  ;;  %v8364_v36 = vld [vmem:[#allocation9 + $0x1370] sm:$0xff]  ;;  %v8365_v43 = vld [vmem:[#allocation9 + $0x1378] sm:$0xff] }
 0x498   : > { %8167 = vmatpush1.bf16.msra.mxu0 %v11206_v34  ;;  %v8346_v34 = vld [vmem:[#allocation9 + $0x1250] sm:$0xff] }
 0x499   : > { %8273 = vmatpush1.bf16.msra.mxu1 %v11208_v35  ;;  %8168 = vmatprep.subr.bf16.mxu0 %v11211_v33  ;;  %v8348_v35 = vld [vmem:[#allocation9 + $0x1270] sm:$0xff]  ;;  %v8347_v33 = vld [vmem:[#allocation9 + $0x1258] sm:$0xff] }
 0x49a   : > { %8274 = vmatprep.subr.bf16.mxu1 %v11213_v21  ;;  %v8349_v21 = vld [vmem:[#allocation9 + $0x1278] sm:$0xff] }
 0x49b   : > { %8154 = vmatmul.mubr.bf16.gmra.mrb[20].mxu0 %v7617_v14  ;;  %8260 = vmatmul.mubr.bf16.gmra.mrb[16].mxu1 %v7617_v14  ;;  %v11228_v14 = vcombine.low %v7603_v19, %v7605_v49  ;;  %v11240_v8 = vcombine.low %v8347_v33, %v8349_v21 }
 0x49c   : > { %8196 = vmatprep.mubr.bf16.mxu0 %v13333_v32  ;;  %8169 = vmatpush1.bf16.msra.mxu0 %v11210_v28  ;;  %v11239_v28 = vcombine.high %v8346_v34, %v8348_v35 }
 0x49d   : > { %8302 = vmatprep.mubr.bf16.mxu1 %v13333_v32  ;;  %8275 = vmatpush1.bf16.msra.mxu1 %v11212_v30  ;;  %v7624_v30 = vsel %vm732_vm2, %v7622_v55, %v7623_v40  ;;  %v8366_v55 = vld [vmem:[#allocation9 + $0x1390] sm:$0xff] }
 0x49e   : > { %8170 = vmatprep.subr.bf16.mxu0 %v11215_v29  ;;  %8276 = vmatprep.subr.bf16.mxu1 %v11217_v45  ;;  %v11241_v29 = vcombine.high %v8347_v33, %v8349_v21  ;;  %v8350_v45 = vld [vmem:[#allocation9 + $0x1290] sm:$0xff]  ;;  %v11259_v33 = vcombine.high %v8366_v55, %v8368_v57 }
 0x49f   : > { %v11243_v41 = vcombine.high %v8350_v45, %v8352_v13 }
 0x4a0   : > { %8171 = vmatpush1.bf16.msra.mxu0 %v11214_v39  ;;  %v8353_v39 = vld [vmem:[#allocation9 + $0x12b8] sm:$0xff] }
 0x4a1   : > { %8277 = vmatpush1.bf16.msra.mxu1 %v11216_v15  ;;  %8172 = vmatprep.subr.bf16.mxu0 %v11219_v61  ;;  %v11238_v15 = vcombine.low %v8346_v34, %v8348_v35  ;;  %v8466_v61 = vrot.slane %v8464_v11, 1  ;;  %v11245_v42 = vcombine.high %v8351_v60, %v8353_v39  ;;  %v11244_v19 = vcombine.low %v8351_v60, %v8353_v39  ;;  %v8372_v11 = vld [vmem:[#allocation9 + $0x13f0] sm:$0xff]  ;;  %v8377_v60 = vld [vmem:[#allocation9 + $0x1438] sm:$0xff] }
 0x4a2   : > { %8278 = vmatprep.subr.bf16.mxu1 %v11221_v7  ;;  %v8469_v7 = vrot.slane %v8467_v6, 2  ;;  %v11256_v35 = vcombine.low %v8363_v56, %v8365_v43  ;;  %v8371_v6 = vld [vmem:[#allocation9 + $0x13d8] sm:$0xff] }
 0x4a4   : > { %8173 = vmatpush1.bf16.msra.mxu0 %v11218_v46  ;;  %v8461_v46 = vrot.slane %v8459_v9, 2  ;;  %v8375_v9 = vld [vmem:[#allocation9 + $0x1418] sm:$0xff] }
 0x4a5   : > { %8279 = vmatpush1.bf16.msra.mxu1 %v11220_v2  ;;  %8174 = vmatprep.subr.bf16.mxu0 %v11223_v16  ;;  %v8356_v2 = vld [vmem:[#allocation9 + $0x12f0] sm:$0xff]  ;;  %v11242_v16 = vcombine.low %v8350_v45, %v8352_v13 }
 0x4a6   : > { %8280 = vmatprep.subr.bf16.mxu1 %v11225_v44  ;;  %v13127_v44 = vor.u32 %v8469_v7, %v8466_v61  ;;  %v8462_v49 = vor.u32 %v8461_v46, %v8458_v27  ;;  %v11246_v37 = vcombine.low %v8354_v24, %v8356_v2  ;;  %v8374_v13 = vld [vmem:[#allocation9 + $0x1410] sm:$0xff]  ;;  %v11269_v7 = vcombine.high %v8375_v9, %v8377_v60  ;;  %v8381_v27 = vld [vmem:[#allocation9 + $0x1478] sm:$0xff] }
 0x4a7   : > { %v11267_v61 = vcombine.high %v8374_v13, %v8376_v18  ;;  %v11266_v46 = vcombine.low %v8374_v13, %v8376_v18 }
 0x4a8   : > { %8175 = vmatpush1.bf16.msra.mxu0 %v11222_v17  ;;  %v11247_v17 = vcombine.high %v8354_v24, %v8356_v2  ;;  %v8471_v4 = vsel %vm941_vm3, %v8462_v49, %v13127_v44  ;;  %v11268_v24 = vcombine.low %v8375_v9, %v8377_v60  ;;  %v8385_v49 = vld [vmem:[#allocation9 + $0x14b8] sm:$0xff]  ;;  %v8402_v9 = vld [vmem:[#allocation9 + $0x15d0] sm:$0xff] }
 0x4a9   : > { %8281 = vmatpush1.bf16.msra.mxu1 %v11224_v10  ;;  %8176 = vmatprep.subr.bf16.mxu0 %v11227_v12  ;;  %v8358_v10 = vld [vmem:[#allocation9 + $0x1310] sm:$0xff] }
 0x4aa   : > { %8282 = vmatprep.subr.bf16.mxu1 %v11229_v47  ;;  %v8360_v12 = vld [vmem:[#allocation9 + $0x1330] sm:$0xff]  ;;  %v11249_v47 = vcombine.high %v8355_v54, %v8357_v31 }
 0x4ab   : > { %v11250_v1 = vcombine.low %v8358_v10, %v8360_v12  ;;  %v8404_v60 = vld [vmem:[#allocation9 + $0x15f0] sm:$0xff] }
 0x4ac   : > { %8177 = vmatpush1.bf16.msra.mxu0 %v11226_v22  ;;  %v11248_v22 = vcombine.low %v8355_v54, %v8357_v31  ;;  %v8382_v54 = vld [vmem:[#allocation9 + $0x1490] sm:$0xff] }
 0x4ad   : > { %8283 = vmatpush1.bf16.msra.mxu1 %v11228_v14  ;;  %8178 = vmatprep.subr.bf16.mxu0 %v11231_v63  ;;  %v11251_v14 = vcombine.high %v8358_v10, %v8360_v12  ;;  %v11253_v63 = vcombine.high %v8359_v58, %v8361_v62  ;;  %v8384_v31 = vld [vmem:[#allocation9 + $0x14b0] sm:$0xff] }
 0x4ae   : > { %8284 = vmatprep.subr.bf16.mxu1 %v11233_v48  ;;  %v8362_v48 = vld [vmem:[#allocation9 + $0x1350] sm:$0xff]  ;;  %v11275_v12 = vcombine.high %v8382_v54, %v8384_v31 }
 0x4af   : > { %v11254_v34 = vcombine.low %v8362_v48, %v8364_v36 }
 0x4b0   : > { %8179 = vmatpush1.bf16.msra.mxu0 %v11230_v23  ;;  %v11252_v23 = vcombine.low %v8359_v58, %v8361_v62  ;;  %v8386_v58 = vld [vmem:[#allocation9 + $0x14d0] sm:$0xff] }
 0x4b1   : > { %8285 = vmatpush1.bf16.msra.mxu1 %v11232_v59  ;;  %8975 = vmatprep.subr.bf16.mxu0 %v11235_v26  ;;  %v11255_v59 = vcombine.high %v8362_v48, %v8364_v36  ;;  %v11257_v26 = vcombine.high %v8363_v56, %v8365_v43  ;;  %v8388_v62 = vld [vmem:[#allocation9 + $0x14f0] sm:$0xff]  ;;  %v8391_v43 = vld [vmem:[#allocation9 + $0x1518] sm:$0xff] }
 0x4b2   : > { %9081 = vmatprep.subr.bf16.mxu1 %v11237_v5  ;;  %v8369_v5 = vld [vmem:[#allocation9 + $0x13b8] sm:$0xff]  ;;  %v8390_v36 = vld [vmem:[#allocation9 + $0x1510] sm:$0xff] }
 0x4b3   : > { %8197 = vmatmul.mubr.bf16.vlgmr.msra.gmra.mrb[16].mxu0 %v7624_v30  ;;  %v8392_v56 = vld [vmem:[#allocation9 + $0x1530] sm:$0xff] }
 0x4b4   : > { %8303 = vmatmul.mubr.bf16.vlgmr.msra.gmra.mrb[12].mxu1 %v7624_v30  ;;  %8976 = vmatpush1.bf16.msra.mxu0 %v11234_v51  ;;  %v8370_v51 = vld [vmem:[#allocation9 + $0x13d0] sm:$0xff] }
 0x4b5   : > { %9082 = vmatpush1.bf16.msra.mxu1 %v11236_v25  ;;  %8977 = vmatprep.subr.bf16.mxu0 %v11239_v28  ;;  %v8373_v25 = vld [vmem:[#allocation9 + $0x13f8] sm:$0xff]  ;;  %v11258_v28 = vcombine.low %v8366_v55, %v8368_v57  ;;  %v11262_v39 = vcombine.low %v8370_v51, %v8372_v11  ;;  %v8394_v57 = vld [vmem:[#allocation9 + $0x1550] sm:$0xff] }
 0x4b6   : > { %9083 = vmatprep.subr.bf16.mxu1 %v11241_v29  ;;  %8206 = vmatprep.mubr.bf16.mxu0 %v13333_v32  ;;  %v11263_v29 = vcombine.high %v8370_v51, %v8372_v11  ;;  %v11265_v45 = vcombine.high %v8371_v6, %v8373_v25  ;;  %v8398_v11 = vld [vmem:[#allocation9 + $0x1590] sm:$0xff] }
 0x4b7   : > { %8312 = vmatprep.mubr.bf16.mxu1 %v13333_v32 }
 0x4b8   : > { %8978 = vmatpush1.bf16.msra.mxu0 %v11238_v15  ;;  %v11264_v15 = vcombine.low %v8371_v6, %v8373_v25  ;;  %v8400_v6 = vld [vmem:[#allocation9 + $0x15b0] sm:$0xff]  ;;  %v8399_v25 = vld [vmem:[#allocation9 + $0x1598] sm:$0xff] }
 0x4b9   : > { %9084 = vmatpush1.bf16.msra.mxu1 %v11240_v8  ;;  %8979 = vmatprep.subr.bf16.mxu0 %v11243_v41  ;;  %v8378_v8 = vld [vmem:[#allocation9 + $0x1450] sm:$0xff]  ;;  %v11291_v13 = vcombine.high %v8398_v11, %v8400_v6 }
 0x4ba   : > { %9085 = vmatprep.subr.bf16.mxu1 %v11245_v42  ;;  %v8380_v41 = vld [vmem:[#allocation9 + $0x1470] sm:$0xff]  ;;  %v8379_v42 = vld [vmem:[#allocation9 + $0x1458] sm:$0xff] }
 0x4bb   : > { %8207 = vmatmul.mubr.bf16.gmra.mrb[20].mxu0 %v7623_v40  ;;  %v11271_v2 = vcombine.high %v8378_v8, %v8380_v41  ;;  %v11272_v10 = vcombine.low %v8379_v42, %v8381_v27 }
 0x4bc   : > { %8313 = vmatmul.mubr.bf16.gmra.mrb[16].mxu1 %v7623_v40  ;;  %8980 = vmatpush1.bf16.msra.mxu0 %v11242_v16  ;;  %v8367_v40 = vld [vmem:[#allocation9 + $0x1398] sm:$0xff]  ;;  %v11273_v16 = vcombine.high %v8379_v42, %v8381_v27  ;;  %v8442_v42 = vshll.u32 %v13107_v20, 16 }
 0x4bd   : > { %9007 = vmatprep.mubr.bf16.mxu0 %v8471_v4  ;;  %9086 = vmatpush1.bf16.msra.mxu1 %v11244_v19  ;;  %v11261_v21 = vcombine.high %v8367_v40, %v8369_v5  ;;  %v11260_v30 = vcombine.low %v8367_v40, %v8369_v5  ;;  %v8383_v19 = vld [vmem:[#allocation9 + $0x1498] sm:$0xff]  ;;  %v8396_v40 = vld [vmem:[#allocation9 + $0x1570] sm:$0xff] }
 0x4be   : > { %9113 = vmatprep.mubr.bf16.mxu1 %v8471_v4  ;;  %8981 = vmatprep.subr.bf16.mxu0 %v11247_v17  ;;  %v11270_v17 = vcombine.low %v8378_v8, %v8380_v41  ;;  %v8387_v4 = vld [vmem:[#allocation9 + $0x14d8] sm:$0xff]  ;;  %v11290_v8 = vcombine.low %v8398_v11, %v8400_v6  ;;  %v8439_v41 = vshrl.u32 %v13107_v20, 16 }
 0x4bf   : > { %9087 = vmatprep.subr.bf16.mxu1 %v11249_v47  ;;  %v11277_v47 = vcombine.high %v8383_v19, %v8385_v49  ;;  %v8395_v5 = vld [vmem:[#allocation9 + $0x1558] sm:$0xff] }
 0x4c0   : > { %8982 = vmatpush1.bf16.msra.mxu0 %v11246_v37  ;;  %v8389_v37 = vld [vmem:[#allocation9 + $0x14f8] sm:$0xff] }
 0x4c1   : > { %9088 = vmatpush1.bf16.msra.mxu1 %v11248_v22  ;;  %8983 = vmatprep.subr.bf16.mxu0 %v11251_v14  ;;  %v11274_v22 = vcombine.low %v8382_v54, %v8384_v31  ;;  %v11276_v14 = vcombine.low %v8383_v19, %v8385_v49  ;;  %v11281_v48 = vcombine.high %v8387_v4, %v8389_v37  ;;  %v8406_v54 = vld [vmem:[#allocation9 + $0x1610] sm:$0xff]  ;;  %v8407_v19 = vld [vmem:[#allocation9 + $0x1618] sm:$0xff] }
 0x4c2   : > { %9089 = vmatprep.subr.bf16.mxu1 %v11253_v63  ;;  %v11279_v63 = vcombine.high %v8386_v58, %v8388_v62  ;;  %v8408_v31 = vld [vmem:[#allocation9 + $0x1630] sm:$0xff]  ;;  %v8409_v49 = vld [vmem:[#allocation9 + $0x1638] sm:$0xff] }
 0x4c3   : > { %v11299_v20 = vcombine.high %v8406_v54, %v8408_v31 }
 0x4c4   : > { %8984 = vmatpush1.bf16.msra.mxu0 %v11250_v1  ;;  %v8393_v1 = vld [vmem:[#allocation9 + $0x1538] sm:$0xff] }
 0x4c5   : > { %9090 = vmatpush1.bf16.msra.mxu1 %v11252_v23  ;;  %8985 = vmatprep.subr.bf16.mxu0 %v11255_v59  ;;  %v11278_v23 = vcombine.low %v8386_v58, %v8388_v62  ;;  %v11280_v59 = vcombine.low %v8387_v4, %v8389_v37  ;;  %v11285_v55 = vcombine.high %v8391_v43, %v8393_v1  ;;  %v8410_v4 = vld [vmem:[#allocation9 + $0x1650] sm:$0xff] }
 0x4c6   : > { %9091 = vmatprep.subr.bf16.mxu1 %v11257_v26  ;;  %v11283_v26 = vcombine.high %v8390_v36, %v8392_v56  ;;  %v11301_v62 = vcombine.high %v8407_v19, %v8409_v49  ;;  %v8412_v37 = vld [vmem:[#allocation9 + $0x1670] sm:$0xff] }
 0x4c8   : > { %8986 = vmatpush1.bf16.msra.mxu0 %v11254_v34  ;;  %v8397_v34 = vld [vmem:[#allocation9 + $0x1578] sm:$0xff] }
 0x4c9   : > { %9092 = vmatpush1.bf16.msra.mxu1 %v11256_v35  ;;  %8987 = vmatprep.subr.bf16.mxu0 %v11259_v33  ;;  %v11282_v35 = vcombine.low %v8390_v36, %v8392_v56  ;;  %v11284_v33 = vcombine.low %v8391_v43, %v8393_v1  ;;  %v11289_v51 = vcombine.high %v8395_v5, %v8397_v34 }
 0x4ca   : > { %9093 = vmatprep.subr.bf16.mxu1 %v11261_v21  ;;  %v11287_v21 = vcombine.high %v8394_v57, %v8396_v40  ;;  %v11300_v56 = vcombine.low %v8407_v19, %v8409_v49  ;;  %v11303_v43 = vcombine.high %v8410_v4, %v8412_v37 }
 0x4cc   : > { %8988 = vmatpush1.bf16.msra.mxu0 %v11258_v28  ;;  %v8401_v28 = vld [vmem:[#allocation9 + $0x15b8] sm:$0xff] }
 0x4cd   : > { %9094 = vmatpush1.bf16.msra.mxu1 %v11260_v30  ;;  %8989 = vmatprep.subr.bf16.mxu0 %v11263_v29  ;;  %v13131_v30 = vld [vmem:[#allocation2 + $0x18] sm:$0xff]  ;;  %v11286_v29 = vcombine.low %v8394_v57, %v8396_v40  ;;  %v11293_v18 = vcombine.high %v8399_v25, %v8401_v28  ;;  %v11292_v27 = vcombine.low %v8399_v25, %v8401_v28  ;;  %v8422_v28 = vld [vmem:[#allocation9 + $0x1710] sm:$0xff] }
 0x4ce   : > { %9095 = vmatprep.subr.bf16.mxu1 %v11265_v45  ;;  %v11288_v45 = vcombine.low %v8395_v5, %v8397_v34  ;;  %v11302_v57 = vcombine.low %v8410_v4, %v8412_v37  ;;  %v8435_v37 = vld [vmem:[#allocation9 + $0x17d8] sm:$0xff] }
 0x4d0   : > { %8990 = vmatpush1.bf16.msra.mxu0 %v11262_v39  ;;  %v8447_v39 = vshrl.u32 %v13131_v30, 16 }
 0x4d1   : > { %9096 = vmatpush1.bf16.msra.mxu1 %v11264_v15  ;;  %8991 = vmatprep.subr.bf16.mxu0 %v11267_v61  ;;  %v8450_v15 = vshll.u32 %v13131_v30, 16  ;;  %v8403_v61 = vld [vmem:[#allocation9 + $0x15d8] sm:$0xff] }
 0x4d2   : > { %9097 = vmatprep.subr.bf16.mxu1 %v11269_v7  ;;  %v8405_v7 = vld [vmem:[#allocation9 + $0x15f8] sm:$0xff] }
 0x4d4   : > { %8992 = vmatpush1.bf16.msra.mxu0 %v11266_v46  ;;  %v11295_v46 = vcombine.high %v8402_v9, %v8404_v60 }
 0x4d5   : > { %9098 = vmatpush1.bf16.msra.mxu1 %v11268_v24  ;;  %8993 = vmatprep.subr.bf16.mxu0 %v11271_v2  ;;  %v11297_v24 = vcombine.high %v8403_v61, %v8405_v7  ;;  %v8449_v2 = vrot.slane %v8447_v39, 1 }
 0x4d6   : > { %9099 = vmatprep.subr.bf16.mxu1 %v11273_v16  ;;  %v8452_v16 = vrot.slane %v8450_v15, 2  ;;  %v8426_v15 = vld [vmem:[#allocation9 + $0x1750] sm:$0xff] }
 0x4d8   : > { %8994 = vmatpush1.bf16.msra.mxu0 %v11270_v17  ;;  %v11294_v17 = vcombine.low %v8402_v9, %v8404_v60  ;;  %v8453_v58 = vor.u32 %v8452_v16, %v8449_v2  ;;  %v8432_v2 = vld [vmem:[#allocation9 + $0x17b0] sm:$0xff]  ;;  %v8431_v16 = vld [vmem:[#allocation9 + $0x1798] sm:$0xff] }
 0x4d9   : > { %9100 = vmatpush1.bf16.msra.mxu1 %v11272_v10  ;;  %8995 = vmatprep.subr.bf16.mxu0 %v11275_v12  ;;  %v8441_v10 = vrot.slane %v8439_v41, 1  ;;  %v8444_v12 = vrot.slane %v8442_v42, 2 }
 0x4da   : > { %9101 = vmatprep.subr.bf16.mxu1 %v11277_v47  ;;  %v11296_v47 = vcombine.low %v8403_v61, %v8405_v7  ;;  %v8428_v61 = vld [vmem:[#allocation9 + $0x1770] sm:$0xff]  ;;  %v8427_v7 = vld [vmem:[#allocation9 + $0x1758] sm:$0xff] }
 0x4db   : > { %v11318_v19 = vcombine.low %v8426_v15, %v8428_v61 }
 0x4dc   : > { %8996 = vmatpush1.bf16.msra.mxu0 %v11274_v22  ;;  %v8445_v22 = vor.u32 %v8444_v12, %v8441_v10  ;;  %v8473_v10 = vshrl.u32 %v13115_v0, 16 }
 0x4dd   : > { %9102 = vmatpush1.bf16.msra.mxu1 %v11276_v14  ;;  %8997 = vmatprep.subr.bf16.mxu0 %v11279_v63  ;;  %v8411_v14 = vld [vmem:[#allocation9 + $0x1658] sm:$0xff] }
 0x4de   : > { %9103 = vmatprep.subr.bf16.mxu1 %v11281_v48  ;;  %v8413_v63 = vld [vmem:[#allocation9 + $0x1678] sm:$0xff]  ;;  %v11298_v48 = vcombine.low %v8406_v54, %v8408_v31  ;;  %v8454_v36 = vsel %vm941_vm3, %v8445_v22, %v8453_v58 }
 0x4df   : > { %v11305_v1 = vcombine.high %v8411_v14, %v8413_v63  ;;  %v11304_v40 = vcombine.low %v8411_v14, %v8413_v63  ;;  %v8433_v54 = vld [vmem:[#allocation9 + $0x17b8] sm:$0xff] }
 0x4e0   : > { %8998 = vmatpush1.bf16.msra.mxu0 %v11278_v23  ;;  %v8414_v23 = vld [vmem:[#allocation9 + $0x1690] sm:$0xff]  ;;  %v11325_v12 = vcombine.high %v8431_v16, %v8433_v54  ;;  %v8437_v22 = vld [vmem:[#allocation9 + $0x17f8] sm:$0xff]  ;;  %v11324_v63 = vcombine.low %v8431_v16, %v8433_v54 }
 0x4e1   : > { %9104 = vmatpush1.bf16.msra.mxu1 %v11280_v59  ;;  %8999 = vmatprep.subr.bf16.mxu0 %v11283_v26  ;;  %v8416_v59 = vld [vmem:[#allocation9 + $0x16b0] sm:$0xff]  ;;  %v8415_v26 = vld [vmem:[#allocation9 + $0x1698] sm:$0xff] }
 0x4e2   : > { %9105 = vmatprep.subr.bf16.mxu1 %v11285_v55  ;;  %v8417_v55 = vld [vmem:[#allocation9 + $0x16b8] sm:$0xff]  ;;  %v11307_v5 = vcombine.high %v8414_v23, %v8416_v59  ;;  %v11306_v11 = vcombine.low %v8414_v23, %v8416_v59  ;;  %v9206_v59 = vld [vmem:[#allocation9 + $0x1810] sm:$0xff] }
 0x4e3   : > { %v11309_v34 = vcombine.high %v8415_v26, %v8417_v55  ;;  %v11308_v6 = vcombine.low %v8415_v26, %v8417_v55  ;;  %v13142_v31 = vld [vmem:[#allocation2 + $0x28] sm:$0xff] }
 0x4e4   : > { %9000 = vmatpush1.bf16.msra.mxu0 %v11282_v35  ;;  %v8418_v35 = vld [vmem:[#allocation9 + $0x16d0] sm:$0xff]  ;;  %v8484_v4 = vshll.u32 %v13142_v31, 16  ;;  %v9207_v26 = vld [vmem:[#allocation9 + $0x1818] sm:$0xff] }
 0x4e5   : > { %9106 = vmatpush1.bf16.msra.mxu1 %v11284_v33  ;;  %9001 = vmatprep.subr.bf16.mxu0 %v11287_v21  ;;  %v8420_v33 = vld [vmem:[#allocation9 + $0x16f0] sm:$0xff]  ;;  %v8419_v21 = vld [vmem:[#allocation9 + $0x16d8] sm:$0xff] }
 0x4e6   : > { %9107 = vmatprep.subr.bf16.mxu1 %v11289_v51  ;;  %v8421_v51 = vld [vmem:[#allocation9 + $0x16f8] sm:$0xff]  ;;  %v11311_v25 = vcombine.high %v8418_v35, %v8420_v33  ;;  %v8486_v23 = vrot.slane %v8484_v4, 2 }
 0x4e7   : > { %v11312_v9 = vcombine.low %v8419_v21, %v8421_v51  ;;  %v9209_v55 = vld [vmem:[#allocation9 + $0x1838] sm:$0xff] }
 0x4e8   : > { %9002 = vmatpush1.bf16.msra.mxu0 %v11286_v29  ;;  %v8424_v29 = vld [vmem:[#allocation9 + $0x1730] sm:$0xff] }
 0x4e9   : > { %9108 = vmatpush1.bf16.msra.mxu1 %v11288_v45  ;;  %9003 = vmatprep.subr.bf16.mxu0 %v11291_v13  ;;  %v8423_v45 = vld [vmem:[#allocation9 + $0x1718] sm:$0xff]  ;;  %v11315_v60 = vcombine.high %v8422_v28, %v8424_v29  ;;  %v11314_v41 = vcombine.low %v8422_v28, %v8424_v29 }
 0x4ea   : > { %9109 = vmatprep.subr.bf16.mxu1 %v11293_v18  ;;  %v8425_v13 = vld [vmem:[#allocation9 + $0x1738] sm:$0xff]  ;;  %v11310_v18 = vcombine.low %v8418_v35, %v8420_v33  ;;  %v11333_v33 = vcombine.high %v9207_v26, %v9209_v55 }
 0x4eb   : > { %v11317_v39 = vcombine.high %v8423_v45, %v8425_v13  ;;  %v11316_v42 = vcombine.low %v8423_v45, %v8425_v13  ;;  %v9214_v13 = vld [vmem:[#allocation9 + $0x1890] sm:$0xff] }
 0x4ec   : > { %9004 = vmatpush1.bf16.msra.mxu0 %v11290_v8  ;;  %v8429_v8 = vld [vmem:[#allocation9 + $0x1778] sm:$0xff] }
 0x4ed   : > { %9110 = vmatpush1.bf16.msra.mxu1 %v11292_v27  ;;  %9005 = vmatprep.subr.bf16.mxu0 %v11295_v46  ;;  %v11319_v27 = vcombine.high %v8426_v15, %v8428_v61  ;;  %v11321_v46 = vcombine.high %v8427_v7, %v8429_v8  ;;  %v11320_v49 = vcombine.low %v8427_v7, %v8429_v8  ;;  %v9204_v8 = vld [vmem:[#allocation2 + $0x8] sm:$0xfc] }
 0x4ee   : > { %9111 = vmatprep.subr.bf16.mxu1 %v11297_v24  ;;  %v8430_v24 = vld [vmem:[#allocation9 + $0x1790] sm:$0xff]  ;;  %v9311_v54 = vrot.slane %v9204_v8, 2 }
 0x4ef   : > { %v11322_v14 = vcombine.low %v8430_v24, %v8432_v2 }
 0x4f0   : > { %9006 = vmatpush1.bf16.msra.mxu0 %v11294_v17  ;;  %v11323_v17 = vcombine.high %v8430_v24, %v8432_v2  ;;  %v9219_v24 = vld [vmem:[#allocation9 + $0x18d8] sm:$0xff] }
 0x4f1   : > { %9112 = vmatpush1.bf16.msra.mxu1 %v11296_v47  ;;  %9028 = vmatprep.subr.bf16.mxu0 %v11299_v20  ;;  %v8434_v47 = vld [vmem:[#allocation9 + $0x17d0] sm:$0xff]  ;;  %v9221_v2 = vld [vmem:[#allocation9 + $0x18f8] sm:$0xff] }
 0x4f2   : > { %9134 = vmatprep.subr.bf16.mxu1 %v11301_v62  ;;  %v8436_v20 = vld [vmem:[#allocation9 + $0x17f0] sm:$0xff]  ;;  %v8481_v62 = vshrl.u32 %v13142_v31, 16 }
 0x4f3   : > { %9008 = vmatmul.mubr.bf16.vlgmr.msra.gmra.mrb[16].mxu0 %v8454_v36 }
 0x4f4   : > { %9114 = vmatmul.mubr.bf16.vlgmr.msra.gmra.mrb[12].mxu1 %v8454_v36  ;;  %9017 = vmatprep.mubr.bf16.mxu0 %v13127_v44  ;;  %v8475_v36 = vrot.slane %v8473_v10, 1  ;;  %v11345_v10 = vcombine.high %v9219_v24, %v9221_v2 }
 0x4f5   : > { %9029 = vmatpush1.bf16.msra.mxu0 %v11298_v48  ;;  %9123 = vmatprep.mubr.bf16.mxu1 %v13127_v44  ;;  %v11313_v44 = vcombine.high %v8419_v21, %v8421_v51  ;;  %v11327_v48 = vcombine.high %v8434_v47, %v8436_v20  ;;  %v9210_v21 = vld [vmem:[#allocation9 + $0x1850] sm:$0xff] }
 0x4f6   : > { %9135 = vmatpush1.bf16.msra.mxu1 %v11300_v56  ;;  %9030 = vmatprep.subr.bf16.mxu0 %v11303_v43  ;;  %v11329_v56 = vcombine.high %v8435_v37, %v8437_v22  ;;  %v9212_v51 = vld [vmem:[#allocation9 + $0x1870] sm:$0xff] }
 0x4f7   : > { %9136 = vmatprep.subr.bf16.mxu1 %v11305_v1  ;;  %v8483_v1 = vrot.slane %v8481_v62, 1  ;;  %v11335_v28 = vcombine.high %v9210_v21, %v9212_v51 }
 0x4f9   : > { %9031 = vmatpush1.bf16.msra.mxu0 %v11302_v57  ;;  %v11326_v57 = vcombine.low %v8434_v47, %v8436_v20  ;;  %v8487_v35 = vor.u32 %v8486_v23, %v8483_v1  ;;  %v9225_v47 = vld [vmem:[#allocation9 + $0x1938] sm:$0xff]  ;;  %v9230_v1 = vld [vmem:[#allocation9 + $0x1990] sm:$0xff] }
 0x4fa   : > { %9137 = vmatpush1.bf16.msra.mxu1 %v11304_v40  ;;  %9032 = vmatprep.subr.bf16.mxu0 %v11307_v5  ;;  %v11328_v40 = vcombine.low %v8435_v37, %v8437_v22  ;;  %v9226_v37 = vld [vmem:[#allocation9 + $0x1950] sm:$0xff] }
 0x4fb   : > { %9018 = vmatmul.mubr.bf16.gmra.mrb[20].mxu0 %v8453_v58  ;;  %9138 = vmatprep.subr.bf16.mxu1 %v11309_v34  ;;  %v9228_v22 = vld [vmem:[#allocation9 + $0x1970] sm:$0xff] }
 0x4fc   : > { %9124 = vmatmul.mubr.bf16.gmra.mrb[16].mxu1 %v8453_v58  ;;  %9060 = vmatprep.mubr.bf16.mxu0 %v13333_v32  ;;  %v8476_v58 = vshll.u32 %v13115_v0, 16  ;;  %v9208_v0 = vld [vmem:[#allocation9 + $0x1830] sm:$0xff] }
 0x4fd   : > { %9033 = vmatpush1.bf16.msra.mxu0 %v11306_v11  ;;  %9166 = vmatprep.mubr.bf16.mxu1 %v13333_v32  ;;  %v11331_v5 = vcombine.high %v9206_v59, %v9208_v0  ;;  %v9211_v11 = vld [vmem:[#allocation9 + $0x1858] sm:$0xff]  ;;  %v9232_v23 = vld [vmem:[#allocation9 + $0x19b0] sm:$0xff] }
 0x4fe   : > { %9139 = vmatpush1.bf16.msra.mxu1 %v11308_v6  ;;  %9034 = vmatprep.subr.bf16.mxu0 %v11311_v25  ;;  %v8478_v43 = vrot.slane %v8476_v58, 2  ;;  %v9213_v6 = vld [vmem:[#allocation9 + $0x1878] sm:$0xff]  ;;  %v11330_v25 = vcombine.low %v9206_v59, %v9208_v0  ;;  %v11344_v58 = vcombine.low %v9219_v24, %v9221_v2  ;;  %v9248_v24 = vld [vmem:[#allocation9 + $0x1ab0] sm:$0xff] }
 0x4ff   : > { %9140 = vmatprep.subr.bf16.mxu1 %v11313_v44  ;;  %v11332_v44 = vcombine.low %v9207_v26, %v9209_v55  ;;  %v11337_v45 = vcombine.high %v9211_v11, %v9213_v6  ;;  %v11336_v15 = vcombine.low %v9211_v11, %v9213_v6  ;;  %v9231_v59 = vld [vmem:[#allocation9 + $0x1998] sm:$0xff]  ;;  %v11350_v26 = vcombine.low %v9226_v37, %v9228_v22 }
 0x500   : > { %v8479_v34 = vor.u32 %v8478_v43, %v8475_v36  ;;  %v9233_v0 = vld [vmem:[#allocation9 + $0x19b8] sm:$0xff] }
 0x501   : > { %9035 = vmatpush1.bf16.msra.mxu0 %v11310_v18  ;;  %v9216_v18 = vld [vmem:[#allocation9 + $0x18b0] sm:$0xff]  ;;  %v9247_v2 = vld [vmem:[#allocation9 + $0x1a98] sm:$0xff] }
 0x502   : > { %9141 = vmatpush1.bf16.msra.mxu1 %v11312_v9  ;;  %9036 = vmatprep.subr.bf16.mxu0 %v11315_v60  ;;  %v8488_v29 = vsel %vm941_vm3, %v8479_v34, %v8487_v35  ;;  %v9215_v9 = vld [vmem:[#allocation9 + $0x1898] sm:$0xff]  ;;  %v11339_v61 = vcombine.high %v9214_v13, %v9216_v18  ;;  %v9236_v34 = vld [vmem:[#allocation9 + $0x19f0] sm:$0xff] }
 0x503   : > { %9142 = vmatprep.subr.bf16.mxu1 %v11317_v39  ;;  %v9217_v60 = vld [vmem:[#allocation9 + $0x18b8] sm:$0xff]  ;;  %v11334_v39 = vcombine.low %v9210_v21, %v9212_v51  ;;  %v11354_v21 = vcombine.low %v9230_v1, %v9232_v23  ;;  %v11356_v51 = vcombine.low %v9231_v59, %v9233_v0 }
 0x504   : > { %v11341_v7 = vcombine.high %v9215_v9, %v9217_v60  ;;  %v11340_v16 = vcombine.low %v9215_v9, %v9217_v60  ;;  %v9242_v60 = vld [vmem:[#allocation9 + $0x1a50] sm:$0xff] }
 0x505   : > { %9037 = vmatpush1.bf16.msra.mxu0 %v11314_v41  ;;  %v9218_v41 = vld [vmem:[#allocation9 + $0x18d0] sm:$0xff] }
 0x506   : > { %9143 = vmatpush1.bf16.msra.mxu1 %v11316_v42  ;;  %9038 = vmatprep.subr.bf16.mxu0 %v11319_v27  ;;  %v9220_v42 = vld [vmem:[#allocation9 + $0x18f0] sm:$0xff]  ;;  %v11338_v27 = vcombine.low %v9214_v13, %v9216_v18 }
 0x507   : > { %9144 = vmatprep.subr.bf16.mxu1 %v11321_v46  ;;  %v13152_v46 = vrot.slane %v13117_v38, 2  ;;  %v11342_v20 = vcombine.low %v9218_v41, %v9220_v42 }
 0x509   : > { %9039 = vmatpush1.bf16.msra.mxu0 %v11318_v19  ;;  %v11343_v19 = vcombine.high %v9218_v41, %v9220_v42  ;;  %v9313_v38 = vsel %vm1164_vm4, %v9311_v54, %v13152_v46 }
 0x50a   : > { %9145 = vmatpush1.bf16.msra.mxu1 %v11320_v49  ;;  %9040 = vmatprep.subr.bf16.mxu0 %v11323_v17  ;;  %v9222_v49 = vld [vmem:[#allocation9 + $0x1910] sm:$0xff] }
 0x50b   : > { %9146 = vmatprep.subr.bf16.mxu1 %v11325_v12  ;;  %v9224_v17 = vld [vmem:[#allocation9 + $0x1930] sm:$0xff]  ;;  %v9223_v12 = vld [vmem:[#allocation9 + $0x1918] sm:$0xff] }
 0x50c   : > { %v11347_v62 = vcombine.high %v9222_v49, %v9224_v17  ;;  %v11349_v4 = vcombine.high %v9223_v12, %v9225_v47  ;;  %v11348_v36 = vcombine.low %v9223_v12, %v9225_v47  ;;  %v9252_v12 = vld [vmem:[#allocation9 + $0x1af0] sm:$0xff]  ;;  %v9251_v47 = vld [vmem:[#allocation9 + $0x1ad8] sm:$0xff] }
 0x50d   : > { %9041 = vmatpush1.bf16.msra.mxu0 %v11322_v14  ;;  %v9227_v14 = vld [vmem:[#allocation9 + $0x1958] sm:$0xff] }
 0x50e   : > { %9147 = vmatpush1.bf16.msra.mxu1 %v11324_v63  ;;  %9042 = vmatprep.subr.bf16.mxu0 %v11327_v48  ;;  %v9229_v63 = vld [vmem:[#allocation9 + $0x1978] sm:$0xff]  ;;  %v11346_v48 = vcombine.low %v9222_v49, %v9224_v17 }
 0x50f   : > { %9148 = vmatprep.subr.bf16.mxu1 %v11329_v56  ;;  %v11351_v56 = vcombine.high %v9226_v37, %v9228_v22  ;;  %v11353_v43 = vcombine.high %v9227_v14, %v9229_v63  ;;  %v11352_v55 = vcombine.low %v9227_v14, %v9229_v63  ;;  %v9254_v37 = vld [vmem:[#allocation9 + $0x1b10] sm:$0xff]  ;;  %v9255_v14 = vld [vmem:[#allocation9 + $0x1b18] sm:$0xff] }
 0x510   : > { %v9256_v22 = vld [vmem:[#allocation9 + $0x1b30] sm:$0xff]  ;;  %v9257_v63 = vld [vmem:[#allocation9 + $0x1b38] sm:$0xff] }
 0x511   : > { %9043 = vmatpush1.bf16.msra.mxu0 %v11326_v57  ;;  %v11355_v57 = vcombine.high %v9230_v1, %v9232_v23  ;;  %v9258_v1 = vld [vmem:[#allocation9 + $0x1b50] sm:$0xff] }
 0x512   : > { %9149 = vmatpush1.bf16.msra.mxu1 %v11328_v40  ;;  %9803 = vmatprep.subr.bf16.mxu0 %v11331_v5  ;;  %v11357_v40 = vcombine.high %v9231_v59, %v9233_v0  ;;  %v9234_v5 = vld [vmem:[#allocation9 + $0x19d0] sm:$0xff]  ;;  %v9259_v59 = vld [vmem:[#allocation9 + $0x1b58] sm:$0xff] }
 0x513   : > { %9909 = vmatprep.subr.bf16.mxu1 %v11333_v33  ;;  %v9237_v33 = vld [vmem:[#allocation9 + $0x19f8] sm:$0xff]  ;;  %v11359_v11 = vcombine.high %v9234_v5, %v9236_v34  ;;  %v9260_v23 = vld [vmem:[#allocation9 + $0x1b70] sm:$0xff] }
 0x514   : > { %9061 = vmatmul.mubr.bf16.vlgmr.msra.gmra.mrb[16].mxu0 %v8488_v29  ;;  %v9261_v0 = vld [vmem:[#allocation9 + $0x1b78] sm:$0xff] }
 0x515   : > { %9167 = vmatmul.mubr.bf16.vlgmr.msra.gmra.mrb[12].mxu1 %v8488_v29  ;;  %9804 = vmatpush1.bf16.msra.mxu0 %v11330_v25  ;;  %v9238_v25 = vld [vmem:[#allocation9 + $0x1a10] sm:$0xff]  ;;  %v9241_v29 = vld [vmem:[#allocation9 + $0x1a38] sm:$0xff] }
 0x516   : > { %9910 = vmatpush1.bf16.msra.mxu1 %v11332_v44  ;;  %9805 = vmatprep.subr.bf16.mxu0 %v11335_v28  ;;  %v9240_v44 = vld [vmem:[#allocation9 + $0x1a30] sm:$0xff]  ;;  %v9239_v28 = vld [vmem:[#allocation9 + $0x1a18] sm:$0xff] }
 0x517   : > { %9911 = vmatprep.subr.bf16.mxu1 %v11337_v45  ;;  %9070 = vmatprep.mubr.bf16.mxu0 %v13333_v32  ;;  %v11358_v45 = vcombine.low %v9234_v5, %v9236_v34  ;;  %v11363_v18 = vcombine.high %v9238_v25, %v9240_v44  ;;  %v11365_v9 = vcombine.high %v9239_v28, %v9241_v29  ;;  %v9262_v5 = vld [vmem:[#allocation9 + $0x1b90] sm:$0xff] }
 0x518   : > { %9176 = vmatprep.mubr.bf16.mxu1 %v13333_v32  ;;  %v11364_v8 = vcombine.low %v9239_v28, %v9241_v29  ;;  %v9264_v34 = vld [vmem:[#allocation9 + $0x1bb0] sm:$0xff]  ;;  %v9267_v28 = vld [vmem:[#allocation9 + $0x1bd8] sm:$0xff] }
 0x519   : > { %9806 = vmatpush1.bf16.msra.mxu0 %v11334_v39  ;;  %v9244_v39 = vld [vmem:[#allocation9 + $0x1a70] sm:$0xff]  ;;  %v9269_v29 = vld [vmem:[#allocation9 + $0x1bf8] sm:$0xff] }
 0x51a   : > { %9912 = vmatpush1.bf16.msra.mxu1 %v11336_v15  ;;  %9807 = vmatprep.subr.bf16.mxu0 %v11339_v61  ;;  %v9243_v15 = vld [vmem:[#allocation9 + $0x1a58] sm:$0xff]  ;;  %v11367_v41 = vcombine.high %v9242_v60, %v9244_v39  ;;  %v11366_v54 = vcombine.low %v9242_v60, %v9244_v39  ;;  %v9270_v60 = vld [vmem:[#allocation9 + $0x1c10] sm:$0xff] }
 0x51b   : > { %9913 = vmatprep.subr.bf16.mxu1 %v11341_v7  ;;  %v9245_v61 = vld [vmem:[#allocation9 + $0x1a78] sm:$0xff]  ;;  %v11362_v7 = vcombine.low %v9238_v25, %v9240_v44  ;;  %v9266_v25 = vld [vmem:[#allocation9 + $0x1bd0] sm:$0xff] }
 0x51c   : > { %9071 = vmatmul.mubr.bf16.gmra.mrb[20].mxu0 %v8487_v35  ;;  %v11369_v42 = vcombine.high %v9243_v15, %v9245_v61  ;;  %v9268_v44 = vld [vmem:[#allocation9 + $0x1bf0] sm:$0xff] }
 0x51d   : > { %9177 = vmatmul.mubr.bf16.gmra.mrb[16].mxu1 %v8487_v35  ;;  %9808 = vmatpush1.bf16.msra.mxu0 %v11338_v27  ;;  %v9235_v35 = vld [vmem:[#allocation9 + $0x19d8] sm:$0xff]  ;;  %v9246_v27 = vld [vmem:[#allocation9 + $0x1a90] sm:$0xff] }
 0x51e   : > { %9835 = vmatprep.mubr.bf16.mxu0 %v9313_v38  ;;  %9914 = vmatpush1.bf16.msra.mxu1 %v11340_v16  ;;  %v11361_v6 = vcombine.high %v9235_v35, %v9237_v33  ;;  %v11360_v13 = vcombine.low %v9235_v35, %v9237_v33  ;;  %v9249_v16 = vld [vmem:[#allocation9 + $0x1ab8] sm:$0xff]  ;;  %v11371_v49 = vcombine.high %v9246_v27, %v9248_v24  ;;  %v9272_v39 = vld [vmem:[#allocation9 + $0x1c30] sm:$0xff] }
 0x51f   : > { %9941 = vmatprep.mubr.bf16.mxu1 %v9313_v38  ;;  %9809 = vmatprep.subr.bf16.mxu0 %v11343_v19  ;;  %v11368_v19 = vcombine.low %v9243_v15, %v9245_v61  ;;  %v11373_v17 = vcombine.high %v9247_v2, %v9249_v16  ;;  %v9253_v38 = vld [vmem:[#allocation9 + $0x1af8] sm:$0xff] }
 0x520   : > { %9915 = vmatprep.subr.bf16.mxu1 %v11345_v10  ;;  %v9250_v10 = vld [vmem:[#allocation9 + $0x1ad0] sm:$0xff]  ;;  %v9263_v35 = vld [vmem:[#allocation9 + $0x1b98] sm:$0xff] }
 0x521   : > { %9810 = vmatpush1.bf16.msra.mxu0 %v11342_v20  ;;  %v11370_v20 = vcombine.low %v9246_v27, %v9248_v24  ;;  %v9265_v33 = vld [vmem:[#allocation9 + $0x1bb8] sm:$0xff]  ;;  %v9309_v27 = vrot.slane %v13131_v30, 2 }
 0x522   : > { %9916 = vmatpush1.bf16.msra.mxu1 %v11344_v58  ;;  %9811 = vmatprep.subr.bf16.mxu0 %v11347_v62  ;;  %v11372_v58 = vcombine.low %v9247_v2, %v9249_v16  ;;  %v11375_v62 = vcombine.high %v9250_v10, %v9252_v12  ;;  %v9271_v15 = vld [vmem:[#allocation9 + $0x1c18] sm:$0xff]  ;;  %v9274_v2 = vld [vmem:[#allocation9 + $0x1c50] sm:$0xff] }
 0x523   : > { %9917 = vmatprep.subr.bf16.mxu1 %v11349_v4  ;;  %v11377_v4 = vcombine.high %v9251_v47, %v9253_v38  ;;  %v9273_v61 = vld [vmem:[#allocation9 + $0x1c38] sm:$0xff]  ;;  %v9276_v16 = vld [vmem:[#allocation9 + $0x1c70] sm:$0xff] }
 0x524   : > { %v11397_v24 = vcombine.high %v9271_v15, %v9273_v61  ;;  %v9279_v30 = vld [vmem:[#allocation9 + $0x1c98] sm:$0xff] }
 0x525   : > { %9812 = vmatpush1.bf16.msra.mxu0 %v11346_v48  ;;  %v11374_v48 = vcombine.low %v9250_v10, %v9252_v12  ;;  %v11396_v12 = vcombine.low %v9271_v15, %v9273_v61  ;;  %v9298_v15 = vld [vmem:[#allocation9 + $0x1dd0] sm:$0xff] }
 0x526   : > { %9918 = vmatpush1.bf16.msra.mxu1 %v11348_v36  ;;  %9813 = vmatprep.subr.bf16.mxu0 %v11351_v56  ;;  %v11376_v36 = vcombine.low %v9251_v47, %v9253_v38  ;;  %v11379_v56 = vcombine.high %v9254_v37, %v9256_v22  ;;  %v11399_v47 = vcombine.high %v9274_v2, %v9276_v16  ;;  %v9300_v61 = vld [vmem:[#allocation9 + $0x1df0] sm:$0xff] }
 0x527   : > { %9919 = vmatprep.subr.bf16.mxu1 %v11353_v43  ;;  %v11381_v43 = vcombine.high %v9255_v14, %v9257_v63 }
 0x529   : > { %9814 = vmatpush1.bf16.msra.mxu0 %v11350_v26  ;;  %v11378_v26 = vcombine.low %v9254_v37, %v9256_v22 }
 0x52a   : > { %9920 = vmatpush1.bf16.msra.mxu1 %v11352_v55  ;;  %9815 = vmatprep.subr.bf16.mxu0 %v11355_v57  ;;  %v11380_v55 = vcombine.low %v9255_v14, %v9257_v63  ;;  %v11383_v57 = vcombine.high %v9258_v1, %v9260_v23  ;;  %v9282_v63 = vld [vmem:[#allocation9 + $0x1cd0] sm:$0xff] }
 0x52b   : > { %9921 = vmatprep.subr.bf16.mxu1 %v11357_v40  ;;  %v11385_v40 = vcombine.high %v9259_v59, %v9261_v0 }
 0x52d   : > { %9816 = vmatpush1.bf16.msra.mxu0 %v11354_v21  ;;  %v11382_v21 = vcombine.low %v9258_v1, %v9260_v23 }
 0x52e   : > { %9922 = vmatpush1.bf16.msra.mxu1 %v11356_v51  ;;  %9817 = vmatprep.subr.bf16.mxu0 %v11359_v11  ;;  %v11384_v51 = vcombine.low %v9259_v59, %v9261_v0  ;;  %v11387_v11 = vcombine.high %v9262_v5, %v9264_v34  ;;  %v9286_v59 = vld [vmem:[#allocation9 + $0x1d10] sm:$0xff] }
 0x52f   : > { %9923 = vmatprep.subr.bf16.mxu1 %v11361_v6  ;;  %v11389_v6 = vcombine.high %v9263_v35, %v9265_v33  ;;  %v9288_v0 = vld [vmem:[#allocation9 + $0x1d30] sm:$0xff] }
 0x531   : > { %9818 = vmatpush1.bf16.msra.mxu0 %v11358_v45  ;;  %v11386_v45 = vcombine.low %v9262_v5, %v9264_v34  ;;  %v11411_v5 = vcombine.high %v9286_v59, %v9288_v0 }
 0x532   : > { %9924 = vmatpush1.bf16.msra.mxu1 %v11360_v13  ;;  %9819 = vmatprep.subr.bf16.mxu0 %v11363_v18  ;;  %v11388_v13 = vcombine.low %v9263_v35, %v9265_v33  ;;  %v11391_v18 = vcombine.high %v9266_v25, %v9268_v44  ;;  %v9290_v35 = vld [vmem:[#allocation9 + $0x1d50] sm:$0xff] }
 0x533   : > { %9925 = vmatprep.subr.bf16.mxu1 %v11365_v9  ;;  %v11393_v9 = vcombine.high %v9267_v28, %v9269_v29  ;;  %v9292_v33 = vld [vmem:[#allocation9 + $0x1d70] sm:$0xff] }
 0x535   : > { %9820 = vmatpush1.bf16.msra.mxu0 %v11362_v7  ;;  %v11390_v7 = vcombine.low %v9266_v25, %v9268_v44  ;;  %v11415_v25 = vcombine.high %v9290_v35, %v9292_v33 }
 0x536   : > { %9926 = vmatpush1.bf16.msra.mxu1 %v11364_v8  ;;  %9821 = vmatprep.subr.bf16.mxu0 %v11367_v41  ;;  %v11392_v8 = vcombine.low %v9267_v28, %v9269_v29  ;;  %v9203_v41 = vld [vmem:[#allocation2] sm:$0xfc] }
 0x537   : > { %9927 = vmatprep.subr.bf16.mxu1 %v11369_v42  ;;  %v11395_v42 = vcombine.high %v9270_v60, %v9272_v39  ;;  %v9294_v28 = vld [vmem:[#allocation9 + $0x1d90] sm:$0xff] }
 0x538   : > { %v9296_v29 = vld [vmem:[#allocation9 + $0x1db0] sm:$0xff] }
 0x539   : > { %9822 = vmatpush1.bf16.msra.mxu0 %v11366_v54  ;;  %v9308_v54 = vrot.slane %v9203_v41, 2  ;;  %v11418_v41 = vcombine.low %v9294_v28, %v9296_v29 }
 0x53a   : > { %9928 = vmatpush1.bf16.msra.mxu1 %v11368_v19  ;;  %9823 = vmatprep.subr.bf16.mxu0 %v11371_v49  ;;  %v9275_v19 = vld [vmem:[#allocation9 + $0x1c58] sm:$0xff] }
 0x53b   : > { %9929 = vmatprep.subr.bf16.mxu1 %v11373_v17  ;;  %v9277_v49 = vld [vmem:[#allocation9 + $0x1c78] sm:$0xff]  ;;  %v11394_v17 = vcombine.low %v9270_v60, %v9272_v39  ;;  %v9310_v10 = vsel %vm1164_vm4, %v9308_v54, %v9309_v27  ;;  %v11419_v60 = vcombine.high %v9294_v28, %v9296_v29 }
 0x53c   : > { %v11401_v38 = vcombine.high %v9275_v19, %v9277_v49  ;;  %v11400_v37 = vcombine.low %v9275_v19, %v9277_v49  ;;  %v9315_v49 = vrot.slane %v13142_v31, 2 }
 0x53d   : > { %9824 = vmatpush1.bf16.msra.mxu0 %v11370_v20  ;;  %v9278_v20 = vld [vmem:[#allocation9 + $0x1c90] sm:$0xff] }
 0x53e   : > { %9930 = vmatpush1.bf16.msra.mxu1 %v11372_v58  ;;  %9825 = vmatprep.subr.bf16.mxu0 %v11375_v62  ;;  %v9280_v58 = vld [vmem:[#allocation9 + $0x1cb0] sm:$0xff]  ;;  %v9281_v62 = vld [vmem:[#allocation9 + $0x1cb8] sm:$0xff] }
 0x53f   : > { %9931 = vmatprep.subr.bf16.mxu1 %v11377_v4  ;;  %v11398_v4 = vcombine.low %v9274_v2, %v9276_v16  ;;  %v11403_v22 = vcombine.high %v9278_v20, %v9280_v58  ;;  %v11405_v14 = vcombine.high %v9279_v30, %v9281_v62  ;;  %v11404_v1 = vcombine.low %v9279_v30, %v9281_v62  ;;  %v9205_v2 = vld [vmem:[#allocation2 + $0x10] sm:$0xfc] }
 0x540   : > { %v11422_v16 = vcombine.low %v9298_v15, %v9300_v61  ;;  %v9314_v19 = vrot.slane %v9205_v2, 2 }
 0x541   : > { %9826 = vmatpush1.bf16.msra.mxu0 %v11374_v48  ;;  %v9284_v48 = vld [vmem:[#allocation9 + $0x1cf0] sm:$0xff] }
 0x542   : > { %9932 = vmatpush1.bf16.msra.mxu1 %v11376_v36  ;;  %9827 = vmatprep.subr.bf16.mxu0 %v11379_v56  ;;  %v9283_v36 = vld [vmem:[#allocation9 + $0x1cd8] sm:$0xff]  ;;  %v11407_v23 = vcombine.high %v9282_v63, %v9284_v48 }
 0x543   : > { %9933 = vmatprep.subr.bf16.mxu1 %v11381_v43  ;;  %v9285_v56 = vld [vmem:[#allocation9 + $0x1cf8] sm:$0xff]  ;;  %v11402_v43 = vcombine.low %v9278_v20, %v9280_v58 }
 0x545   : > { %9828 = vmatpush1.bf16.msra.mxu0 %v11378_v26  ;;  %v9287_v26 = vld [vmem:[#allocation9 + $0x1d18] sm:$0xff] }
 0x546   : > { %9934 = vmatpush1.bf16.msra.mxu1 %v11380_v55  ;;  %9829 = vmatprep.subr.bf16.mxu0 %v11383_v57  ;;  %v9289_v55 = vld [vmem:[#allocation9 + $0x1d38] sm:$0xff]  ;;  %v11406_v57 = vcombine.low %v9282_v63, %v9284_v48 }
 0x547   : > { %9935 = vmatprep.subr.bf16.mxu1 %v11385_v40  ;;  %v11408_v40 = vcombine.low %v9283_v36, %v9285_v56  ;;  %v11413_v34 = vcombine.high %v9287_v26, %v9289_v55 }
 0x549   : > { %9830 = vmatpush1.bf16.msra.mxu0 %v11382_v21  ;;  %v9291_v21 = vld [vmem:[#allocation9 + $0x1d58] sm:$0xff] }
 0x54a   : > { %9936 = vmatpush1.bf16.msra.mxu1 %v11384_v51  ;;  %9831 = vmatprep.subr.bf16.mxu0 %v11387_v11  ;;  %v9293_v51 = vld [vmem:[#allocation9 + $0x1d78] sm:$0xff]  ;;  %v11410_v11 = vcombine.low %v9286_v59, %v9288_v0 }
 0x54b   : > { %9937 = vmatprep.subr.bf16.mxu1 %v11389_v6  ;;  %v11412_v6 = vcombine.low %v9287_v26, %v9289_v55  ;;  %v11417_v44 = vcombine.high %v9291_v21, %v9293_v51 }
 0x54d   : > { %9832 = vmatpush1.bf16.msra.mxu0 %v11386_v45  ;;  %v9295_v45 = vld [vmem:[#allocation9 + $0x1d98] sm:$0xff] }
 0x54e   : > { %9938 = vmatpush1.bf16.msra.mxu1 %v11388_v13  ;;  %9833 = vmatprep.subr.bf16.mxu0 %v11391_v18  ;;  %v9297_v13 = vld [vmem:[#allocation9 + $0x1db8] sm:$0xff]  ;;  %v11414_v18 = vcombine.low %v9290_v35, %v9292_v33 }
 0x54f   : > { %9939 = vmatprep.subr.bf16.mxu1 %v11393_v9  ;;  %v11416_v9 = vcombine.low %v9291_v21, %v9293_v51  ;;  %v11421_v39 = vcombine.high %v9295_v45, %v9297_v13 }
 0x551   : > { %9834 = vmatpush1.bf16.msra.mxu0 %v11390_v7  ;;  %v9299_v7 = vld [vmem:[#allocation9 + $0x1dd8] sm:$0xff] }
 0x552   : > { %9940 = vmatpush1.bf16.msra.mxu1 %v11392_v8  ;;  %9856 = vmatprep.subr.bf16.mxu0 %v11395_v42  ;;  %v9301_v8 = vld [vmem:[#allocation9 + $0x1df8] sm:$0xff]  ;;  %v11420_v42 = vcombine.low %v9295_v45, %v9297_v13 }
 0x553   : > { %9962 = vmatprep.subr.bf16.mxu1 %v11397_v24  ;;  %v11425_v24 = vcombine.high %v9299_v7, %v9301_v8  ;;  %v11424_v54 = vcombine.low %v9299_v7, %v9301_v8 }
 0x554   : > { %9836 = vmatmul.mubr.bf16.vlgmr.msra.gmra.mrb[16].mxu0 %v9310_v10 }
 0x555   : > { %9942 = vmatmul.mubr.bf16.vlgmr.msra.gmra.mrb[12].mxu1 %v9310_v10  ;;  %9845 = vmatprep.mubr.bf16.mxu0 %v13152_v46  ;;  %v10031_v10 = vld [vmem:[#allocation11 + $0x4] sm:$0xf] }
 0x556   : > { %9857 = vmatpush1.bf16.msra.mxu0 %v11394_v17  ;;  %9951 = vmatprep.mubr.bf16.mxu1 %v13152_v46  ;;  %v11409_v46 = vcombine.high %v9283_v36, %v9285_v56  ;;  %v9316_v17 = vsel %vm1164_vm4, %v9314_v19, %v9315_v49  ;;  %v13173_v31 = vrot.slane %v10031_v10, %v12642_v53 }
 0x557   : > { %9963 = vmatpush1.bf16.msra.mxu1 %v11396_v12  ;;  %9858 = vmatprep.subr.bf16.mxu0 %v11399_v47  ;;  %v13167_v12 = vrot.slane %v10031_v10, %v12638_v50  ;;  %v13170_v47 = vrot.slane %v10031_v10, %v12640_v52 }
 0x558   : > { %9964 = vmatprep.subr.bf16.mxu1 %v11401_v38  ;;  %v13176_v38 = vrot.slane %v10031_v10, %v12653_v3 }
 0x55a   : > { %9859 = vmatpush1.bf16.msra.mxu0 %v11398_v4 }
 0x55b   : > { %9965 = vmatpush1.bf16.msra.mxu1 %v11400_v37  ;;  %9860 = vmatprep.subr.bf16.mxu0 %v11403_v22 }
 0x55c   : > { %9846 = vmatmul.mubr.bf16.gmra.mrb[20].mxu0 %v9309_v27  ;;  %9966 = vmatprep.subr.bf16.mxu1 %v11405_v14 }
 0x55d   : > { %9952 = vmatmul.mubr.bf16.gmra.mrb[16].mxu1 %v9309_v27  ;;  %9888 = vmatprep.mubr.bf16.mxu0 %v13333_v32  ;;  %v11423_v27 = vcombine.high %v9298_v15, %v9300_v61 }
 0x55e   : > { %9861 = vmatpush1.bf16.msra.mxu0 %v11402_v43  ;;  %9994 = vmatprep.mubr.bf16.mxu1 %v13333_v32 }
 0x55f   : > { %9967 = vmatpush1.bf16.msra.mxu1 %v11404_v1  ;;  %9862 = vmatprep.subr.bf16.mxu0 %v11407_v23 }
 0x560   : > { %9968 = vmatprep.subr.bf16.mxu1 %v11409_v46 }
 0x562   : > { %9863 = vmatpush1.bf16.msra.mxu0 %v11406_v57 }
 0x563   : > { %9969 = vmatpush1.bf16.msra.mxu1 %v11408_v40  ;;  %9864 = vmatprep.subr.bf16.mxu0 %v11411_v5 }
 0x564   : > { %9970 = vmatprep.subr.bf16.mxu1 %v11413_v34 }
 0x566   : > { %9865 = vmatpush1.bf16.msra.mxu0 %v11410_v11 }
 0x567   : > { %9971 = vmatpush1.bf16.msra.mxu1 %v11412_v6  ;;  %9866 = vmatprep.subr.bf16.mxu0 %v11415_v25 }
 0x568   : > { %9972 = vmatprep.subr.bf16.mxu1 %v11417_v44 }
 0x56a   : > { %9867 = vmatpush1.bf16.msra.mxu0 %v11414_v18 }
 0x56b   : > { %9973 = vmatpush1.bf16.msra.mxu1 %v11416_v9  ;;  %9868 = vmatprep.subr.bf16.mxu0 %v11419_v60 }
 0x56c   : > { %9974 = vmatprep.subr.bf16.mxu1 %v11421_v39 }
 0x56e   : > { %9869 = vmatpush1.bf16.msra.mxu0 %v11418_v41 }
 0x56f   : > { %9975 = vmatpush1.bf16.msra.mxu1 %v11420_v42  ;;  %9870 = vmatprep.subr.bf16.mxu0 %v11423_v27 }
 0x570   : > { %9976 = vmatprep.subr.bf16.mxu1 %v11425_v24 }
 0x572   : > { %9871 = vmatpush1.bf16.msra.mxu0 %v11422_v16 }
 0x573   : > { %9977 = vmatpush1.bf16.msra.mxu1 %v11424_v54 }
 0x575   : > { %9889 = vmatmul.mubr.bf16.vlgmr.msra.gmra.mrb[16].mxu0 %v9316_v17 }
 0x576   : > { %9995 = vmatmul.mubr.bf16.vlgmr.msra.gmra.mrb[12].mxu1 %v9316_v17  ;;  %9898 = vmatprep.mubr.bf16.mxu0 %v13333_v32 }
 0x577   : > { %10004 = vmatprep.mubr.bf16.mxu1 %v13333_v32 }
 0x57d   : > { %9899 = vmatmul.mubr.bf16.gmra.mrb[20].mxu0 %v9315_v49 }
 0x57e   : > { %10005 = vmatmul.mubr.bf16.gmra.mrb[16].mxu1 %v9315_v49 }
 0x648   : > { %v9890_v20 = vpop.f32.mrb[16].mxu0 }
 0x649   : > { %v10053_v58 = vadd.f32 %v13167_v12, %v9890_v20  ;;  %v9996_v30 = vpop.f32.mrb[12].mxu1  ;;  %v9892_v32 = vpop.f32.mrb[17].mxu0 }
 0x64a   : > { %v10055_v62 = vadd.f32 %v13170_v47, %v9996_v30  ;;  %v10054_v4 = vadd.f32 %v13173_v31, %v9892_v32  ;;  %v9998_v37 = vpop.f32.mrb[13].mxu1  ;;  %v9894_v22 = vpop.f32.mrb[18].mxu0 }
 0x64b   : > { %v10069_v14 = vmax.f32 %v10053_v58, 0.0  ;;  %v10056_v52 = vadd.f32 %v13176_v38, %v9998_v37  ;;  %v10057_v53 = vadd.f32 %v13167_v12, %v9894_v22  ;;  %v10000_v63 = vpop.f32.mrb[14].mxu1  ;;  %v9896_v48 = vpop.f32.mrb[19].mxu0 }
 0x64c   : > { %v10071_v36 = vmax.f32 %v10055_v62, 0.0  ;;  %v10070_v56 = vmax.f32 %v10054_v4, 0.0  ;;  %v10059_v43 = vadd.f32 %v13170_v47, %v10000_v63  ;;  %v10058_v1 = vadd.f32 %v13173_v31, %v9896_v48  ;;  %v10002_v23 = vpop.f32.mrb[15].mxu1 }
 0x64d   : > { %v10088_v46 = vrot.slane %v10069_v14, %v12638_v50  ;;  %v10157_v59 = vrot.slane %v10069_v14, 6  ;;  %v10072_v0 = vmax.f32 %v10056_v52, 0.0  ;;  %v10073_v26 = vmax.f32 %v10057_v53, 0.0 }
 0x64e   : > { %v10096_v55 = vrot.slane %v10071_v36, %v12638_v50  ;;  %v10159_v57 = vrot.slane %v10071_v36, 6  ;;  %v10092_v40 = vrot.slane %v10070_v56, %v12638_v50  ;;  %v10158_v5 = vrot.slane %v10070_v56, 6 }
 0x64f   : > { %v10205_v34 = vsel %vm1447_vm5, %v10088_v46, %v10157_v59  ;;  %v10100_v35 = vrot.slane %v10072_v0, %v12638_v50  ;;  %v10160_v33 = vrot.slane %v10072_v0, 6  ;;  %v10104_v21 = vrot.slane %v10073_v26, %v12653_v3 }
 0x650   : > { %10221 = vst [vmem:[%s12993_s26 + $0x20] sm:$0xff] %v10205_v34  ;;  %v10207_v51 = vsel %vm1447_vm5, %v10096_v55, %v10159_v57  ;;  %v10206_v11 = vsel %vm1447_vm5, %v10092_v40, %v10158_v5  ;;  %v10161_v6 = vrot.slane %v10073_v26, 6  ;;  %v10075_v25 = vmax.f32 %v10059_v43, 0.0  ;;  %v9900_v44 = vpop.f32.mrb[20].mxu0 }
 0x651   : > { %10223 = vst [vmem:[%s12993_s26 + $0x30] sm:$0xff] %v10207_v51  ;;  %10222 = vst [vmem:[%s12993_s26 + $0x28] sm:$0xff] %v10206_v11  ;;  %v10208_v28 = vsel %vm1447_vm5, %v10100_v35, %v10160_v33  ;;  %v10074_v29 = vmax.f32 %v10058_v1, 0.0  ;;  %v10060_v45 = vadd.f32 %v13176_v38, %v10002_v23  ;;  %v10061_v13 = vadd.f32 %v13167_v12, %v9900_v44  ;;  %v10006_v18 = vpop.f32.mrb[16].mxu1  ;;  %v9902_v9 = vpop.f32.mrb[21].mxu0 }
 0x652   : > { %10224 = vst [vmem:[%s12993_s26 + $0x38] sm:$0xff] %v10208_v28  ;;  %v10162_v60 = vsel %vm1447_vm5, %v10157_v59, %v10161_v6  ;;  %v10112_v39 = vrot.slane %v10075_v25, %v12653_v3  ;;  %v10165_v15 = vrot.slane %v10075_v25, 6  ;;  %v10063_v61 = vadd.f32 %v13170_v47, %v10006_v18  ;;  %v10008_v7 = vpop.f32.mrb[17].mxu1  ;;  %v9904_v8 = vpop.f32.mrb[22].mxu0 }
 0x653   : > { %v10209_v41 = vsel %vm1164_vm4, %v10162_v60, %v10104_v21  ;;  %v10108_v42 = vrot.slane %v10074_v29, %v12653_v3  ;;  %v10163_v27 = vrot.slane %v10074_v29, 6  ;;  %v10076_v24 = vmax.f32 %v10060_v45, 0.0  ;;  %v10010_v2 = vpop.f32.mrb[18].mxu1  ;;  %v9906_v16 = vpop.f32.mrb[23].mxu0 }
 0x654   : > { %10225 = vst [vmem:[%s12993_s26 + $0x60] sm:$0xff] %v10209_v41  ;;  %v10166_v54 = vsel %vm1447_vm5, %v10159_v57, %v10165_v15  ;;  %v10077_v19 = vmax.f32 %v10061_v13, 0.0  ;;  %v10079_v49 = vmax.f32 %v10063_v61, 0.0  ;;  %v10062_v17 = vadd.f32 %v13173_v31, %v9902_v9  ;;  %v10012_v10 = vpop.f32.mrb[19].mxu1 }
 0x655   : > { %v10211_v20 = vsel %vm1164_vm4, %v10166_v54, %v10112_v39  ;;  %v10164_v58 = vsel %vm1447_vm5, %v10158_v5, %v10163_v27  ;;  %v10116_v30 = vrot.slane %v10076_v24, %v12653_v3  ;;  %v10167_v32 = vrot.slane %v10076_v24, 6 }
 0x656   : > { %10227 = vst [vmem:[%s12993_s26 + $0x70] sm:$0xff] %v10211_v20  ;;  %v10210_v62 = vsel %vm1164_vm4, %v10164_v58, %v10108_v42  ;;  %v10120_v4 = vrot.slane %v10077_v19, %v12638_v50  ;;  %v10185_v37 = vrot.slane %v10077_v19, 6  ;;  %v10128_v22 = vrot.slane %v10079_v49, %v12638_v50 }
 0x657   : > { %10226 = vst [vmem:[%s12993_s26 + $0x68] sm:$0xff] %v10210_v62  ;;  %v10168_v14 = vsel %vm1447_vm5, %v10160_v33, %v10167_v32  ;;  %v10187_v52 = vrot.slane %v10079_v49, 6  ;;  %v10078_v53 = vmax.f32 %v10062_v17, 0.0  ;;  %v10064_v63 = vadd.f32 %v13176_v38, %v10008_v7 }
 0x658   : > { %v10212_v48 = vsel %vm1164_vm4, %v10168_v14, %v10116_v30  ;;  %v10213_v36 = vsel %vm1447_vm5, %v10120_v4, %v10185_v37  ;;  %v10065_v56 = vadd.f32 %v13167_v12, %v9904_v8  ;;  %v10067_v43 = vadd.f32 %v13170_v47, %v10010_v2 }
 0x659   : > { %10228 = vst [vmem:[%s12993_s26 + $0x78] sm:$0xff] %v10212_v48  ;;  %10229 = vst [vmem:[%s12993_s26 + $0xa0] sm:$0xff] %v10213_v36  ;;  %v10215_v1 = vsel %vm1447_vm5, %v10128_v22, %v10187_v52  ;;  %v10124_v23 = vrot.slane %v10078_v53, %v12638_v50  ;;  %v10186_v46 = vrot.slane %v10078_v53, 6  ;;  %v10080_v59 = vmax.f32 %v10064_v63, 0.0 }
 0x65a   : > { %10231 = vst [vmem:[%s12993_s26 + $0xb0] sm:$0xff] %v10215_v1  ;;  %v10081_v0 = vmax.f32 %v10065_v56, 0.0  ;;  %v10083_v26 = vmax.f32 %v10067_v43, 0.0  ;;  %v10066_v55 = vadd.f32 %v13173_v31, %v9906_v16  ;;  %v10068_v12 = vadd.f32 %v13176_v38, %v10012_v10 }
 0x65b   : > { %v10214_v47 = vsel %vm1447_vm5, %v10124_v23, %v10186_v46  ;;  %v10132_v57 = vrot.slane %v10080_v59, %v12638_v50  ;;  %v10188_v40 = vrot.slane %v10080_v59, 6 }
 0x65c   : > { %10230 = vst [vmem:[%s12993_s26 + $0xa8] sm:$0xff] %v10214_v47  ;;  %v10136_v5 = vrot.slane %v10081_v0, %v12653_v3  ;;  %v10189_v34 = vrot.slane %v10081_v0, 6  ;;  %v10144_v35 = vrot.slane %v10083_v26, %v12653_v3  ;;  %v10193_v33 = vrot.slane %v10083_v26, 6 }
 0x65d   : > { %v10216_v31 = vsel %vm1447_vm5, %v10132_v57, %v10188_v40  ;;  %v10082_v21 = vmax.f32 %v10066_v55, 0.0  ;;  %v10084_v51 = vmax.f32 %v10068_v12, 0.0 }
 0x65e   : > { %10232 = vst [vmem:[%s12993_s26 + $0xb8] sm:$0xff] %v10216_v31  ;;  %v10190_v38 = vsel %vm1447_vm5, %v10185_v37, %v10189_v34  ;;  %v10194_v11 = vsel %vm1447_vm5, %v10187_v52, %v10193_v33 }
 0x65f   : > { %v10217_v50 = vsel %vm1164_vm4, %v10190_v38, %v10136_v5  ;;  %v10219_v6 = vsel %vm1164_vm4, %v10194_v11, %v10144_v35  ;;  %v10140_v25 = vrot.slane %v10082_v21, %v12653_v3  ;;  %v10191_v44 = vrot.slane %v10082_v21, 6 }
 0x660   : > { %10233 = vst [vmem:[%s12993_s26 + $0xe0] sm:$0xff] %v10217_v50  ;;  %10235 = vst [vmem:[%s12993_s26 + $0xf0] sm:$0xff] %v10219_v6  ;;  %v10148_v28 = vrot.slane %v10084_v51, %v12653_v3  ;;  %v10195_v29 = vrot.slane %v10084_v51, 6 }
 0x661   : > { %v10192_v45 = vsel %vm1447_vm5, %v10186_v46, %v10191_v44 }
 0x662   : > { %v10218_v13 = vsel %vm1164_vm4, %v10192_v45, %v10140_v25  ;;  %v10196_v18 = vsel %vm1447_vm5, %v10188_v40, %v10195_v29 }
 0x663   : > { %10234 = vst [vmem:[%s12993_s26 + $0xe8] sm:$0xff] %v10218_v13  ;;  %v10220_v3 = vsel %vm1164_vm4, %v10196_v18, %v10148_v28 }
 0x664   : > { %10236 = vst [vmem:[%s12993_s26 + $0xf8] sm:$0xff] %v10220_v3 }
 0x665   : > { %12203 = shalt.err (!%p12200_p13)
}
 0x666   : > { %s12204_s6 = scalar_lea.hbm %s13250_s27, 4096  ;;  %s12208_s7 = scalar_lea.hbm %s13306_s5, 8192 }
 0x667   : > { %p12205_p9 = scmp.ne.s32.totalorder %s13250_s27, %s12204_s6  ;;  %p12209_p6 = scmp.lt.u32.totalorder %s13250_s27, %s13306_s5 }
 0x668   : > { %p12210_p10 = scmp.lt.u32.totalorder %s12208_s7, %s12204_s6  ;;  %p12212_p4 = scmp.lt.u32.totalorder %s12204_s6, %s13250_s27 }
 0x669   : > { %p12206_p0 = pnand %p12205_p9, %p12477_p8 }
 0x66a   : > { %p12211_p3 = por %p12210_p10, %p12209_p6 }
 0x66b   : > { %p12207_p11 = pneg %p12206_p0 }
 0x66c   : > { %p12213_p5 = por %p12212_p4, %p12211_p3 }
 0x66e   : > { %p12214_p7 = pnand %p12213_p5, %p12207_p11 }
 0x670   : > { %12217 = shalt.err (!%p12214_p7)
}
 0x671   : > { %s12279_s9 = smov 1024   ;;  %s12280_s13 = smov 64  }
 0x672   : > { %11879 = dma.vmem_to_hbm [thread:$0]  (%p12477_p8), %s13252_s11, 4096, %s13250_s27, %s10238_s17, %s12279_s9, %s12279_s9, %s12280_s13  }
 0x673 PF: > { %s10267_s22 = sand.u32 1, %s12252_s18   ;;  %p13334_p12 = scmp.ne.s32.totalorder %s13313_s25, 0 }
 0x674   : > { %p13335_p2 = scmp.ge.s32.totalorder %s12264_s21, 2  ;;  %s10268_s30 = scalar_lea.sflag [#allocation5], %s10267_s22 }
 0x676   : > { %p11899_p1 = pnand %p13335_p2, %p13334_p12 }
 0x678   : > { %12247 = dma.done.wait (!%p11899_p1), %s10268_s30, 4096  }
 0x679   : > { %12249 = vsyncadd (!%p11899_p1), %s10268_s30, 4294963200  ;;  %p20_p13 = scmp.ge.s32.totalorder %s12464_s12, 4   ;;  %s13336_s18 = smov %s12256_s19 }
 0x67a   : > { %s13337_s19 = smov %s12260_s20  ;;  %s13338_s20 = smov %s12473_s15 }
 0x67b   : > { %s13339_s21 = smov %s12464_s12  ;;  %22 = sbr.rel (!%p20_p13) target bundleno = 7 (0x7), region = 109 }
 0x682   :  { %10273 = vsyncpa [#allocation4], 1 }
 0x683   :  { %10275 = vsyncpa [#allocation4 + $0x1], 1 }
 0x684   :  { %10276 = vsyncpa [#allocation7], 1 }
 0x685   :  { %10277 = vsyncpa [#allocation10], 1 }
 0x686   :  { %10278 = vsyncpa [#allocation5], 1 }
 0x687   :  { %10280 = vsyncpa [#allocation5 + $0x1], 1 }

</bundles_post_ra>
